<compile_context>
chip_gen: v7x
topology: tpu7x:2x2x1
jax: 0.10.0
libtpu: 0.0.40
codegen_flags: <defaults>
</compile_context>

<pallas_src>
import functools

import numpy as np
import jax
import jax.numpy as jnp
from jax.experimental import pallas as pl
from jax.experimental.pallas import tpu as pltpu


# ---------------------------------------------------------------------------
# One-time weight preprocessing (outside jit).
# ---------------------------------------------------------------------------
def _banded_conv_weight(weight, W):
    """Banded weight for a KxK stride-1 'same' conv over UNPADDED lane-dense
    rows (lane index = w*Cin + c).

    Returns band of shape (K, W*Cin, W*Cout) with
        band[kh, iw*Cin + c, w*Cout + co] = weight[co, c, kh, kw],  iw = w+kw-p
    and zero where iw falls outside [0, W) (horizontal zero padding folded in).
    The conv then reduces to:  out_row[h] = sum_kh in_row[h + kh - p] @ band[kh].
    """
    w_np = np.asarray(weight, dtype=np.float32)
    Cout, Cin, K, _ = w_np.shape
    p = K // 2
    band = np.zeros((K, W * Cin, W * Cout), dtype=np.float32)
    for kh in range(K):
        for kw in range(K):
            tap = w_np[:, :, kh, kw].T                       # (Cin, Cout)
            for w in range(W):
                iw = w + kw - p
                if 0 <= iw < W:
                    band[kh, iw * Cin:(iw + 1) * Cin,
                         w * Cout:(w + 1) * Cout] = tap
    return band


def _pixel_shuffle_perm(W, Cin, r):
    """Output-column permutation mapping conv3 lanes (w, c, ry, rx) to the
    pixel-shuffle-friendly order (ry, c, w, rx)."""
    C3 = Cin * r * r
    perm = np.empty(W * C3, dtype=np.int64)
    for w in range(W):
        for c in range(Cin):
            for ry in range(r):
                for rx in range(r):
                    old = w * C3 + (c * r + ry) * r + rx
                    new = ((ry * Cin + c) * W + w) * r + rx
                    perm[new] = old
    return perm


def prepare_fused_params(params, W, upscale_factor):
    """PyTorch-layout params -> banded bf16 weights / lane-tiled f32 biases."""
    r = upscale_factor
    Cin = params["w1"].shape[1]

    def tile_bias(b):
        return np.tile(np.asarray(b, np.float32), W).reshape(1, -1)

    band3 = _banded_conv_weight(params["w3"], W)
    b3t = tile_bias(params["b3"])
    perm = _pixel_shuffle_perm(W, Cin, r)     # fold PixelShuffle into w3/b3
    band3 = band3[:, :, perm]
    b3t = b3t[:, perm]

    return dict(
        w1=jnp.asarray(_banded_conv_weight(params["w1"], W), jnp.bfloat16),
        b1=jnp.asarray(tile_bias(params["b1"]), jnp.float32),
        w2=jnp.asarray(_banded_conv_weight(params["w2"], W), jnp.bfloat16),
        b2=jnp.asarray(tile_bias(params["b2"]), jnp.float32),
        w3=jnp.asarray(band3, jnp.bfloat16),
        b3=jnp.asarray(b3t, jnp.float32),
    )


# ---------------------------------------------------------------------------
# Fused Pallas kernel: conv1(5x5)+tanh -> conv2(3x3)+tanh -> conv3(3x3)
# ---------------------------------------------------------------------------
def _make_espcn_kernel(H, W, NB, Cin, C1, C2, C3, K1, K2, GAP):
    Hblk = H + GAP                 # per-image row block (image + bottom gap)
    R = NB * Hblk + GAP            # stacked rows per grid step (+ top halo)
    OFF = GAP                      # 8-aligned first valid row in each block
    p1, p2 = K1 // 2, K2 // 2
    Rout1 = R - (K1 - 1)
    Rout2 = R - (K2 - 1)

    def kernel(x_ref, w1_ref, b1_ref, w2_ref, b2_ref, w3_ref, b3_ref,
               o_ref, a1_ref, a2_ref):
        # ---- conv1: 5x5 'same' + tanh (bf16 operands, f32 accumulation) ----
        x = x_ref[0]                                        # (R, W*Cin) bf16
        acc1 = jnp.dot(x[0:Rout1], w1_ref[0],
                       preferred_element_type=jnp.float32)
        for kh in range(1, K1):
            acc1 = acc1 + jnp.dot(x[kh:kh + Rout1], w1_ref[kh],
                                  preferred_element_type=jnp.float32)
        a1 = jnp.tanh(acc1 + b1_ref[...])                   # (Rout1, W*C1) f32

        # Stage valid image rows at lane offset 0 / 8-aligned row offsets and
        # re-zero only the one halo row above/below each image.
        for i in range(NB):
            base = i * Hblk
            a1_ref[base + OFF - p2:base + OFF - p2 + 1, :] = (
                jnp.zeros((1, W * C1), jnp.float32))
            a1_ref[base + OFF + H:base + OFF + H + 1, :] = (
                jnp.zeros((1, W * C1), jnp.float32))
            a1_ref[base + OFF:base + OFF + H, :] = (
                a1[base + OFF - p1:base + OFF - p1 + H, :])

        # ---- conv2: 3x3 'same' + tanh --------------------------------------
        A1 = a1_ref[...].astype(jnp.bfloat16)               # (R, W*C1)
        acc2 = jnp.dot(A1[0:Rout2], w2_ref[0],
                       preferred_element_type=jnp.float32)
        for kh in range(1, K2):
            acc2 = acc2 + jnp.dot(A1[kh:kh + Rout2], w2_ref[kh],
                                  preferred_element_type=jnp.float32)
        a2 = jnp.tanh(acc2 + b2_ref[...])                   # (Rout2, W*C2) f32

        for i in range(NB):
            base = i * Hblk
            a2_ref[base + OFF - p2:base + OFF - p2 + 1, :] = (
                jnp.zeros((1, W * C2), jnp.float32))
            a2_ref[base + OFF + H:base + OFF + H + 1, :] = (
                jnp.zeros((1, W * C2), jnp.float32))
            a2_ref[base + OFF:base + OFF + H, :] = (
                a2[base + OFF - p2:base + OFF - p2 + H, :])

        # ---- conv3: 3x3 'same' (pixel-shuffle order baked into w3/b3) ------
        A2 = a2_ref[...].astype(jnp.bfloat16)               # (R, W*C2)
        acc3 = jnp.dot(A2[0:Rout2], w3_ref[0],
                       preferred_element_type=jnp.float32)
        for kh in range(1, K2):
            acc3 = acc3 + jnp.dot(A2[kh:kh + Rout2], w3_ref[kh],
                                  preferred_element_type=jnp.float32)
        y = acc3 + b3_ref[...]                               # (Rout2, W*C3) f32

        for i in range(NB):
            base = i * Hblk
            o_ref[i, :, :] = y[base + OFF - p2:base + OFF - p2 + H, :]

    return kernel


@functools.partial(jax.jit, static_argnames=("upscale_factor",))
def espcn_forward(fused, x_nchw, upscale_factor):
    """fused = prepare_fused_params(params, W, upscale); x_nchw: (N,Cin,H,W)."""
    N, Cin, H, W = x_nchw.shape
    K1, K2 = 5, 3
    C1, C2 = 64, 32
    r = upscale_factor
    C3 = r * r * Cin
    GAP = 8

    # Pack as many images as possible (divisor of N) into the matmul M
    # dimension, targeting ~256 stacked rows per grid step.
    nb = 1
    for cand in range(1, N + 1):
        if N % cand == 0 and cand * (H + GAP) + GAP <= 256:
            nb = cand
    Hblk = H + GAP
    R = nb * Hblk + GAP

    # Entry: one NCHW->lane-dense transform; stack nb images per grid step
    # with 8 zero halo rows between images (and at the top / bottom).
    x_rows = jnp.transpose(x_nchw, (0, 2, 3, 1)).reshape(N, H, W * Cin)
    xb = x_rows.reshape(N // nb, nb, H, W * Cin)
    xb = jnp.pad(xb, ((0, 0), (0, 0), (0, GAP), (0, 0)))
    xb = xb.reshape(N // nb, nb * Hblk, W * Cin)
    x_stacked = jnp.pad(xb, ((0, 0), (GAP, 0), (0, 0))).astype(jnp.bfloat16)

    kernel = _make_espcn_kernel(H, W, nb, Cin, C1, C2, C3, K1, K2, GAP)

    out2d = pl.pallas_call(
        kernel,
        out_shape=jax.ShapeDtypeStruct((N, H, W * C3), jnp.float32),
        grid=(N // nb,),
        in_specs=[
            pl.BlockSpec((1, R, W * Cin), lambda n: (n, 0, 0)),
            pl.BlockSpec(fused["w1"].shape, lambda n: (0, 0, 0)),
            pl.BlockSpec(fused["b1"].shape, lambda n: (0, 0)),
            pl.BlockSpec(fused["w2"].shape, lambda n: (0, 0, 0)),
            pl.BlockSpec(fused["b2"].shape, lambda n: (0, 0)),
            pl.BlockSpec(fused["w3"].shape, lambda n: (0, 0, 0)),
            pl.BlockSpec(fused["b3"].shape, lambda n: (0, 0)),
        ],
        out_specs=pl.BlockSpec((nb, H, W * C3), lambda n: (n, 0, 0)),
        scratch_shapes=[
            pltpu.VMEM((R, W * C1), jnp.float32),
            pltpu.VMEM((R, W * C2), jnp.float32),
        ],
        compiler_params=pltpu.CompilerParams(
            dimension_semantics=("parallel",),
            vmem_limit_bytes=32 * 1024 * 1024),
    )(x_stacked, fused["w1"], fused["b1"], fused["w2"], fused["b2"],
      fused["w3"], fused["b3"])

    # Exit: lanes are already ordered (ry, c, w, rx), so PixelShuffle is a
    # reshape + one coarse transpose (contiguous W*r inner runs).
    out = out2d.reshape(N, H, r, Cin, W * r)
    out = jnp.transpose(out, (0, 3, 1, 2, 4))        # (N, Cin, H, r, W*r)
    return out.reshape(N, Cin, H * r, W * r)


# ---------------------------------------------------------------------------
# Parameter init (PyTorch layout) and pure-JAX reference for the self-check.
# ---------------------------------------------------------------------------
def init_espcn_params(key, in_ch, upscale_factor):
    ks = jax.random.split(key, 6)
    out3 = upscale_factor ** 2 * in_ch

    def conv_init(kw_key, kb_key, cout, cin, k):
        fan_in = cin * k * k
        bound = 1.0 / jnp.sqrt(jnp.float32(fan_in))
        w = jax.random.uniform(kw_key, (cout, cin, k, k), jnp.float32,
                               -bound, bound)
        b = jax.random.uniform(kb_key, (cout,), jnp.float32, -bound, bound)
        return w, b

    w1, b1 = conv_init(ks[0], ks[1], 64, in_ch, 5)
    w2, b2 = conv_init(ks[2], ks[3], 32, 64, 3)
    w3, b3 = conv_init(ks[4], ks[5], out3, 32, 3)
    return dict(w1=w1, b1=b1, w2=w2, b2=b2, w3=w3, b3=b3)


def _pixel_shuffle_nchw(x, r):
    N, Cr2, H, W = x.shape
    C = Cr2 // (r * r)
    x = x.reshape(N, C, r, r, H, W)
    x = jnp.transpose(x, (0, 1, 4, 2, 5, 3))
    return x.reshape(N, C, H * r, W * r)


def _reference_forward(params, x, r):
    def conv(x, w, b):
        y = jax.lax.conv_general_dilated(
            x, w, window_strides=(1, 1), padding="SAME",
            dimension_numbers=("NCHW", "OIHW", "NCHW"))
        return y + b.reshape(1, -1, 1, 1)

    net = jnp.tanh(conv(x, params["w1"], params["b1"]))
    net = jnp.tanh(conv(net, params["w2"], params["b2"]))
    net = conv(net, params["w3"], params["b3"])
    return _pixel_shuffle_nchw(net, r)


if __name__ == "__main__":
    in_ch = 4
    upscale = 2
    N, H, W = 2, 16, 16

    key = jax.random.PRNGKey(0)
    k_params, k_x = jax.random.split(key)
    params = init_espcn_params(k_params, in_ch, upscale)
    fused = prepare_fused_params(params, W, upscale)   # one-time preprocessing
    x = jax.random.normal(k_x, (N, in_ch, H, W), jnp.float32)

    out = jax.block_until_ready(espcn_forward(fused, x, upscale))
    assert out.shape == (N, in_ch, H * upscale, W * upscale), out.shape

    ref = jax.block_until_ready(_reference_forward(params, x, upscale))
    max_err = float(jnp.max(jnp.abs(out - ref)))
    # bf16 matmul operands with f32 accumulation -> relaxed tolerance.
    assert jnp.allclose(out, ref, atol=5e-2, rtol=5e-2), max_err

    print("KERNEL_OK")
</pallas_src>

<mosaic_0001>
module attributes {stable_mosaic.version = 11 : i64} {
  func.func @kernel(%arg0: i32, %arg1: memref<1x56x64xbf16, #tpu.memory_space<vmem>>, %arg2: memref<5x64x1024xbf16, #tpu.memory_space<vmem>>, %arg3: memref<1x1024xf32, #tpu.memory_space<vmem>>, %arg4: memref<3x1024x512xbf16, #tpu.memory_space<vmem>>, %arg5: memref<1x512xf32, #tpu.memory_space<vmem>>, %arg6: memref<3x512x256xbf16, #tpu.memory_space<vmem>>, %arg7: memref<1x256xf32, #tpu.memory_space<vmem>>, %arg8: memref<2x16x256xf32, #tpu.memory_space<vmem>>, %arg9: memref<56x1024xf32, #tpu.memory_space<vmem>>, %arg10: memref<56x512xf32, #tpu.memory_space<vmem>>) attributes {dimension_semantics = [#tpu.dimension_semantics<parallel>], iteration_bounds = array<i64: 1>, scalar_prefetch = 0 : i64, scratch_operands = 2 : i64, tpu.core_type = #tpu.core_type<tc>, window_params = [{transform_indices = @transform_0, window_bounds = array<i64: 1, 56, 64>}, {pipeline_mode = #tpu.pipeline_mode<synchronous>, transform_indices = @transform_1, window_bounds = array<i64: 5, 64, 1024>}, {pipeline_mode = #tpu.pipeline_mode<synchronous>, transform_indices = @transform_2, window_bounds = array<i64: 1, 1024>}, {pipeline_mode = #tpu.pipeline_mode<synchronous>, transform_indices = @transform_3, window_bounds = array<i64: 3, 1024, 512>}, {pipeline_mode = #tpu.pipeline_mode<synchronous>, transform_indices = @transform_4, window_bounds = array<i64: 1, 512>}, {pipeline_mode = #tpu.pipeline_mode<synchronous>, transform_indices = @transform_5, window_bounds = array<i64: 3, 512, 256>}, {pipeline_mode = #tpu.pipeline_mode<synchronous>, transform_indices = @transform_6, window_bounds = array<i64: 1, 256>}, {transform_indices = @transform_7, window_bounds = array<i64: 2, 16, 256>}]} {
    %c0 = arith.constant 0 : index
    %c0_0 = arith.constant 0 : index
    %c0_1 = arith.constant 0 : index
    %0 = vector.load %arg1[%c0, %c0_0, %c0_1] : memref<1x56x64xbf16, #tpu.memory_space<vmem>>, vector<1x56x64xbf16>
    %1 = vector.shape_cast %0 : vector<1x56x64xbf16> to vector<56x64xbf16>
    %2 = vector.extract_strided_slice %1 {offsets = [0, 0], sizes = [52, 64], strides = [1, 1]} : vector<56x64xbf16> to vector<52x64xbf16>
    %c0_2 = arith.constant 0 : index
    %c0_3 = arith.constant 0 : index
    %c0_4 = arith.constant 0 : index
    %3 = vector.load %arg2[%c0_2, %c0_3, %c0_4] : memref<5x64x1024xbf16, #tpu.memory_space<vmem>>, vector<1x64x1024xbf16>
    %4 = vector.shape_cast %3 : vector<1x64x1024xbf16> to vector<64x1024xbf16>
    %cst = arith.constant dense<0.000000e+00> : vector<52x1024xf32>
    %5 = tpu.matmul %2, %4, %cst {dimension_numbers = #tpu.dot_dimension_numbers<[1], [0], [0], [1], [0, 0, 1, 1], [], []>} : vector<52x64xbf16>, vector<64x1024xbf16>, vector<52x1024xf32> -> vector<52x1024xf32>
    %6 = vector.extract_strided_slice %1 {offsets = [1, 0], sizes = [52, 64], strides = [1, 1]} : vector<56x64xbf16> to vector<52x64xbf16>
    %c1 = arith.constant 1 : index
    %c0_5 = arith.constant 0 : index
    %c0_6 = arith.constant 0 : index
    %7 = vector.load %arg2[%c1, %c0_5, %c0_6] : memref<5x64x1024xbf16, #tpu.memory_space<vmem>>, vector<1x64x1024xbf16>
    %8 = vector.shape_cast %7 : vector<1x64x1024xbf16> to vector<64x1024xbf16>
    %cst_7 = arith.constant dense<0.000000e+00> : vector<52x1024xf32>
    %9 = tpu.matmul %6, %8, %cst_7 {dimension_numbers = #tpu.dot_dimension_numbers<[1], [0], [0], [1], [0, 0, 1, 1], [], []>} : vector<52x64xbf16>, vector<64x1024xbf16>, vector<52x1024xf32> -> vector<52x1024xf32>
    %10 = arith.addf %5, %9 : vector<52x1024xf32>
    %11 = vector.extract_strided_slice %1 {offsets = [2, 0], sizes = [52, 64], strides = [1, 1]} : vector<56x64xbf16> to vector<52x64xbf16>
    %c2 = arith.constant 2 : index
    %c0_8 = arith.constant 0 : index
    %c0_9 = arith.constant 0 : index
    %12 = vector.load %arg2[%c2, %c0_8, %c0_9] : memref<5x64x1024xbf16, #tpu.memory_space<vmem>>, vector<1x64x1024xbf16>
    %13 = vector.shape_cast %12 : vector<1x64x1024xbf16> to vector<64x1024xbf16>
    %cst_10 = arith.constant dense<0.000000e+00> : vector<52x1024xf32>
    %14 = tpu.matmul %11, %13, %cst_10 {dimension_numbers = #tpu.dot_dimension_numbers<[1], [0], [0], [1], [0, 0, 1, 1], [], []>} : vector<52x64xbf16>, vector<64x1024xbf16>, vector<52x1024xf32> -> vector<52x1024xf32>
    %15 = arith.addf %10, %14 : vector<52x1024xf32>
    %16 = vector.extract_strided_slice %1 {offsets = [3, 0], sizes = [52, 64], strides = [1, 1]} : vector<56x64xbf16> to vector<52x64xbf16>
    %c3 = arith.constant 3 : index
    %c0_11 = arith.constant 0 : index
    %c0_12 = arith.constant 0 : index
    %17 = vector.load %arg2[%c3, %c0_11, %c0_12] : memref<5x64x1024xbf16, #tpu.memory_space<vmem>>, vector<1x64x1024xbf16>
    %18 = vector.shape_cast %17 : vector<1x64x1024xbf16> to vector<64x1024xbf16>
    %cst_13 = arith.constant dense<0.000000e+00> : vector<52x1024xf32>
    %19 = tpu.matmul %16, %18, %cst_13 {dimension_numbers = #tpu.dot_dimension_numbers<[1], [0], [0], [1], [0, 0, 1, 1], [], []>} : vector<52x64xbf16>, vector<64x1024xbf16>, vector<52x1024xf32> -> vector<52x1024xf32>
    %20 = arith.addf %15, %19 : vector<52x1024xf32>
    %21 = vector.extract_strided_slice %1 {offsets = [4, 0], sizes = [52, 64], strides = [1, 1]} : vector<56x64xbf16> to vector<52x64xbf16>
    %c4 = arith.constant 4 : index
    %c0_14 = arith.constant 0 : index
    %c0_15 = arith.constant 0 : index
    %22 = vector.load %arg2[%c4, %c0_14, %c0_15] : memref<5x64x1024xbf16, #tpu.memory_space<vmem>>, vector<1x64x1024xbf16>
    %23 = vector.shape_cast %22 : vector<1x64x1024xbf16> to vector<64x1024xbf16>
    %cst_16 = arith.constant dense<0.000000e+00> : vector<52x1024xf32>
    %24 = tpu.matmul %21, %23, %cst_16 {dimension_numbers = #tpu.dot_dimension_numbers<[1], [0], [0], [1], [0, 0, 1, 1], [], []>} : vector<52x64xbf16>, vector<64x1024xbf16>, vector<52x1024xf32> -> vector<52x1024xf32>
    %25 = arith.addf %20, %24 : vector<52x1024xf32>
    %c0_17 = arith.constant 0 : index
    %c0_18 = arith.constant 0 : index
    %26 = vector.load %arg3[%c0_17, %c0_18] : memref<1x1024xf32, #tpu.memory_space<vmem>>, vector<1x1024xf32>
    %27 = vector.broadcast %26 : vector<1x1024xf32> to vector<52x1024xf32>
    %28 = arith.addf %25, %27 : vector<52x1024xf32>
    %29 = math.tanh %28 : vector<52x1024xf32>
    %cst_19 = arith.constant 0.000000e+00 : f32
    %30 = vector.broadcast %cst_19 : f32 to vector<1x1024xf32>
    %c7 = arith.constant 7 : index
    %c0_20 = arith.constant 0 : index
    %31 = vector.load %arg9[%c7, %c0_20] : memref<56x1024xf32, #tpu.memory_space<vmem>>, vector<1x1024xf32>
    tpu.vector_store %arg9[%c7, %c0_20], %30 {strides = array<i32>} : memref<56x1024xf32, #tpu.memory_space<vmem>>, vector<1x1024xf32>,
    %cst_21 = arith.constant 0.000000e+00 : f32
    %32 = vector.broadcast %cst_21 : f32 to vector<1x1024xf32>
    %c24 = arith.constant 24 : index
    %c0_22 = arith.constant 0 : index
    %33 = vector.load %arg9[%c24, %c0_22] : memref<56x1024xf32, #tpu.memory_space<vmem>>, vector<1x1024xf32>
    tpu.vector_store %arg9[%c24, %c0_22], %32 {strides = array<i32>} : memref<56x1024xf32, #tpu.memory_space<vmem>>, vector<1x1024xf32>,
    %34 = vector.extract_strided_slice %29 {offsets = [6, 0], sizes = [16, 1024], strides = [1, 1]} : vector<52x1024xf32> to vector<16x1024xf32>
    %c8 = arith.constant 8 : index
    %c0_23 = arith.constant 0 : index
    %35 = vector.load %arg9[%c8, %c0_23] : memref<56x1024xf32, #tpu.memory_space<vmem>>, vector<16x1024xf32>
    tpu.vector_store %arg9[%c8, %c0_23], %34 {strides = array<i32>} : memref<56x1024xf32, #tpu.memory_space<vmem>>, vector<16x1024xf32>,
    %cst_24 = arith.constant 0.000000e+00 : f32
    %36 = vector.broadcast %cst_24 : f32 to vector<1x1024xf32>
    %c31 = arith.constant 31 : index
    %c0_25 = arith.constant 0 : index
    %37 = vector.load %arg9[%c31, %c0_25] : memref<56x1024xf32, #tpu.memory_space<vmem>>, vector<1x1024xf32>
    tpu.vector_store %arg9[%c31, %c0_25], %36 {strides = array<i32>} : memref<56x1024xf32, #tpu.memory_space<vmem>>, vector<1x1024xf32>,
    %cst_26 = arith.constant 0.000000e+00 : f32
    %38 = vector.broadcast %cst_26 : f32 to vector<1x1024xf32>
    %c48 = arith.constant 48 : index
    %c0_27 = arith.constant 0 : index
    %39 = vector.load %arg9[%c48, %c0_27] : memref<56x1024xf32, #tpu.memory_space<vmem>>, vector<1x1024xf32>
    tpu.vector_store %arg9[%c48, %c0_27], %38 {strides = array<i32>} : memref<56x1024xf32, #tpu.memory_space<vmem>>, vector<1x1024xf32>,
    %40 = vector.extract_strided_slice %29 {offsets = [30, 0], sizes = [16, 1024], strides = [1, 1]} : vector<52x1024xf32> to vector<16x1024xf32>
    %c32 = arith.constant 32 : index
    %c0_28 = arith.constant 0 : index
    %41 = vector.load %arg9[%c32, %c0_28] : memref<56x1024xf32, #tpu.memory_space<vmem>>, vector<16x1024xf32>
    tpu.vector_store %arg9[%c32, %c0_28], %40 {strides = array<i32>} : memref<56x1024xf32, #tpu.memory_space<vmem>>, vector<16x1024xf32>,
    %c0_29 = arith.constant 0 : index
    %c0_30 = arith.constant 0 : index
    %42 = vector.load %arg9[%c0_29, %c0_30] : memref<56x1024xf32, #tpu.memory_space<vmem>>, vector<56x1024xf32>
    %43 = arith.truncf %42 : vector<56x1024xf32> to vector<56x1024xbf16>
    %44 = vector.extract_strided_slice %43 {offsets = [0, 0], sizes = [54, 1024], strides = [1, 1]} : vector<56x1024xbf16> to vector<54x1024xbf16>
    %c0_31 = arith.constant 0 : index
    %c0_32 = arith.constant 0 : index
    %c0_33 = arith.constant 0 : index
    %45 = vector.load %arg4[%c0_31, %c0_32, %c0_33] : memref<3x1024x512xbf16, #tpu.memory_space<vmem>>, vector<1x1024x512xbf16>
    %46 = vector.shape_cast %45 : vector<1x1024x512xbf16> to vector<1024x512xbf16>
    %cst_34 = arith.constant dense<0.000000e+00> : vector<54x512xf32>
    %47 = tpu.matmul %44, %46, %cst_34 {dimension_numbers = #tpu.dot_dimension_numbers<[1], [0], [0], [1], [0, 0, 1, 1], [], []>} : vector<54x1024xbf16>, vector<1024x512xbf16>, vector<54x512xf32> -> vector<54x512xf32>
    %48 = vector.extract_strided_slice %43 {offsets = [1, 0], sizes = [54, 1024], strides = [1, 1]} : vector<56x1024xbf16> to vector<54x1024xbf16>
    %c1_35 = arith.constant 1 : index
    %c0_36 = arith.constant 0 : index
    %c0_37 = arith.constant 0 : index
    %49 = vector.load %arg4[%c1_35, %c0_36, %c0_37] : memref<3x1024x512xbf16, #tpu.memory_space<vmem>>, vector<1x1024x512xbf16>
    %50 = vector.shape_cast %49 : vector<1x1024x512xbf16> to vector<1024x512xbf16>
    %cst_38 = arith.constant dense<0.000000e+00> : vector<54x512xf32>
    %51 = tpu.matmul %48, %50, %cst_38 {dimension_numbers = #tpu.dot_dimension_numbers<[1], [0], [0], [1], [0, 0, 1, 1], [], []>} : vector<54x1024xbf16>, vector<1024x512xbf16>, vector<54x512xf32> -> vector<54x512xf32>
    %52 = arith.addf %47, %51 : vector<54x512xf32>
    %53 = vector.extract_strided_slice %43 {offsets = [2, 0], sizes = [54, 1024], strides = [1, 1]} : vector<56x1024xbf16> to vector<54x1024xbf16>
    %c2_39 = arith.constant 2 : index
    %c0_40 = arith.constant 0 : index
    %c0_41 = arith.constant 0 : index
    %54 = vector.load %arg4[%c2_39, %c0_40, %c0_41] : memref<3x1024x512xbf16, #tpu.memory_space<vmem>>, vector<1x1024x512xbf16>
    %55 = vector.shape_cast %54 : vector<1x1024x512xbf16> to vector<1024x512xbf16>
    %cst_42 = arith.constant dense<0.000000e+00> : vector<54x512xf32>
    %56 = tpu.matmul %53, %55, %cst_42 {dimension_numbers = #tpu.dot_dimension_numbers<[1], [0], [0], [1], [0, 0, 1, 1], [], []>} : vector<54x1024xbf16>, vector<1024x512xbf16>, vector<54x512xf32> -> vector<54x512xf32>
    %57 = arith.addf %52, %56 : vector<54x512xf32>
    %c0_43 = arith.constant 0 : index
    %c0_44 = arith.constant 0 : index
    %58 = vector.load %arg5[%c0_43, %c0_44] : memref<1x512xf32, #tpu.memory_space<vmem>>, vector<1x512xf32>
    %59 = vector.broadcast %58 : vector<1x512xf32> to vector<54x512xf32>
    %60 = arith.addf %57, %59 : vector<54x512xf32>
    %61 = math.tanh %60 : vector<54x512xf32>
    %cst_45 = arith.constant 0.000000e+00 : f32
    %62 = vector.broadcast %cst_45 : f32 to vector<1x512xf32>
    %c7_46 = arith.constant 7 : index
    %c0_47 = arith.constant 0 : index
    %63 = vector.load %arg10[%c7_46, %c0_47] : memref<56x512xf32, #tpu.memory_space<vmem>>, vector<1x512xf32>
    tpu.vector_store %arg10[%c7_46, %c0_47], %62 {strides = array<i32>} : memref<56x512xf32, #tpu.memory_space<vmem>>, vector<1x512xf32>,
    %cst_48 = arith.constant 0.000000e+00 : f32
    %64 = vector.broadcast %cst_48 : f32 to vector<1x512xf32>
    %c24_49 = arith.constant 24 : index
    %c0_50 = arith.constant 0 : index
    %65 = vector.load %arg10[%c24_49, %c0_50] : memref<56x512xf32, #tpu.memory_space<vmem>>, vector<1x512xf32>
    tpu.vector_store %arg10[%c24_49, %c0_50], %64 {strides = array<i32>} : memref<56x512xf32, #tpu.memory_space<vmem>>, vector<1x512xf32>,
    %66 = vector.extract_strided_slice %61 {offsets = [7, 0], sizes = [16, 512], strides = [1, 1]} : vector<54x512xf32> to vector<16x512xf32>
    %c8_51 = arith.constant 8 : index
    %c0_52 = arith.constant 0 : index
    %67 = vector.load %arg10[%c8_51, %c0_52] : memref<56x512xf32, #tpu.memory_space<vmem>>, vector<16x512xf32>
    tpu.vector_store %arg10[%c8_51, %c0_52], %66 {strides = array<i32>} : memref<56x512xf32, #tpu.memory_space<vmem>>, vector<16x512xf32>,
    %cst_53 = arith.constant 0.000000e+00 : f32
    %68 = vector.broadcast %cst_53 : f32 to vector<1x512xf32>
    %c31_54 = arith.constant 31 : index
    %c0_55 = arith.constant 0 : index
    %69 = vector.load %arg10[%c31_54, %c0_55] : memref<56x512xf32, #tpu.memory_space<vmem>>, vector<1x512xf32>
    tpu.vector_store %arg10[%c31_54, %c0_55], %68 {strides = array<i32>} : memref<56x512xf32, #tpu.memory_space<vmem>>, vector<1x512xf32>,
    %cst_56 = arith.constant 0.000000e+00 : f32
    %70 = vector.broadcast %cst_56 : f32 to vector<1x512xf32>
    %c48_57 = arith.constant 48 : index
    %c0_58 = arith.constant 0 : index
    %71 = vector.load %arg10[%c48_57, %c0_58] : memref<56x512xf32, #tpu.memory_space<vmem>>, vector<1x512xf32>
    tpu.vector_store %arg10[%c48_57, %c0_58], %70 {strides = array<i32>} : memref<56x512xf32, #tpu.memory_space<vmem>>, vector<1x512xf32>,
    %72 = vector.extract_strided_slice %61 {offsets = [31, 0], sizes = [16, 512], strides = [1, 1]} : vector<54x512xf32> to vector<16x512xf32>
    %c32_59 = arith.constant 32 : index
    %c0_60 = arith.constant 0 : index
    %73 = vector.load %arg10[%c32_59, %c0_60] : memref<56x512xf32, #tpu.memory_space<vmem>>, vector<16x512xf32>
    tpu.vector_store %arg10[%c32_59, %c0_60], %72 {strides = array<i32>} : memref<56x512xf32, #tpu.memory_space<vmem>>, vector<16x512xf32>,
    %c0_61 = arith.constant 0 : index
    %c0_62 = arith.constant 0 : index
    %74 = vector.load %arg10[%c0_61, %c0_62] : memref<56x512xf32, #tpu.memory_space<vmem>>, vector<56x512xf32>
    %75 = arith.truncf %74 : vector<56x512xf32> to vector<56x512xbf16>
    %76 = vector.extract_strided_slice %75 {offsets = [0, 0], sizes = [54, 512], strides = [1, 1]} : vector<56x512xbf16> to vector<54x512xbf16>
    %c0_63 = arith.constant 0 : index
    %c0_64 = arith.constant 0 : index
    %c0_65 = arith.constant 0 : index
    %77 = vector.load %arg6[%c0_63, %c0_64, %c0_65] : memref<3x512x256xbf16, #tpu.memory_space<vmem>>, vector<1x512x256xbf16>
    %78 = vector.shape_cast %77 : vector<1x512x256xbf16> to vector<512x256xbf16>
    %cst_66 = arith.constant dense<0.000000e+00> : vector<54x256xf32>
    %79 = tpu.matmul %76, %78, %cst_66 {dimension_numbers = #tpu.dot_dimension_numbers<[1], [0], [0], [1], [0, 0, 1, 1], [], []>} : vector<54x512xbf16>, vector<512x256xbf16>, vector<54x256xf32> -> vector<54x256xf32>
    %80 = vector.extract_strided_slice %75 {offsets = [1, 0], sizes = [54, 512], strides = [1, 1]} : vector<56x512xbf16> to vector<54x512xbf16>
    %c1_67 = arith.constant 1 : index
    %c0_68 = arith.constant 0 : index
    %c0_69 = arith.constant 0 : index
    %81 = vector.load %arg6[%c1_67, %c0_68, %c0_69] : memref<3x512x256xbf16, #tpu.memory_space<vmem>>, vector<1x512x256xbf16>
    %82 = vector.shape_cast %81 : vector<1x512x256xbf16> to vector<512x256xbf16>
    %cst_70 = arith.constant dense<0.000000e+00> : vector<54x256xf32>
    %83 = tpu.matmul %80, %82, %cst_70 {dimension_numbers = #tpu.dot_dimension_numbers<[1], [0], [0], [1], [0, 0, 1, 1], [], []>} : vector<54x512xbf16>, vector<512x256xbf16>, vector<54x256xf32> -> vector<54x256xf32>
    %84 = arith.addf %79, %83 : vector<54x256xf32>
    %85 = vector.extract_strided_slice %75 {offsets = [2, 0], sizes = [54, 512], strides = [1, 1]} : vector<56x512xbf16> to vector<54x512xbf16>
    %c2_71 = arith.constant 2 : index
    %c0_72 = arith.constant 0 : index
    %c0_73 = arith.constant 0 : index
    %86 = vector.load %arg6[%c2_71, %c0_72, %c0_73] : memref<3x512x256xbf16, #tpu.memory_space<vmem>>, vector<1x512x256xbf16>
    %87 = vector.shape_cast %86 : vector<1x512x256xbf16> to vector<512x256xbf16>
    %cst_74 = arith.constant dense<0.000000e+00> : vector<54x256xf32>
    %88 = tpu.matmul %85, %87, %cst_74 {dimension_numbers = #tpu.dot_dimension_numbers<[1], [0], [0], [1], [0, 0, 1, 1], [], []>} : vector<54x512xbf16>, vector<512x256xbf16>, vector<54x256xf32> -> vector<54x256xf32>
    %89 = arith.addf %84, %88 : vector<54x256xf32>
    %c0_75 = arith.constant 0 : index
    %c0_76 = arith.constant 0 : index
    %90 = vector.load %arg7[%c0_75, %c0_76] : memref<1x256xf32, #tpu.memory_space<vmem>>, vector<1x256xf32>
    %91 = vector.broadcast %90 : vector<1x256xf32> to vector<54x256xf32>
    %92 = arith.addf %89, %91 : vector<54x256xf32>
    %93 = vector.extract_strided_slice %92 {offsets = [7, 0], sizes = [16, 256], strides = [1, 1]} : vector<54x256xf32> to vector<16x256xf32>
    %c0_77 = arith.constant 0 : index
    %c0_78 = arith.constant 0 : index
    %c0_79 = arith.constant 0 : index
    %94 = vector.load %arg8[%c0_77, %c0_78, %c0_79] : memref<2x16x256xf32, #tpu.memory_space<vmem>>, vector<1x16x256xf32>
    %95 = vector.shape_cast %94 : vector<1x16x256xf32> to vector<16x256xf32>
    %96 = vector.shape_cast %93 : vector<16x256xf32> to vector<1x16x256xf32>
    tpu.vector_store %arg8[%c0_77, %c0_78, %c0_79], %96 {strides = array<i32>} : memref<2x16x256xf32, #tpu.memory_space<vmem>>, vector<1x16x256xf32>,
    %97 = vector.extract_strided_slice %92 {offsets = [31, 0], sizes = [16, 256], strides = [1, 1]} : vector<54x256xf32> to vector<16x256xf32>
    %c1_80 = arith.constant 1 : index
    %c0_81 = arith.constant 0 : index
    %c0_82 = arith.constant 0 : index
    %98 = vector.load %arg8[%c1_80, %c0_81, %c0_82] : memref<2x16x256xf32, #tpu.memory_space<vmem>>, vector<1x16x256xf32>
    %99 = vector.shape_cast %98 : vector<1x16x256xf32> to vector<16x256xf32>
    %100 = vector.shape_cast %97 : vector<16x256xf32> to vector<1x16x256xf32>
    tpu.vector_store %arg8[%c1_80, %c0_81, %c0_82], %100 {strides = array<i32>} : memref<2x16x256xf32, #tpu.memory_space<vmem>>, vector<1x16x256xf32>,
    return
  }
  func.func @transform_0(%arg0: i32) -> (i32, i32, i32) {
    %c0_i32 = arith.constant 0 : i32
    %c0_i32_0 = arith.constant 0 : i32
    %c0_i32_1 = arith.constant 0 : i32
    return %arg0, %c0_i32, %c0_i32_0 : i32, i32, i32
  }
  func.func @transform_1(%arg0: i32) -> (i32, i32, i32) {
    %c0_i32 = arith.constant 0 : i32
    %c0_i32_0 = arith.constant 0 : i32
    %c0_i32_1 = arith.constant 0 : i32
    %c0_i32_2 = arith.constant 0 : i32
    return %c0_i32, %c0_i32_0, %c0_i32_1 : i32, i32, i32
  }
  func.func @transform_2(%arg0: i32) -> (i32, i32) {
    %c0_i32 = arith.constant 0 : i32
    %c0_i32_0 = arith.constant 0 : i32
    %c0_i32_1 = arith.constant 0 : i32
    return %c0_i32, %c0_i32_0 : i32, i32
  }
  func.func @transform_3(%arg0: i32) -> (i32, i32, i32) {
    %c0_i32 = arith.constant 0 : i32
    %c0_i32_0 = arith.constant 0 : i32
    %c0_i32_1 = arith.constant 0 : i32
    %c0_i32_2 = arith.constant 0 : i32
    return %c0_i32, %c0_i32_0, %c0_i32_1 : i32, i32, i32
  }
  func.func @transform_4(%arg0: i32) -> (i32, i32) {
    %c0_i32 = arith.constant 0 : i32
    %c0_i32_0 = arith.constant 0 : i32
    %c0_i32_1 = arith.constant 0 : i32
    return %c0_i32, %c0_i32_0 : i32, i32
  }
  func.func @transform_5(%arg0: i32) -> (i32, i32, i32) {
    %c0_i32 = arith.constant 0 : i32
    %c0_i32_0 = arith.constant 0 : i32
    %c0_i32_1 = arith.constant 0 : i32
    %c0_i32_2 = arith.constant 0 : i32
    return %c0_i32, %c0_i32_0, %c0_i32_1 : i32, i32, i32
  }
  func.func @transform_6(%arg0: i32) -> (i32, i32) {
    %c0_i32 = arith.constant 0 : i32
    %c0_i32_0 = arith.constant 0 : i32
    %c0_i32_1 = arith.constant 0 : i32
    return %c0_i32, %c0_i32_0 : i32, i32
  }
  func.func @transform_7(%arg0: i32) -> (i32, i32, i32) {
    %c0_i32 = arith.constant 0 : i32
    %c0_i32_0 = arith.constant 0 : i32
    %c0_i32_1 = arith.constant 0 : i32
    return %arg0, %c0_i32, %c0_i32_0 : i32, i32, i32
  }
}

</mosaic_0001>

<bundles_post_ra>
// kernel: espcn_forward.1
= control target key start
LH: loop header
LB: loop body
LE: loop exit
PB: predicated region body
PF: predicated region fallthrough
CT: control target
= control target key end

     0   :  { %12 = vsyncpa [#allocation5], 0  ;;  %s16880_s0 = inlined_call_operand.vmem [shape: bf16[1,56,64], index: 0, kind: input, shape index: {}]   ;;  %s16881_s1 = inlined_call_operand.hbm [shape: bf16[5,64,1024], index: 1, kind: input, shape index: {}]   ;;  %s16882_s2 = inlined_call_operand.hbm [shape: f32[1,1024], index: 2, kind: input, shape index: {}]   ;;  %s16883_s3 = inlined_call_operand.hbm [shape: bf16[3,1024,512], index: 3, kind: input, shape index: {}]   ;;  %s16884_s4 = inlined_call_operand.hbm [shape: f32[1,512], index: 4, kind: input, shape index: {}]   ;;  %s16885_s5 = inlined_call_operand.hbm [shape: bf16[3,512,256], index: 5, kind: input, shape index: {}]   ;;  %s16886_s6 = inlined_call_operand.hbm [shape: f32[1,256], index: 6, kind: input, shape index: {}]   ;;  %s16887_s7 = inlined_call_operand.vmem [shape: f32[2,16,256], index: 7, kind: output, shape index: {}]  }
   0x1   :  { %13 = vsyncpa [#allocation7], 0 }
   0x2   :  { %14 = vsyncpa [#allocation10], 0 }
   0x3   :  { %15 = vsyncpa [#allocation13], 0  ;;  %s15420_s24 = smov [#allocation6]   ;;  %s15421_s26 = smov [#allocation9]  }
   0x4   :  { %s36_s25 = sshll.u32 %s15420_s24, 4  ;;  %s58_s27 = sshll.u32 %s15421_s26, 4  ;;  %s37_s25 = int_to_ptr.vmem [resolvable:$true] %s36_s25  ;;  %s59_s27 = int_to_ptr.vmem [resolvable:$true] %s58_s27 }
   0x5   :  { %s15280_s30 = scalar_lea.hbm %s16882_s2, 128 }
   0x6   :  { %p15281_p0 = scmp.ne.s32.totalorder %s16882_s2, %s15280_s30  ;;  %p15284_p1 = scmp.lt.u32.totalorder %s15280_s30, %s16882_s2 }
   0x8   :  { %p15286_p2 = pnand %p15284_p1, %p15281_p0 }
   0xa   :  { %15289 = shalt.err (!%p15286_p2)
}
   0xb   :  { %s15290_s12 = scalar_lea.vmem %s37_s25, 128  ;;  %p15295_p4 = scmp.lt.s32.totalorder %s37_s25, %s37_s25 }
   0xc   :  { %p15291_p3 = scmp.ne.s32.totalorder %s37_s25, %s15290_s12  ;;  %p15296_p5 = scmp.lt.s32.totalorder %s15290_s12, %s15290_s12 }
   0xe   :  { %p15297_p6 = por %p15296_p5, %p15295_p4 }
  0x10   :  { %p15298_p7 = pnand %p15297_p6, %p15291_p3 }
  0x12   :  { %15301 = shalt.err (!%p15298_p7)
}
  0x13   :  { %39 = dma.hbm_to_vmem [thread:$0]  %s16882_s2, 128, %s37_s25, [#allocation7]  }
  0x14   :  { %s15302_s17 = scalar_lea.hbm %s16884_s4, 64 }
  0x15   :  { %p15303_p8 = scmp.ne.s32.totalorder %s16884_s4, %s15302_s17  ;;  %p15306_p9 = scmp.lt.u32.totalorder %s15302_s17, %s16884_s4 }
  0x17   :  { %p15308_p10 = pnand %p15306_p9, %p15303_p8 }
  0x19   :  { %15311 = shalt.err (!%p15308_p10)
}
  0x1a   :  { %s15312_s22 = scalar_lea.vmem %s59_s27, 64  ;;  %p15317_p12 = scmp.lt.s32.totalorder %s59_s27, %s59_s27 }
  0x1b   :  { %p15313_p11 = scmp.ne.s32.totalorder %s59_s27, %s15312_s22  ;;  %p15318_p13 = scmp.lt.s32.totalorder %s15312_s22, %s15312_s22 }
  0x1d   :  { %p15319_p0 = por %p15318_p13, %p15317_p12 }
  0x1f   :  { %p15320_p1 = pnand %p15319_p0, %p15313_p11 }
  0x21   :  { %15323 = shalt.err (!%p15320_p1)
}
  0x22   :  { %61 = dma.hbm_to_vmem [thread:$0]  %s16884_s4, 64, %s59_s27, [#allocation10]  }
  0x23   :  { %s15422_s24 = smov [#allocation4]   ;;  %s15324_s29 = scalar_lea.hbm %s16881_s1, 20480 }
  0x24   :  { %s23_s25 = sshll.u32 %s15422_s24, 4  ;;  %p15325_p2 = scmp.ne.s32.totalorder %s16881_s1, %s15324_s29  ;;  %s24_s25 = int_to_ptr.vmem [resolvable:$true] %s23_s25 }
  0x25   :  { %p15328_p3 = scmp.lt.u32.totalorder %s15324_s29, %s16881_s1 }
  0x27   :  { %p15330_p4 = pnand %p15328_p3, %p15325_p2 }
  0x29   :  { %15333 = shalt.err (!%p15330_p4)
}
  0x2a   :  { %s15334_s11 = scalar_lea.vmem %s24_s25, 20480  ;;  %p15339_p6 = scmp.lt.s32.totalorder %s24_s25, %s24_s25 }
  0x2b   :  { %p15335_p5 = scmp.ne.s32.totalorder %s24_s25, %s15334_s11  ;;  %p15340_p7 = scmp.lt.s32.totalorder %s15334_s11, %s15334_s11 }
  0x2d   :  { %p15341_p8 = por %p15340_p7, %p15339_p6 }
  0x2f   :  { %p15342_p9 = pnand %p15341_p8, %p15335_p5 }
  0x31   :  { %15345 = shalt.err (!%p15342_p9)
}
  0x32   :  { %s15423_s4 = smov 512   ;;  %s15424_s27 = smov 32  }
  0x33   :  { %29 = dma.hbm_to_vmem [thread:$0]  %s16881_s1, 20480, %s24_s25, [#allocation5], %s15423_s4, %s15423_s4, %s15424_s27  }
  0x34   :  { %s15425_s14 = smov [#allocation8]   ;;  %s15346_s18 = scalar_lea.hbm %s16883_s3, 98304 }
  0x35   :  { %s45_s15 = sshll.u32 %s15425_s14, 4  ;;  %p15347_p10 = scmp.ne.s32.totalorder %s16883_s3, %s15346_s18  ;;  %s46_s15 = int_to_ptr.vmem [resolvable:$true] %s45_s15 }
  0x36   :  { %p15350_p11 = scmp.lt.u32.totalorder %s15346_s18, %s16883_s3 }
  0x38   :  { %p15352_p12 = pnand %p15350_p11, %p15347_p10 }
  0x3a   :  { %15355 = shalt.err (!%p15352_p12)
}
  0x3b   :  { %s15356_s2 = scalar_lea.vmem %s46_s15, 98304  ;;  %p15361_p0 = scmp.lt.s32.totalorder %s46_s15, %s46_s15 }
  0x3c   :  { %p15357_p13 = scmp.ne.s32.totalorder %s46_s15, %s15356_s2  ;;  %p15362_p1 = scmp.lt.s32.totalorder %s15356_s2, %s15356_s2 }
  0x3e   :  { %p15363_p2 = por %p15362_p1, %p15361_p0 }
  0x40   :  { %p15364_p3 = pnand %p15363_p2, %p15357_p13 }
  0x42   :  { %15367 = shalt.err (!%p15364_p3)
}
  0x43   :  { %s15426_s1 = smov 256   ;;  %s15427_s23 = smov 16  }
  0x44   :  { %51 = dma.hbm_to_vmem [thread:$0]  %s16883_s3, 98304, %s46_s15, [#allocation7], %s15426_s1, %s15426_s1, %s15427_s23  }
  0x45   :  { %s15428_s26 = smov [#allocation11]   ;;  %s15368_s8 = scalar_lea.hbm %s16885_s5, 24576 }
  0x46   :  { %s67_s28 = sshll.u32 %s15428_s26, 4  ;;  %p15369_p4 = scmp.ne.s32.totalorder %s16885_s5, %s15368_s8  ;;  %s68_s28 = int_to_ptr.vmem [resolvable:$true] %s67_s28 }
  0x47   :  { %p15372_p5 = scmp.lt.u32.totalorder %s15368_s8, %s16885_s5 }
  0x49   :  { %p15374_p6 = pnand %p15372_p5, %p15369_p4 }
  0x4b   :  { %15377 = shalt.err (!%p15374_p6)
}
  0x4c   :  { %s15378_s27 = scalar_lea.vmem %s68_s28, 24576  ;;  %p15383_p8 = scmp.lt.s32.totalorder %s68_s28, %s68_s28 }
  0x4d   :  { %p15379_p7 = scmp.ne.s32.totalorder %s68_s28, %s15378_s27  ;;  %p15384_p9 = scmp.lt.s32.totalorder %s15378_s27, %s15378_s27 }
  0x4f   :  { %p15385_p10 = por %p15384_p9, %p15383_p8 }
  0x51   :  { %p15386_p11 = pnand %p15385_p10, %p15379_p7 }
  0x53   :  { %15389 = shalt.err (!%p15386_p11)
}
  0x54   :  { %s15429_s3 = smov 128   ;;  %s15430_s12 = smov 8  }
  0x55   :  { %73 = dma.hbm_to_vmem [thread:$0]  %s16885_s5, 24576, %s68_s28, [#allocation10], %s15429_s3, %s15429_s3, %s15430_s12  }
  0x56   :  { %s15431_s15 = smov [#allocation12]   ;;  %s15390_s19 = scalar_lea.hbm %s16886_s6, 32 }
  0x57   :  { %s80_s16 = sshll.u32 %s15431_s15, 4  ;;  %p15391_p12 = scmp.ne.s32.totalorder %s16886_s6, %s15390_s19  ;;  %s81_s16 = int_to_ptr.vmem [resolvable:$true] %s80_s16 }
  0x58   :  { %p15394_p13 = scmp.lt.u32.totalorder %s15390_s19, %s16886_s6 }
  0x5a   :  { %p15396_p0 = pnand %p15394_p13, %p15391_p12 }
  0x5c   :  { %15399 = shalt.err (!%p15396_p0)
}
  0x5d   :  { %s15400_s1 = scalar_lea.vmem %s81_s16, 32  ;;  %p15405_p2 = scmp.lt.s32.totalorder %s81_s16, %s81_s16 }
  0x5e   :  { %p15401_p1 = scmp.ne.s32.totalorder %s81_s16, %s15400_s1  ;;  %p15406_p3 = scmp.lt.s32.totalorder %s15400_s1, %s15400_s1 }
  0x60   :  { %p15407_p4 = por %p15406_p3, %p15405_p2 }
  0x62   :  { %p15408_p5 = pnand %p15407_p4, %p15401_p1 }
  0x64   :  { %15411 = shalt.err (!%p15408_p5)
}
  0x65   :  { %83 = dma.hbm_to_vmem [thread:$0]  %s16886_s6, 32, %s81_s16, [#allocation13]  }
  0x66   :  { %15412 = dma.done.wait [#allocation5], 20480  }
  0x67   :  { %15413 = vsyncadd [#allocation5], 4294946816 }
  0x68   :  { %15414 = dma.done.wait [#allocation7], 98432  }
  0x69   :  { %15415 = vsyncadd [#allocation7], 4294868864 }
  0x6a   :  { %15416 = dma.done.wait [#allocation10], 24640  }
  0x6b   :  { %15417 = vsyncadd [#allocation10], 4294942656 }
  0x6c   :  { %15418 = dma.done.wait [#allocation13], 32  }
  0x6d   :  { %15419 = vsyncadd [#allocation13], 4294967264  ;;  %v15432_v0 = vmov 0   ;;  %v143_v1 = vld [vmem:[#allocation4 + $0x100] sm:$0xff]  ;;  %v144_v3 = vld [vmem:[#allocation4 + $0x108] sm:$0xff]  ;;  %vm385_vm1 = vcmask 523264  }
  0x6e   :  { %430 = vmatprep.mubr.bf16.mxu0 %v15432_v0  ;;  %499 = vmatprep.mubr.bf16.mxu1 %v15432_v0  ;;  %v147_v2 = vld [vmem:[#allocation4 + $0x120] sm:$0xff]  ;;  %v148_v5 = vld [vmem:[#allocation4 + $0x128] sm:$0xff]  ;;  %v145_v37 = vld [vmem:[#allocation4 + $0x110] sm:$0xff]  ;;  %vm193_vm0 = vsmask.f32 7424  ;;  %vm1151_vm3 = vcmask 1046528  }
  0x6f   :  { %v11951_v4 = vcombine.high %v143_v1, %v147_v2  ;;  %v11950_v6 = vcombine.low %v143_v1, %v147_v2  ;;  %v151_v7 = vld [vmem:[#allocation4 + $0x140] sm:$0xff]  ;;  %v11953_v9 = vcombine.high %v144_v3, %v148_v5  ;;  %v11952_v10 = vcombine.low %v144_v3, %v148_v5  ;;  %v152_v12 = vld [vmem:[#allocation4 + $0x148] sm:$0xff]  ;;  %v149_v38 = vld [vmem:[#allocation4 + $0x130] sm:$0xff] }
  0x70   :  { %v155_v8 = vld [vmem:[#allocation4 + $0x160] sm:$0xff]  ;;  %v156_v13 = vld [vmem:[#allocation4 + $0x168] sm:$0xff]  ;;  %v15566_v39 = vld [vmem:[%s16880_s0 + $0x18] ss:$0 sps:$4 sm:$0xff]   ;;  %v11955_v47 = vcombine.high %v145_v37, %v149_v38  ;;  %v11954_v50 = vcombine.low %v145_v37, %v149_v38  ;;  %vm1688_vm2 = vsmask.f32 6400 }
  0x71   :  { %v11959_v11 = vcombine.high %v151_v7, %v155_v8  ;;  %v159_v14 = vld [vmem:[#allocation4 + $0x180] sm:$0xff]  ;;  %398 = vmatprep.subr.bf16.mxu0 %v11951_v4  ;;  %v11961_v15 = vcombine.high %v152_v12, %v156_v13  ;;  %v160_v17 = vld [vmem:[#allocation4 + $0x188] sm:$0xff]  ;;  %467 = vmatprep.subr.bf16.mxu1 %v11953_v9  ;;  %v11958_v19 = vcombine.low %v151_v7, %v155_v8  ;;  %v15575_v43 = vld [vmem:[%s16880_s0 + $0x10] sm:$0xff]   ;;  %v218_v48 = vshll.u32 %v15566_v39, 16 }
  0x72   :  { %v163_v16 = vld [vmem:[#allocation4 + $0x1a0] sm:$0xff]  ;;  %v164_v18 = vld [vmem:[#allocation4 + $0x1a8] sm:$0xff]  ;;  %399 = vmatpush1.bf16.msra.mxu0 %v11950_v6  ;;  %468 = vmatpush1.bf16.msra.mxu1 %v11952_v10  ;;  %v11960_v21 = vcombine.low %v152_v12, %v156_v13  ;;  %v146_v44 = vld [vmem:[#allocation4 + $0x118] sm:$0xff]  ;;  %v210_v55 = vshll.u32 %v15575_v43, 16  ;;  %v222_v59 = vshrl.u32 %v15566_v39, 16  ;;  %vm2233_vm4 = vcmask 1045504  }
  0x73   :  { %v167_v20 = vld [vmem:[#allocation4 + $0x1c0] sm:$0xff]  ;;  %400 = vmatprep.subr.bf16.mxu0 %v11959_v11  ;;  %v11967_v22 = vcombine.high %v159_v14, %v163_v16  ;;  %469 = vmatprep.subr.bf16.mxu1 %v11961_v15  ;;  %v11969_v24 = vcombine.high %v160_v17, %v164_v18  ;;  %v168_v26 = vld [vmem:[#allocation4 + $0x1c8] sm:$0xff]  ;;  %v11966_v29 = vcombine.low %v159_v14, %v163_v16  ;;  %v150_v45 = vld [vmem:[#allocation4 + $0x138] sm:$0xff]  ;;  %v1701_v56 = vrot.slane %v218_v48, 2 }
  0x74   :  { %v171_v23 = vld [vmem:[#allocation4 + $0x1e0] sm:$0xff]  ;;  %v172_v27 = vld [vmem:[#allocation4 + $0x1e8] sm:$0xff]  ;;  %v11968_v32 = vcombine.low %v160_v17, %v164_v18  ;;  %v11957_v49 = vcombine.high %v146_v44, %v150_v45  ;;  %v153_v52 = vld [vmem:[#allocation4 + $0x150] sm:$0xff]  ;;  %v11956_v63 = vcombine.low %v146_v44, %v150_v45  ;;  %v1700_v1 = vrot.slane %v222_v59, 1 }
  0x75   :  { %v15551_v25 = vld [vmem:[%s16880_s0] sm:$0xff]   ;;  %v15556_v28 = vld [vmem:[%s16880_s0 + $0x8] sm:$0xff]   ;;  %v11975_v33 = vcombine.high %v167_v20, %v171_v23  ;;  %v11977_v35 = vcombine.high %v168_v26, %v172_v27  ;;  %v11974_v40 = vcombine.low %v167_v20, %v171_v23  ;;  %v11976_v46 = vcombine.low %v168_v26, %v172_v27  ;;  %v157_v53 = vld [vmem:[#allocation4 + $0x170] sm:$0xff] }
  0x76   :  { %401 = vmatpush1.bf16.msra.mxu0 %v11958_v19  ;;  %v195_v30 = vshrl.u32 %v15551_v25, 16  ;;  %v197_v31 = vshll.u32 %v15551_v25, 16  ;;  %470 = vmatpush1.bf16.msra.mxu1 %v11960_v21  ;;  %v202_v34 = vshll.u32 %v15556_v28, 16  ;;  %v206_v51 = vshrl.u32 %v15556_v28, 16  ;;  %v154_v57 = vld [vmem:[#allocation4 + $0x158] sm:$0xff]  ;;  %v161_v61 = vld [vmem:[#allocation4 + $0x190] sm:$0xff] }
  0x77   :  { %402 = vmatprep.subr.bf16.mxu0 %v11967_v22  ;;  %471 = vmatprep.subr.bf16.mxu1 %v11969_v24  ;;  %v158_v58 = vld [vmem:[#allocation4 + $0x178] sm:$0xff]  ;;  %v11963_v60 = vcombine.high %v153_v52, %v157_v53  ;;  %v165_v62 = vld [vmem:[#allocation4 + $0x1b0] sm:$0xff]  ;;  %v212_v4 = vrot.slane %v210_v55, 1  ;;  %v11962_v5 = vcombine.low %v153_v52, %v157_v53  ;;  %v15594_v6 = vor.u32 %v1701_v56, %v1700_v1  ;;  %v110_v22 = vld [vmem:[#allocation4] sm:$0xff] }
  0x78   :  { %v199_v36 = vrot.slane %v197_v31, 1  ;;  %v204_v42 = vrot.slane %v202_v34, 1  ;;  %v11965_v2 = vcombine.high %v154_v57, %v158_v58  ;;  %v162_v7 = vld [vmem:[#allocation4 + $0x198] sm:$0xff]  ;;  %v11971_v9 = vcombine.high %v161_v61, %v165_v62  ;;  %v169_v11 = vld [vmem:[#allocation4 + $0x1d0] sm:$0xff]  ;;  %v114_v23 = vld [vmem:[#allocation4 + $0x20] sm:$0xff] }
  0x79   :  { %v166_v8 = vld [vmem:[#allocation4 + $0x1b8] sm:$0xff]  ;;  %v11964_v10 = vcombine.low %v154_v57, %v158_v58  ;;  %v173_v12 = vld [vmem:[#allocation4 + $0x1f0] sm:$0xff]  ;;  %v214_v15 = vshrl.u32 %v15575_v43, 16  ;;  %v11970_v18 = vcombine.low %v161_v61, %v165_v62  ;;  %v220_v26 = vrot.slane %v218_v48, 1  ;;  %v111_v27 = vld [vmem:[#allocation4 + $0x8] sm:$0xff] }
  0x7a   :  { %403 = vmatpush1.bf16.msra.mxu0 %v11966_v29  ;;  %v200_v41 = vor.u32 %v199_v36, %v195_v30  ;;  %472 = vmatpush1.bf16.msra.mxu1 %v11968_v32  ;;  %v208_v3 = vor.u32 %v206_v51, %v204_v42  ;;  %v11973_v13 = vcombine.high %v162_v7, %v166_v8  ;;  %v170_v16 = vld [vmem:[#allocation4 + $0x1d8] sm:$0xff]  ;;  %v115_v29 = vld [vmem:[#allocation4 + $0x28] sm:$0xff]  ;;  %v134_v58 = vld [vmem:[#allocation4 + $0xc0] sm:$0xff]  ;;  %vm2905_vm5 = vcmask 1041408  }
  0x7b   :  { %404 = vmatprep.subr.bf16.mxu0 %v11975_v33  ;;  %473 = vmatprep.subr.bf16.mxu1 %v11977_v35  ;;  %v174_v17 = vld [vmem:[#allocation4 + $0x1f8] sm:$0xff]  ;;  %v11979_v19 = vcombine.high %v169_v11, %v173_v12  ;;  %v11972_v20 = vcombine.low %v162_v7, %v166_v8  ;;  %v216_v24 = vor.u32 %v214_v15, %v212_v4  ;;  %v123_v44 = vld [vmem:[#allocation4 + $0x68] sm:$0xff]  ;;  %v112_v1 = vld [vmem:[#allocation4 + $0x10] sm:$0xff]  ;;  %vm9950_vm7 = vcmask 1040384  }
  0x7c   :  { %v15580_v54 = vsel %vm193_vm0, %v200_v41, %v204_v42  ;;  %v15599_v14 = vsel %vm193_vm0, %v208_v3, %v212_v4  ;;  %v11981_v21 = vcombine.high %v170_v16, %v174_v17  ;;  %v11978_v32 = vcombine.low %v169_v11, %v173_v12  ;;  %v122_v41 = vld [vmem:[#allocation4 + $0x60] sm:$0xff]  ;;  %v119_v42 = vld [vmem:[#allocation4 + $0x48] sm:$0xff]  ;;  %v113_v7 = vld [vmem:[#allocation4 + $0x18] sm:$0xff] }
  0x7d   :  { %v11980_v33 = vcombine.low %v170_v16, %v174_v17  ;;  %v11999_v35 = vcombine.high %v110_v22, %v114_v23  ;;  %v12001_v36 = vcombine.high %v111_v27, %v115_v29  ;;  %v15611_v37 = vsel %vm193_vm0, %v216_v24, %v220_v26  ;;  %v127_v53 = vld [vmem:[#allocation4 + $0x88] sm:$0xff]  ;;  %v117_v8 = vld [vmem:[#allocation4 + $0x38] sm:$0xff] }
  0x7e   :  { %405 = vmatpush1.bf16.msra.mxu0 %v11974_v40  ;;  %474 = vmatpush1.bf16.msra.mxu1 %v11976_v46  ;;  %v15621_v38 = vor.u32 %v222_v59, %v220_v26  ;;  %v118_v40 = vld [vmem:[#allocation4 + $0x40] sm:$0xff]  ;;  %v11998_v45 = vcombine.low %v110_v22, %v114_v23  ;;  %v131_v56 = vld [vmem:[#allocation4 + $0xa8] sm:$0xff]  ;;  %v12005_v12 = vcombine.high %v113_v7, %v117_v8  ;;  %v1693_v16 = vrot.slane %v202_v34, 2  ;;  %v132_v22 = vld [vmem:[#allocation4 + $0xb0] sm:$0xff] }
  0x7f   :  { %536 = vmatprep.subr.bf16.mxu0 %v11955_v47  ;;  %605 = vmatprep.subr.bf16.mxu1 %v11957_v49  ;;  %v126_v46 = vld [vmem:[#allocation4 + $0x80] sm:$0xff]  ;;  %v12007_v48 = vcombine.high %v118_v40, %v122_v41  ;;  %v12000_v49 = vcombine.low %v111_v27, %v115_v29  ;;  %v12006_v52 = vcombine.low %v118_v40, %v122_v41  ;;  %v135_v61 = vld [vmem:[#allocation4 + $0xc8] sm:$0xff]  ;;  %v1692_v17 = vrot.slane %v206_v51, 1  ;;  %v128_v51 = vld [vmem:[#allocation4 + $0x90] sm:$0xff] }
  0x80   :  { %v130_v47 = vld [vmem:[#allocation4 + $0xa0] sm:$0xff]  ;;  %v139_v62 = vld [vmem:[#allocation4 + $0xe8] sm:$0xff]  ;;  %v12016_v4 = vcombine.low %v127_v53, %v131_v56  ;;  %v12004_v26 = vcombine.low %v113_v7, %v117_v8  ;;  %v137_v40 = vld [vmem:[#allocation4 + $0xd8] sm:$0xff] }
  0x81   :  { %11982 = vmatmul.mubr.msk.bf16.vlgmr.msra.gmra.mrb[0].mxu0 %vm385_vm1, %v15580_v54  ;;  %11986 = vmatmul.mubr.msk.bf16.vlgmr.msra.gmra.mrb[0].mxu1 %vm385_vm1, %v15580_v54  ;;  %v12015_v57 = vcombine.high %v126_v46, %v130_v47  ;;  %v138_v59 = vld [vmem:[#allocation4 + $0xe0] sm:$0xff]  ;;  %v15661_v34 = vor.u32 %v1693_v16, %v1692_v17  ;;  %v141_v41 = vld [vmem:[#allocation4 + $0xf8] sm:$0xff]  ;;  %v1125_v16 = vld [vmem:[#allocation4 + $0x230] sm:$0xff] }
  0x82   :  { %537 = vmatpush1.bf16.msra.mxu0 %v11954_v50  ;;  %440 = vmatprep.mubr.bf16.mxu0 %v15432_v0  ;;  %v12009_v50 = vcombine.high %v119_v42, %v123_v44  ;;  %v12023_v3 = vcombine.high %v134_v58, %v138_v59  ;;  %v1143_v8 = vld [vmem:[#allocation4 + $0x2c0] sm:$0xff] }
  0x83   :  { %509 = vmatprep.mubr.bf16.mxu1 %v15432_v0  ;;  %538 = vmatprep.subr.bf16.mxu0 %v11963_v60  ;;  %v12008_v60 = vcombine.low %v119_v42, %v123_v44  ;;  %v12018_v44 = vcombine.low %v128_v51, %v132_v22 }
  0x84   :  { %606 = vmatpush1.bf16.msra.mxu1 %v11956_v63  ;;  %v12017_v63 = vcombine.high %v127_v53, %v131_v56  ;;  %v12028_v56 = vcombine.low %v137_v40, %v141_v41 }
  0x85   :  { %607 = vmatprep.subr.bf16.mxu1 %v11965_v2  ;;  %v116_v2 = vld [vmem:[#allocation4 + $0x30] sm:$0xff] }
  0x86   :  { %539 = vmatpush1.bf16.msra.mxu0 %v11962_v5  ;;  %v12025_v5 = vcombine.high %v135_v61, %v139_v62  ;;  %v12003_v11 = vcombine.high %v112_v1, %v116_v2 }
  0x87   :  { %540 = vmatprep.subr.bf16.mxu0 %v11971_v9  ;;  %v12022_v9 = vcombine.low %v134_v58, %v138_v59  ;;  %v1131_v59 = vld [vmem:[#allocation4 + $0x260] sm:$0xff] }
  0x88   :  { %608 = vmatpush1.bf16.msra.mxu1 %v11964_v10  ;;  %v12024_v10 = vcombine.low %v135_v61, %v139_v62  ;;  %v1132_v61 = vld [vmem:[#allocation4 + $0x268] sm:$0xff] }
  0x89   :  { %11983 = vmatmul.mubr.msk.bf16.gmra.mrb[4].mxu0 %vm385_vm1, %v15599_v14  ;;  %609 = vmatprep.subr.bf16.mxu1 %v11973_v13  ;;  %v1689_v13 = vrot.slane %v195_v30, 1  ;;  %v120_v30 = vld [vmem:[#allocation4 + $0x50] sm:$0xff] }
  0x8a   :  { %11987 = vmatmul.mubr.msk.bf16.gmra.mrb[4].mxu1 %vm385_vm1, %v15599_v14  ;;  %450 = vmatprep.mubr.bf16.mxu0 %v15432_v0 }
  0x8b   :  { %519 = vmatprep.mubr.bf16.mxu1 %v15432_v0  ;;  %541 = vmatpush1.bf16.msra.mxu0 %v11970_v18  ;;  %v124_v18 = vld [vmem:[#allocation4 + $0x70] sm:$0xff] }
  0x8c   :  { %542 = vmatprep.subr.bf16.mxu0 %v11979_v19  ;;  %610 = vmatpush1.bf16.msra.mxu1 %v11972_v20  ;;  %v121_v19 = vld [vmem:[#allocation4 + $0x58] sm:$0xff]  ;;  %v12011_v24 = vcombine.high %v120_v30, %v124_v18  ;;  %v12010_v29 = vcombine.low %v120_v30, %v124_v18  ;;  %v15700_v18 = vld [vmem:[%s16880_s0 + $0x8] sm:$0xff]  }
  0x8d   :  { %611 = vmatprep.subr.bf16.mxu1 %v11981_v21  ;;  %v125_v20 = vld [vmem:[#allocation4 + $0x78] sm:$0xff]  ;;  %v12002_v21 = vcombine.low %v112_v1, %v116_v2 }
  0x8e   :  { %v12013_v27 = vcombine.high %v121_v19, %v125_v20 }
  0x8f   :  { %543 = vmatpush1.bf16.msra.mxu0 %v11978_v32  ;;  %v129_v32 = vld [vmem:[#allocation4 + $0x98] sm:$0xff] }
  0x90   :  { %612 = vmatpush1.bf16.msra.mxu1 %v11980_v33  ;;  %842 = vmatprep.subr.bf16.mxu0 %v11999_v35  ;;  %v133_v33 = vld [vmem:[#allocation4 + $0xb8] sm:$0xff]  ;;  %v12019_v35 = vcombine.high %v128_v51, %v132_v22 }
  0x91   :  { %11984 = vmatmul.mubr.msk.bf16.gmra.mrb[8].mxu0 %vm385_vm1, %v15611_v37  ;;  %911 = vmatprep.subr.bf16.mxu1 %v12001_v36  ;;  %v136_v36 = vld [vmem:[#allocation4 + $0xd0] sm:$0xff]  ;;  %v12021_v42 = vcombine.high %v129_v32, %v133_v33 }
  0x92   :  { %11988 = vmatmul.mubr.msk.bf16.gmra.mrb[8].mxu1 %vm385_vm1, %v15611_v37  ;;  %460 = vmatprep.mubr.bf16.mxu0 %v15432_v0 }
  0x93   :  { %529 = vmatprep.mubr.bf16.mxu1 %v15432_v0 }
  0x99   :  { %11985 = vmatmul.mubr.msk.bf16.gmra.mrb[12].mxu0 %vm385_vm1, %v15621_v38 }
  0x9a   :  { %11989 = vmatmul.mubr.msk.bf16.gmra.mrb[12].mxu1 %vm385_vm1, %v15621_v38  ;;  %568 = vmatprep.mubr.bf16.mxu0 %v15432_v0 }
  0x9b   :  { %637 = vmatprep.mubr.bf16.mxu1 %v15432_v0 }
  0xa1   :  { %11990 = vmatmul.mubr.msk.bf16.vlgmr.msra.gmra.mrb[16].mxu0 %vm385_vm1, %v15580_v54 }
  0xa2   :  { %11994 = vmatmul.mubr.msk.bf16.vlgmr.msra.gmra.mrb[16].mxu1 %vm385_vm1, %v15580_v54  ;;  %843 = vmatpush1.bf16.msra.mxu0 %v11998_v45  ;;  %v12014_v54 = vcombine.low %v126_v46, %v130_v47  ;;  %v1119_v45 = vld [vmem:[#allocation4 + $0x200] sm:$0xff] }
  0xa3   :  { %578 = vmatprep.mubr.bf16.mxu0 %v15432_v0  ;;  %647 = vmatprep.mubr.bf16.mxu1 %v15432_v0  ;;  %v1123_v46 = vld [vmem:[#allocation4 + $0x220] sm:$0xff] }
  0xa4   :  { %844 = vmatprep.subr.bf16.mxu0 %v12007_v48  ;;  %912 = vmatpush1.bf16.msra.mxu1 %v12000_v49  ;;  %v12020_v48 = vcombine.low %v129_v32, %v133_v33  ;;  %v12029_v49 = vcombine.high %v137_v40, %v141_v41  ;;  %v12046_v62 = vcombine.low %v1119_v45, %v1123_v46  ;;  %v1153_v33 = vrot.slane %v15700_v18, 1 }
  0xa5   :  { %913 = vmatprep.subr.bf16.mxu1 %v12009_v50  ;;  %v1120_v50 = vld [vmem:[#allocation4 + $0x208] sm:$0xff] }
  0xa6   :  { %845 = vmatpush1.bf16.msra.mxu0 %v12006_v52  ;;  %v1124_v52 = vld [vmem:[#allocation4 + $0x228] sm:$0xff] }
  0xa7   :  { %846 = vmatprep.subr.bf16.mxu0 %v12015_v57  ;;  %v12047_v57 = vcombine.high %v1119_v45, %v1123_v46  ;;  %v12049_v58 = vcombine.high %v1120_v50, %v1124_v52  ;;  %v12048_v2 = vcombine.low %v1120_v50, %v1124_v52 }
  0xa8   :  { %914 = vmatpush1.bf16.msra.mxu1 %v12008_v60  ;;  %v1128_v60 = vld [vmem:[#allocation4 + $0x248] sm:$0xff] }
  0xa9   :  { %11991 = vmatmul.mubr.msk.bf16.gmra.mrb[20].mxu0 %vm385_vm1, %v15599_v14  ;;  %915 = vmatprep.subr.bf16.mxu1 %v12017_v63  ;;  %v1135_v63 = vld [vmem:[#allocation4 + $0x280] sm:$0xff] }
  0xaa   :  { %11995 = vmatmul.mubr.msk.bf16.gmra.mrb[20].mxu1 %vm385_vm1, %v15599_v14  ;;  %588 = vmatprep.mubr.bf16.mxu0 %v15432_v0  ;;  %v1690_v14 = vrot.slane %v197_v31, 2 }
  0xab   :  { %657 = vmatprep.mubr.bf16.mxu1 %v15432_v0  ;;  %847 = vmatpush1.bf16.msra.mxu0 %v12014_v54  ;;  %v1139_v54 = vld [vmem:[#allocation4 + $0x2a0] sm:$0xff] }
  0xac   :  { %848 = vmatprep.subr.bf16.mxu0 %v12023_v3  ;;  %916 = vmatpush1.bf16.msra.mxu1 %v12016_v4  ;;  %v1691_v31 = vor.u32 %v1690_v14, %v1689_v13  ;;  %v12057_v3 = vcombine.high %v1128_v60, %v1132_v61  ;;  %v1136_v4 = vld [vmem:[#allocation4 + $0x288] sm:$0xff]  ;;  %v12063_v7 = vcombine.high %v1135_v63, %v1139_v54  ;;  %v1121_v14 = vld [vmem:[#allocation4 + $0x210] sm:$0xff] }
  0xad   :  { %917 = vmatprep.subr.bf16.mxu1 %v12025_v5  ;;  %v1140_v5 = vld [vmem:[#allocation4 + $0x2a8] sm:$0xff]  ;;  %v12051_v22 = vcombine.high %v1121_v14, %v1125_v16  ;;  %v12050_v41 = vcombine.low %v1121_v14, %v1125_v16 }
  0xae   :  { %v15665_v23 = vsel %vm1688_vm2, %v1691_v31, %v15661_v34  ;;  %v12065_v13 = vcombine.high %v1136_v4, %v1140_v5  ;;  %v12064_v30 = vcombine.low %v1136_v4, %v1140_v5  ;;  %v1669_v14 = vld [vmem:[#allocation4 + $0x368] sm:$0xff] }
  0xaf   :  { %849 = vmatpush1.bf16.msra.mxu0 %v12022_v9  ;;  %v1147_v9 = vld [vmem:[#allocation4 + $0x2e0] sm:$0xff] }
  0xb0   :  { %918 = vmatpush1.bf16.msra.mxu1 %v12024_v10  ;;  %980 = vmatprep.subr.bf16.mxu0 %v12003_v11  ;;  %v12056_v10 = vcombine.low %v1128_v60, %v1132_v61  ;;  %v1144_v11 = vld [vmem:[#allocation4 + $0x2c8] sm:$0xff]  ;;  %v12071_v17 = vcombine.high %v1143_v8, %v1147_v9 }
  0xb1   :  { %11992 = vmatmul.mubr.msk.bf16.gmra.mrb[24].mxu0 %vm385_vm1, %v15611_v37  ;;  %1049 = vmatprep.subr.bf16.mxu1 %v12005_v12  ;;  %v1148_v12 = vld [vmem:[#allocation4 + $0x2e8] sm:$0xff] }
  0xb2   :  { %11996 = vmatmul.mubr.msk.bf16.gmra.mrb[24].mxu1 %vm385_vm1, %v15611_v37  ;;  %598 = vmatprep.mubr.bf16.mxu0 %v15432_v0  ;;  %v140_v37 = vld [vmem:[#allocation4 + $0xf0] sm:$0xff]  ;;  %v12073_v31 = vcombine.high %v1144_v11, %v1148_v12  ;;  %v12072_v51 = vcombine.low %v1144_v11, %v1148_v12  ;;  %v1664_v12 = vld [vmem:[#allocation4 + $0x340] sm:$0xff] }
  0xb3   :  { %667 = vmatprep.mubr.bf16.mxu1 %v15432_v0  ;;  %v12027_v47 = vcombine.high %v136_v36, %v140_v37  ;;  %v12026_v53 = vcombine.low %v136_v36, %v140_v37  ;;  %v1133_v36 = vld [vmem:[#allocation4 + $0x270] sm:$0xff]  ;;  %v1130_v37 = vld [vmem:[#allocation4 + $0x258] sm:$0xff] }
  0xb9   :  { %11993 = vmatmul.mubr.msk.bf16.gmra.mrb[28].mxu0 %vm385_vm1, %v15621_v38 }
  0xba   :  { %11997 = vmatmul.mubr.msk.bf16.gmra.mrb[28].mxu1 %vm385_vm1, %v15621_v38  ;;  %874 = vmatprep.mubr.bf16.mxu0 %v15432_v0  ;;  %v12012_v38 = vcombine.low %v121_v19, %v125_v20  ;;  %v1122_v19 = vld [vmem:[#allocation4 + $0x218] sm:$0xff] }
  0xbb   :  { %943 = vmatprep.mubr.bf16.mxu1 %v15432_v0  ;;  %v1126_v20 = vld [vmem:[#allocation4 + $0x238] sm:$0xff] }
  0xbc   :  { %v12052_v46 = vcombine.low %v1122_v19, %v1126_v20 }
  0xc1   :  { %12030 = vmatmul.mubr.msk.bf16.vlgmr.msra.gmra.mrb[0].mxu0 %vm385_vm1, %v15551_v25 }
  0xc2   :  { %12034 = vmatmul.mubr.msk.bf16.vlgmr.msra.gmra.mrb[0].mxu1 %vm385_vm1, %v15551_v25  ;;  %981 = vmatpush1.bf16.msra.mxu0 %v12002_v21  ;;  %v12070_v21 = vcombine.low %v1143_v8, %v1147_v9 }
  0xc3   :  { %884 = vmatprep.mubr.bf16.mxu0 %v15432_v0  ;;  %953 = vmatprep.mubr.bf16.mxu1 %v15432_v0 }
  0xc4   :  { %982 = vmatprep.subr.bf16.mxu0 %v12011_v24  ;;  %1050 = vmatpush1.bf16.msra.mxu1 %v12004_v26  ;;  %v12053_v24 = vcombine.high %v1122_v19, %v1126_v20  ;;  %v15711_v26 = vld [vmem:[%s16880_s0 + $0x10] sm:$0xff]   ;;  %v1673_v19 = vld [vmem:[#allocation4 + $0x388] sm:$0xff] }
  0xc5   :  { %1051 = vmatprep.subr.bf16.mxu1 %v12013_v27  ;;  %v15274_v27 = vld [vmem:[%s16880_s0 + $0x18] ss:$0 sps:$4 sm:$0xff]   ;;  %v1155_v50 = vrot.slane %v15711_v26, 1  ;;  %v1677_v20 = vld [vmem:[#allocation4 + $0x3a8] sm:$0xff] }
  0xc6   :  { %983 = vmatpush1.bf16.msra.mxu0 %v12010_v29  ;;  %v15275_v29 = vld [vmem:[%s16880_s0] sm:$0xff]   ;;  %v15748_v5 = vrot.slane %v15274_v27, 1 }
  0xc7   :  { %984 = vmatprep.subr.bf16.mxu0 %v12019_v35  ;;  %v1152_v32 = vrot.slane %v15275_v29, 1  ;;  %v1129_v35 = vld [vmem:[#allocation4 + $0x250] sm:$0xff]  ;;  %v15741_v61 = vsel %vm1151_vm3, %v1153_v33, %v1155_v50  ;;  %v1681_v29 = vld [vmem:[#allocation4 + $0x3c8] sm:$0xff] }
  0xc8   :  { %1052 = vmatpush1.bf16.msra.mxu1 %v12012_v38  ;;  %v1134_v38 = vld [vmem:[#allocation4 + $0x278] sm:$0xff]  ;;  %v12059_v45 = vcombine.high %v1129_v35, %v1133_v36  ;;  %v12058_v52 = vcombine.low %v1129_v35, %v1133_v36  ;;  %v15753_v11 = vsel %vm1151_vm3, %v1155_v50, %v15748_v5  ;;  %v1658_v36 = vld [vmem:[#allocation4 + $0x310] sm:$0xff] }
  0xc9   :  { %12031 = vmatmul.mubr.msk.bf16.gmra.mrb[4].mxu0 %vm385_vm1, %v15556_v28  ;;  %1053 = vmatprep.subr.bf16.mxu1 %v12021_v42  ;;  %v15731_v40 = vsel %vm1151_vm3, %v1152_v32, %v1153_v33  ;;  %v1137_v42 = vld [vmem:[#allocation4 + $0x290] sm:$0xff]  ;;  %v1685_v32 = vld [vmem:[#allocation4 + $0x3e8] sm:$0xff]  ;;  %v12113_v33 = vcombine.high %v1673_v19, %v1677_v20 }
  0xca   :  { %12035 = vmatmul.mubr.msk.bf16.gmra.mrb[4].mxu1 %vm385_vm1, %v15556_v28  ;;  %894 = vmatprep.mubr.bf16.mxu0 %v15432_v0  ;;  %v1127_v28 = vld [vmem:[#allocation4 + $0x240] sm:$0xff]  ;;  %v1670_v50 = vld [vmem:[#allocation4 + $0x370] sm:$0xff] }
  0xcb   :  { %963 = vmatprep.mubr.bf16.mxu1 %v15432_v0  ;;  %985 = vmatpush1.bf16.msra.mxu0 %v12018_v44  ;;  %v12055_v1 = vcombine.high %v1127_v28, %v1131_v59  ;;  %v1141_v44 = vld [vmem:[#allocation4 + $0x2b0] sm:$0xff] }
  0xcc   :  { %986 = vmatprep.subr.bf16.mxu0 %v12027_v47  ;;  %1054 = vmatpush1.bf16.msra.mxu1 %v12020_v48  ;;  %v1138_v47 = vld [vmem:[#allocation4 + $0x298] sm:$0xff] }
  0xcd   :  { %1055 = vmatprep.subr.bf16.mxu1 %v12029_v49  ;;  %v1142_v48 = vld [vmem:[#allocation4 + $0x2b8] sm:$0xff]  ;;  %v12061_v49 = vcombine.high %v1130_v37, %v1134_v38 }
  0xce   :  { %v12069_v60 = vcombine.high %v1138_v47, %v1142_v48 }
  0xcf   :  { %987 = vmatpush1.bf16.msra.mxu0 %v12026_v53  ;;  %v12067_v53 = vcombine.high %v1137_v42, %v1141_v44 }
  0xd0   :  { %1056 = vmatpush1.bf16.msra.mxu1 %v12028_v56  ;;  %1331 = vmatprep.subr.bf16.mxu0 %v12047_v57  ;;  %v1145_v56 = vld [vmem:[#allocation4 + $0x2d0] sm:$0xff] }
  0xd1   :  { %12032 = vmatmul.mubr.msk.bf16.gmra.mrb[8].mxu0 %vm385_vm1, %v15575_v43  ;;  %1400 = vmatprep.subr.bf16.mxu1 %v12049_v58  ;;  %v1149_v57 = vld [vmem:[#allocation4 + $0x2f0] sm:$0xff]  ;;  %v12060_v58 = vcombine.low %v1130_v37, %v1134_v38 }
  0xd2   :  { %12036 = vmatmul.mubr.msk.bf16.gmra.mrb[8].mxu1 %vm385_vm1, %v15575_v43  ;;  %904 = vmatprep.mubr.bf16.mxu0 %v15432_v0  ;;  %v1662_v37 = vld [vmem:[#allocation4 + $0x330] sm:$0xff] }
  0xd3   :  { %973 = vmatprep.mubr.bf16.mxu1 %v15432_v0 }
  0xd9   :  { %12033 = vmatmul.mubr.msk.bf16.gmra.mrb[32].mxu0 %vm385_vm1, %v15566_v39 }
  0xda   :  { %12037 = vmatmul.mubr.msk.bf16.gmra.mrb[32].mxu1 %vm385_vm1, %v15566_v39  ;;  %1012 = vmatprep.mubr.bf16.mxu0 %v15432_v0  ;;  %v12054_v39 = vcombine.low %v1127_v28, %v1131_v59  ;;  %v1146_v28 = vld [vmem:[#allocation4 + $0x2d8] sm:$0xff] }
  0xdb   :  { %1081 = vmatprep.mubr.bf16.mxu1 %v15432_v0  ;;  %v1150_v59 = vld [vmem:[#allocation4 + $0x2f8] sm:$0xff] }
  0xdc   :  { %v12077_v4 = vcombine.high %v1146_v28, %v1150_v59  ;;  %v12076_v8 = vcombine.low %v1146_v28, %v1150_v59  ;;  %v1674_v28 = vld [vmem:[#allocation4 + $0x390] sm:$0xff] }
  0xdd   :  { %v1678_v59 = vld [vmem:[#allocation4 + $0x3b0] sm:$0xff] }
  0xde   :  { %v12115_v43 = vcombine.high %v1674_v28, %v1678_v59 }
  0xe1   :  { %12038 = vmatmul.mubr.msk.bf16.vlgmr.msra.gmra.mrb[16].mxu0 %vm385_vm1, %v15551_v25 }
  0xe2   :  { %12042 = vmatmul.mubr.msk.bf16.vlgmr.msra.gmra.mrb[16].mxu1 %vm385_vm1, %v15551_v25  ;;  %1332 = vmatpush1.bf16.msra.mxu0 %v12046_v62  ;;  %v12062_v25 = vcombine.low %v1135_v63, %v1139_v54  ;;  %v12066_v62 = vcombine.low %v1137_v42, %v1141_v44  ;;  %v1656_v63 = vld [vmem:[#allocation4 + $0x300] sm:$0xff]  ;;  %v1663_v42 = vld [vmem:[#allocation4 + $0x338] sm:$0xff]  ;;  %v12121_v44 = vcombine.high %v1681_v29, %v1685_v32 }
  0xe3   :  { %1022 = vmatprep.mubr.bf16.mxu0 %v15432_v0  ;;  %1091 = vmatprep.mubr.bf16.mxu1 %v15432_v0  ;;  %v1660_v54 = vld [vmem:[#allocation4 + $0x320] sm:$0xff] }
  0xe4   :  { %1333 = vmatprep.subr.bf16.mxu0 %v12055_v1  ;;  %1401 = vmatpush1.bf16.msra.mxu1 %v12048_v2  ;;  %v12075_v1 = vcombine.high %v1145_v56, %v1149_v57  ;;  %v12068_v2 = vcombine.low %v1138_v47, %v1142_v48  ;;  %v12095_v9 = vcombine.high %v1656_v63, %v1660_v54 }
  0xe5   :  { %1402 = vmatprep.subr.bf16.mxu1 %v12057_v3  ;;  %v1657_v3 = vld [vmem:[#allocation4 + $0x308] sm:$0xff]  ;;  %v12094_v16 = vcombine.low %v1656_v63, %v1660_v54  ;;  %v12099_v47 = vcombine.high %v1658_v36, %v1662_v37  ;;  %v1679_v63 = vld [vmem:[#allocation4 + $0x3b8] sm:$0xff] }
  0xe6   :  { %1334 = vmatpush1.bf16.msra.mxu0 %v12054_v39  ;;  %v1661_v39 = vld [vmem:[#allocation4 + $0x328] sm:$0xff] }
  0xe7   :  { %1335 = vmatprep.subr.bf16.mxu0 %v12063_v7  ;;  %v12074_v7 = vcombine.low %v1145_v56, %v1149_v57  ;;  %v12098_v56 = vcombine.low %v1658_v36, %v1662_v37  ;;  %v1696_v57 = vrot.slane %v214_v15, 1  ;;  %v1686_v15 = vld [vmem:[#allocation4 + $0x3f0] sm:$0xff]  ;;  %v2225_v37 = vld [vmem:[#allocation4 + $0x4c0] sm:$0xff] }
  0xe8   :  { %1403 = vmatpush1.bf16.msra.mxu1 %v12056_v10  ;;  %v12097_v10 = vcombine.high %v1657_v3, %v1661_v39 }
  0xe9   :  { %12039 = vmatmul.mubr.msk.bf16.gmra.mrb[20].mxu0 %vm385_vm1, %v15700_v18  ;;  %1404 = vmatprep.subr.bf16.mxu1 %v12065_v13  ;;  %v1668_v13 = vld [vmem:[#allocation4 + $0x360] sm:$0xff] }
  0xea   :  { %12043 = vmatmul.mubr.msk.bf16.gmra.mrb[20].mxu1 %vm385_vm1, %v15700_v18  ;;  %1032 = vmatprep.mubr.bf16.mxu0 %v15432_v0  ;;  %v12103_v18 = vcombine.high %v1664_v12, %v1668_v13 }
  0xeb   :  { %1101 = vmatprep.mubr.bf16.mxu1 %v15432_v0  ;;  %1336 = vmatpush1.bf16.msra.mxu0 %v12062_v25  ;;  %v1665_v25 = vld [vmem:[#allocation4 + $0x348] sm:$0xff] }
  0xec   :  { %1337 = vmatprep.subr.bf16.mxu0 %v12071_v17  ;;  %1405 = vmatpush1.bf16.msra.mxu1 %v12064_v30  ;;  %v1672_v17 = vld [vmem:[#allocation4 + $0x380] sm:$0xff] }
  0xed   :  { %1406 = vmatprep.subr.bf16.mxu1 %v12073_v31  ;;  %v1676_v30 = vld [vmem:[#allocation4 + $0x3a0] sm:$0xff]  ;;  %v12096_v31 = vcombine.low %v1657_v3, %v1661_v39  ;;  %v1683_v39 = vld [vmem:[#allocation4 + $0x3d8] sm:$0xff] }
  0xee   :  { %v12110_v35 = vcombine.low %v1672_v17, %v1676_v30 }
  0xef   :  { %1338 = vmatpush1.bf16.msra.mxu0 %v12070_v21  ;;  %v12105_v21 = vcombine.high %v1665_v25, %v1669_v14 }
  0xf0   :  { %1407 = vmatpush1.bf16.msra.mxu1 %v12072_v51  ;;  %1469 = vmatprep.subr.bf16.mxu0 %v12051_v22  ;;  %v12102_v51 = vcombine.low %v1664_v12, %v1668_v13  ;;  %v12111_v22 = vcombine.high %v1672_v17, %v1676_v30  ;;  %v2202_v13 = vld [vmem:[#allocation4 + $0x408] sm:$0xff] }
  0xf1   :  { %12040 = vmatmul.mubr.msk.bf16.gmra.mrb[24].mxu0 %vm385_vm1, %v15711_v26  ;;  %1538 = vmatprep.subr.bf16.mxu1 %v12053_v24  ;;  %v1680_v24 = vld [vmem:[#allocation4 + $0x3c0] sm:$0xff] }
  0xf2   :  { %12044 = vmatmul.mubr.msk.bf16.gmra.mrb[24].mxu1 %vm385_vm1, %v15711_v26  ;;  %1042 = vmatprep.mubr.bf16.mxu0 %v15432_v0  ;;  %v1684_v26 = vld [vmem:[#allocation4 + $0x3e0] sm:$0xff] }
  0xf3   :  { %1111 = vmatprep.mubr.bf16.mxu1 %v15432_v0  ;;  %v12119_v38 = vcombine.high %v1680_v24, %v1684_v26 }
  0xf9   :  { %12041 = vmatmul.mubr.msk.bf16.gmra.mrb[36].mxu0 %vm385_vm1, %v15274_v27 }
  0xfa   :  { %12045 = vmatmul.mubr.msk.bf16.gmra.mrb[36].mxu1 %vm385_vm1, %v15274_v27  ;;  %1363 = vmatprep.mubr.bf16.mxu0 %v15432_v0  ;;  %v12104_v27 = vcombine.low %v1665_v25, %v1669_v14  ;;  %v2206_v25 = vld [vmem:[#allocation4 + $0x428] sm:$0xff] }
  0xfb   :  { %1432 = vmatprep.mubr.bf16.mxu1 %v15432_v0  ;;  %v12145_v30 = vcombine.high %v2202_v13, %v2206_v25 }
 0x101   :  { %12078 = vmatmul.mubr.msk.bf16.vlgmr.msra.gmra.mrb[0].mxu0 %vm385_vm1, %v15731_v40 }
 0x102   :  { %12082 = vmatmul.mubr.msk.bf16.vlgmr.msra.gmra.mrb[0].mxu1 %vm385_vm1, %v15731_v40  ;;  %1470 = vmatpush1.bf16.msra.mxu0 %v12050_v41  ;;  %v1659_v41 = vld [vmem:[#allocation4 + $0x318] sm:$0xff] }
 0x103   :  { %1373 = vmatprep.mubr.bf16.mxu0 %v15432_v0  ;;  %1442 = vmatprep.mubr.bf16.mxu1 %v15432_v0  ;;  %v12101_v48 = vcombine.high %v1659_v41, %v1663_v42 }
 0x104   :  { %1471 = vmatprep.subr.bf16.mxu0 %v12059_v45  ;;  %1539 = vmatpush1.bf16.msra.mxu1 %v12052_v46  ;;  %v12118_v45 = vcombine.low %v1680_v24, %v1684_v26  ;;  %v12120_v46 = vcombine.low %v1681_v29, %v1685_v32  ;;  %v2221_v24 = vld [vmem:[#allocation4 + $0x4a0] sm:$0xff]  ;;  %v2218_v29 = vld [vmem:[#allocation4 + $0x488] sm:$0xff] }
 0x105   :  { %1540 = vmatprep.subr.bf16.mxu1 %v12061_v49  ;;  %v1666_v49 = vld [vmem:[#allocation4 + $0x350] sm:$0xff]  ;;  %v2222_v32 = vld [vmem:[#allocation4 + $0x4a8] sm:$0xff] }
 0x106   :  { %1472 = vmatpush1.bf16.msra.mxu0 %v12058_v52  ;;  %v1667_v52 = vld [vmem:[#allocation4 + $0x358] sm:$0xff] }
 0x107   :  { %1473 = vmatprep.subr.bf16.mxu0 %v12067_v53  ;;  %v1671_v53 = vld [vmem:[#allocation4 + $0x378] sm:$0xff] }
 0x108   :  { %1541 = vmatpush1.bf16.msra.mxu1 %v12060_v58  ;;  %v1697_v58 = vrot.slane %v210_v55, 2  ;;  %v12109_v54 = vcombine.high %v1667_v52, %v1671_v53  ;;  %v1682_v55 = vld [vmem:[#allocation4 + $0x3d0] sm:$0xff]  ;;  %v12108_v3 = vcombine.low %v1667_v52, %v1671_v53 }
 0x109   :  { %12079 = vmatmul.mubr.msk.bf16.gmra.mrb[4].mxu0 %vm385_vm1, %v15741_v61  ;;  %1542 = vmatprep.subr.bf16.mxu1 %v12069_v60  ;;  %v12107_v60 = vcombine.high %v1666_v49, %v1670_v50 }
 0x10a   :  { %12083 = vmatmul.mubr.msk.bf16.gmra.mrb[4].mxu1 %vm385_vm1, %v15741_v61  ;;  %1383 = vmatprep.mubr.bf16.mxu0 %v15432_v0 }
 0x10b   :  { %1452 = vmatprep.mubr.bf16.mxu1 %v15432_v0  ;;  %1474 = vmatpush1.bf16.msra.mxu0 %v12066_v62  ;;  %v1675_v62 = vld [vmem:[#allocation4 + $0x398] sm:$0xff] }
 0x10c   :  { %1475 = vmatprep.subr.bf16.mxu0 %v12075_v1  ;;  %1543 = vmatpush1.bf16.msra.mxu1 %v12068_v2  ;;  %v1698_v1 = vor.u32 %v1697_v58, %v1696_v57  ;;  %v12106_v2 = vcombine.low %v1666_v49, %v1670_v50  ;;  %v12116_v12 = vcombine.low %v1675_v62, %v1679_v63  ;;  %v15837_v49 = vld [vmem:[#allocation4 + $0x418] sm:$0xff] }
 0x10d   :  { %1544 = vmatprep.subr.bf16.mxu1 %v12077_v4  ;;  %v1687_v4 = vld [vmem:[#allocation4 + $0x3f8] sm:$0xff] }
 0x10e   :  { %v12125_v14 = vcombine.high %v1683_v39, %v1687_v4  ;;  %v15839_v50 = vld [vmem:[#allocation4 + $0x438] sm:$0xff] }
 0x10f   :  { %1476 = vmatpush1.bf16.msra.mxu0 %v12074_v7  ;;  %v15803_v7 = vsel %vm1688_vm2, %v15661_v34, %v1698_v1  ;;  %v12122_v34 = vcombine.low %v1682_v55, %v1686_v15 }
 0x110   :  { %1545 = vmatpush1.bf16.msra.mxu1 %v12076_v8  ;;  %1876 = vmatprep.subr.bf16.mxu0 %v12095_v9  ;;  %v12114_v8 = vcombine.low %v1674_v28, %v1678_v59  ;;  %v2201_v9 = vld [vmem:[#allocation4 + $0x400] sm:$0xff]  ;;  %v12149_v59 = vcombine.high %v15837_v49, %v15839_v50 }
 0x111   :  { %12080 = vmatmul.mubr.msk.bf16.gmra.mrb[8].mxu0 %vm385_vm1, %v15753_v11  ;;  %1945 = vmatprep.subr.bf16.mxu1 %v12097_v10  ;;  %v2205_v10 = vld [vmem:[#allocation4 + $0x420] sm:$0xff] }
 0x112   :  { %12084 = vmatmul.mubr.msk.bf16.gmra.mrb[8].mxu1 %vm385_vm1, %v15753_v11  ;;  %1393 = vmatprep.mubr.bf16.mxu0 %v15432_v0  ;;  %v12143_v17 = vcombine.high %v2201_v9, %v2205_v10 }
 0x113   :  { %1462 = vmatprep.mubr.bf16.mxu1 %v15432_v0 }
 0x119   :  { %12081 = vmatmul.mubr.msk.bf16.gmra.mrb[40].mxu0 %vm385_vm1, %v15748_v5 }
 0x11a   :  { %12085 = vmatmul.mubr.msk.bf16.gmra.mrb[40].mxu1 %vm385_vm1, %v15748_v5  ;;  %1501 = vmatprep.mubr.bf16.mxu0 %v15432_v0 }
 0x11b   :  { %1570 = vmatprep.mubr.bf16.mxu1 %v15432_v0 }
 0x121   :  { %12086 = vmatmul.mubr.msk.bf16.vlgmr.msra.gmra.mrb[16].mxu0 %vm385_vm1, %v15731_v40 }
 0x122   :  { %12090 = vmatmul.mubr.msk.bf16.vlgmr.msra.gmra.mrb[16].mxu1 %vm385_vm1, %v15731_v40  ;;  %1877 = vmatpush1.bf16.msra.mxu0 %v12094_v16  ;;  %v12112_v40 = vcombine.low %v1673_v19, %v1677_v20  ;;  %v12124_v16 = vcombine.low %v1683_v39, %v1687_v4  ;;  %v2213_v19 = vld [vmem:[#allocation4 + $0x460] sm:$0xff]  ;;  %v2210_v20 = vld [vmem:[#allocation4 + $0x448] sm:$0xff]  ;;  %v2215_v39 = vld [vmem:[#allocation4 + $0x470] sm:$0xff] }
 0x123   :  { %1511 = vmatprep.mubr.bf16.mxu0 %v15432_v0  ;;  %1580 = vmatprep.mubr.bf16.mxu1 %v15432_v0  ;;  %v2212_v4 = vld [vmem:[#allocation4 + $0x458] sm:$0xff] }
 0x124   :  { %1878 = vmatprep.subr.bf16.mxu0 %v12103_v18  ;;  %1946 = vmatpush1.bf16.msra.mxu1 %v12096_v31  ;;  %v15813_v18 = vsel %vm1688_vm2, %v1698_v1, %v15594_v6  ;;  %v2209_v31 = vld [vmem:[#allocation4 + $0x440] sm:$0xff] }
 0x125   :  { %1947 = vmatprep.subr.bf16.mxu1 %v12105_v21  ;;  %v2214_v21 = vld [vmem:[#allocation4 + $0x468] sm:$0xff]  ;;  %v12151_v26 = vcombine.high %v2209_v31, %v2213_v19 }
 0x126   :  { %1879 = vmatpush1.bf16.msra.mxu0 %v12102_v51  ;;  %v12142_v51 = vcombine.low %v2201_v9, %v2205_v10  ;;  %v2223_v9 = vld [vmem:[#allocation4 + $0x4b0] sm:$0xff]  ;;  %v12148_v10 = vcombine.low %v15837_v49, %v15839_v50 }
 0x127   :  { %1880 = vmatprep.subr.bf16.mxu0 %v12111_v22  ;;  %v2217_v22 = vld [vmem:[#allocation4 + $0x480] sm:$0xff] }
 0x128   :  { %1948 = vmatpush1.bf16.msra.mxu1 %v12104_v27  ;;  %v12144_v27 = vcombine.low %v2202_v13, %v2206_v25  ;;  %v12159_v36 = vcombine.high %v2217_v22, %v2221_v24  ;;  %v2224_v13 = vld [vmem:[#allocation4 + $0x4b8] sm:$0xff] }
 0x129   :  { %12087 = vmatmul.mubr.msk.bf16.gmra.mrb[20].mxu0 %vm385_vm1, %v15741_v61  ;;  %1949 = vmatprep.subr.bf16.mxu1 %v12113_v33  ;;  %v12153_v33 = vcombine.high %v2210_v20, %v2214_v21 }
 0x12a   :  { %12091 = vmatmul.mubr.msk.bf16.gmra.mrb[20].mxu1 %vm385_vm1, %v15741_v61  ;;  %1521 = vmatprep.mubr.bf16.mxu0 %v15432_v0  ;;  %v12100_v61 = vcombine.low %v1659_v41, %v1663_v42  ;;  %v2226_v41 = vld [vmem:[#allocation4 + $0x4c8] sm:$0xff] }
 0x12b   :  { %1590 = vmatprep.mubr.bf16.mxu1 %v15432_v0  ;;  %1881 = vmatpush1.bf16.msra.mxu0 %v12110_v35  ;;  %v12150_v35 = vcombine.low %v2209_v31, %v2213_v19  ;;  %v2230_v42 = vld [vmem:[#allocation4 + $0x4e8] sm:$0xff]  ;;  %v2228_v19 = vld [vmem:[#allocation4 + $0x4d8] sm:$0xff] }
 0x12c   :  { %1882 = vmatprep.subr.bf16.mxu0 %v12119_v38  ;;  %1950 = vmatpush1.bf16.msra.mxu1 %v12112_v40  ;;  %v2229_v38 = vld [vmem:[#allocation4 + $0x4e0] sm:$0xff]  ;;  %v12152_v40 = vcombine.low %v2210_v20, %v2214_v21  ;;  %v12169_v52 = vcombine.high %v2226_v41, %v2230_v42  ;;  %v12168_v57 = vcombine.low %v2226_v41, %v2230_v42  ;;  %v2232_v20 = vld [vmem:[#allocation4 + $0x4f8] sm:$0xff] }
 0x12d   :  { %1951 = vmatprep.subr.bf16.mxu1 %v12121_v44  ;;  %v12161_v44 = vcombine.high %v2218_v29, %v2222_v32  ;;  %v12166_v53 = vcombine.low %v2225_v37, %v2229_v38 }
 0x12f   :  { %1883 = vmatpush1.bf16.msra.mxu0 %v12118_v45  ;;  %v12158_v45 = vcombine.low %v2217_v22, %v2221_v24 }
 0x130   :  { %1952 = vmatpush1.bf16.msra.mxu1 %v12120_v46  ;;  %2014 = vmatprep.subr.bf16.mxu0 %v12099_v47  ;;  %v15835_v46 = vld [vmem:[#allocation4 + $0x430] sm:$0xff]  ;;  %v12167_v47 = vcombine.high %v2225_v37, %v2229_v38 }
 0x131   :  { %12088 = vmatmul.mubr.msk.bf16.gmra.mrb[24].mxu0 %vm385_vm1, %v15753_v11  ;;  %2083 = vmatprep.subr.bf16.mxu1 %v12101_v48  ;;  %v12160_v48 = vcombine.low %v2218_v29, %v2222_v32  ;;  %v15279_v29 = vld [vmem:[%s16880_s0 + $0x18] ss:$0 sps:$4 sm:$0xff]  }
 0x132   :  { %12092 = vmatmul.mubr.msk.bf16.gmra.mrb[24].mxu1 %vm385_vm1, %v15753_v11  ;;  %1531 = vmatprep.mubr.bf16.mxu0 %v15432_v0  ;;  %v12123_v11 = vcombine.high %v1682_v55, %v1686_v15  ;;  %v15277_v55 = vld [vmem:[%s16880_s0 + $0x8] sm:$0xff]   ;;  %v2239_v32 = vrot.slane %v15279_v29, 2 }
 0x133   :  { %1600 = vmatprep.mubr.bf16.mxu1 %v15432_v0  ;;  %v2235_v15 = vrot.slane %v15277_v55, 2  ;;  %v13736_v29 = vld [vmem:[#allocation8 + $0x980] ss:$16 sps:$4 sm:$0xff]  }
 0x139   :  { %12089 = vmatmul.mubr.msk.bf16.gmra.mrb[44].mxu0 %vm385_vm1, %v15748_v5 }
 0x13a   :  { %12093 = vmatmul.mubr.msk.bf16.gmra.mrb[44].mxu1 %vm385_vm1, %v15748_v5  ;;  %1908 = vmatprep.mubr.bf16.mxu0 %v15432_v0  ;;  %v12117_v5 = vcombine.high %v1675_v62, %v1679_v63 }
 0x13b   :  { %1977 = vmatprep.mubr.bf16.mxu1 %v15432_v0 }
 0x141   :  { %12126 = vmatmul.mubr.msk.bf16.vlgmr.msra.gmra.mrb[0].mxu0 %vm385_vm1, %v15665_v23 }
 0x142   :  { %12130 = vmatmul.mubr.msk.bf16.vlgmr.msra.gmra.mrb[0].mxu1 %vm385_vm1, %v15665_v23  ;;  %2015 = vmatpush1.bf16.msra.mxu0 %v12098_v56 }
 0x143   :  { %1918 = vmatprep.mubr.bf16.mxu0 %v15432_v0  ;;  %1987 = vmatprep.mubr.bf16.mxu1 %v15432_v0 }
 0x144   :  { %2016 = vmatprep.subr.bf16.mxu0 %v12107_v60  ;;  %2084 = vmatpush1.bf16.msra.mxu1 %v12100_v61 }
 0x145   :  { %2085 = vmatprep.subr.bf16.mxu1 %v12109_v54 }
 0x146   :  { %2017 = vmatpush1.bf16.msra.mxu0 %v12106_v2  ;;  %v15276_v2 = vld [vmem:[%s16880_s0] sm:$0xff]  }
 0x147   :  { %2018 = vmatprep.subr.bf16.mxu0 %v12115_v43  ;;  %v2234_v43 = vrot.slane %v15276_v2, 2  ;;  %v13705_v2 = vld [vmem:[#allocation8 + $0x8a4] ss:$16 sps:$4 sm:$0xff]  }
 0x148   :  { %2086 = vmatpush1.bf16.msra.mxu1 %v12108_v3  ;;  %v2211_v3 = vld [vmem:[#allocation4 + $0x450] sm:$0xff] }
 0x149   :  { %12127 = vmatmul.mubr.msk.bf16.gmra.mrb[4].mxu0 %vm385_vm1, %v15803_v7  ;;  %2087 = vmatprep.subr.bf16.mxu1 %v12117_v5  ;;  %v2216_v5 = vld [vmem:[#allocation4 + $0x478] sm:$0xff] }
 0x14a   :  { %12131 = vmatmul.mubr.msk.bf16.gmra.mrb[4].mxu1 %vm385_vm1, %v15803_v7  ;;  %1928 = vmatprep.mubr.bf16.mxu0 %v15432_v0  ;;  %v12157_v25 = vcombine.high %v2212_v4, %v2216_v5 }
 0x14b   :  { %1997 = vmatprep.mubr.bf16.mxu1 %v15432_v0  ;;  %2019 = vmatpush1.bf16.msra.mxu0 %v12114_v8  ;;  %v2219_v8 = vld [vmem:[#allocation4 + $0x490] sm:$0xff] }
 0x14c   :  { %2020 = vmatprep.subr.bf16.mxu0 %v12123_v11  ;;  %2088 = vmatpush1.bf16.msra.mxu1 %v12116_v12  ;;  %v12155_v11 = vcombine.high %v2211_v3, %v2215_v39  ;;  %v2220_v12 = vld [vmem:[#allocation4 + $0x498] sm:$0xff]  ;;  %v12163_v31 = vcombine.high %v2219_v8, %v2223_v9  ;;  %v12162_v22 = vcombine.low %v2219_v8, %v2223_v9 }
 0x14d   :  { %2089 = vmatprep.subr.bf16.mxu1 %v12125_v14  ;;  %v15278_v14 = vld [vmem:[%s16880_s0 + $0x10] sm:$0xff]   ;;  %v12165_v21 = vcombine.high %v2220_v12, %v2224_v13  ;;  %v12164_v24 = vcombine.low %v2220_v12, %v2224_v13  ;;  %v13711_v9 = vld [vmem:[#allocation8 + $0x8e4] ss:$16 sps:$4 sm:$0xff]   ;;  %v13712_v13 = vld [vmem:[#allocation8 + $0x900] ss:$16 sps:$4 sm:$0xff]  }
 0x14e   :  { %v13717_v12 = vld [vmem:[#allocation8 + $0xe04] ss:$16 sps:$4 sm:$0xff]  }
 0x14f   :  { %2021 = vmatpush1.bf16.msra.mxu0 %v12122_v34  ;;  %v2237_v34 = vrot.slane %v15278_v14, 2  ;;  %v13720_v14 = vld [vmem:[#allocation8 + $0x924] ss:$16 sps:$4 sm:$0xff]  }
 0x150   :  { %2090 = vmatpush1.bf16.msra.mxu1 %v12124_v16  ;;  %2413 = vmatprep.subr.bf16.mxu0 %v12143_v17  ;;  %v12154_v16 = vcombine.low %v2211_v3, %v2215_v39  ;;  %v2227_v17 = vld [vmem:[#allocation4 + $0x4d0] sm:$0xff]  ;;  %v13708_v3 = vld [vmem:[#allocation8 + $0x8c4] ss:$16 sps:$4 sm:$0xff]  }
 0x151   :  { %12128 = vmatmul.mubr.msk.bf16.gmra.mrb[8].mxu0 %vm385_vm1, %v15813_v18  ;;  %2482 = vmatprep.subr.bf16.mxu1 %v12145_v30  ;;  %v2231_v30 = vld [vmem:[#allocation4 + $0x4f0] sm:$0xff]  ;;  %v2240_v41 = vsel %vm2233_vm4, %v2237_v34, %v2239_v32 }
 0x152   :  { %12132 = vmatmul.mubr.msk.bf16.gmra.mrb[8].mxu1 %vm385_vm1, %v15813_v18  ;;  %1938 = vmatprep.mubr.bf16.mxu0 %v15432_v0 }
 0x153   :  { %2007 = vmatprep.mubr.bf16.mxu1 %v15432_v0 }
 0x159   :  { %12129 = vmatmul.mubr.msk.bf16.gmra.mrb[48].mxu0 %vm385_vm1, %v15594_v6 }
 0x15a   :  { %12133 = vmatmul.mubr.msk.bf16.gmra.mrb[48].mxu1 %vm385_vm1, %v15594_v6  ;;  %2046 = vmatprep.mubr.bf16.mxu0 %v15432_v0 }
 0x15b   :  { %2115 = vmatprep.mubr.bf16.mxu1 %v15432_v0 }
 0x161   :  { %12134 = vmatmul.mubr.msk.bf16.vlgmr.msra.gmra.mrb[16].mxu0 %vm385_vm1, %v15665_v23 }
 0x162   :  { %12138 = vmatmul.mubr.msk.bf16.vlgmr.msra.gmra.mrb[16].mxu1 %vm385_vm1, %v15665_v23  ;;  %2414 = vmatpush1.bf16.msra.mxu0 %v12142_v51  ;;  %v15833_v23 = vld [vmem:[#allocation4 + $0x410] sm:$0xff]  ;;  %v2238_v51 = vsel %vm2233_vm4, %v2235_v15, %v2237_v34  ;;  %v13723_v34 = vld [vmem:[#allocation8 + $0xe24] ss:$16 sps:$4 sm:$0xff]  }
 0x163   :  { %2056 = vmatprep.mubr.bf16.mxu0 %v15432_v0  ;;  %2125 = vmatprep.mubr.bf16.mxu1 %v15432_v0  ;;  %v12147_v58 = vcombine.high %v15833_v23, %v15835_v46 }
 0x164   :  { %2415 = vmatprep.subr.bf16.mxu0 %v12151_v26  ;;  %2483 = vmatpush1.bf16.msra.mxu1 %v12144_v27  ;;  %v12171_v26 = vcombine.high %v2227_v17, %v2231_v30  ;;  %v12173_v27 = vcombine.high %v2228_v19, %v2232_v20 }
 0x165   :  { %2484 = vmatprep.subr.bf16.mxu1 %v12153_v33  ;;  %v12170_v33 = vcombine.low %v2227_v17, %v2231_v30  ;;  %v13721_v17 = vld [vmem:[#allocation8 + $0xe20] ss:$16 sps:$4 sm:$0xff]   ;;  %v13726_v30 = vld [vmem:[#allocation8 + $0x944] ss:$16 sps:$4 sm:$0xff]  }
 0x166   :  { %2416 = vmatpush1.bf16.msra.mxu0 %v12150_v35 }
 0x167   :  { %2417 = vmatprep.subr.bf16.mxu0 %v12159_v36  ;;  %v12172_v36 = vcombine.low %v2228_v19, %v2232_v20  ;;  %v13727_v19 = vld [vmem:[#allocation8 + $0xe40] ss:$16 sps:$4 sm:$0xff]   ;;  %v13732_v20 = vld [vmem:[#allocation8 + $0x964] ss:$16 sps:$4 sm:$0xff]  }
 0x168   :  { %2485 = vmatpush1.bf16.msra.mxu1 %v12152_v40 }
 0x169   :  { %12135 = vmatmul.mubr.msk.bf16.gmra.mrb[20].mxu0 %vm385_vm1, %v15803_v7  ;;  %2486 = vmatprep.subr.bf16.mxu1 %v12161_v44 }
 0x16a   :  { %12139 = vmatmul.mubr.msk.bf16.gmra.mrb[20].mxu1 %vm385_vm1, %v15803_v7  ;;  %2066 = vmatprep.mubr.bf16.mxu0 %v15432_v0  ;;  %v12146_v7 = vcombine.low %v15833_v23, %v15835_v46 }
 0x16b   :  { %2135 = vmatprep.mubr.bf16.mxu1 %v15432_v0  ;;  %2418 = vmatpush1.bf16.msra.mxu0 %v12158_v45 }
 0x16c   :  { %v462_v56 = vpop.f32.mrb[12].mxu0  ;;  %2419 = vmatprep.subr.bf16.mxu0 %v12167_v47  ;;  %2487 = vmatpush1.bf16.msra.mxu1 %v12160_v48 }
 0x16d   :  { %v463_v28 = vpop.f32.mrb[13].mxu0  ;;  %2488 = vmatprep.subr.bf16.mxu1 %v12169_v52  ;;  %v531_v60 = vpop.f32.mrb[12].mxu1  ;;  %v13688_v56 = vld [vmem:[#allocation8 + $0x800] ss:$16 sps:$4 sm:$0xff]  }
 0x16e   :  { %v464_v61 = vpop.f32.mrb[14].mxu0  ;;  %v532_v62 = vpop.f32.mrb[13].mxu1  ;;  %v13693_v28 = vld [vmem:[#allocation8 + $0x824] ss:$16 sps:$4 sm:$0xff]  }
 0x16f   :  { %v465_v63 = vpop.f32.mrb[15].mxu0  ;;  %2420 = vmatpush1.bf16.msra.mxu0 %v12166_v53  ;;  %v533_v54 = vpop.f32.mrb[14].mxu1  ;;  %v13696_v60 = vld [vmem:[#allocation8 + $0x844] ss:$16 sps:$4 sm:$0xff]   ;;  %v13694_v61 = vld [vmem:[#allocation8 + $0x840] ss:$16 sps:$4 sm:$0xff]  }
 0x170   :  { %2489 = vmatpush1.bf16.msra.mxu1 %v12168_v57  ;;  %2551 = vmatprep.subr.bf16.mxu0 %v12147_v58  ;;  %v534_v1 = vpop.f32.mrb[15].mxu1  ;;  %v13690_v57 = vld [vmem:[#allocation8 + $0x804] ss:$16 sps:$4 sm:$0xff]   ;;  %v13697_v63 = vld [vmem:[#allocation8 + $0x860] ss:$16 sps:$4 sm:$0xff]  }
 0x171   :  { %12136 = vmatmul.mubr.msk.bf16.gmra.mrb[24].mxu0 %vm385_vm1, %v15813_v18  ;;  %2620 = vmatprep.subr.bf16.mxu1 %v12149_v59  ;;  %v13691_v59 = vld [vmem:[#allocation8 + $0x820] ss:$16 sps:$4 sm:$0xff]   ;;  %v13699_v62 = vld [vmem:[#allocation8 + $0x864] ss:$16 sps:$4 sm:$0xff]  }
 0x172   :  { %12140 = vmatmul.mubr.msk.bf16.gmra.mrb[24].mxu1 %vm385_vm1, %v15813_v18  ;;  %2076 = vmatprep.mubr.bf16.mxu0 %v15432_v0  ;;  %v12156_v18 = vcombine.low %v2212_v4, %v2216_v5  ;;  %v13702_v54 = vld [vmem:[#allocation8 + $0x884] ss:$16 sps:$4 sm:$0xff]   ;;  %v13700_v1 = vld [vmem:[#allocation8 + $0x880] ss:$16 sps:$4 sm:$0xff]  }
 0x173   :  { %2145 = vmatprep.mubr.bf16.mxu1 %v15432_v0  ;;  %v13706_v5 = vld [vmem:[#allocation8 + $0x8c0] ss:$16 sps:$4 sm:$0xff]  }
 0x179   :  { %12137 = vmatmul.mubr.msk.bf16.gmra.mrb[52].mxu0 %vm385_vm1, %v15594_v6 }
 0x17a   :  { %12141 = vmatmul.mubr.msk.bf16.gmra.mrb[52].mxu1 %vm385_vm1, %v15594_v6  ;;  %2445 = vmatprep.mubr.bf16.mxu0 %v15432_v0  ;;  %v15870_v6 = vsel %vm2233_vm4, %v2234_v43, %v2235_v15  ;;  %v13703_v43 = vld [vmem:[#allocation8 + $0x8a0] ss:$16 sps:$4 sm:$0xff]  }
 0x17b   :  { %2514 = vmatprep.mubr.bf16.mxu1 %v15432_v0 }
 0x181   :  { %12174 = vmatmul.mubr.msk.bf16.vlgmr.msra.gmra.mrb[0].mxu0 %vm385_vm1, %v15870_v6 }
 0x182   :  { %12178 = vmatmul.mubr.msk.bf16.vlgmr.msra.gmra.mrb[0].mxu1 %vm385_vm1, %v15870_v6  ;;  %2455 = vmatprep.mubr.bf16.mxu0 %v15432_v0 }
 0x183   :  { %2524 = vmatprep.mubr.bf16.mxu1 %v15432_v0  ;;  %2552 = vmatpush1.bf16.msra.mxu0 %v12146_v7 }
 0x184   :  { %2621 = vmatpush1.bf16.msra.mxu1 %v12148_v10  ;;  %2553 = vmatprep.subr.bf16.mxu0 %v12155_v11  ;;  %v13709_v10 = vld [vmem:[#allocation8 + $0x8e0] ss:$16 sps:$4 sm:$0xff]   ;;  %v13714_v11 = vld [vmem:[#allocation8 + $0x904] ss:$16 sps:$4 sm:$0xff]  }
 0x185   :  { %2622 = vmatprep.subr.bf16.mxu1 %v12157_v25  ;;  %v13715_v25 = vld [vmem:[#allocation8 + $0xe00] ss:$16 sps:$4 sm:$0xff]  }
 0x187   :  { %2554 = vmatpush1.bf16.msra.mxu0 %v12154_v16  ;;  %v13718_v16 = vld [vmem:[#allocation8 + $0x920] ss:$16 sps:$4 sm:$0xff]  }
 0x188   :  { %2623 = vmatpush1.bf16.msra.mxu1 %v12156_v18  ;;  %2555 = vmatprep.subr.bf16.mxu0 %v12163_v31  ;;  %v13729_v18 = vld [vmem:[#allocation8 + $0xe44] ss:$16 sps:$4 sm:$0xff]   ;;  %v13724_v31 = vld [vmem:[#allocation8 + $0x940] ss:$16 sps:$4 sm:$0xff]  }
 0x189   :  { %12175 = vmatmul.mubr.msk.bf16.gmra.mrb[4].mxu0 %vm385_vm1, %v2238_v51  ;;  %2624 = vmatprep.subr.bf16.mxu1 %v12165_v21  ;;  %v13735_v21 = vld [vmem:[#allocation8 + $0xe64] ss:$16 sps:$4 sm:$0xff]  }
 0x18a   :  { %12179 = vmatmul.mubr.msk.bf16.gmra.mrb[4].mxu1 %vm385_vm1, %v2238_v51  ;;  %2465 = vmatprep.mubr.bf16.mxu0 %v15432_v0 }
 0x18b   :  { %2534 = vmatprep.mubr.bf16.mxu1 %v15432_v0  ;;  %2556 = vmatpush1.bf16.msra.mxu0 %v12162_v22  ;;  %v13730_v22 = vld [vmem:[#allocation8 + $0x960] ss:$16 sps:$4 sm:$0xff]  }
 0x18c   :  { %v600_v35 = vpop.f32.mrb[28].mxu0  ;;  %2625 = vmatpush1.bf16.msra.mxu1 %v12164_v24  ;;  %2557 = vmatprep.subr.bf16.mxu0 %v12171_v26  ;;  %v13733_v24 = vld [vmem:[#allocation8 + $0xe60] ss:$16 sps:$4 sm:$0xff]   ;;  %v13738_v26 = vld [vmem:[#allocation8 + $0x984] ss:$16 sps:$4 sm:$0xff]  }
 0x18d   :  { %v601_v37 = vpop.f32.mrb[29].mxu0  ;;  %2626 = vmatprep.subr.bf16.mxu1 %v12173_v27  ;;  %v669_v38 = vpop.f32.mrb[28].mxu1  ;;  %v13741_v27 = vld [vmem:[#allocation8 + $0xe84] ss:$16 sps:$4 sm:$0xff]  }
 0x18e   :  { %v602_v40 = vpop.f32.mrb[30].mxu0  ;;  %v670_v42 = vpop.f32.mrb[29].mxu1  ;;  %v13747_v35 = vld [vmem:[#allocation8 + $0xea4] ss:$16 sps:$4 sm:$0xff]   ;;  %v13742_v37 = vld [vmem:[#allocation8 + $0x9a0] ss:$16 sps:$4 sm:$0xff]  }
 0x18f   :  { %v603_v44 = vpop.f32.mrb[31].mxu0  ;;  %2558 = vmatpush1.bf16.msra.mxu0 %v12170_v33  ;;  %v671_v45 = vpop.f32.mrb[30].mxu1  ;;  %v13744_v33 = vld [vmem:[#allocation8 + $0x9a4] ss:$16 sps:$4 sm:$0xff]   ;;  %v13745_v38 = vld [vmem:[#allocation8 + $0xea0] ss:$16 sps:$4 sm:$0xff]  }
 0x190   :  { %2627 = vmatpush1.bf16.msra.mxu1 %v12172_v36  ;;  %v672_v23 = vpop.f32.mrb[31].mxu1  ;;  %5448 = vmatprep.subr.bf16.mxu0 %v13717_v12  ;;  %v13807_v12 = vld [vmem:[#allocation8 + $0xfe4] ss:$16 sps:$4 sm:$0xff]  }
 0x191   :  { %12176 = vmatmul.mubr.msk.bf16.gmra.mrb[8].mxu0 %vm385_vm1, %v2240_v41  ;;  %5241 = vmatprep.subr.bf16.mxu1 %v13690_v57  ;;  %v13757_v57 = vld [vmem:[#allocation8 + $0xee0] ss:$16 sps:$4 sm:$0xff]  }
 0x192   :  { %12180 = vmatmul.mubr.msk.bf16.gmra.mrb[8].mxu1 %vm385_vm1, %v2240_v41  ;;  %2475 = vmatprep.mubr.bf16.mxu0 %v15432_v0 }
 0x193   :  { %2544 = vmatprep.mubr.bf16.mxu1 %v15432_v0 }
 0x199   :  { %12177 = vmatmul.mubr.msk.bf16.gmra.mrb[56].mxu0 %vm385_vm1, %v2239_v32 }
 0x19a   :  { %12181 = vmatmul.mubr.msk.bf16.gmra.mrb[56].mxu1 %vm385_vm1, %v2239_v32  ;;  %2583 = vmatprep.mubr.bf16.mxu0 %v15432_v0 }
 0x19b   :  { %2652 = vmatprep.mubr.bf16.mxu1 %v15432_v0 }
 0x1a1   :  { %12182 = vmatmul.mubr.msk.bf16.vlgmr.msra.gmra.mrb[16].mxu0 %vm385_vm1, %v15870_v6 }
 0x1a2   :  { %12186 = vmatmul.mubr.msk.bf16.vlgmr.msra.gmra.mrb[16].mxu1 %vm385_vm1, %v15870_v6  ;;  %2593 = vmatprep.mubr.bf16.mxu0 %v15432_v0 }
 0x1a3   :  { %2662 = vmatprep.mubr.bf16.mxu1 %v15432_v0  ;;  %5242 = vmatpush1.bf16.msra.mxu1 %v13688_v56  ;;  %v13754_v56 = vld [vmem:[#allocation8 + $0x9e0] ss:$16 sps:$4 sm:$0xff]  }
 0x1a4   :  { %5243 = vmatprep.subr.bf16.mxu1 %v13693_v28  ;;  %5449 = vmatpush1.bf16.msra.mxu0 %v13715_v25  ;;  %v13765_v28 = vld [vmem:[#allocation8 + $0xf04] ss:$16 sps:$4 sm:$0xff]  }
 0x1a5   :  { %5450 = vmatprep.subr.bf16.mxu0 %v13723_v34 }
 0x1a7   :  { %5244 = vmatpush1.bf16.msra.mxu1 %v13691_v59  ;;  %v13763_v59 = vld [vmem:[#allocation8 + $0xf00] ss:$16 sps:$4 sm:$0xff]  }
 0x1a8   :  { %5245 = vmatprep.subr.bf16.mxu1 %v13696_v60  ;;  %5451 = vmatpush1.bf16.msra.mxu0 %v13721_v17  ;;  %v13771_v60 = vld [vmem:[#allocation8 + $0xf24] ss:$16 sps:$4 sm:$0xff]  }
 0x1a9   :  { %12183 = vmatmul.mubr.msk.bf16.gmra.mrb[20].mxu0 %vm385_vm1, %v2238_v51  ;;  %5452 = vmatprep.subr.bf16.mxu0 %v13729_v18 }
 0x1aa   :  { %12187 = vmatmul.mubr.msk.bf16.gmra.mrb[20].mxu1 %vm385_vm1, %v2238_v51  ;;  %2603 = vmatprep.mubr.bf16.mxu0 %v15432_v0  ;;  %v16890_v51 = vmov 0.0  }
 0x1ab   :  { %2672 = vmatprep.mubr.bf16.mxu1 %v15432_v0  ;;  %5246 = vmatpush1.bf16.msra.mxu1 %v13694_v61  ;;  %2876 = vst [vmem:[#allocation2 + $0x7] ss:$8 sm:$0xf] %v16890_v51  ;;  %2879 = vst [vmem:[#allocation2 + $0xc0] ss:$8 sm:$0xf] %v16890_v51 }
 0x1ac   :  { %v906_v46 = vpop.f32.mrb[32].mxu0  ;;  %5247 = vmatprep.subr.bf16.mxu1 %v13699_v62  ;;  %5453 = vmatpush1.bf16.msra.mxu0 %v13727_v19  ;;  %2979 = vst [vmem:[#allocation2 + $0xc7] ss:$8 sm:$0xf] %v16890_v51  ;;  %v13769_v61 = vld [vmem:[#allocation8 + $0xf20] ss:$16 sps:$4 sm:$0xff]   ;;  %v16892_v19 = vlaneseq }
 0x1ad   :  { %v907_v47 = vpop.f32.mrb[33].mxu0  ;;  %v975_v48 = vpop.f32.mrb[32].mxu1  ;;  %2877 = vst [vmem:[#allocation2 + $0x7] ss:$8 sm:$0xf0] %v16890_v51  ;;  %5454 = vmatprep.subr.bf16.mxu0 %v13735_v21 }
 0x1ae   :  { %v908_v49 = vpop.f32.mrb[34].mxu0  ;;  %v976_v50 = vpop.f32.mrb[33].mxu1  ;;  %2880 = vst [vmem:[#allocation2 + $0xc0] ss:$8 sm:$0xf0] %v16890_v51 }
 0x1af   :  { %v909_v52 = vpop.f32.mrb[35].mxu0  ;;  %v977_v53 = vpop.f32.mrb[34].mxu1  ;;  %5248 = vmatpush1.bf16.msra.mxu1 %v13697_v63  ;;  %2980 = vst [vmem:[#allocation2 + $0xc7] ss:$8 sm:$0xf0] %v16890_v51 }
 0x1b0   :  { %v978_v58 = vpop.f32.mrb[35].mxu1  ;;  %5249 = vmatprep.subr.bf16.mxu1 %v13702_v54  ;;  %2982 = vst [vmem:[#allocation2 + $0x180] ss:$8 sm:$0xf] %v16890_v51  ;;  %5455 = vmatpush1.bf16.msra.mxu0 %v13733_v24  ;;  %v13750_v46 = vld [vmem:[#allocation8 + $0x9c4] ss:$16 sps:$4 sm:$0xff]  }
 0x1b1   :  { %12184 = vmatmul.mubr.msk.bf16.gmra.mrb[24].mxu0 %vm385_vm1, %v2240_v41  ;;  %2983 = vst [vmem:[#allocation2 + $0x180] ss:$8 sm:$0xf0] %v16890_v51  ;;  %5456 = vmatprep.subr.bf16.mxu0 %v13741_v27  ;;  %v13753_v47 = vld [vmem:[#allocation8 + $0xec4] ss:$16 sps:$4 sm:$0xff]  }
 0x1b2   :  { %12188 = vmatmul.mubr.msk.bf16.gmra.mrb[24].mxu1 %vm385_vm1, %v2240_v41  ;;  %2613 = vmatprep.mubr.bf16.mxu0 %v15432_v0  ;;  %v13748_v49 = vld [vmem:[#allocation8 + $0x9c0] ss:$16 sps:$4 sm:$0xff]   ;;  %v13756_v52 = vld [vmem:[#allocation8 + $0x9e4] ss:$16 sps:$4 sm:$0xff]  }
 0x1b3   :  { %2682 = vmatprep.mubr.bf16.mxu1 %v15432_v0  ;;  %5250 = vmatpush1.bf16.msra.mxu1 %v13700_v1  ;;  %v13751_v50 = vld [vmem:[#allocation8 + $0xec0] ss:$16 sps:$4 sm:$0xff]   ;;  %v13759_v53 = vld [vmem:[#allocation8 + $0xee4] ss:$16 sps:$4 sm:$0xff]  }
 0x1b4   :  { %5251 = vmatprep.subr.bf16.mxu1 %v13705_v2  ;;  %v13762_v58 = vld [vmem:[#allocation8 + $0xa04] ss:$16 sps:$4 sm:$0xff]   ;;  %v13775_v63 = vld [vmem:[#allocation8 + $0xf40] ss:$16 sps:$4 sm:$0xff]  }
 0x1b5   :  { %v13777_v62 = vld [vmem:[#allocation8 + $0xf44] ss:$16 sps:$4 sm:$0xff]   ;;  %v13781_v1 = vld [vmem:[#allocation8 + $0xf60] ss:$16 sps:$4 sm:$0xff]  }
 0x1b6   :  { %v13783_v54 = vld [vmem:[#allocation8 + $0xf64] ss:$16 sps:$4 sm:$0xff]   ;;  %v13856_v51 = vld [vmem:[#allocation8 + $0xc00] ss:$16 sps:$4 sm:$0xff]  }
 0x1b7   :  { %5252 = vmatpush1.bf16.msra.mxu1 %v13703_v43  ;;  %v13789_v43 = vld [vmem:[#allocation8 + $0xf84] ss:$16 sps:$4 sm:$0xff]  }
 0x1b8   :  { %5253 = vmatprep.subr.bf16.mxu1 %v13708_v3 }
 0x1b9   :  { %12185 = vmatmul.mubr.msk.bf16.gmra.mrb[60].mxu0 %vm385_vm1, %v2239_v32 }
 0x1ba   :  { %12189 = vmatmul.mubr.msk.bf16.gmra.mrb[60].mxu1 %vm385_vm1, %v2239_v32  ;;  %v13739_v32 = vld [vmem:[#allocation8 + $0xe80] ss:$16 sps:$4 sm:$0xff]  }
 0x1bb   :  { %5254 = vmatpush1.bf16.msra.mxu1 %v13706_v5  ;;  %5457 = vmatpush1.bf16.msra.mxu0 %v13739_v32  ;;  %v15932_v32 = vld [vmem:[#allocation6] sm:$0xff] }
 0x1bc   :  { %5255 = vmatprep.subr.bf16.mxu1 %v13711_v9  ;;  %5458 = vmatprep.subr.bf16.mxu0 %v13747_v35  ;;  %v13801_v9 = vld [vmem:[#allocation8 + $0xfc4] ss:$16 sps:$4 sm:$0xff]  }
 0x1bf   :  { %5256 = vmatpush1.bf16.msra.mxu1 %v13709_v10  ;;  %5459 = vmatpush1.bf16.msra.mxu0 %v13745_v38  ;;  %v13799_v10 = vld [vmem:[#allocation8 + $0xfc0] ss:$16 sps:$4 sm:$0xff]  }
 0x1c0   :  { %5257 = vmatprep.subr.bf16.mxu1 %v13714_v11  ;;  %5460 = vmatprep.subr.bf16.mxu0 %v13753_v47  ;;  %v13805_v11 = vld [vmem:[#allocation8 + $0xfe0] ss:$16 sps:$4 sm:$0xff]  }
 0x1c3   :  { %5258 = vmatpush1.bf16.msra.mxu1 %v13712_v13  ;;  %5461 = vmatpush1.bf16.msra.mxu0 %v13751_v50  ;;  %v13813_v13 = vld [vmem:[#allocation8 + $0x4] ss:$16 sps:$4 sm:$0xff]  }
 0x1c4   :  { %5259 = vmatprep.subr.bf16.mxu1 %v13720_v14  ;;  %5462 = vmatprep.subr.bf16.mxu0 %v13759_v53 }
 0x1c7   :  { %5260 = vmatpush1.bf16.msra.mxu1 %v13718_v16  ;;  %5463 = vmatpush1.bf16.msra.mxu0 %v13757_v57 }
 0x1c8   :  { %5261 = vmatprep.subr.bf16.mxu1 %v13726_v30  ;;  %5464 = vmatprep.subr.bf16.mxu0 %v13765_v28 }
 0x1cb   :  { %5262 = vmatpush1.bf16.msra.mxu1 %v13724_v31  ;;  %5465 = vmatpush1.bf16.msra.mxu0 %v13763_v59 }
 0x1cc   :  { %v1044_v0 = vpop.f32.mrb[36].mxu0  ;;  %5263 = vmatprep.subr.bf16.mxu1 %v13732_v20  ;;  %5466 = vmatprep.subr.bf16.mxu0 %v13771_v60  ;;  %v15927_v20 = vshrl.u32 %v16892_v19, 7 }
 0x1cd   :  { %v1045_v55 = vpop.f32.mrb[37].mxu0  ;;  %v1113_v15 = vpop.f32.mrb[36].mxu1 }
 0x1ce   :  { %v1046_v39 = vpop.f32.mrb[38].mxu0  ;;  %v1114_v4 = vpop.f32.mrb[37].mxu1  ;;  %v13787_v15 = vld [vmem:[#allocation8 + $0xf80] ss:$16 sps:$4 sm:$0xff]   ;;  %16928 = vst [vmem:[#allocation18_spill] sm:$0xff] %v15927_v20  ;;  %v15936_v35 = vsub.s32 1, %v15927_v20 }
 0x1cf   :  { %v1047_v6 = vpop.f32.mrb[39].mxu0  ;;  %v1115_v7 = vpop.f32.mrb[38].mxu1  ;;  %5264 = vmatpush1.bf16.msra.mxu1 %v13730_v22  ;;  %5467 = vmatpush1.bf16.msra.mxu0 %v13769_v61  ;;  %v16888_v38 = vsub.s32 3, %v15927_v20 }
 0x1d0   :  { %v1116_v8 = vpop.f32.mrb[39].mxu1  ;;  %5265 = vmatprep.subr.bf16.mxu1 %v13738_v26  ;;  %5468 = vmatprep.subr.bf16.mxu0 %v13777_v62  ;;  %v13795_v7 = vld [vmem:[#allocation8 + $0xfa4] ss:$16 sps:$4 sm:$0xff]   ;;  %v15930_v26 = vsub.s32 0, %v15927_v20  ;;  %16930 = vst [vmem:[#allocation20_spill] sm:$0xff] %v15936_v35 }
 0x1d1   :  { %v13793_v8 = vld [vmem:[#allocation8 + $0xfa0] ss:$16 sps:$4 sm:$0xff]  }
 0x1d2   :  { %16929 = vst [vmem:[#allocation19_spill] sm:$0xff] %v15930_v26  ;;  %v3129_v62 = vld [vmem:[#allocation2 + $0x188] sm:$0xff] }
 0x1d3   :  { %5266 = vmatpush1.bf16.msra.mxu1 %v13736_v29  ;;  %5469 = vmatpush1.bf16.msra.mxu0 %v13775_v63 }
 0x1d4   :  { %5267 = vmatprep.subr.bf16.mxu1 %v13744_v33  ;;  %5470 = vmatprep.subr.bf16.mxu0 %v13783_v54  ;;  %v16889_v33 = vsub.s32 2, %v15927_v20  ;;  %v3128_v54 = vld [vmem:[#allocation2 + $0x180] sm:$0xff] }
 0x1d7   :  { %5268 = vmatpush1.bf16.msra.mxu1 %v13742_v37  ;;  %5471 = vmatpush1.bf16.msra.mxu0 %v13781_v1  ;;  %v2757_v1 = vsub.s32 4, %v15927_v20 }
 0x1d8   :  { %5269 = vmatprep.subr.bf16.mxu1 %v13750_v46  ;;  %5472 = vmatprep.subr.bf16.mxu0 %v13789_v43  ;;  %v2765_v43 = vsub.s32 6, %v15927_v20 }
 0x1db   :  { %5270 = vmatpush1.bf16.msra.mxu1 %v13748_v49  ;;  %5473 = vmatpush1.bf16.msra.mxu0 %v13787_v15 }
 0x1dc   :  { %5271 = vmatprep.subr.bf16.mxu1 %v13756_v52  ;;  %5474 = vmatprep.subr.bf16.mxu0 %v13795_v7 }
 0x1df   :  { %5272 = vmatpush1.bf16.msra.mxu1 %v13754_v56  ;;  %5475 = vmatpush1.bf16.msra.mxu0 %v13793_v8 }
 0x1e0   :  { %5310 = vmatprep.subr.bf16.mxu1 %v13762_v58  ;;  %5476 = vmatprep.subr.bf16.mxu0 %v13801_v9 }
 0x1e3   :  { %5477 = vmatpush1.bf16.msra.mxu0 %v13799_v10 }
 0x1e4   :  { %5478 = vmatprep.subr.bf16.mxu0 %v13807_v12 }
 0x1e7   :  { %5479 = vmatpush1.bf16.msra.mxu0 %v13805_v11 }
 0x1e8   :  { %7073 = vmatprep.subr.bf16.mxu0 %v13813_v13 }
 0x1ec   :  { %v1395_v36 = vpop.f32.mrb[40].mxu0 }
 0x1ed   :  { %v1396_v40 = vpop.f32.mrb[41].mxu0  ;;  %v1464_v41 = vpop.f32.mrb[40].mxu1 }
 0x1ee   :  { %v1397_v42 = vpop.f32.mrb[42].mxu0  ;;  %v1465_v44 = vpop.f32.mrb[41].mxu1  ;;  %v15941_v41 = vrot.slane %v15932_v32, %v15930_v26 }
 0x1ef   :  { %v1398_v45 = vpop.f32.mrb[43].mxu0  ;;  %v1466_v23 = vpop.f32.mrb[42].mxu1  ;;  %v15946_v42 = vrot.slane %v15932_v32, %v16889_v33  ;;  %v15950_v44 = vrot.slane %v15932_v32, %v15936_v35 }
 0x1f0   :  { %v1467_v48 = vpop.f32.mrb[43].mxu1  ;;  %v15955_v45 = vrot.slane %v15932_v32, %v16888_v38 }
 0x20c   :  { %v1533_v2 = vpop.f32.mrb[44].mxu0 }
 0x20d   :  { %v1534_v0 = vpop.f32.mrb[45].mxu0  ;;  %v1602_v55 = vpop.f32.mrb[44].mxu1 }
 0x20e   :  { %v1535_v3 = vpop.f32.mrb[46].mxu0  ;;  %v1603_v39 = vpop.f32.mrb[45].mxu1  ;;  %v2761_v0 = vsub.s32 5, %v15927_v20  ;;  %v15968_v55 = vpack.c.bf16 %v3129_v62, %v3129_v62 }
 0x20f   :  { %v1536_v4 = vpop.f32.mrb[47].mxu0  ;;  %v1604_v5 = vpop.f32.mrb[46].mxu1 }
 0x210   :  { %v1605_v6 = vpop.f32.mrb[47].mxu1  ;;  %16931 = vst [vmem:[#allocation21_spill] sm:$0xff] %v15968_v55  ;;  %v2769_v4 = vsub.s32 7, %v15927_v20  ;;  %v15972_v5 = vpack.c.bf16 %v3128_v54, %v3128_v54  ;;  %v3853_v10 = vshll.u32 %v15968_v55, 16  ;;  %v13868_v20 = vld [vmem:[#allocation8 + $0xc40] ss:$16 sps:$4 sm:$0xff]  }
 0x212   :  { %16932 = vst [vmem:[#allocation22_spill] sm:$0xff] %v15972_v5 }
 0x22c   :  { %v1940_v25 = vpop.f32.mrb[48].mxu0 }
 0x22d   :  { %v1941_v14 = vpop.f32.mrb[49].mxu0  ;;  %v2009_v34 = vpop.f32.mrb[48].mxu1 }
 0x22e   :  { %v1942_v16 = vpop.f32.mrb[50].mxu0  ;;  %v2010_v17 = vpop.f32.mrb[49].mxu1  ;;  %v3845_v14 = vshll.u32 %v15972_v5, 16 }
 0x22f   :  { %v1943_v30 = vpop.f32.mrb[51].mxu0  ;;  %v2011_v18 = vpop.f32.mrb[50].mxu1  ;;  %v3908_v17 = vshrl.u32 %v15968_v55, 16 }
 0x230   :  { %v2012_v31 = vpop.f32.mrb[51].mxu1 }
 0x231   :  { %v15984_v31 = vrot.slane %v15932_v32, %v2757_v1 }
 0x24c   :  { %v2078_v21 = vpop.f32.mrb[52].mxu0 }
 0x24d   :  { %v2079_v22 = vpop.f32.mrb[53].mxu0  ;;  %v2147_v24 = vpop.f32.mrb[52].mxu1  ;;  %v15987_v21 = vrot.slane %v15932_v32, %v2765_v43 }
 0x24e   :  { %v2080_v27 = vpop.f32.mrb[54].mxu0  ;;  %v2148_v29 = vpop.f32.mrb[53].mxu1 }
 0x24f   :  { %v2081_v36 = vpop.f32.mrb[55].mxu0  ;;  %v2149_v37 = vpop.f32.mrb[54].mxu1  ;;  %v15991_v27 = vrot.slane %v15932_v32, %v2761_v0  ;;  %v15993_v29 = vrot.slane %v3853_v10, 1 }
 0x250   :  { %v2150_v40 = vpop.f32.mrb[55].mxu1  ;;  %v15996_v37 = vrot.slane %v15932_v32, %v2769_v4 }
 0x251   :  { %v15998_v40 = vrot.slane %v3845_v14, 1 }
 0x254   :  { %v2447_v23 = vpop.f32.mrb[0].mxu0 }
 0x255   :  { %v2779_v46 = vadd.f32 %v15941_v41, %v2447_v23  ;;  %v2516_v47 = vpop.f32.mrb[0].mxu1  ;;  %v2449_v48 = vpop.f32.mrb[1].mxu0  ;;  %v3905_v23 = vshrl.u32 %v15972_v5, 16 }
 0x256   :  { %v2781_v49 = vadd.f32 %v15946_v42, %v2516_v47  ;;  %v2780_v50 = vadd.f32 %v15950_v44, %v2449_v48  ;;  %v2518_v52 = vpop.f32.mrb[1].mxu1  ;;  %v2451_v53 = vpop.f32.mrb[2].mxu0 }
 0x257   :  { %15128 = vtanh.f32 %v2779_v46  ;;  %v2782_v56 = vadd.f32 %v15955_v45, %v2518_v52  ;;  %v2787_v57 = vadd.f32 %v15941_v41, %v2451_v53  ;;  %v2520_v58 = vpop.f32.mrb[2].mxu1  ;;  %v2453_v28 = vpop.f32.mrb[3].mxu0 }
 0x258   :  { %15130 = vtanh.f32 %v2781_v49  ;;  %v2789_v59 = vadd.f32 %v15946_v42, %v2520_v58  ;;  %v2522_v60 = vpop.f32.mrb[3].mxu1  ;;  %v2788_v61 = vadd.f32 %v15950_v44, %v2453_v28 }
 0x259   :  { %15132 = vtanh.f32 %v2780_v50  ;;  %v2790_v63 = vadd.f32 %v15955_v45, %v2522_v60  ;;  %v16002_v50 = vor.u32 %v3908_v17, %v15993_v29 }
 0x25a   :  { %15134 = vtanh.f32 %v2782_v56 }
 0x25b   :  { %15136 = vtanh.f32 %v2787_v57 }
 0x25c   :  { %15138 = vtanh.f32 %v2789_v59  ;;  %v2457_v2 = vpop.f32.mrb[4].mxu0 }
 0x25d   :  { %15140 = vtanh.f32 %v2788_v61  ;;  %v2795_v15 = vadd.f32 %v15941_v41, %v2457_v2  ;;  %v2526_v3 = vpop.f32.mrb[4].mxu1  ;;  %v2459_v39 = vpop.f32.mrb[5].mxu0 }
 0x25e   :  { %15142 = vtanh.f32 %v2790_v63  ;;  %v2797_v6 = vadd.f32 %v15946_v42, %v2526_v3  ;;  %v2796_v7 = vadd.f32 %v15950_v44, %v2459_v39  ;;  %v2528_v8 = vpop.f32.mrb[5].mxu1  ;;  %v2461_v9 = vpop.f32.mrb[6].mxu0 }
 0x25f   :  { %15144 = vtanh.f32 %v2795_v15  ;;  %v2798_v11 = vadd.f32 %v15955_v45, %v2528_v8  ;;  %v2803_v12 = vadd.f32 %v15941_v41, %v2461_v9  ;;  %v2530_v13 = vpop.f32.mrb[6].mxu1  ;;  %v2463_v25 = vpop.f32.mrb[7].mxu0  ;;  %v3081_v8 = vld [vmem:[#allocation2 + $0x8] sm:$0xff] }
 0x260   :  { %15146 = vtanh.f32 %v2797_v6  ;;  %v2805_v34 = vadd.f32 %v15946_v42, %v2530_v13  ;;  %v2532_v16 = vpop.f32.mrb[7].mxu1  ;;  %v2804_v18 = vadd.f32 %v15950_v44, %v2463_v25  ;;  %v3080_v13 = vld [vmem:[#allocation2] sm:$0xff] }
 0x261   :  { %v15129_v30 = vpop.eup %15128  ;;  %15148 = vtanh.f32 %v2796_v7  ;;  %v2806_v24 = vadd.f32 %v15955_v45, %v2532_v16 }
 0x262   :  { %v15131_v22 = vpop.eup %15130  ;;  %15150 = vtanh.f32 %v2798_v11  ;;  %v2906_v47 = vrot.slane %v15129_v30, 6 }
 0x263   :  { %v15133_v36 = vpop.eup %15132  ;;  %15152 = vtanh.f32 %v2803_v12  ;;  %v2912_v48 = vrot.slane %v15131_v22, 6 }
 0x264   :  { %v15135_v46 = vpop.eup %15134  ;;  %15154 = vtanh.f32 %v2805_v34  ;;  %v2467_v49 = vpop.f32.mrb[8].mxu0  ;;  %v2909_v53 = vrot.slane %v15133_v36, 6  ;;  %v3105_v36 = vld [vmem:[#allocation2 + $0xc8] sm:$0xff] }
 0x265   :  { %v15137_v52 = vpop.eup %15136  ;;  %v2915_v56 = vrot.slane %v15135_v46, 6  ;;  %15156 = vtanh.f32 %v2804_v18  ;;  %v2811_v57 = vadd.f32 %v15941_v41, %v2467_v49  ;;  %v2536_v32 = vpop.f32.mrb[8].mxu1  ;;  %v3104_v46 = vld [vmem:[#allocation2 + $0xc0] sm:$0xff] }
 0x266   :  { %v2469_v58 = vpop.f32.mrb[9].mxu0  ;;  %v15139_v28 = vpop.eup %15138  ;;  %v2907_v59 = vrot.slane %v15137_v52, 6  ;;  %15158 = vtanh.f32 %v2806_v24  ;;  %v2813_v60 = vadd.f32 %v15946_v42, %v2536_v32 }
 0x267   :  { %v2812_v61 = vadd.f32 %v15950_v44, %v2469_v58  ;;  %v2538_v62 = vpop.f32.mrb[9].mxu1  ;;  %v2471_v63 = vpop.f32.mrb[10].mxu0  ;;  %v2913_v1 = vrot.slane %v15139_v28, 6  ;;  %15160 = vtanh.f32 %v2811_v57 }
 0x268   :  { %v15141_v54 = vpop.eup %15140  ;;  %v2814_v2 = vadd.f32 %v15955_v45, %v2538_v62  ;;  %v2819_v43 = vadd.f32 %v15941_v41, %v2471_v63  ;;  %v2540_v0 = vpop.f32.mrb[10].mxu1  ;;  %v2908_v39 = vsel %vm2905_vm5, %v2906_v47, %v2907_v59  ;;  %15162 = vtanh.f32 %v2813_v60 }
 0x269   :  { %v2473_v15 = vpop.f32.mrb[11].mxu0  ;;  %v15143_v3 = vpop.eup %15142  ;;  %v2910_v4 = vrot.slane %v15141_v54, 6  ;;  %v2821_v6 = vadd.f32 %v15946_v42, %v2540_v0  ;;  %v2914_v10 = vsel %vm2905_vm5, %v2912_v48, %v2913_v1  ;;  %15164 = vtanh.f32 %v2812_v61 }
 0x26a   :  { %v2542_v7 = vpop.f32.mrb[11].mxu1  ;;  %v15145_v9 = vpop.eup %15144  ;;  %v2916_v11 = vrot.slane %v15143_v3, 6  ;;  %v2820_v12 = vadd.f32 %v15950_v44, %v2473_v15  ;;  %2964 = vst [vmem:[#allocation2 + $0x50] sm:$0xff] %v2914_v10  ;;  %15166 = vtanh.f32 %v2814_v2  ;;  %v16019_v47 = vpack.c.bf16 %v2908_v39, %v3080_v13  ;;  %v3107_v13 = vld [vmem:[#allocation2 + $0xd8] sm:$0xff] }
 0x26b   :  { %v15147_v41 = vpop.eup %15146  ;;  %v2911_v25 = vsel %vm2905_vm5, %v2909_v53, %v2910_v4  ;;  %v2930_v14 = vrot.slane %v15145_v9, 6  ;;  %v2822_v34 = vadd.f32 %v15955_v45, %v2542_v7  ;;  %15168 = vtanh.f32 %v2819_v43  ;;  %v3083_v7 = vld [vmem:[#allocation2 + $0x18] sm:$0xff] }
 0x26c   :  { %v15149_v16 = vpop.eup %15148  ;;  %v2917_v42 = vsel %vm2905_vm5, %v2915_v56, %v2916_v11  ;;  %v2934_v17 = vrot.slane %v15147_v41, 6  ;;  %v16016_v30 = vpack.c.bf16 %v2911_v25, %v3081_v8  ;;  %15170 = vtanh.f32 %v2821_v6  ;;  %v2477_v24 = vpop.f32.mrb[56].mxu0  ;;  %16933 = vst [vmem:[#allocation23_spill] sm:$0xff] %v16019_v47 }
 0x26d   :  { %v15151_v18 = vpop.eup %15150  ;;  %v2931_v22 = vsel %vm2905_vm5, %v2907_v59, %v2930_v14  ;;  %v2932_v44 = vrot.slane %v15149_v16, 6  ;;  %15172 = vtanh.f32 %v2820_v12  ;;  %v2546_v52 = vpop.f32.mrb[56].mxu1  ;;  %v3684_v6 = vshll.u32 %v16019_v47, 16 }
 0x26e   :  { %v15153_v48 = vpop.eup %15152  ;;  %v2935_v45 = vsel %vm2905_vm5, %v2913_v1, %v2934_v17  ;;  %v2936_v49 = vrot.slane %v15151_v18, 6  ;;  %v2478_v53 = vpop.f32.mrb[57].mxu0  ;;  %v3694_v56 = vshrl.u32 %v16016_v30, 16  ;;  %15174 = vtanh.f32 %v2822_v34 }
 0x26f   :  { %v15155_v57 = vpop.eup %15154  ;;  %2972 = vst [vmem:[#allocation2 + $0x90] sm:$0xff] %v2935_v45  ;;  %v2933_v32 = vsel %vm2905_vm5, %v2910_v4, %v2932_v44  ;;  %v3008_v58 = vrot.slane %v15153_v48, 6  ;;  %v2547_v28 = vpop.f32.mrb[57].mxu1  ;;  %v3696_v60 = vshll.u32 %v16016_v30, 16  ;;  %v16028_v43 = vpack.c.bf16 %v3104_v46, %v2931_v22 }
 0x270   :  { %v2479_v59 = vpop.f32.mrb[58].mxu0  ;;  %v15157_v61 = vpop.eup %15156  ;;  %v2937_v62 = vsel %vm2905_vm5, %v2916_v11, %v2936_v49  ;;  %v3014_v63 = vrot.slane %v15155_v57, 6  ;;  %v16026_v2 = vpack.c.bf16 %v3105_v36, %v2933_v32  ;;  %v3682_v4 = vshrl.u32 %v16019_v47, 16 }
 0x271   :  { %v2548_v54 = vpop.f32.mrb[58].mxu1  ;;  %v2480_v1 = vpop.f32.mrb[59].mxu0  ;;  %16934 = vst [vmem:[#allocation24_spill] sm:$0xff] %v16028_v43  ;;  %v3011_v15 = vrot.slane %v15157_v61, 6  ;;  %v3698_v39 = vrot.slane %v3696_v60, 1  ;;  %v3689_v11 = vshll.u32 %v16028_v43, 16  ;;  %v16036_v24 = vpack.c.bf16 %v2917_v42, %v3083_v7 }
 0x272   :  { %v15159_v0 = vpop.eup %15158  ;;  %v2549_v3 = vpop.f32.mrb[59].mxu1  ;;  %v3701_v10 = vshll.u32 %v16026_v2, 16  ;;  %v3785_v12 = vshrl.u32 %v16026_v2, 16  ;;  %v3686_v34 = vrot.slane %v3684_v6, 1  ;;  %v3777_v16 = vshrl.u32 %v16028_v43, 16 }
 0x273   :  { %v15161_v8 = vpop.eup %15160  ;;  %v3017_v9 = vrot.slane %v15159_v0, 6  ;;  %v3699_v14 = vor.u32 %v3698_v39, %v3694_v56  ;;  %v3691_v44 = vrot.slane %v3689_v11, 1  ;;  %16935 = vst [vmem:[#allocation25_spill] sm:$0xff] %v16036_v24  ;;  %v16039_v52 = vpack.c.bf16 %v3107_v13, %v2937_v62 }
 0x274   :  { %v15163_v41 = vpop.eup %15162  ;;  %v3009_v25 = vrot.slane %v15161_v8, 6  ;;  %v3703_v22 = vrot.slane %v3701_v10, 1  ;;  %v2585_v45 = vpop.f32.mrb[16].mxu0  ;;  %v3687_v49 = vor.u32 %v3686_v34, %v3682_v4  ;;  %v13760_v34 = vld [vmem:[#allocation8 + $0xa00] ss:$16 sps:$4 sm:$0xff]  }
 0x275   :  { %v15165_v17 = vpop.eup %15164  ;;  %v3015_v18 = vrot.slane %v15163_v41, 6  ;;  %v2783_v32 = vadd.f32 %v15984_v31, %v2585_v45  ;;  %v2654_v28 = vpop.f32.mrb[16].mxu1  ;;  %v13768_v45 = vld [vmem:[#allocation8 + $0xa24] ss:$16 sps:$4 sm:$0xff]   ;;  %v3801_v38 = vshrl.u32 %v16039_v52, 16 }
 0x276   :  { %v15167_v36 = vpop.eup %15166  ;;  %v3010_v46 = vsel %vm2905_vm5, %v3008_v58, %v3009_v25  ;;  %v3012_v48 = vrot.slane %v15165_v17, 6  ;;  %v2587_v59 = vpop.f32.mrb[17].mxu0  ;;  %v16044_v60 = vsel %vm193_vm0, %v3699_v14, %v3703_v22  ;;  %v2785_v54 = vadd.f32 %v15987_v21, %v2654_v28 }
 0x277   :  { %v15169_v53 = vpop.eup %15168  ;;  %v3016_v56 = vsel %vm2905_vm5, %v3014_v63, %v3015_v18  ;;  %v3018_v57 = vrot.slane %v15167_v36, 6  ;;  %v2784_v62 = vadd.f32 %v15991_v27, %v2587_v59  ;;  %v2656_v1 = vpop.f32.mrb[17].mxu1  ;;  %5273 = vmatprep.mubr.bf16.mxu1 %v16044_v60  ;;  %15176 = vtanh.f32 %v2783_v32 }
 0x278   :  { %v15171_v42 = vpop.eup %15170  ;;  %3066 = vst [vmem:[#allocation2 + $0x110] sm:$0xff] %v3016_v56  ;;  %v3013_v58 = vsel %vm2905_vm5, %v3011_v15, %v3012_v48  ;;  %v3032_v61 = vrot.slane %v15169_v53, 6  ;;  %v2589_v0 = vpop.f32.mrb[18].mxu0  ;;  %v2786_v4 = vadd.f32 %v15996_v37, %v2656_v1  ;;  %15178 = vtanh.f32 %v2785_v54 }
 0x279   :  { %v15173_v63 = vpop.eup %15172  ;;  %v3019_v3 = vsel %vm2905_vm5, %v3017_v9, %v3018_v57  ;;  %v3036_v39 = vrot.slane %v15171_v42, 6  ;;  %v2658_v6 = vpop.f32.mrb[18].mxu1  ;;  %v2791_v11 = vadd.f32 %v15984_v31, %v2589_v0  ;;  %15180 = vtanh.f32 %v2784_v62 }
 0x27a   :  { %v2591_v7 = vpop.f32.mrb[19].mxu0  ;;  %v15175_v8 = vpop.eup %15174  ;;  %3067 = vst [vmem:[#allocation2 + $0x118] sm:$0xff] %v3019_v3  ;;  %v3033_v15 = vsel %vm2905_vm5, %v3009_v25, %v3032_v61  ;;  %v3034_v10 = vrot.slane %v15173_v63, 6  ;;  %v2793_v9 = vadd.f32 %v15987_v21, %v2658_v6  ;;  %15182 = vtanh.f32 %v2786_v4 }
 0x27b   :  { %v2660_v13 = vpop.f32.mrb[19].mxu1  ;;  %v3037_v41 = vsel %vm2905_vm5, %v3015_v18, %v3036_v39  ;;  %v3038_v14 = vrot.slane %v15175_v8, 6  ;;  %v2792_v36 = vadd.f32 %v15991_v27, %v2591_v7  ;;  %15184 = vtanh.f32 %v2791_v11  ;;  %v13772_v11 = vld [vmem:[#allocation8 + $0xa40] ss:$16 sps:$4 sm:$0xff]  }
 0x27c   :  { %3074 = vst [vmem:[#allocation2 + $0x150] sm:$0xff] %v3037_v41  ;;  %v3035_v17 = vsel %vm2905_vm5, %v3012_v48, %v3034_v10  ;;  %v2794_v25 = vadd.f32 %v15996_v37, %v2660_v13  ;;  %v16061_v56 = vsel %vm193_vm0, %v3687_v49, %v3691_v44  ;;  %15186 = vtanh.f32 %v2793_v9  ;;  %v2595_v32 = vpop.f32.mrb[20].mxu0 }
 0x27d   :  { %v3039_v53 = vsel %vm2905_vm5, %v3018_v57, %v3038_v14  ;;  %v16063_v18 = vpack.c.bf16 %v3035_v17, %v3013_v58  ;;  %5274 = vmatmul.mubr.bf16.vlgmr.msra.gmra.mrb[64].mxu1 %v16061_v56  ;;  %v3787_v48 = vor.u32 %v3785_v12, %v3703_v22  ;;  %v16068_v28 = vpack.c.bf16 %v3033_v15, %v3010_v46  ;;  %v2664_v49 = vpop.f32.mrb[20].mxu1  ;;  %v2597_v42 = vpop.f32.mrb[21].mxu0  ;;  %v13766_v58 = vld [vmem:[#allocation8 + $0xa20] ss:$16 sps:$4 sm:$0xff]   ;;  %v13780_v17 = vld [vmem:[#allocation8 + $0xa64] ss:$16 sps:$4 sm:$0xff]  }
 0x27e   :  { %3075 = vst [vmem:[#allocation2 + $0x158] sm:$0xff] %v3039_v53  ;;  %v3779_v59 = vor.u32 %v3777_v16, %v3691_v44  ;;  %15188 = vtanh.f32 %v2792_v36  ;;  %v2799_v57 = vadd.f32 %v15984_v31, %v2595_v32  ;;  %5311 = vmatpush1.bf16.msra.mxu1 %v13760_v34  ;;  %v2801_v62 = vadd.f32 %v15987_v21, %v2664_v49  ;;  %v2666_v22 = vpop.f32.mrb[21].mxu1  ;;  %v2599_v46 = vpop.f32.mrb[22].mxu0  ;;  %v13774_v16 = vld [vmem:[#allocation8 + $0xa44] ss:$16 sps:$4 sm:$0xff]  }
 0x27f   :  { %16936 = vst [vmem:[#allocation26_spill] sm:$0xff] %v16063_v18  ;;  %16937 = vst [vmem:[#allocation27_spill] sm:$0xff] %v16068_v28  ;;  %v3789_v61 = vshll.u32 %v16063_v18, 16  ;;  %v3849_v54 = vshrl.u32 %v16063_v18, 16  ;;  %15190 = vtanh.f32 %v2794_v25  ;;  %v2800_v12 = vadd.f32 %v15991_v27, %v2597_v42  ;;  %5312 = vmatprep.subr.bf16.mxu1 %v13768_v45  ;;  %v2668_v63 = vpop.f32.mrb[22].mxu1  ;;  %v2601_v3 = vpop.f32.mrb[23].mxu0 }
 0x280   :  { %v3781_v44 = vshll.u32 %v16068_v28, 16  ;;  %15192 = vtanh.f32 %v2799_v57  ;;  %v2802_v1 = vadd.f32 %v15996_v37, %v2666_v22  ;;  %v2807_v0 = vadd.f32 %v15984_v31, %v2599_v46  ;;  %v2670_v7 = vpop.f32.mrb[23].mxu1 }
 0x281   :  { %v3791_v39 = vrot.slane %v3789_v61, 1  ;;  %15194 = vtanh.f32 %v2801_v62  ;;  %v2809_v4 = vadd.f32 %v15987_v21, %v2668_v63  ;;  %v2808_v6 = vadd.f32 %v15991_v27, %v2601_v3  ;;  %v15177_v15 = vpop.eup %15176  ;;  %v13786_v3 = vld [vmem:[#allocation8 + $0xa84] ss:$16 sps:$4 sm:$0xff]  }
 0x282   :  { %v3783_v8 = vrot.slane %v3781_v44, 1  ;;  %15196 = vtanh.f32 %v2800_v12  ;;  %v2810_v10 = vadd.f32 %v15996_v37, %v2670_v7  ;;  %5313 = vmatpush1.bf16.msra.mxu1 %v13766_v58  ;;  %v15179_v14 = vpop.eup %15178  ;;  %v2918_v9 = vrot.slane %v15177_v15, 6 }
 0x283   :  { %v16084_v13 = vsel %vm193_vm0, %v3787_v48, %v3791_v39  ;;  %v3851_v41 = vor.u32 %v3849_v54, %v3791_v39  ;;  %15198 = vtanh.f32 %v2802_v1  ;;  %5314 = vmatprep.subr.bf16.mxu1 %v13774_v16  ;;  %v3841_v36 = vshrl.u32 %v16068_v28, 16  ;;  %v15181_v25 = vpop.eup %15180 }
 0x284   :  { %5283 = vmatprep.mubr.bf16.mxu1 %v16084_v13  ;;  %v16088_v34 = vsel %vm193_vm0, %v3779_v59, %v3783_v8  ;;  %v2924_v45 = vrot.slane %v15179_v14, 6  ;;  %15200 = vtanh.f32 %v2807_v0  ;;  %v3718_v32 = vshrl.u32 %v16036_v24, 16  ;;  %v15183_v48 = vpop.eup %15182  ;;  %v2605_v49 = vpop.f32.mrb[24].mxu0 }
 0x285   :  { %v16093_v53 = vsel %vm193_vm0, %v3851_v41, %v15993_v29  ;;  %v2921_v57 = vrot.slane %v15181_v25, 6  ;;  %15202 = vtanh.f32 %v2809_v4  ;;  %5284 = vmatmul.mubr.bf16.gmra.mrb[68].mxu1 %v16088_v34  ;;  %v3843_v59 = vor.u32 %v3841_v36, %v3783_v8  ;;  %v15185_v58 = vpop.eup %15184  ;;  %v2674_v62 = vpop.f32.mrb[24].mxu1  ;;  %v13778_v29 = vld [vmem:[#allocation8 + $0xa60] ss:$16 sps:$4 sm:$0xff]  }
 0x286   :  { %v3720_v42 = vshll.u32 %v16036_v24, 16  ;;  %v2927_v61 = vrot.slane %v15183_v48, 6  ;;  %15204 = vtanh.f32 %v2808_v6  ;;  %v2815_v54 = vadd.f32 %v15984_v31, %v2605_v49  ;;  %v2607_v12 = vpop.f32.mrb[25].mxu0  ;;  %5315 = vmatpush1.bf16.msra.mxu1 %v13772_v11  ;;  %5293 = vmatprep.mubr.bf16.mxu1 %v16093_v53  ;;  %v15187_v46 = vpop.eup %15186 }
 0x287   :  { %v3725_v22 = vshll.u32 %v16039_v52, 16  ;;  %v2919_v16 = vrot.slane %v15185_v58, 6  ;;  %15206 = vtanh.f32 %v2810_v10  ;;  %v2817_v44 = vadd.f32 %v15987_v21, %v2674_v62  ;;  %v2676_v0 = vpop.f32.mrb[25].mxu1  ;;  %v2609_v63 = vpop.f32.mrb[26].mxu0  ;;  %5316 = vmatprep.subr.bf16.mxu1 %v13780_v17 }
 0x288   :  { %v2816_v1 = vadd.f32 %v15991_v27, %v2607_v12  ;;  %v15189_v39 = vpop.eup %15188  ;;  %v2925_v4 = vrot.slane %v15187_v46, 6  ;;  %15208 = vtanh.f32 %v2815_v54  ;;  %v2818_v6 = vadd.f32 %v15996_v37, %v2676_v0  ;;  %v2678_v8 = vpop.f32.mrb[26].mxu1  ;;  %v3086_v0 = vld [vmem:[#allocation2 + $0x30] sm:$0xff] }
 0x289   :  { %v2823_v7 = vadd.f32 %v15984_v31, %v2609_v63  ;;  %v2611_v15 = vpop.f32.mrb[27].mxu0  ;;  %v15191_v11 = vpop.eup %15190  ;;  %v2920_v10 = vsel %vm2905_vm5, %v2918_v9, %v2919_v16  ;;  %v2922_v41 = vrot.slane %v15189_v39, 6  ;;  %15210 = vtanh.f32 %v2817_v44  ;;  %v13784_v31 = vld [vmem:[#allocation8 + $0xa80] ss:$16 sps:$4 sm:$0xff]  }
 0x28a   :  { %v2825_v14 = vadd.f32 %v15987_v21, %v2678_v8  ;;  %v2680_v36 = vpop.f32.mrb[27].mxu1  ;;  %v15193_v25 = vpop.eup %15192  ;;  %2966 = vst [vmem:[#allocation2 + $0x60] sm:$0xff] %v2920_v10  ;;  %v2926_v17 = vsel %vm2905_vm5, %v2924_v45, %v2925_v4  ;;  %v2928_v48 = vrot.slane %v15191_v11, 6  ;;  %15212 = vtanh.f32 %v2816_v1  ;;  %5317 = vmatpush1.bf16.msra.mxu1 %v13778_v29  ;;  %v13792_v21 = vld [vmem:[#allocation8 + $0xaa4] ss:$16 sps:$4 sm:$0xff]  }
 0x28b   :  { %v2824_v49 = vadd.f32 %v15991_v27, %v2611_v15  ;;  %v15195_v58 = vpop.eup %15194  ;;  %v2923_v54 = vsel %vm2905_vm5, %v2921_v57, %v2922_v41  ;;  %v2938_v62 = vrot.slane %v15193_v25, 6  ;;  %15214 = vtanh.f32 %v2818_v6  ;;  %5318 = vmatprep.subr.bf16.mxu1 %v13786_v3  ;;  %v3087_v1 = vld [vmem:[#allocation2 + $0x38] sm:$0xff]  ;;  %v3110_v6 = vld [vmem:[#allocation2 + $0xf0] sm:$0xff] }
 0x28c   :  { %v2826_v9 = vadd.f32 %v15996_v37, %v2680_v36  ;;  %v15197_v12 = vpop.eup %15196  ;;  %2967 = vst [vmem:[#allocation2 + $0x68] sm:$0xff] %v2923_v54  ;;  %v2929_v46 = vsel %vm2905_vm5, %v2927_v61, %v2928_v48  ;;  %v2942_v45 = vrot.slane %v15195_v58, 6  ;;  %15216 = vtanh.f32 %v2823_v7  ;;  %v13790_v39 = vld [vmem:[#allocation8 + $0xaa0] ss:$16 sps:$4 sm:$0xff]   ;;  %v13804_v54 = vld [vmem:[#allocation8 + $0xae4] ss:$16 sps:$4 sm:$0xff]  }
 0x28d   :  { %v16114_v27 = vsel %vm193_vm0, %v3843_v59, %v15998_v40  ;;  %v15199_v29 = vpop.eup %15198  ;;  %v2939_v44 = vsel %vm2905_vm5, %v2919_v16, %v2938_v62  ;;  %v2940_v57 = vrot.slane %v15197_v12, 6  ;;  %15218 = vtanh.f32 %v2825_v14  ;;  %v3111_v16 = vld [vmem:[#allocation2 + $0xf8] sm:$0xff]  ;;  %v2684_v15 = vpop.f32.mrb[60].mxu1 }
 0x28e   :  { %5294 = vmatmul.mubr.bf16.gmra.mrb[72].mxu1 %v16114_v27  ;;  %v3722_v37 = vrot.slane %v3720_v42, 1  ;;  %v15201_v63 = vpop.eup %15200  ;;  %2974 = vst [vmem:[#allocation2 + $0xa0] sm:$0xff] %v2939_v44  ;;  %v2943_v61 = vsel %vm2905_vm5, %v2925_v4, %v2942_v45  ;;  %v2944_v3 = vrot.slane %v15199_v29, 6  ;;  %15220 = vtanh.f32 %v2824_v49  ;;  %v13798_v42 = vld [vmem:[#allocation8 + $0xac4] ss:$16 sps:$4 sm:$0xff]   ;;  %v2685_v25 = vpop.f32.mrb[61].mxu1 }
 0x28f   :  { %5319 = vmatpush1.bf16.msra.mxu1 %v13784_v31  ;;  %5303 = vmatprep.mubr.bf16.mxu1 %v16002_v50  ;;  %v16120_v59 = vrot.slane %v3725_v22, 1  ;;  %v15203_v7 = vpop.eup %15202  ;;  %v2941_v8 = vsel %vm2905_vm5, %v2922_v41, %v2940_v57  ;;  %15222 = vtanh.f32 %v2826_v9  ;;  %v16126_v4 = vor.u32 %v3905_v23, %v15998_v40  ;;  %v13796_v22 = vld [vmem:[#allocation8 + $0xac0] ss:$16 sps:$4 sm:$0xff]   ;;  %v2686_v62 = vpop.f32.mrb[62].mxu1 }
 0x290   :  { %5320 = vmatprep.subr.bf16.mxu1 %v13792_v21  ;;  %v15205_v11 = vpop.eup %15204  ;;  %2975 = vst [vmem:[#allocation2 + $0xa8] sm:$0xff] %v2941_v8  ;;  %v2945_v10 = vsel %vm2905_vm5, %v2928_v48, %v2944_v3  ;;  %v3723_v14 = vor.u32 %v3722_v37, %v3718_v32  ;;  %v16131_v36 = vpack.c.bf16 %v2929_v46, %v3087_v1  ;;  %v3020_v31 = vrot.slane %v15201_v63, 6  ;;  %v2615_v9 = vpop.f32.mrb[60].mxu0 }
 0x291   :  { %v16133_v41 = vpack.c.bf16 %v2926_v17, %v3086_v0  ;;  %v15207_v49 = vpop.eup %15206  ;;  %v3026_v58 = vrot.slane %v15203_v7, 6  ;;  %v16135_v40 = vpack.c.bf16 %v3111_v16, %v2945_v10  ;;  %v16137_v23 = vpack.c.bf16 %v3110_v6, %v2943_v61  ;;  %v2687_v46 = vpop.f32.mrb[63].mxu1 }
 0x292   :  { %v15209_v48 = vpop.eup %15208  ;;  %v3023_v21 = vrot.slane %v15205_v11, 6  ;;  %v3029_v12 = vrot.slane %v15207_v49, 6  ;;  %v16141_v32 = vsel %vm193_vm0, %v3723_v14, %v16120_v59  ;;  %v3768_v17 = vshll.u32 %v16131_v36, 16  ;;  %v2616_v45 = vpop.f32.mrb[61].mxu0  ;;  %v13802_v49 = vld [vmem:[#allocation8 + $0xae0] ss:$16 sps:$4 sm:$0xff]  }
 0x293   :  { %5321 = vmatpush1.bf16.msra.mxu1 %v13790_v39  ;;  %v15211_v29 = vpop.eup %15210  ;;  %v3021_v44 = vrot.slane %v15209_v48, 6  ;;  %v3773_v57 = vshll.u32 %v16135_v40, 16  ;;  %v3756_v37 = vshll.u32 %v16133_v41, 16  ;;  %v3761_v1 = vshll.u32 %v16137_v23, 16  ;;  %v2617_v0 = vpop.f32.mrb[62].mxu0 }
 0x294   :  { %5322 = vmatprep.subr.bf16.mxu1 %v13798_v42  ;;  %v15213_v63 = vpop.eup %15212  ;;  %v3027_v61 = vrot.slane %v15211_v29, 6  ;;  %v3766_v3 = vshrl.u32 %v16131_v36, 16  ;;  %v3770_v39 = vrot.slane %v3768_v17, 1  ;;  %v3754_v16 = vshrl.u32 %v16133_v41, 16  ;;  %v2618_v6 = vpop.f32.mrb[63].mxu0 }
 0x295   :  { %v15215_v7 = vpop.eup %15214  ;;  %v3022_v8 = vsel %vm2905_vm5, %v3020_v31, %v3021_v44  ;;  %v3024_v15 = vrot.slane %v15213_v63, 6  ;;  %v16151_v42 = vrot.slane %v3773_v57, 1  ;;  %v3758_v11 = vrot.slane %v3756_v37, 1  ;;  %v13810_v46 = vld [vmem:[#allocation8 + $0xb04] ss:$16 sps:$4 sm:$0xff]  }
 0x296   :  { %5304 = vmatmul.mubr.bf16.gmra.mrb[76].mxu1 %v16126_v4  ;;  %v15217_v10 = vpop.eup %15216  ;;  %3068 = vst [vmem:[#allocation2 + $0x120] sm:$0xff] %v3022_v8  ;;  %v3028_v14 = vsel %vm2905_vm5, %v3026_v58, %v3027_v61  ;;  %v3030_v25 = vrot.slane %v15215_v7, 6  ;;  %v3771_v62 = vor.u32 %v3770_v39, %v3766_v3  ;;  %v3763_v9 = vrot.slane %v3761_v1, 1  ;;  %v13811_v45 = vld [vmem:[#allocation8] ss:$16 sps:$4 sm:$0xff]  }
 0x297   :  { %5323 = vmatpush1.bf16.msra.mxu1 %v13796_v22  ;;  %5342 = vmatprep.mubr.bf16.mxu1 %v16141_v32  ;;  %v15219_v48 = vpop.eup %15218  ;;  %v3025_v31 = vsel %vm2905_vm5, %v3023_v21, %v3024_v15  ;;  %v3040_v17 = vrot.slane %v15217_v10, 6  ;;  %v3759_v29 = vor.u32 %v3758_v11, %v3754_v16  ;;  %v13819_v0 = vld [vmem:[#allocation8 + $0x24] ss:$16 sps:$4 sm:$0xff]   ;;  %v13808_v16 = vld [vmem:[#allocation8 + $0xb00] ss:$16 sps:$4 sm:$0xff]  }
 0x298   :  { %5324 = vmatprep.subr.bf16.mxu1 %v13804_v54  ;;  %v15221_v57 = vpop.eup %15220  ;;  %3069 = vst [vmem:[#allocation2 + $0x128] sm:$0xff] %v3025_v31  ;;  %v3031_v37 = vsel %vm2905_vm5, %v3029_v12, %v3030_v25  ;;  %v3044_v58 = vrot.slane %v15219_v48, 6  ;;  %v16159_v22 = vsel %vm193_vm0, %v3771_v62, %v16151_v42  ;;  %v3135_v63 = vld [vmem:[#allocation2 + $0x1b8] sm:$0xff] }
 0x299   :  { %16938 = vst [vmem:[#allocation28_spill] sm:$0xff] %v16159_v22  ;;  %v15223_v1 = vpop.eup %15222  ;;  %v3041_v3 = vsel %vm2905_vm5, %v3021_v44, %v3040_v17  ;;  %v3042_v21 = vrot.slane %v15221_v57, 6  ;;  %5480 = vmatprep.mubr.bf16.mxu0 %v16159_v22  ;;  %v16164_v54 = vsel %vm193_vm0, %v3759_v29, %v3763_v9  ;;  %v13816_v7 = vld [vmem:[#allocation8 + $0xb24] ss:$16 sps:$4 sm:$0xff]   ;;  %v13817_v44 = vld [vmem:[#allocation8 + $0x20] ss:$16 sps:$4 sm:$0xff]   ;;  %v16171_v11 = vpack.c.bf16 %v3135_v63, %v3135_v63 }
 0x29a   :  { %16939 = vst [vmem:[#allocation29_spill] sm:$0xff] %v16164_v54  ;;  %3076 = vst [vmem:[#allocation2 + $0x160] sm:$0xff] %v3041_v3  ;;  %v3045_v39 = vsel %vm2905_vm5, %v3027_v61, %v3044_v58  ;;  %v3046_v12 = vrot.slane %v15223_v1, 6  ;;  %5481 = vmatmul.mubr.bf16.vlgmr.msra.gmra.mrb[64].mxu0 %v16164_v54  ;;  %v13825_v61 = vld [vmem:[#allocation8 + $0x44] ss:$16 sps:$4 sm:$0xff]   ;;  %v3833_v17 = vshrl.u32 %v16135_v40, 16 }
 0x29b   :  { %5325 = vmatpush1.bf16.msra.mxu1 %v13802_v49  ;;  %v3043_v6 = vsel %vm2905_vm5, %v3024_v15, %v3042_v21  ;;  %7074 = vmatpush1.bf16.msra.mxu0 %v13811_v45  ;;  %v16169_v8 = vpack.c.bf16 %v3045_v39, %v3028_v14  ;;  %v3901_v48 = vshll.u32 %v16171_v11, 16  ;;  %v13814_v15 = vld [vmem:[#allocation8 + $0xb20] ss:$16 sps:$4 sm:$0xff]   ;;  %v13822_v31 = vld [vmem:[#allocation8 + $0xb44] ss:$16 sps:$4 sm:$0xff]   ;;  %v3134_v45 = vld [vmem:[#allocation2 + $0x1b0] sm:$0xff] }
 0x29c   :  { %5326 = vmatprep.subr.bf16.mxu1 %v13810_v46  ;;  %3077 = vst [vmem:[#allocation2 + $0x168] sm:$0xff] %v3043_v6  ;;  %v3047_v10 = vsel %vm2905_vm5, %v3030_v25, %v3046_v12  ;;  %7075 = vmatprep.subr.bf16.mxu0 %v13819_v0  ;;  %v13823_v14 = vld [vmem:[#allocation8 + $0x40] ss:$16 sps:$4 sm:$0xff]   ;;  %v3825_v25 = vshrl.u32 %v16137_v23, 16  ;;  %v13831_v57 = vld [vmem:[#allocation8 + $0x64] ss:$16 sps:$4 sm:$0xff]   ;;  %v16183_v21 = vpack.c.bf16 %v3134_v45, %v3134_v45 }
 0x29d   :  { %v16174_v62 = vpack.c.bf16 %v3047_v10, %v3031_v37  ;;  %v3829_v49 = vshll.u32 %v16169_v8, 16  ;;  %v3835_v37 = vor.u32 %v3833_v17, %v16151_v42  ;;  %v3903_v63 = vrot.slane %v3901_v48, 1  ;;  %v13820_v1 = vld [vmem:[#allocation8 + $0xb40] ss:$16 sps:$4 sm:$0xff]   ;;  %v13828_v12 = vld [vmem:[#allocation8 + $0xb64] ss:$16 sps:$4 sm:$0xff]  }
 0x29e   :  { %v3827_v3 = vor.u32 %v3825_v25, %v3763_v9  ;;  %v13829_v6 = vld [vmem:[#allocation8 + $0x60] ss:$16 sps:$4 sm:$0xff]   ;;  %v13834_v48 = vld [vmem:[#allocation8 + $0xb84] ss:$16 sps:$4 sm:$0xff]   ;;  %v3082_v25 = vld [vmem:[#allocation2 + $0x10] sm:$0xff] }
 0x29f   :  { %5327 = vmatpush1.bf16.msra.mxu1 %v13808_v16  ;;  %7076 = vmatpush1.bf16.msra.mxu0 %v13817_v44  ;;  %v3837_v46 = vshll.u32 %v16174_v62, 16  ;;  %v3831_v29 = vrot.slane %v3829_v49, 1  ;;  %v3897_v0 = vshrl.u32 %v16174_v62, 16  ;;  %v3893_v44 = vshll.u32 %v16183_v21, 16  ;;  %v13826_v10 = vld [vmem:[#allocation8 + $0xb60] ss:$16 sps:$4 sm:$0xff]  }
 0x2a0   :  { %5328 = vmatprep.subr.bf16.mxu1 %v13816_v7  ;;  %7077 = vmatprep.subr.bf16.mxu0 %v13825_v61  ;;  %v13837_v7 = vld [vmem:[#allocation8 + $0x84] ss:$16 sps:$4 sm:$0xff]   ;;  %v3889_v61 = vshrl.u32 %v16169_v8, 16  ;;  %v3926_v49 = vshrl.u32 %v16171_v11, 16 }
 0x2a1   :  { %v3839_v58 = vrot.slane %v3837_v46, 1  ;;  %v16190_v42 = vsel %vm193_vm0, %v3827_v3, %v3831_v29  ;;  %v13843_v17 = vld [vmem:[#allocation8 + $0xa4] ss:$16 sps:$4 sm:$0xff]   ;;  %v13832_v46 = vld [vmem:[#allocation8 + $0xb80] ss:$16 sps:$4 sm:$0xff]   ;;  %v3098_v3 = vld [vmem:[#allocation2 + $0x90] sm:$0xff] }
 0x2a2   :  { %16941 = vst [vmem:[#allocation31_spill] sm:$0xff] %v16190_v42  ;;  %v16200_v45 = vor.u32 %v3926_v49, %v3903_v63  ;;  %v3115_v49 = vld [vmem:[#allocation2 + $0x118] sm:$0xff] }
 0x2a3   :  { %5329 = vmatpush1.bf16.msra.mxu1 %v13814_v15  ;;  %7078 = vmatpush1.bf16.msra.mxu0 %v13823_v14  ;;  %v16186_v39 = vsel %vm193_vm0, %v3835_v37, %v3839_v58  ;;  %v3899_v16 = vor.u32 %v3897_v0, %v3839_v58  ;;  %v13835_v15 = vld [vmem:[#allocation8 + $0x80] ss:$16 sps:$4 sm:$0xff]   ;;  %v3895_v14 = vrot.slane %v3893_v44, 1  ;;  %v3090_v58 = vld [vmem:[#allocation2 + $0x50] sm:$0xff] }
 0x2a4   :  { %5330 = vmatprep.subr.bf16.mxu1 %v13822_v31  ;;  %16940 = vst [vmem:[#allocation30_spill] sm:$0xff] %v16186_v39  ;;  %5490 = vmatprep.mubr.bf16.mxu0 %v16186_v39  ;;  %v3891_v31 = vor.u32 %v3889_v61, %v3831_v29  ;;  %16943 = vst [vmem:[#allocation33_spill] sm:$0xff] %v16200_v45  ;;  %v13841_v37 = vld [vmem:[#allocation8 + $0xa0] ss:$16 sps:$4 sm:$0xff]   ;;  %v3923_v29 = vshrl.u32 %v16183_v21, 16 }
 0x2a5   :  { %7079 = vmatprep.subr.bf16.mxu0 %v13831_v57  ;;  %5491 = vmatmul.mubr.bf16.gmra.mrb[68].mxu0 %v16190_v42  ;;  %v16195_v9 = vsel %vm193_vm0, %v3899_v16, %v3903_v63  ;;  %v13840_v57 = vld [vmem:[#allocation8 + $0xba4] ss:$16 sps:$4 sm:$0xff]   ;;  %v13838_v63 = vld [vmem:[#allocation8 + $0xba0] ss:$16 sps:$4 sm:$0xff]   ;;  %v16208_v16 = vpack.c.bf16 %v3090_v58, %v3082_v25 }
 0x2a6   :  { %16942 = vst [vmem:[#allocation32_spill] sm:$0xff] %v16195_v9  ;;  %5500 = vmatprep.mubr.bf16.mxu0 %v16195_v9  ;;  %v16203_v0 = vsel %vm193_vm0, %v3891_v31, %v3895_v14  ;;  %v13847_v44 = vld [vmem:[#allocation8 + $0xc0] ss:$16 sps:$4 sm:$0xff]   ;;  %v13888_v9 = vld [vmem:[#allocation8 + $0xca4] ss:$16 sps:$4 sm:$0xff]  }
 0x2a7   :  { %5331 = vmatpush1.bf16.msra.mxu1 %v13820_v1  ;;  %7080 = vmatpush1.bf16.msra.mxu0 %v13829_v6  ;;  %16944 = vst [vmem:[#allocation34_spill] sm:$0xff] %v16203_v0  ;;  %v13849_v1 = vld [vmem:[#allocation8 + $0xc4] ss:$16 sps:$4 sm:$0xff]   ;;  %v13844_v31 = vld [vmem:[#allocation8 + $0xbc0] ss:$16 sps:$4 sm:$0xff]  }
 0x2a8   :  { %5332 = vmatprep.subr.bf16.mxu1 %v13828_v12  ;;  %7081 = vmatprep.subr.bf16.mxu0 %v13837_v7  ;;  %v3106_v12 = vld [vmem:[#allocation2 + $0xd0] sm:$0xff]  ;;  %v3123_v6 = vld [vmem:[#allocation2 + $0x158] sm:$0xff] }
 0x2a9   :  { %v13846_v7 = vld [vmem:[#allocation8 + $0xbc4] ss:$16 sps:$4 sm:$0xff]   ;;  %v16210_v61 = vpack.c.bf16 %v3106_v12, %v3098_v3  ;;  %v13853_v25 = vld [vmem:[#allocation8 + $0xe0] ss:$16 sps:$4 sm:$0xff]  }
 0x2aa   :  { %v13858_v3 = vld [vmem:[#allocation8 + $0xc04] ss:$16 sps:$4 sm:$0xff]   ;;  %v13859_v12 = vld [vmem:[#allocation8 + $0x100] ss:$16 sps:$4 sm:$0xff]  }
 0x2ab   :  { %5333 = vmatpush1.bf16.msra.mxu1 %v13826_v10  ;;  %7082 = vmatpush1.bf16.msra.mxu0 %v13835_v15  ;;  %v13855_v10 = vld [vmem:[#allocation8 + $0xe4] ss:$16 sps:$4 sm:$0xff]   ;;  %v16214_v15 = vpack.c.bf16 %v3123_v6, %v3115_v49  ;;  %v3706_v6 = vshrl.u32 %v16208_v16, 16  ;;  %v13889_v42 = vld [vmem:[#allocation8 + $0x1a0] ss:$16 sps:$4 sm:$0xff]  }
 0x2ac   :  { %5334 = vmatprep.subr.bf16.mxu1 %v13834_v48  ;;  %7083 = vmatprep.subr.bf16.mxu0 %v13843_v17  ;;  %v16212_v48 = vor.u32 %v3923_v29, %v3895_v14  ;;  %v3708_v17 = vshll.u32 %v16208_v16, 16  ;;  %v3122_v14 = vld [vmem:[#allocation2 + $0x150] sm:$0xff]  ;;  %v3131_v49 = vld [vmem:[#allocation2 + $0x198] sm:$0xff] }
 0x2ad   :  { %5501 = vmatmul.mubr.bf16.gmra.mrb[72].mxu0 %v16203_v0  ;;  %v3805_v58 = vshll.u32 %v16214_v15, 16  ;;  %v16226_v19 = vpack.c.bf16 %v3131_v49, %v3131_v49  ;;  %v13951_v39 = vld [vmem:[#allocation8 + $0x2e4] ss:$16 sps:$4 sm:$0xff]  }
 0x2ae   :  { %5510 = vmatprep.mubr.bf16.mxu0 %v16200_v45  ;;  %16945 = vst [vmem:[#allocation35_spill] sm:$0xff] %v16212_v48  ;;  %v3710_v29 = vrot.slane %v3708_v17, 1  ;;  %v3803_v17 = vor.u32 %v3801_v38, %v16120_v59  ;;  %v13862_v38 = vld [vmem:[#allocation8 + $0xc20] ss:$16 sps:$4 sm:$0xff]   ;;  %v13870_v59 = vld [vmem:[#allocation8 + $0xc44] ss:$16 sps:$4 sm:$0xff]  }
 0x2af   :  { %5335 = vmatpush1.bf16.msra.mxu1 %v13832_v46  ;;  %7084 = vmatpush1.bf16.msra.mxu0 %v13841_v37  ;;  %v13852_v46 = vld [vmem:[#allocation8 + $0xbe4] ss:$16 sps:$4 sm:$0xff]  }
 0x2b0   :  { %5336 = vmatprep.subr.bf16.mxu1 %v13840_v57  ;;  %7085 = vmatprep.subr.bf16.mxu0 %v13849_v1  ;;  %v3713_v57 = vshll.u32 %v16210_v61, 16  ;;  %v13861_v37 = vld [vmem:[#allocation8 + $0x104] ss:$16 sps:$4 sm:$0xff]   ;;  %v13850_v1 = vld [vmem:[#allocation8 + $0xbe0] ss:$16 sps:$4 sm:$0xff]   ;;  %v3711_v33 = vor.u32 %v3710_v29, %v3706_v6  ;;  %v3865_v29 = vshrl.u32 %v16214_v15, 16 }
 0x2b1   :  { %v13879_v6 = vld [vmem:[#allocation8 + $0x164] ss:$16 sps:$4 sm:$0xff]  }
 0x2b3   :  { %5337 = vmatpush1.bf16.msra.mxu1 %v13838_v63  ;;  %7086 = vmatpush1.bf16.msra.mxu0 %v13847_v44  ;;  %v3114_v63 = vld [vmem:[#allocation2 + $0x110] sm:$0xff]  ;;  %v13867_v44 = vld [vmem:[#allocation8 + $0x124] ss:$16 sps:$4 sm:$0xff]  }
 0x2b4   :  { %5338 = vmatprep.subr.bf16.mxu1 %v13846_v7  ;;  %7087 = vmatprep.subr.bf16.mxu0 %v13855_v10  ;;  %v3715_v7 = vrot.slane %v3713_v57, 1  ;;  %v16222_v10 = vpack.c.bf16 %v3122_v14, %v3114_v63  ;;  %v13873_v14 = vld [vmem:[#allocation8 + $0x144] ss:$16 sps:$4 sm:$0xff]  }
 0x2b5   :  { %5511 = vmatmul.mubr.bf16.gmra.mrb[76].mxu0 %v16212_v48  ;;  %v3093_v48 = vld [vmem:[#allocation2 + $0x68] sm:$0xff] }
 0x2b6   :  { %7105 = vmatprep.mubr.bf16.mxu0 %v16016_v30  ;;  %v16229_v57 = vsel %vm193_vm0, %v3711_v33, %v3715_v7  ;;  %v13871_v33 = vld [vmem:[#allocation8 + $0x140] ss:$16 sps:$4 sm:$0xff]  }
 0x2b7   :  { %5339 = vmatpush1.bf16.msra.mxu1 %v13844_v31  ;;  %7088 = vmatpush1.bf16.msra.mxu0 %v13853_v25  ;;  %v3807_v31 = vrot.slane %v3805_v58, 1  ;;  %v13865_v25 = vld [vmem:[#allocation8 + $0x120] ss:$16 sps:$4 sm:$0xff]  }
 0x2b8   :  { %5340 = vmatprep.subr.bf16.mxu1 %v13852_v46  ;;  %7089 = vmatprep.subr.bf16.mxu0 %v13861_v37  ;;  %v13864_v46 = vld [vmem:[#allocation8 + $0xc24] ss:$16 sps:$4 sm:$0xff]   ;;  %v3797_v37 = vshll.u32 %v16222_v10, 16 }
 0x2b9   :  { %v16234_v58 = vsel %vm193_vm0, %v3803_v17, %v3807_v31 }
 0x2ba   :  { %v3799_v63 = vrot.slane %v3797_v37, 1  ;;  %v13885_v37 = vld [vmem:[#allocation8 + $0x184] ss:$16 sps:$4 sm:$0xff]  }
 0x2bb   :  { %5341 = vmatpush1.bf16.msra.mxu1 %v13850_v1  ;;  %7090 = vmatpush1.bf16.msra.mxu0 %v13859_v12  ;;  %v3869_v1 = vshll.u32 %v16226_v19, 16  ;;  %v3793_v12 = vshrl.u32 %v16210_v61, 16 }
 0x2bc   :  { %5379 = vmatprep.subr.bf16.mxu1 %v13858_v3  ;;  %7091 = vmatprep.subr.bf16.mxu0 %v13867_v44  ;;  %v3130_v3 = vld [vmem:[#allocation2 + $0x190] sm:$0xff]  ;;  %v3867_v44 = vor.u32 %v3865_v29, %v3807_v31  ;;  %v13874_v31 = vld [vmem:[#allocation8 + $0xc60] ss:$16 sps:$4 sm:$0xff]   ;;  %v13882_v29 = vld [vmem:[#allocation8 + $0xc84] ss:$16 sps:$4 sm:$0xff]  }
 0x2bd   :  { %v3871_v49 = vrot.slane %v3869_v1, 1  ;;  %v3795_v17 = vor.u32 %v3793_v12, %v3715_v7  ;;  %v16240_v35 = vpack.c.bf16 %v3130_v3, %v3130_v3  ;;  %v3857_v1 = vshrl.u32 %v16222_v10, 16  ;;  %v13883_v3 = vld [vmem:[#allocation8 + $0x180] ss:$16 sps:$4 sm:$0xff]  }
 0x2be   :  { %5343 = vmatmul.mubr.bf16.vlgmr.msra.gmra.mrb[64].mxu1 %v16229_v57 }
 0x2bf   :  { %5352 = vmatprep.mubr.bf16.mxu1 %v16234_v58  ;;  %5380 = vmatpush1.bf16.msra.mxu1 %v13856_v51  ;;  %v13876_v51 = vld [vmem:[#allocation8 + $0xc64] ss:$16 sps:$4 sm:$0xff]   ;;  %v3861_v26 = vshll.u32 %v16240_v35, 16  ;;  %v16248_v7 = vsel %vm193_vm0, %v3867_v44, %v3871_v49 }
 0x2c0   :  { %5381 = vmatprep.subr.bf16.mxu1 %v13864_v46  ;;  %7092 = vmatpush1.bf16.msra.mxu0 %v13865_v25  ;;  %v13877_v46 = vld [vmem:[#allocation8 + $0x160] ss:$16 sps:$4 sm:$0xff]   ;;  %v16243_v25 = vsel %vm193_vm0, %v3795_v17, %v3799_v63  ;;  %v13891_v44 = vld [vmem:[#allocation8 + $0x1a4] ss:$16 sps:$4 sm:$0xff]  }
 0x2c1   :  { %7093 = vmatprep.subr.bf16.mxu0 %v13873_v14  ;;  %v3085_v14 = vld [vmem:[#allocation2 + $0x28] sm:$0xff]  ;;  %v3863_v17 = vrot.slane %v3861_v26, 1  ;;  %v3911_v26 = vshrl.u32 %v16240_v35, 16 }
 0x2c2   :  { %v16253_v12 = vpack.c.bf16 %v3093_v48, %v3085_v14  ;;  %v13897_v48 = vld [vmem:[#allocation8 + $0x1c4] ss:$16 sps:$4 sm:$0xff]   ;;  %v13895_v14 = vld [vmem:[#allocation8 + $0x1c0] ss:$16 sps:$4 sm:$0xff]  }
 0x2c3   :  { %5382 = vmatpush1.bf16.msra.mxu1 %v13862_v38  ;;  %v3914_v38 = vshrl.u32 %v16226_v19, 16 }
 0x2c4   :  { %5383 = vmatprep.subr.bf16.mxu1 %v13870_v59  ;;  %7094 = vmatpush1.bf16.msra.mxu0 %v13871_v33  ;;  %v3101_v59 = vld [vmem:[#allocation2 + $0xa8] sm:$0xff] }
 0x2c5   :  { %7095 = vmatprep.subr.bf16.mxu0 %v13879_v6  ;;  %v3109_v33 = vld [vmem:[#allocation2 + $0xe8] sm:$0xff]  ;;  %v3859_v6 = vor.u32 %v3857_v1, %v3799_v63  ;;  %v16257_v0 = vor.u32 %v3914_v38, %v3871_v49  ;;  %v16267_v38 = vor.u32 %v3911_v26, %v3863_v17 }
 0x2c6   :  { %5353 = vmatmul.mubr.bf16.gmra.mrb[68].mxu1 %v16243_v25  ;;  %v16255_v45 = vpack.c.bf16 %v3109_v33, %v3101_v59  ;;  %v13886_v49 = vld [vmem:[#allocation8 + $0xca0] ss:$16 sps:$4 sm:$0xff]   ;;  %v13903_v1 = vld [vmem:[#allocation8 + $0x1e4] ss:$16 sps:$4 sm:$0xff]   ;;  %v3742_v59 = vshrl.u32 %v16253_v12, 16 }
 0x2c7   :  { %5362 = vmatprep.mubr.bf16.mxu1 %v16248_v7  ;;  %5384 = vmatpush1.bf16.msra.mxu1 %v13868_v20  ;;  %v13880_v20 = vld [vmem:[#allocation8 + $0xc80] ss:$16 sps:$4 sm:$0xff]  }
 0x2c8   :  { %5385 = vmatprep.subr.bf16.mxu1 %v13876_v51  ;;  %7096 = vmatpush1.bf16.msra.mxu0 %v13877_v46  ;;  %v3744_v51 = vshll.u32 %v16253_v12, 16  ;;  %v16261_v46 = vsel %vm193_vm0, %v3859_v6, %v3863_v17  ;;  %v3749_v63 = vshll.u32 %v16255_v45, 16  ;;  %v13900_v6 = vld [vmem:[#allocation8 + $0xce4] ss:$16 sps:$4 sm:$0xff]   ;;  %v13898_v17 = vld [vmem:[#allocation8 + $0xce0] ss:$16 sps:$4 sm:$0xff]  }
 0x2c9   :  { %7097 = vmatprep.subr.bf16.mxu0 %v13885_v37  ;;  %v13894_v37 = vld [vmem:[#allocation8 + $0xcc4] ss:$16 sps:$4 sm:$0xff]   ;;  %v13904_v26 = vld [vmem:[#allocation8 + $0xd00] ss:$16 sps:$4 sm:$0xff]  }
 0x2ca   :  { %v16270_v33 = vrot.slane %v3749_v63, 1  ;;  %v13912_v63 = vld [vmem:[#allocation8 + $0xd24] ss:$16 sps:$4 sm:$0xff]  }
 0x2cb   :  { %5386 = vmatpush1.bf16.msra.mxu1 %v13874_v31  ;;  %v3746_v31 = vrot.slane %v3744_v51, 1  ;;  %v13907_v51 = vld [vmem:[#allocation8 + $0x200] ss:$16 sps:$4 sm:$0xff]  }
 0x2cc   :  { %5387 = vmatprep.subr.bf16.mxu1 %v13882_v29  ;;  %7098 = vmatpush1.bf16.msra.mxu0 %v13883_v3  ;;  %v13892_v29 = vld [vmem:[#allocation8 + $0xcc0] ss:$16 sps:$4 sm:$0xff]  }
 0x2cd   :  { %7099 = vmatprep.subr.bf16.mxu0 %v13891_v44  ;;  %v3747_v3 = vor.u32 %v3746_v31, %v3742_v59  ;;  %v13901_v44 = vld [vmem:[#allocation8 + $0x1e0] ss:$16 sps:$4 sm:$0xff]   ;;  %v13918_v31 = vld [vmem:[#allocation8 + $0xd44] ss:$16 sps:$4 sm:$0xff]  }
 0x2ce   :  { %5363 = vmatmul.mubr.bf16.gmra.mrb[72].mxu1 %v16261_v46  ;;  %v13927_v59 = vld [vmem:[#allocation8 + $0x264] ss:$16 sps:$4 sm:$0xff]  }
 0x2cf   :  { %5388 = vmatpush1.bf16.msra.mxu1 %v13880_v20  ;;  %5372 = vmatprep.mubr.bf16.mxu1 %v16257_v0  ;;  %v13906_v20 = vld [vmem:[#allocation8 + $0xd04] ss:$16 sps:$4 sm:$0xff]  }
 0x2d0   :  { %5389 = vmatprep.subr.bf16.mxu1 %v13888_v9  ;;  %7100 = vmatpush1.bf16.msra.mxu0 %v13889_v42  ;;  %v13909_v42 = vld [vmem:[#allocation8 + $0x204] ss:$16 sps:$4 sm:$0xff]   ;;  %v16275_v9 = vsel %vm193_vm0, %v3747_v3, %v16270_v33 }
 0x2d1   :  { %7101 = vmatprep.subr.bf16.mxu0 %v13897_v48  ;;  %v13915_v48 = vld [vmem:[#allocation8 + $0x224] ss:$16 sps:$4 sm:$0xff]  }
 0x2d2   :  { %v13924_v3 = vld [vmem:[#allocation8 + $0xd64] ss:$16 sps:$4 sm:$0xff]  }
 0x2d3   :  { %5390 = vmatpush1.bf16.msra.mxu1 %v13886_v49  ;;  %v13913_v49 = vld [vmem:[#allocation8 + $0x220] ss:$16 sps:$4 sm:$0xff]  }
 0x2d4   :  { %5391 = vmatprep.subr.bf16.mxu1 %v13894_v37  ;;  %7102 = vmatpush1.bf16.msra.mxu0 %v13895_v14  ;;  %v13921_v37 = vld [vmem:[#allocation8 + $0x244] ss:$16 sps:$4 sm:$0xff]   ;;  %v13910_v14 = vld [vmem:[#allocation8 + $0xd20] ss:$16 sps:$4 sm:$0xff]  }
 0x2d5   :  { %7103 = vmatprep.subr.bf16.mxu0 %v13903_v1  ;;  %v13919_v1 = vld [vmem:[#allocation8 + $0x240] ss:$16 sps:$4 sm:$0xff]  }
 0x2d6   :  { %5373 = vmatmul.mubr.bf16.gmra.mrb[80].mxu1 %v16267_v38 }
 0x2d7   :  { %5392 = vmatpush1.bf16.msra.mxu1 %v13892_v29  ;;  %5411 = vmatprep.mubr.bf16.mxu1 %v16275_v9  ;;  %v13916_v29 = vld [vmem:[#allocation8 + $0xd40] ss:$16 sps:$4 sm:$0xff]  }
 0x2d8   :  { %5393 = vmatprep.subr.bf16.mxu1 %v13900_v6  ;;  %7104 = vmatpush1.bf16.msra.mxu0 %v13901_v44  ;;  %v13925_v6 = vld [vmem:[#allocation8 + $0x260] ss:$16 sps:$4 sm:$0xff]   ;;  %v13933_v44 = vld [vmem:[#allocation8 + $0x284] ss:$16 sps:$4 sm:$0xff]  }
 0x2d9   :  { %7142 = vmatprep.subr.bf16.mxu0 %v13909_v42  ;;  %v13922_v42 = vld [vmem:[#allocation8 + $0xd60] ss:$16 sps:$4 sm:$0xff]  }
 0x2db   :  { %5394 = vmatpush1.bf16.msra.mxu1 %v13898_v17  ;;  %7106 = vmatmul.mubr.bf16.vlgmr.msra.gmra.mrb[64].mxu0 %v16019_v47  ;;  %v13930_v17 = vld [vmem:[#allocation8 + $0xd84] ss:$16 sps:$4 sm:$0xff]   ;;  %v13952_v47 = vld [vmem:[#allocation8 + $0x808] ss:$16 sps:$4 sm:$0xff]  }
 0x2dc   :  { %5395 = vmatprep.subr.bf16.mxu1 %v13906_v20  ;;  %7115 = vmatprep.mubr.bf16.mxu0 %v16026_v2  ;;  %v13931_v20 = vld [vmem:[#allocation8 + $0x280] ss:$16 sps:$4 sm:$0xff]  }
 0x2dd   :  { %7143 = vmatpush1.bf16.msra.mxu0 %v13907_v51  ;;  %v13939_v51 = vld [vmem:[#allocation8 + $0x2a4] ss:$16 sps:$4 sm:$0xff]  }
 0x2de   :  { %7144 = vmatprep.subr.bf16.mxu0 %v13915_v48  ;;  %v13928_v48 = vld [vmem:[#allocation8 + $0xd80] ss:$16 sps:$4 sm:$0xff]  }
 0x2df   :  { %5396 = vmatpush1.bf16.msra.mxu1 %v13904_v26  ;;  %v13936_v26 = vld [vmem:[#allocation8 + $0xda4] ss:$16 sps:$4 sm:$0xff]  }
 0x2e0   :  { %5397 = vmatprep.subr.bf16.mxu1 %v13912_v63  ;;  %v3084_v63 = vld [vmem:[#allocation2 + $0x20] sm:$0xff] }
 0x2e1   :  { %7145 = vmatpush1.bf16.msra.mxu0 %v13913_v49  ;;  %v3092_v49 = vld [vmem:[#allocation2 + $0x60] sm:$0xff] }
 0x2e2   :  { %7146 = vmatprep.subr.bf16.mxu0 %v13921_v37  ;;  %v13937_v37 = vld [vmem:[#allocation8 + $0x2a0] ss:$16 sps:$4 sm:$0xff]  }
 0x2e3   :  { %5398 = vmatpush1.bf16.msra.mxu1 %v13910_v14  ;;  %7116 = vmatmul.mubr.bf16.gmra.mrb[68].mxu0 %v16028_v43  ;;  %v13945_v14 = vld [vmem:[#allocation8 + $0x2c4] ss:$16 sps:$4 sm:$0xff]   ;;  %v13964_v43 = vld [vmem:[#allocation8 + $0x848] ss:$16 sps:$4 sm:$0xff]  }
 0x2e4   :  { %5399 = vmatprep.subr.bf16.mxu1 %v13918_v31  ;;  %7125 = vmatprep.mubr.bf16.mxu0 %v16063_v18  ;;  %v3100_v31 = vld [vmem:[#allocation2 + $0xa0] sm:$0xff] }
 0x2e5   :  { %7147 = vmatpush1.bf16.msra.mxu0 %v13919_v1  ;;  %v3108_v1 = vld [vmem:[#allocation2 + $0xe0] sm:$0xff] }
 0x2e6   :  { %7148 = vmatprep.subr.bf16.mxu0 %v13927_v59  ;;  %v13934_v59 = vld [vmem:[#allocation8 + $0xda0] ss:$16 sps:$4 sm:$0xff]  }
 0x2e7   :  { %5400 = vmatpush1.bf16.msra.mxu1 %v13916_v29  ;;  %v16284_v29 = vpack.c.bf16 %v3092_v49, %v3084_v63  ;;  %v13949_v63 = vld [vmem:[#allocation8 + $0x2e0] ss:$16 sps:$4 sm:$0xff]  }
 0x2e8   :  { %5401 = vmatprep.subr.bf16.mxu1 %v13924_v3  ;;  %v3125_v3 = vld [vmem:[#allocation2 + $0x168] sm:$0xff] }
 0x2e9   :  { %7149 = vmatpush1.bf16.msra.mxu0 %v13925_v6  ;;  %v13942_v6 = vld [vmem:[#allocation8 + $0xdc4] ss:$16 sps:$4 sm:$0xff]  }
 0x2ea   :  { %7150 = vmatprep.subr.bf16.mxu0 %v13933_v44  ;;  %v13943_v44 = vld [vmem:[#allocation8 + $0x2c0] ss:$16 sps:$4 sm:$0xff]  }
 0x2eb   :  { %5402 = vmatpush1.bf16.msra.mxu1 %v13922_v42  ;;  %7126 = vmatmul.mubr.bf16.gmra.mrb[72].mxu0 %v16068_v28  ;;  %v16286_v42 = vpack.c.bf16 %v3108_v1, %v3100_v31  ;;  %v3124_v31 = vld [vmem:[#allocation2 + $0x160] sm:$0xff]  ;;  %v13946_v1 = vld [vmem:[#allocation8 + $0xde0] ss:$16 sps:$4 sm:$0xff]   ;;  %v13963_v28 = vld [vmem:[#allocation8 + $0x324] ss:$16 sps:$4 sm:$0xff]  }
 0x2ec   :  { %5403 = vmatprep.subr.bf16.mxu1 %v13930_v17  ;;  %7135 = vmatprep.mubr.bf16.mxu0 %v15968_v55  ;;  %v3117_v17 = vld [vmem:[#allocation2 + $0x128] sm:$0xff] }
 0x2ed   :  { %7151 = vmatpush1.bf16.msra.mxu0 %v13931_v20  ;;  %v16288_v20 = vpack.c.bf16 %v3125_v3, %v3117_v17  ;;  %v3737_v49 = vshll.u32 %v16286_v42, 16  ;;  %v13954_v3 = vld [vmem:[#allocation8 + $0x80c] ss:$16 sps:$4 sm:$0xff]  }
 0x2ee   :  { %7152 = vmatprep.subr.bf16.mxu0 %v13939_v51  ;;  %v13940_v51 = vld [vmem:[#allocation8 + $0xdc0] ss:$16 sps:$4 sm:$0xff]   ;;  %v3116_v17 = vld [vmem:[#allocation2 + $0x120] sm:$0xff] }
 0x2ef   :  { %5404 = vmatpush1.bf16.msra.mxu1 %v13928_v48  ;;  %v3732_v48 = vshll.u32 %v16284_v29, 16  ;;  %v3739_v54 = vrot.slane %v3737_v49, 1 }
 0x2f0   :  { %5405 = vmatprep.subr.bf16.mxu1 %v13936_v26  ;;  %v13948_v26 = vld [vmem:[#allocation8 + $0xde4] ss:$16 sps:$4 sm:$0xff]  }
 0x2f1   :  { %7153 = vmatpush1.bf16.msra.mxu0 %v13937_v37  ;;  %v13957_v37 = vld [vmem:[#allocation8 + $0x304] ss:$16 sps:$4 sm:$0xff]  }
 0x2f2   :  { %7154 = vmatprep.subr.bf16.mxu0 %v13945_v14  ;;  %v3821_v14 = vshll.u32 %v16288_v20, 16 }
 0x2f3   :  { %5406 = vmatpush1.bf16.msra.mxu1 %v13934_v59  ;;  %7136 = vmatmul.mubr.bf16.gmra.mrb[80].mxu0 %v15972_v5  ;;  %v3734_v59 = vrot.slane %v3732_v48, 1  ;;  %v3133_v5 = vld [vmem:[#allocation2 + $0x1a8] sm:$0xff] }
 0x2f4   :  { %5407 = vmatprep.subr.bf16.mxu1 %v13942_v6  ;;  %7174 = vmatprep.mubr.bf16.mxu0 %v16036_v24  ;;  %v3730_v6 = vshrl.u32 %v16284_v29, 16  ;;  %v13955_v24 = vld [vmem:[#allocation8 + $0x300] ss:$16 sps:$4 sm:$0xff]   ;;  %v3823_v55 = vrot.slane %v3821_v14, 1 }
 0x2f5   :  { %7155 = vmatpush1.bf16.msra.mxu0 %v13943_v44  ;;  %v16296_v44 = vpack.c.bf16 %v3124_v31, %v3116_v17  ;;  %v13961_v31 = vld [vmem:[#allocation8 + $0x320] ss:$16 sps:$4 sm:$0xff]   ;;  %v3809_v17 = vshrl.u32 %v16286_v42, 16 }
 0x2f6   :  { %7156 = vmatprep.subr.bf16.mxu0 %v13951_v39  ;;  %v3817_v39 = vshrl.u32 %v16255_v45, 16 }
 0x2f7   :  { %5408 = vmatpush1.bf16.msra.mxu1 %v13940_v51  ;;  %v3735_v51 = vor.u32 %v3734_v59, %v3730_v6  ;;  %v3811_v18 = vor.u32 %v3809_v17, %v3739_v54  ;;  %v13976_v17 = vld [vmem:[#allocation8 + $0x888] ss:$16 sps:$4 sm:$0xff]  }
 0x2f8   :  { %5409 = vmatprep.subr.bf16.mxu1 %v13948_v26  ;;  %v3819_v48 = vor.u32 %v3817_v39, %v16270_v33  ;;  %v13960_v26 = vld [vmem:[#allocation8 + $0x82c] ss:$16 sps:$4 sm:$0xff]   ;;  %v13967_v39 = vld [vmem:[#allocation8 + $0x340] ss:$16 sps:$4 sm:$0xff]  }
 0x2f9   :  { %7157 = vmatpush1.bf16.msra.mxu0 %v13949_v63  ;;  %v16300_v63 = vpack.c.bf16 %v3133_v5, %v3133_v5  ;;  %v16303_v49 = vsel %vm193_vm0, %v3735_v51, %v3739_v54  ;;  %v13958_v5 = vld [vmem:[#allocation8 + $0x828] ss:$16 sps:$4 sm:$0xff]   ;;  %v13966_v33 = vld [vmem:[#allocation8 + $0x84c] ss:$16 sps:$4 sm:$0xff]  }
 0x2fa   :  { %7158 = vmatprep.subr.bf16.mxu0 %v13957_v37  ;;  %v3813_v37 = vshll.u32 %v16296_v44, 16  ;;  %v16308_v14 = vsel %vm193_vm0, %v3819_v48, %v3823_v55  ;;  %v13975_v48 = vld [vmem:[#allocation8 + $0x364] ss:$16 sps:$4 sm:$0xff]   ;;  %v13970_v54 = vld [vmem:[#allocation8 + $0x868] ss:$16 sps:$4 sm:$0xff]  }
 0x2fb   :  { %5410 = vmatpush1.bf16.msra.mxu1 %v13946_v1  ;;  %16946 = vst [vmem:[#allocation36_spill] sm:$0xff] %v16308_v14  ;;  %v13969_v1 = vld [vmem:[#allocation8 + $0x344] ss:$16 sps:$4 sm:$0xff]   ;;  %v3885_v59 = vshll.u32 %v16300_v63, 16 }
 0x2fc   :  { %5517 = vmatprep.subr.bf16.mxu1 %v13954_v3  ;;  %v3132_v3 = vld [vmem:[#allocation2 + $0x1a0] sm:$0xff]  ;;  %v3815_v6 = vrot.slane %v3813_v37, 1  ;;  %v13981_v37 = vld [vmem:[#allocation8 + $0x384] ss:$16 sps:$4 sm:$0xff]  }
 0x2fd   :  { %7159 = vmatpush1.bf16.msra.mxu0 %v13955_v24  ;;  %v3881_v24 = vshrl.u32 %v16288_v20, 16  ;;  %v16314_v22 = vpack.c.bf16 %v3132_v3, %v3132_v3  ;;  %v13987_v3 = vld [vmem:[#allocation8 + $0x3a4] ss:$16 sps:$4 sm:$0xff]  }
 0x2fe   :  { %5412 = vmatmul.mubr.bf16.vlgmr.msra.gmra.mrb[64].mxu1 %v16303_v49  ;;  %7160 = vmatprep.subr.bf16.mxu0 %v13963_v28  ;;  %v3887_v28 = vrot.slane %v3885_v59, 1  ;;  %v13978_v59 = vld [vmem:[#allocation8 + $0x88c] ss:$16 sps:$4 sm:$0xff]  }
 0x2ff   :  { %5421 = vmatprep.mubr.bf16.mxu1 %v16308_v14  ;;  %5518 = vmatpush1.bf16.msra.mxu1 %v13952_v47  ;;  %v3883_v51 = vor.u32 %v3881_v24, %v3823_v55  ;;  %v13972_v47 = vld [vmem:[#allocation8 + $0x86c] ss:$16 sps:$4 sm:$0xff]   ;;  %v3877_v14 = vshll.u32 %v16314_v22, 16  ;;  %v13979_v24 = vld [vmem:[#allocation8 + $0x380] ss:$16 sps:$4 sm:$0xff]  }
 0x300   :  { %5519 = vmatprep.subr.bf16.mxu1 %v13960_v26  ;;  %v16317_v26 = vsel %vm193_vm0, %v3811_v18, %v3815_v6  ;;  %v3920_v18 = vshrl.u32 %v16300_v63, 16 }
 0x301   :  { %7161 = vmatpush1.bf16.msra.mxu0 %v13961_v31  ;;  %v13973_v31 = vld [vmem:[#allocation8 + $0x360] ss:$16 sps:$4 sm:$0xff]   ;;  %v16322_v55 = vsel %vm193_vm0, %v3883_v51, %v3887_v28  ;;  %v13984_v51 = vld [vmem:[#allocation8 + $0x8ac] ss:$16 sps:$4 sm:$0xff]  }
 0x302   :  { %7162 = vmatprep.subr.bf16.mxu0 %v13969_v1  ;;  %v3873_v1 = vshrl.u32 %v16296_v44, 16 }
 0x303   :  { %5520 = vmatpush1.bf16.msra.mxu1 %v13958_v5 }
 0x304   :  { %5521 = vmatprep.subr.bf16.mxu1 %v13966_v33  ;;  %v3875_v5 = vor.u32 %v3873_v1, %v3815_v6  ;;  %v3879_v33 = vrot.slane %v3877_v14, 1  ;;  %v3917_v6 = vshrl.u32 %v16314_v22, 16  ;;  %v13993_v14 = vld [vmem:[#allocation8 + $0x3c4] ss:$16 sps:$4 sm:$0xff]   ;;  %v13988_v1 = vld [vmem:[#allocation8 + $0x8c8] ss:$16 sps:$4 sm:$0xff]  }
 0x305   :  { %7163 = vmatpush1.bf16.msra.mxu0 %v13967_v39  ;;  %v16327_v39 = vor.u32 %v3920_v18, %v3887_v28  ;;  %v13990_v28 = vld [vmem:[#allocation8 + $0x8cc] ss:$16 sps:$4 sm:$0xff]  }
 0x306   :  { %5422 = vmatmul.mubr.bf16.gmra.mrb[68].mxu1 %v16317_v26  ;;  %7164 = vmatprep.subr.bf16.mxu0 %v13975_v48  ;;  %v13985_v48 = vld [vmem:[#allocation8 + $0x3a0] ss:$16 sps:$4 sm:$0xff]   ;;  %v13996_v18 = vld [vmem:[#allocation8 + $0x8ec] ss:$16 sps:$4 sm:$0xff]  }
 0x307   :  { %5431 = vmatprep.mubr.bf16.mxu1 %v16322_v55  ;;  %5522 = vmatpush1.bf16.msra.mxu1 %v13964_v43  ;;  %v16330_v43 = vsel %vm193_vm0, %v3875_v5, %v3879_v33  ;;  %v14005_v5 = vld [vmem:[#allocation8 + $0x404] ss:$16 sps:$4 sm:$0xff]  }
 0x308   :  { %5523 = vmatprep.subr.bf16.mxu1 %v13972_v47  ;;  %v13982_v47 = vld [vmem:[#allocation8 + $0x8a8] ss:$16 sps:$4 sm:$0xff]  }
 0x309   :  { %7165 = vmatpush1.bf16.msra.mxu0 %v13973_v31  ;;  %v13991_v31 = vld [vmem:[#allocation8 + $0x3c0] ss:$16 sps:$4 sm:$0xff]  }
 0x30a   :  { %7166 = vmatprep.subr.bf16.mxu0 %v13981_v37  ;;  %v16335_v37 = vor.u32 %v3917_v6, %v3879_v33  ;;  %v14003_v33 = vld [vmem:[#allocation8 + $0x400] ss:$16 sps:$4 sm:$0xff]  }
 0x30b   :  { %5524 = vmatpush1.bf16.msra.mxu1 %v13970_v54  ;;  %v13999_v54 = vld [vmem:[#allocation8 + $0x3e4] ss:$16 sps:$4 sm:$0xff]   ;;  %v14009_v6 = vld [vmem:[#allocation8 + $0x420] ss:$16 sps:$4 sm:$0xff]  }
 0x30c   :  { %5525 = vmatprep.subr.bf16.mxu1 %v13978_v59  ;;  %v13997_v59 = vld [vmem:[#allocation8 + $0x3e0] ss:$16 sps:$4 sm:$0xff]  }
 0x30d   :  { %7167 = vmatpush1.bf16.msra.mxu0 %v13979_v24  ;;  %v13994_v24 = vld [vmem:[#allocation8 + $0x8e8] ss:$16 sps:$4 sm:$0xff]  }
 0x30e   :  { %5432 = vmatmul.mubr.bf16.gmra.mrb[72].mxu1 %v16330_v43  ;;  %7168 = vmatprep.subr.bf16.mxu0 %v13987_v3  ;;  %v14002_v3 = vld [vmem:[#allocation8 + $0x90c] ss:$16 sps:$4 sm:$0xff]  }
 0x30f   :  { %5526 = vmatpush1.bf16.msra.mxu1 %v13976_v17  ;;  %5441 = vmatprep.mubr.bf16.mxu1 %v16327_v39  ;;  %v14011_v17 = vld [vmem:[#allocation8 + $0x424] ss:$16 sps:$4 sm:$0xff]  }
 0x310   :  { %5527 = vmatprep.subr.bf16.mxu1 %v13984_v51  ;;  %v14000_v51 = vld [vmem:[#allocation8 + $0x908] ss:$16 sps:$4 sm:$0xff]  }
 0x311   :  { %7169 = vmatpush1.bf16.msra.mxu0 %v13985_v48  ;;  %v14008_v48 = vld [vmem:[#allocation8 + $0x92c] ss:$16 sps:$4 sm:$0xff]  }
 0x312   :  { %7170 = vmatprep.subr.bf16.mxu0 %v13993_v14  ;;  %v14017_v14 = vld [vmem:[#allocation8 + $0x444] ss:$16 sps:$4 sm:$0xff]  }
 0x313   :  { %5528 = vmatpush1.bf16.msra.mxu1 %v13982_v47  ;;  %v14014_v47 = vld [vmem:[#allocation8 + $0x94c] ss:$16 sps:$4 sm:$0xff]  }
 0x314   :  { %5529 = vmatprep.subr.bf16.mxu1 %v13990_v28  ;;  %v14015_v28 = vld [vmem:[#allocation8 + $0x440] ss:$16 sps:$4 sm:$0xff]  }
 0x315   :  { %7171 = vmatpush1.bf16.msra.mxu0 %v13991_v31  ;;  %v14023_v31 = vld [vmem:[#allocation8 + $0x464] ss:$16 sps:$4 sm:$0xff]  }
 0x316   :  { %5442 = vmatmul.mubr.bf16.gmra.mrb[84].mxu1 %v16335_v37  ;;  %7172 = vmatprep.subr.bf16.mxu0 %v13999_v54  ;;  %v14012_v54 = vld [vmem:[#allocation8 + $0x948] ss:$16 sps:$4 sm:$0xff]  }
 0x317   :  { %5530 = vmatpush1.bf16.msra.mxu1 %v13988_v1  ;;  %5549 = vmatprep.mubr.bf16.mxu1 %v16044_v60  ;;  %v14006_v60 = vld [vmem:[#allocation8 + $0x928] ss:$16 sps:$4 sm:$0xff]   ;;  %v14020_v1 = vld [vmem:[#allocation8 + $0x96c] ss:$16 sps:$4 sm:$0xff]  }
 0x318   :  { %5531 = vmatprep.subr.bf16.mxu1 %v13996_v18  ;;  %v14021_v18 = vld [vmem:[#allocation8 + $0x460] ss:$16 sps:$4 sm:$0xff]  }
 0x319   :  { %7173 = vmatpush1.bf16.msra.mxu0 %v13997_v59  ;;  %v14029_v59 = vld [vmem:[#allocation8 + $0x484] ss:$16 sps:$4 sm:$0xff]  }
 0x31a   :  { %7211 = vmatprep.subr.bf16.mxu0 %v14005_v5  ;;  %v14018_v5 = vld [vmem:[#allocation8 + $0x968] ss:$16 sps:$4 sm:$0xff]  }
 0x31b   :  { %5532 = vmatpush1.bf16.msra.mxu1 %v13994_v24  ;;  %v14026_v24 = vld [vmem:[#allocation8 + $0x98c] ss:$16 sps:$4 sm:$0xff]  }
 0x31c   :  { %5533 = vmatprep.subr.bf16.mxu1 %v14002_v3  ;;  %7175 = vmatmul.mubr.bf16.vlgmr.msra.gmra.mrb[64].mxu0 %v16208_v16  ;;  %v14027_v3 = vld [vmem:[#allocation8 + $0x480] ss:$16 sps:$4 sm:$0xff]  }
 0x31d   :  { %7184 = vmatprep.mubr.bf16.mxu0 %v16039_v52  ;;  %7212 = vmatpush1.bf16.msra.mxu0 %v14003_v33  ;;  %v14035_v33 = vld [vmem:[#allocation8 + $0x4a4] ss:$16 sps:$4 sm:$0xff]  }
 0x31e   :  { %7213 = vmatprep.subr.bf16.mxu0 %v14011_v17  ;;  %v14024_v17 = vld [vmem:[#allocation8 + $0x988] ss:$16 sps:$4 sm:$0xff]  }
 0x31f   :  { %5534 = vmatpush1.bf16.msra.mxu1 %v14000_v51  ;;  %v14032_v51 = vld [vmem:[#allocation8 + $0x9ac] ss:$16 sps:$4 sm:$0xff]  }
 0x320   :  { %5535 = vmatprep.subr.bf16.mxu1 %v14008_v48  ;;  %v14033_v48 = vld [vmem:[#allocation8 + $0x4a0] ss:$16 sps:$4 sm:$0xff]  }
 0x321   :  { %7214 = vmatpush1.bf16.msra.mxu0 %v14009_v6  ;;  %v14041_v6 = vld [vmem:[#allocation8 + $0x4c4] ss:$16 sps:$4 sm:$0xff]  }
 0x322   :  { %7215 = vmatprep.subr.bf16.mxu0 %v14017_v14  ;;  %v14030_v14 = vld [vmem:[#allocation8 + $0x9a8] ss:$16 sps:$4 sm:$0xff]  }
 0x323   :  { %5536 = vmatpush1.bf16.msra.mxu1 %v14006_v60  ;;  %v14038_v60 = vld [vmem:[#allocation8 + $0x9cc] ss:$16 sps:$4 sm:$0xff]  }
 0x324   :  { %5537 = vmatprep.subr.bf16.mxu1 %v14014_v47  ;;  %7185 = vmatmul.mubr.bf16.gmra.mrb[68].mxu0 %v16210_v61  ;;  %v14039_v47 = vld [vmem:[#allocation8 + $0x4c0] ss:$16 sps:$4 sm:$0xff]  }
 0x325   :  { %7194 = vmatprep.mubr.bf16.mxu0 %v16214_v15  ;;  %7216 = vmatpush1.bf16.msra.mxu0 %v14015_v28  ;;  %v14047_v28 = vld [vmem:[#allocation8 + $0x4e4] ss:$16 sps:$4 sm:$0xff]  }
 0x326   :  { %7217 = vmatprep.subr.bf16.mxu0 %v14023_v31  ;;  %v14036_v31 = vld [vmem:[#allocation8 + $0x9c8] ss:$16 sps:$4 sm:$0xff]  }
 0x327   :  { %5538 = vmatpush1.bf16.msra.mxu1 %v14012_v54  ;;  %v14044_v54 = vld [vmem:[#allocation8 + $0x9ec] ss:$16 sps:$4 sm:$0xff]  }
 0x328   :  { %5539 = vmatprep.subr.bf16.mxu1 %v14020_v1  ;;  %v14045_v1 = vld [vmem:[#allocation8 + $0x4e0] ss:$16 sps:$4 sm:$0xff]  }
 0x329   :  { %7218 = vmatpush1.bf16.msra.mxu0 %v14021_v18  ;;  %v14053_v18 = vld [vmem:[#allocation8 + $0x504] ss:$16 sps:$4 sm:$0xff]  }
 0x32a   :  { %7219 = vmatprep.subr.bf16.mxu0 %v14029_v59  ;;  %v14042_v59 = vld [vmem:[#allocation8 + $0x9e8] ss:$16 sps:$4 sm:$0xff]  }
 0x32b   :  { %5540 = vmatpush1.bf16.msra.mxu1 %v14018_v5  ;;  %v14050_v5 = vld [vmem:[#allocation8 + $0xa0c] ss:$16 sps:$4 sm:$0xff]  }
 0x32c   :  { %5541 = vmatprep.subr.bf16.mxu1 %v14026_v24  ;;  %7195 = vmatmul.mubr.bf16.gmra.mrb[72].mxu0 %v16222_v10  ;;  %v14051_v24 = vld [vmem:[#allocation8 + $0x500] ss:$16 sps:$4 sm:$0xff]  }
 0x32d   :  { %7220 = vmatpush1.bf16.msra.mxu0 %v14027_v3  ;;  %7204 = vmatprep.mubr.bf16.mxu0 %v16226_v19  ;;  %v14059_v3 = vld [vmem:[#allocation8 + $0x524] ss:$16 sps:$4 sm:$0xff]  }
 0x32e   :  { %7221 = vmatprep.subr.bf16.mxu0 %v14035_v33  ;;  %v14048_v33 = vld [vmem:[#allocation8 + $0xa08] ss:$16 sps:$4 sm:$0xff]  }
 0x32f   :  { %5542 = vmatpush1.bf16.msra.mxu1 %v14024_v17  ;;  %v14056_v17 = vld [vmem:[#allocation8 + $0xa2c] ss:$16 sps:$4 sm:$0xff]  }
 0x330   :  { %5543 = vmatprep.subr.bf16.mxu1 %v14032_v51  ;;  %v14057_v51 = vld [vmem:[#allocation8 + $0x520] ss:$16 sps:$4 sm:$0xff]  }
 0x331   :  { %7222 = vmatpush1.bf16.msra.mxu0 %v14033_v48  ;;  %v14065_v48 = vld [vmem:[#allocation8 + $0x544] ss:$16 sps:$4 sm:$0xff]  }
 0x332   :  { %7223 = vmatprep.subr.bf16.mxu0 %v14041_v6  ;;  %v14054_v6 = vld [vmem:[#allocation8 + $0xa28] ss:$16 sps:$4 sm:$0xff]  }
 0x333   :  { %5544 = vmatpush1.bf16.msra.mxu1 %v14030_v14  ;;  %v14062_v14 = vld [vmem:[#allocation8 + $0xa4c] ss:$16 sps:$4 sm:$0xff]  }
 0x334   :  { %5545 = vmatprep.subr.bf16.mxu1 %v14038_v60  ;;  %7205 = vmatmul.mubr.bf16.gmra.mrb[84].mxu0 %v16240_v35  ;;  %v14063_v60 = vld [vmem:[#allocation8 + $0x540] ss:$16 sps:$4 sm:$0xff]  }
 0x335   :  { %7224 = vmatpush1.bf16.msra.mxu0 %v14039_v47  ;;  %7243 = vmatprep.mubr.bf16.mxu0 %v16253_v12  ;;  %v14071_v47 = vld [vmem:[#allocation8 + $0x564] ss:$16 sps:$4 sm:$0xff]  }
 0x336   :  { %7225 = vmatprep.subr.bf16.mxu0 %v14047_v28  ;;  %v14060_v28 = vld [vmem:[#allocation8 + $0xa48] ss:$16 sps:$4 sm:$0xff]  }
 0x337   :  { %5546 = vmatpush1.bf16.msra.mxu1 %v14036_v31  ;;  %v14068_v31 = vld [vmem:[#allocation8 + $0xa6c] ss:$16 sps:$4 sm:$0xff]  }
 0x338   :  { %5547 = vmatprep.subr.bf16.mxu1 %v14044_v54  ;;  %v14069_v54 = vld [vmem:[#allocation8 + $0x560] ss:$16 sps:$4 sm:$0xff]  }
 0x339   :  { %7226 = vmatpush1.bf16.msra.mxu0 %v14045_v1  ;;  %v14074_v1 = vld [vmem:[#allocation8 + $0xa8c] ss:$16 sps:$4 sm:$0xff]  }
 0x33a   :  { %7227 = vmatprep.subr.bf16.mxu0 %v14053_v18  ;;  %v14075_v18 = vld [vmem:[#allocation8 + $0x580] ss:$16 sps:$4 sm:$0xff]  }
 0x33b   :  { %5548 = vmatpush1.bf16.msra.mxu1 %v14042_v59  ;;  %v14083_v59 = vld [vmem:[#allocation8 + $0x5a4] ss:$16 sps:$4 sm:$0xff]  }
 0x33c   :  { %5586 = vmatprep.subr.bf16.mxu1 %v14050_v5  ;;  %v14072_v5 = vld [vmem:[#allocation8 + $0xa88] ss:$16 sps:$4 sm:$0xff]  }
 0x33d   :  { %7228 = vmatpush1.bf16.msra.mxu0 %v14051_v24  ;;  %v14080_v24 = vld [vmem:[#allocation8 + $0xaac] ss:$16 sps:$4 sm:$0xff]  }
 0x33e   :  { %5550 = vmatmul.mubr.bf16.vlgmr.msra.gmra.mrb[88].mxu1 %v16061_v56  ;;  %7229 = vmatprep.subr.bf16.mxu0 %v14059_v3  ;;  %v14077_v56 = vld [vmem:[#allocation8 + $0x584] ss:$16 sps:$4 sm:$0xff]   ;;  %v14081_v3 = vld [vmem:[#allocation8 + $0x5a0] ss:$16 sps:$4 sm:$0xff]  }
 0x33f   :  { %5559 = vmatprep.mubr.bf16.mxu1 %v16084_v13  ;;  %5587 = vmatpush1.bf16.msra.mxu1 %v14048_v33  ;;  %v14066_v13 = vld [vmem:[#allocation8 + $0xa68] ss:$16 sps:$4 sm:$0xff]   ;;  %v14086_v33 = vld [vmem:[#allocation8 + $0xacc] ss:$16 sps:$4 sm:$0xff]  }
 0x340   :  { %5588 = vmatprep.subr.bf16.mxu1 %v14056_v17  ;;  %v14087_v17 = vld [vmem:[#allocation8 + $0x5c0] ss:$16 sps:$4 sm:$0xff]  }
 0x341   :  { %7230 = vmatpush1.bf16.msra.mxu0 %v14057_v51  ;;  %v14095_v51 = vld [vmem:[#allocation8 + $0x5e4] ss:$16 sps:$4 sm:$0xff]  }
 0x342   :  { %7231 = vmatprep.subr.bf16.mxu0 %v14065_v48  ;;  %v14084_v48 = vld [vmem:[#allocation8 + $0xac8] ss:$16 sps:$4 sm:$0xff]  }
 0x343   :  { %5589 = vmatpush1.bf16.msra.mxu1 %v14054_v6  ;;  %v14092_v6 = vld [vmem:[#allocation8 + $0xaec] ss:$16 sps:$4 sm:$0xff]  }
 0x344   :  { %5590 = vmatprep.subr.bf16.mxu1 %v14062_v14  ;;  %v14093_v14 = vld [vmem:[#allocation8 + $0x5e0] ss:$16 sps:$4 sm:$0xff]  }
 0x345   :  { %7232 = vmatpush1.bf16.msra.mxu0 %v14063_v60  ;;  %v14098_v60 = vld [vmem:[#allocation8 + $0xb0c] ss:$16 sps:$4 sm:$0xff]  }
 0x346   :  { %5560 = vmatmul.mubr.bf16.gmra.mrb[92].mxu1 %v16088_v34  ;;  %7233 = vmatprep.subr.bf16.mxu0 %v14071_v47  ;;  %v14089_v34 = vld [vmem:[#allocation8 + $0x5c4] ss:$16 sps:$4 sm:$0xff]   ;;  %v14099_v47 = vld [vmem:[#allocation8 + $0x600] ss:$16 sps:$4 sm:$0xff]  }
 0x347   :  { %5569 = vmatprep.mubr.bf16.mxu1 %v16093_v53  ;;  %5591 = vmatpush1.bf16.msra.mxu1 %v14060_v28  ;;  %v14078_v53 = vld [vmem:[#allocation8 + $0xaa8] ss:$16 sps:$4 sm:$0xff]   ;;  %v14107_v28 = vld [vmem:[#allocation8 + $0x624] ss:$16 sps:$4 sm:$0xff]  }
 0x348   :  { %5592 = vmatprep.subr.bf16.mxu1 %v14068_v31  ;;  %v14096_v31 = vld [vmem:[#allocation8 + $0xb08] ss:$16 sps:$4 sm:$0xff]  }
 0x349   :  { %7234 = vmatpush1.bf16.msra.mxu0 %v14069_v54  ;;  %v14104_v54 = vld [vmem:[#allocation8 + $0xb2c] ss:$16 sps:$4 sm:$0xff]  }
 0x34a   :  { %7235 = vmatprep.subr.bf16.mxu0 %v14077_v56  ;;  %v14113_v56 = vld [vmem:[#allocation8 + $0x644] ss:$16 sps:$4 sm:$0xff]  }
 0x34b   :  { %5593 = vmatpush1.bf16.msra.mxu1 %v14066_v13  ;;  %v14110_v13 = vld [vmem:[#allocation8 + $0xb4c] ss:$16 sps:$4 sm:$0xff]  }
 0x34c   :  { %5594 = vmatprep.subr.bf16.mxu1 %v14074_v1  ;;  %v14111_v1 = vld [vmem:[#allocation8 + $0x640] ss:$16 sps:$4 sm:$0xff]  }
 0x34d   :  { %7236 = vmatpush1.bf16.msra.mxu0 %v14075_v18  ;;  %v14119_v18 = vld [vmem:[#allocation8 + $0x664] ss:$16 sps:$4 sm:$0xff]  }
 0x34e   :  { %5570 = vmatmul.mubr.bf16.gmra.mrb[96].mxu1 %v16114_v27  ;;  %7237 = vmatprep.subr.bf16.mxu0 %v14083_v59  ;;  %v14101_v27 = vld [vmem:[#allocation8 + $0x604] ss:$16 sps:$4 sm:$0xff]   ;;  %v14108_v59 = vld [vmem:[#allocation8 + $0xb48] ss:$16 sps:$4 sm:$0xff]  }
 0x34f   :  { %5595 = vmatpush1.bf16.msra.mxu1 %v14072_v5  ;;  %5579 = vmatprep.mubr.bf16.mxu1 %v16002_v50  ;;  %v14090_v50 = vld [vmem:[#allocation8 + $0xae8] ss:$16 sps:$4 sm:$0xff]   ;;  %v14116_v5 = vld [vmem:[#allocation8 + $0xb6c] ss:$16 sps:$4 sm:$0xff]  }
 0x350   :  { %5596 = vmatprep.subr.bf16.mxu1 %v14080_v24  ;;  %v14117_v24 = vld [vmem:[#allocation8 + $0x660] ss:$16 sps:$4 sm:$0xff]  }
 0x351   :  { %7238 = vmatpush1.bf16.msra.mxu0 %v14081_v3  ;;  %v14125_v3 = vld [vmem:[#allocation8 + $0x684] ss:$16 sps:$4 sm:$0xff]  }
 0x352   :  { %7239 = vmatprep.subr.bf16.mxu0 %v14089_v34  ;;  %v14114_v34 = vld [vmem:[#allocation8 + $0xb68] ss:$16 sps:$4 sm:$0xff]  }
 0x353   :  { %5597 = vmatpush1.bf16.msra.mxu1 %v14078_v53  ;;  %v14122_v53 = vld [vmem:[#allocation8 + $0xb8c] ss:$16 sps:$4 sm:$0xff]  }
 0x354   :  { %5598 = vmatprep.subr.bf16.mxu1 %v14086_v33  ;;  %v14123_v33 = vld [vmem:[#allocation8 + $0x680] ss:$16 sps:$4 sm:$0xff]  }
 0x355   :  { %7240 = vmatpush1.bf16.msra.mxu0 %v14087_v17 }
 0x356   :  { %5580 = vmatmul.mubr.bf16.gmra.mrb[100].mxu1 %v16126_v4  ;;  %7241 = vmatprep.subr.bf16.mxu0 %v14095_v51  ;;  %v14105_v4 = vld [vmem:[#allocation8 + $0x620] ss:$16 sps:$4 sm:$0xff]   ;;  %v14131_v51 = vld [vmem:[#allocation8 + $0x6a4] ss:$16 sps:$4 sm:$0xff]  }
 0x357   :  { %5599 = vmatpush1.bf16.msra.mxu1 %v14084_v48  ;;  %5618 = vmatprep.mubr.bf16.mxu1 %v16141_v32  ;;  %v14102_v32 = vld [vmem:[#allocation8 + $0xb28] ss:$16 sps:$4 sm:$0xff]  }
 0x358   :  { %5600 = vmatprep.subr.bf16.mxu1 %v14092_v6  ;;  %v14120_v6 = vld [vmem:[#allocation8 + $0xb88] ss:$16 sps:$4 sm:$0xff]  }
 0x359   :  { %7242 = vmatpush1.bf16.msra.mxu0 %v14093_v14 }
 0x35a   :  { %7280 = vmatprep.subr.bf16.mxu0 %v14101_v27  ;;  %v14128_v27 = vld [vmem:[#allocation8 + $0xbac] ss:$16 sps:$4 sm:$0xff]  }
 0x35b   :  { %5601 = vmatpush1.bf16.msra.mxu1 %v14090_v50 }
 0x35c   :  { %5602 = vmatprep.subr.bf16.mxu1 %v14098_v60  ;;  %7244 = vmatmul.mubr.bf16.vlgmr.msra.gmra.mrb[64].mxu0 %v16284_v29  ;;  %v14129_v60 = vld [vmem:[#allocation8 + $0x6a0] ss:$16 sps:$4 sm:$0xff]  }
 0x35d   :  { %7253 = vmatprep.mubr.bf16.mxu0 %v16255_v45  ;;  %7281 = vmatpush1.bf16.msra.mxu0 %v14099_v47  ;;  %v14137_v47 = vld [vmem:[#allocation8 + $0x6c4] ss:$16 sps:$4 sm:$0xff]  }
 0x35e   :  { %7282 = vmatprep.subr.bf16.mxu0 %v14107_v28  ;;  %v14126_v28 = vld [vmem:[#allocation8 + $0xba8] ss:$16 sps:$4 sm:$0xff]  }
 0x35f   :  { %5603 = vmatpush1.bf16.msra.mxu1 %v14096_v31  ;;  %v14134_v31 = vld [vmem:[#allocation8 + $0xbcc] ss:$16 sps:$4 sm:$0xff]  }
 0x360   :  { %5604 = vmatprep.subr.bf16.mxu1 %v14104_v54  ;;  %v14135_v54 = vld [vmem:[#allocation8 + $0x6c0] ss:$16 sps:$4 sm:$0xff]  }
 0x361   :  { %7283 = vmatpush1.bf16.msra.mxu0 %v14105_v4  ;;  %v14143_v4 = vld [vmem:[#allocation8 + $0x6e4] ss:$16 sps:$4 sm:$0xff]  }
 0x362   :  { %7284 = vmatprep.subr.bf16.mxu0 %v14113_v56  ;;  %v14132_v56 = vld [vmem:[#allocation8 + $0xbc8] ss:$16 sps:$4 sm:$0xff]  }
 0x363   :  { %5605 = vmatpush1.bf16.msra.mxu1 %v14102_v32  ;;  %v14140_v32 = vld [vmem:[#allocation8 + $0xbec] ss:$16 sps:$4 sm:$0xff]  }
 0x364   :  { %5606 = vmatprep.subr.bf16.mxu1 %v14110_v13  ;;  %7254 = vmatmul.mubr.bf16.gmra.mrb[68].mxu0 %v16286_v42  ;;  %v14141_v13 = vld [vmem:[#allocation8 + $0x6e0] ss:$16 sps:$4 sm:$0xff]  }
 0x365   :  { %7263 = vmatprep.mubr.bf16.mxu0 %v16288_v20  ;;  %7285 = vmatpush1.bf16.msra.mxu0 %v14111_v1  ;;  %v14149_v1 = vld [vmem:[#allocation8 + $0x704] ss:$16 sps:$4 sm:$0xff]  }
 0x366   :  { %7286 = vmatprep.subr.bf16.mxu0 %v14119_v18  ;;  %v14138_v18 = vld [vmem:[#allocation8 + $0xbe8] ss:$16 sps:$4 sm:$0xff]  }
 0x367   :  { %5607 = vmatpush1.bf16.msra.mxu1 %v14108_v59  ;;  %v14146_v59 = vld [vmem:[#allocation8 + $0xc0c] ss:$16 sps:$4 sm:$0xff]  }
 0x368   :  { %5608 = vmatprep.subr.bf16.mxu1 %v14116_v5  ;;  %v14147_v5 = vld [vmem:[#allocation8 + $0x700] ss:$16 sps:$4 sm:$0xff]  }
 0x369   :  { %7287 = vmatpush1.bf16.msra.mxu0 %v14117_v24  ;;  %v5305_v17 = vpop.f32.mrb[76].mxu1  ;;  %v14155_v24 = vld [vmem:[#allocation8 + $0x724] ss:$16 sps:$4 sm:$0xff]  }
 0x36a   :  { %7288 = vmatprep.subr.bf16.mxu0 %v14125_v3  ;;  %v5306_v48 = vpop.f32.mrb[77].mxu1  ;;  %v14144_v3 = vld [vmem:[#allocation8 + $0xc08] ss:$16 sps:$4 sm:$0xff]  }
 0x36b   :  { %5609 = vmatpush1.bf16.msra.mxu1 %v14114_v34  ;;  %v5307_v14 = vpop.f32.mrb[78].mxu1  ;;  %v14152_v34 = vld [vmem:[#allocation8 + $0xc2c] ss:$16 sps:$4 sm:$0xff]   ;;  %v14150_v17 = vld [vmem:[#allocation8 + $0xc28] ss:$16 sps:$4 sm:$0xff]  }
 0x36c   :  { %5610 = vmatprep.subr.bf16.mxu1 %v14122_v53  ;;  %7264 = vmatmul.mubr.bf16.gmra.mrb[72].mxu0 %v16296_v44  ;;  %v5308_v50 = vpop.f32.mrb[79].mxu1  ;;  %v14153_v53 = vld [vmem:[#allocation8 + $0x720] ss:$16 sps:$4 sm:$0xff]   ;;  %v14156_v14 = vld [vmem:[#allocation8 + $0xc48] ss:$16 sps:$4 sm:$0xff]  }
 0x36d   :  { %7289 = vmatpush1.bf16.msra.mxu0 %v14123_v33  ;;  %7273 = vmatprep.mubr.bf16.mxu0 %v16300_v63  ;;  %v14161_v33 = vld [vmem:[#allocation8 + $0x744] ss:$16 sps:$4 sm:$0xff]   ;;  %v14159_v48 = vld [vmem:[#allocation8 + $0x740] ss:$16 sps:$4 sm:$0xff]  }
 0x36e   :  { %7290 = vmatprep.subr.bf16.mxu0 %v14131_v51  ;;  %v14158_v51 = vld [vmem:[#allocation8 + $0xc4c] ss:$16 sps:$4 sm:$0xff]   ;;  %v14165_v50 = vld [vmem:[#allocation8 + $0x760] ss:$16 sps:$4 sm:$0xff]  }
 0x36f   :  { %5611 = vmatpush1.bf16.msra.mxu1 %v14120_v6  ;;  %v14167_v6 = vld [vmem:[#allocation8 + $0x764] ss:$16 sps:$4 sm:$0xff]  }
 0x370   :  { %5612 = vmatprep.subr.bf16.mxu1 %v14128_v27  ;;  %v14164_v27 = vld [vmem:[#allocation8 + $0xc6c] ss:$16 sps:$4 sm:$0xff]  }
 0x371   :  { %7291 = vmatpush1.bf16.msra.mxu0 %v14129_v60  ;;  %v14170_v60 = vld [vmem:[#allocation8 + $0xc8c] ss:$16 sps:$4 sm:$0xff]  }
 0x372   :  { %7292 = vmatprep.subr.bf16.mxu0 %v14137_v47  ;;  %v14171_v47 = vld [vmem:[#allocation8 + $0x780] ss:$16 sps:$4 sm:$0xff]  }
 0x373   :  { %5613 = vmatpush1.bf16.msra.mxu1 %v14126_v28 }
 0x374   :  { %5614 = vmatprep.subr.bf16.mxu1 %v14134_v31  ;;  %7274 = vmatmul.mubr.bf16.gmra.mrb[88].mxu0 %v16314_v22  ;;  %v14179_v31 = vld [vmem:[#allocation8 + $0x7a4] ss:$16 sps:$4 sm:$0xff]  }
 0x375   :  { %7293 = vmatpush1.bf16.msra.mxu0 %v14135_v54  ;;  %7312 = vmatprep.mubr.bf16.mxu0 %v16131_v36 }
 0x376   :  { %7294 = vmatprep.subr.bf16.mxu0 %v14143_v4  ;;  %v14168_v4 = vld [vmem:[#allocation8 + $0xc88] ss:$16 sps:$4 sm:$0xff]  }
 0x377   :  { %5615 = vmatpush1.bf16.msra.mxu1 %v14132_v56 }
 0x378   :  { %5616 = vmatprep.subr.bf16.mxu1 %v14140_v32  ;;  %v14176_v32 = vld [vmem:[#allocation8 + $0xcac] ss:$16 sps:$4 sm:$0xff]  }
 0x379   :  { %7295 = vmatpush1.bf16.msra.mxu0 %v14141_v13  ;;  %v14177_v13 = vld [vmem:[#allocation8 + $0x7a0] ss:$16 sps:$4 sm:$0xff]  }
 0x37a   :  { %7296 = vmatprep.subr.bf16.mxu0 %v14149_v1  ;;  %v14174_v1 = vld [vmem:[#allocation8 + $0xca8] ss:$16 sps:$4 sm:$0xff]  }
 0x37b   :  { %5617 = vmatpush1.bf16.msra.mxu1 %v14138_v18  ;;  %v14182_v18 = vld [vmem:[#allocation8 + $0xccc] ss:$16 sps:$4 sm:$0xff]  }
 0x37c   :  { %5655 = vmatprep.subr.bf16.mxu1 %v14146_v59  ;;  %v14183_v59 = vld [vmem:[#allocation8 + $0x7c0] ss:$16 sps:$4 sm:$0xff]  }
 0x37d   :  { %7297 = vmatpush1.bf16.msra.mxu0 %v14147_v5  ;;  %v14191_v5 = vld [vmem:[#allocation8 + $0x7e4] ss:$16 sps:$4 sm:$0xff]  }
 0x37e   :  { %5619 = vmatmul.mubr.bf16.vlgmr.msra.gmra.mrb[88].mxu1 %v16229_v57  ;;  %7298 = vmatprep.subr.bf16.mxu0 %v14155_v24  ;;  %v14173_v57 = vld [vmem:[#allocation8 + $0x784] ss:$16 sps:$4 sm:$0xff]   ;;  %v14180_v24 = vld [vmem:[#allocation8 + $0xcc8] ss:$16 sps:$4 sm:$0xff]  }
 0x37f   :  { %5628 = vmatprep.mubr.bf16.mxu1 %v16234_v58  ;;  %5656 = vmatpush1.bf16.msra.mxu1 %v14144_v3  ;;  %v14162_v58 = vld [vmem:[#allocation8 + $0xc68] ss:$16 sps:$4 sm:$0xff]   ;;  %v14188_v3 = vld [vmem:[#allocation8 + $0xcec] ss:$16 sps:$4 sm:$0xff]  }
 0x380   :  { %5657 = vmatprep.subr.bf16.mxu1 %v14152_v34  ;;  %v14189_v34 = vld [vmem:[#allocation8 + $0x7e0] ss:$16 sps:$4 sm:$0xff]  }
 0x381   :  { %7299 = vmatpush1.bf16.msra.mxu0 %v14153_v53  ;;  %v14194_v53 = vld [vmem:[#allocation8 + $0xd0c] ss:$16 sps:$4 sm:$0xff]  }
 0x382   :  { %7300 = vmatprep.subr.bf16.mxu0 %v14161_v33  ;;  %v14195_v33 = vld [vmem:[#allocation8 + $0x1000] ss:$16 sps:$4 sm:$0xff]  }
 0x383   :  { %5658 = vmatpush1.bf16.msra.mxu1 %v14150_v17  ;;  %v14203_v17 = vld [vmem:[#allocation8 + $0x1024] ss:$16 sps:$4 sm:$0xff]  }
 0x384   :  { %5659 = vmatprep.subr.bf16.mxu1 %v14158_v51  ;;  %v14192_v51 = vld [vmem:[#allocation8 + $0xd08] ss:$16 sps:$4 sm:$0xff]  }
 0x385   :  { %7301 = vmatpush1.bf16.msra.mxu0 %v14159_v48  ;;  %v14200_v48 = vld [vmem:[#allocation8 + $0xd2c] ss:$16 sps:$4 sm:$0xff]  }
 0x386   :  { %5629 = vmatmul.mubr.bf16.gmra.mrb[92].mxu1 %v16243_v25  ;;  %7302 = vmatprep.subr.bf16.mxu0 %v14167_v6  ;;  %v14209_v6 = vld [vmem:[#allocation8 + $0x1044] ss:$16 sps:$4 sm:$0xff]  }
 0x387   :  { %5638 = vmatprep.mubr.bf16.mxu1 %v16248_v7  ;;  %5660 = vmatpush1.bf16.msra.mxu1 %v14156_v14  ;;  %v14185_v7 = vld [vmem:[#allocation8 + $0x7c4] ss:$16 sps:$4 sm:$0xff]   ;;  %v14206_v14 = vld [vmem:[#allocation8 + $0xd4c] ss:$16 sps:$4 sm:$0xff]  }
 0x388   :  { %5661 = vmatprep.subr.bf16.mxu1 %v14164_v27  ;;  %v5512_v28 = vpop.f32.mrb[76].mxu0  ;;  %v14207_v27 = vld [vmem:[#allocation8 + $0x1040] ss:$16 sps:$4 sm:$0xff]  }
 0x389   :  { %7303 = vmatpush1.bf16.msra.mxu0 %v14165_v50  ;;  %v5513_v54 = vpop.f32.mrb[77].mxu0  ;;  %v14215_v50 = vld [vmem:[#allocation8 + $0x1064] ss:$16 sps:$4 sm:$0xff]   ;;  %v14210_v28 = vld [vmem:[#allocation8 + $0xd68] ss:$16 sps:$4 sm:$0xff]  }
 0x38a   :  { %7304 = vmatprep.subr.bf16.mxu0 %v14173_v57  ;;  %v5514_v56 = vpop.f32.mrb[78].mxu0  ;;  %v14204_v57 = vld [vmem:[#allocation8 + $0xd48] ss:$16 sps:$4 sm:$0xff]   ;;  %v14219_v54 = vld [vmem:[#allocation8 + $0x1080] ss:$16 sps:$4 sm:$0xff]  }
 0x38b   :  { %5662 = vmatpush1.bf16.msra.mxu1 %v14162_v58  ;;  %v5515_v25 = vpop.f32.mrb[79].mxu0  ;;  %v14212_v58 = vld [vmem:[#allocation8 + $0xd6c] ss:$16 sps:$4 sm:$0xff]   ;;  %v14227_v56 = vld [vmem:[#allocation8 + $0x10a4] ss:$16 sps:$4 sm:$0xff]  }
 0x38c   :  { %5663 = vmatprep.subr.bf16.mxu1 %v14170_v60  ;;  %v14213_v60 = vld [vmem:[#allocation8 + $0x1060] ss:$16 sps:$4 sm:$0xff]   ;;  %v14216_v25 = vld [vmem:[#allocation8 + $0xd88] ss:$16 sps:$4 sm:$0xff]  }
 0x38d   :  { %7305 = vmatpush1.bf16.msra.mxu0 %v14171_v47  ;;  %v14221_v47 = vld [vmem:[#allocation8 + $0x1084] ss:$16 sps:$4 sm:$0xff]  }
 0x38e   :  { %5639 = vmatmul.mubr.bf16.gmra.mrb[96].mxu1 %v16261_v46  ;;  %7306 = vmatprep.subr.bf16.mxu0 %v14179_v31  ;;  %v14197_v46 = vld [vmem:[#allocation8 + $0x1004] ss:$16 sps:$4 sm:$0xff]   ;;  %v14218_v31 = vld [vmem:[#allocation8 + $0xd8c] ss:$16 sps:$4 sm:$0xff]  }
 0x38f   :  { %5664 = vmatpush1.bf16.msra.mxu1 %v14168_v4  ;;  %5648 = vmatprep.mubr.bf16.mxu1 %v16257_v0  ;;  %v14186_v0 = vld [vmem:[#allocation8 + $0xce8] ss:$16 sps:$4 sm:$0xff]  }
 0x390   :  { %5665 = vmatprep.subr.bf16.mxu1 %v14176_v32 }
 0x391   :  { %7307 = vmatpush1.bf16.msra.mxu0 %v14177_v13 }
 0x392   :  { %7308 = vmatprep.subr.bf16.mxu0 %v14185_v7  ;;  %v14224_v7 = vld [vmem:[#allocation8 + $0xdac] ss:$16 sps:$4 sm:$0xff]  }
 0x393   :  { %5666 = vmatpush1.bf16.msra.mxu1 %v14174_v1 }
 0x394   :  { %5667 = vmatprep.subr.bf16.mxu1 %v14182_v18  ;;  %v14225_v18 = vld [vmem:[#allocation8 + $0x10a0] ss:$16 sps:$4 sm:$0xff]  }
 0x395   :  { %7309 = vmatpush1.bf16.msra.mxu0 %v14183_v59  ;;  %v14233_v59 = vld [vmem:[#allocation8 + $0x10c4] ss:$16 sps:$4 sm:$0xff]  }
 0x396   :  { %5649 = vmatmul.mubr.bf16.gmra.mrb[104].mxu1 %v16267_v38  ;;  %7310 = vmatprep.subr.bf16.mxu0 %v14191_v5  ;;  %v14201_v38 = vld [vmem:[#allocation8 + $0x1020] ss:$16 sps:$4 sm:$0xff]   ;;  %v14222_v5 = vld [vmem:[#allocation8 + $0xda8] ss:$16 sps:$4 sm:$0xff]  }
 0x397   :  { %5668 = vmatpush1.bf16.msra.mxu1 %v14180_v24  ;;  %5687 = vmatprep.mubr.bf16.mxu1 %v16275_v9  ;;  %v14198_v9 = vld [vmem:[#allocation8 + $0xd28] ss:$16 sps:$4 sm:$0xff]   ;;  %v14230_v24 = vld [vmem:[#allocation8 + $0xdcc] ss:$16 sps:$4 sm:$0xff]  }
 0x398   :  { %5669 = vmatprep.subr.bf16.mxu1 %v14188_v3  ;;  %v7918_v3 = vrot.slane %v16026_v2, 1 }
 0x399   :  { %7311 = vmatpush1.bf16.msra.mxu0 %v14189_v34  ;;  %v14231_v34 = vld [vmem:[#allocation8 + $0x10c0] ss:$16 sps:$4 sm:$0xff]  }
 0x39a   :  { %9282 = vmatprep.subr.bf16.mxu0 %v14197_v46  ;;  %v7917_v46 = vrot.slane %v16016_v30, 1 }
 0x39b   :  { %5670 = vmatpush1.bf16.msra.mxu1 %v14186_v0  ;;  %v14239_v0 = vld [vmem:[#allocation8 + $0x10e4] ss:$16 sps:$4 sm:$0xff]  }
 0x39c   :  { %5671 = vmatprep.subr.bf16.mxu1 %v14194_v53  ;;  %7313 = vmatmul.mubr.bf16.vlgmr.msra.gmra.mrb[64].mxu0 %v16133_v41  ;;  %v14228_v53 = vld [vmem:[#allocation8 + $0xdc8] ss:$16 sps:$4 sm:$0xff]  }
 0x39d   :  { %7322 = vmatprep.mubr.bf16.mxu0 %v16135_v40  ;;  %9283 = vmatpush1.bf16.msra.mxu0 %v14195_v33  ;;  %v16383_v33 = vsel %vm1151_vm3, %v7917_v46, %v7918_v3  ;;  %v14273_v46 = vld [vmem:[#allocation8 + $0x11a0] ss:$16 sps:$4 sm:$0xff]  }
 0x39e   :  { %9284 = vmatprep.subr.bf16.mxu0 %v14203_v17  ;;  %v14236_v17 = vld [vmem:[#allocation8 + $0xdec] ss:$16 sps:$4 sm:$0xff]  }
 0x39f   :  { %5672 = vmatpush1.bf16.msra.mxu1 %v14192_v51  ;;  %v14237_v51 = vld [vmem:[#allocation8 + $0x10e0] ss:$16 sps:$4 sm:$0xff]  }
 0x3a0   :  { %5673 = vmatprep.subr.bf16.mxu1 %v14200_v48  ;;  %v14245_v48 = vld [vmem:[#allocation8 + $0x1104] ss:$16 sps:$4 sm:$0xff]  }
 0x3a1   :  { %9285 = vmatpush1.bf16.msra.mxu0 %v14201_v38  ;;  %v14234_v38 = vld [vmem:[#allocation8 + $0xde8] ss:$16 sps:$4 sm:$0xff]  }
 0x3a2   :  { %9286 = vmatprep.subr.bf16.mxu0 %v14209_v6  ;;  %v14242_v6 = vld [vmem:[#allocation8 + $0xe0c] ss:$16 sps:$4 sm:$0xff]  }
 0x3a3   :  { %5674 = vmatpush1.bf16.msra.mxu1 %v14198_v9  ;;  %v14243_v9 = vld [vmem:[#allocation8 + $0x1100] ss:$16 sps:$4 sm:$0xff]  }
 0x3a4   :  { %5675 = vmatprep.subr.bf16.mxu1 %v14206_v14  ;;  %7323 = vmatmul.mubr.bf16.gmra.mrb[68].mxu0 %v16137_v23  ;;  %v14251_v14 = vld [vmem:[#allocation8 + $0x1124] ss:$16 sps:$4 sm:$0xff]  }
 0x3a5   :  { %7332 = vmatprep.mubr.bf16.mxu0 %v16174_v62  ;;  %9287 = vmatpush1.bf16.msra.mxu0 %v14207_v27  ;;  %v14240_v27 = vld [vmem:[#allocation8 + $0xe08] ss:$16 sps:$4 sm:$0xff]  }
 0x3a6   :  { %9288 = vmatprep.subr.bf16.mxu0 %v14215_v50  ;;  %v14248_v50 = vld [vmem:[#allocation8 + $0xe2c] ss:$16 sps:$4 sm:$0xff]  }
 0x3a7   :  { %5676 = vmatpush1.bf16.msra.mxu1 %v14204_v57  ;;  %v14249_v57 = vld [vmem:[#allocation8 + $0x1120] ss:$16 sps:$4 sm:$0xff]  }
 0x3a8   :  { %5677 = vmatprep.subr.bf16.mxu1 %v14212_v58  ;;  %v14257_v58 = vld [vmem:[#allocation8 + $0x1144] ss:$16 sps:$4 sm:$0xff]  }
 0x3a9   :  { %9289 = vmatpush1.bf16.msra.mxu0 %v14213_v60  ;;  %v5374_v4 = vpop.f32.mrb[80].mxu1  ;;  %v16947_v60 = vld [vmem:[#allocation36_spill] sm:$0xff] }
 0x3aa   :  { %9290 = vmatprep.subr.bf16.mxu0 %v14221_v47  ;;  %v5375_v32 = vpop.f32.mrb[81].mxu1  ;;  %v14246_v47 = vld [vmem:[#allocation8 + $0xe28] ss:$16 sps:$4 sm:$0xff]  }
 0x3ab   :  { %5678 = vmatpush1.bf16.msra.mxu1 %v14210_v28  ;;  %v5376_v13 = vpop.f32.mrb[82].mxu1  ;;  %v14254_v28 = vld [vmem:[#allocation8 + $0xe4c] ss:$16 sps:$4 sm:$0xff]   ;;  %v14252_v4 = vld [vmem:[#allocation8 + $0xe48] ss:$16 sps:$4 sm:$0xff]  }
 0x3ac   :  { %5679 = vmatprep.subr.bf16.mxu1 %v14218_v31  ;;  %7333 = vmatmul.mubr.bf16.gmra.mrb[72].mxu0 %v16169_v8  ;;  %v5377_v1 = vpop.f32.mrb[83].mxu1  ;;  %v14255_v31 = vld [vmem:[#allocation8 + $0x1140] ss:$16 sps:$4 sm:$0xff]   ;;  %v14266_v13 = vld [vmem:[#allocation8 + $0xe8c] ss:$16 sps:$4 sm:$0xff]  }
 0x3ad   :  { %9291 = vmatpush1.bf16.msra.mxu0 %v14219_v54  ;;  %7342 = vmatprep.mubr.bf16.mxu0 %v16171_v11  ;;  %v14263_v54 = vld [vmem:[#allocation8 + $0x1164] ss:$16 sps:$4 sm:$0xff]   ;;  %v14261_v32 = vld [vmem:[#allocation8 + $0x1160] ss:$16 sps:$4 sm:$0xff]  }
 0x3ae   :  { %9292 = vmatprep.subr.bf16.mxu0 %v14227_v56  ;;  %v14260_v56 = vld [vmem:[#allocation8 + $0xe6c] ss:$16 sps:$4 sm:$0xff]   ;;  %v14267_v1 = vld [vmem:[#allocation8 + $0x1180] ss:$16 sps:$4 sm:$0xff]  }
 0x3af   :  { %5680 = vmatpush1.bf16.msra.mxu1 %v14216_v25  ;;  %v14258_v25 = vld [vmem:[#allocation8 + $0xe68] ss:$16 sps:$4 sm:$0xff]  }
 0x3b0   :  { %5681 = vmatprep.subr.bf16.mxu1 %v14224_v7 }
 0x3b1   :  { %9293 = vmatpush1.bf16.msra.mxu0 %v14225_v18 }
 0x3b2   :  { %9294 = vmatprep.subr.bf16.mxu0 %v14233_v59  ;;  %v14275_v59 = vld [vmem:[#allocation8 + $0x11a4] ss:$16 sps:$4 sm:$0xff]  }
 0x3b3   :  { %5682 = vmatpush1.bf16.msra.mxu1 %v14222_v5 }
 0x3b4   :  { %5683 = vmatprep.subr.bf16.mxu1 %v14230_v24  ;;  %7343 = vmatmul.mubr.bf16.gmra.mrb[92].mxu0 %v16183_v21  ;;  %v14264_v24 = vld [vmem:[#allocation8 + $0xe88] ss:$16 sps:$4 sm:$0xff]  }
 0x3b5   :  { %9295 = vmatpush1.bf16.msra.mxu0 %v14231_v34  ;;  %9314 = vmatprep.mubr.bf16.mxu0 %v16383_v33 }
 0x3b6   :  { %9296 = vmatprep.subr.bf16.mxu0 %v14239_v0  ;;  %v14270_v0 = vld [vmem:[#allocation8 + $0xea8] ss:$16 sps:$4 sm:$0xff]  }
 0x3b7   :  { %5684 = vmatpush1.bf16.msra.mxu1 %v14228_v53  ;;  %v14278_v53 = vld [vmem:[#allocation8 + $0xecc] ss:$16 sps:$4 sm:$0xff]  }
 0x3b8   :  { %5685 = vmatprep.subr.bf16.mxu1 %v14236_v17 }
 0x3b9   :  { %9297 = vmatpush1.bf16.msra.mxu0 %v14237_v51  ;;  %v14279_v51 = vld [vmem:[#allocation8 + $0x11c0] ss:$16 sps:$4 sm:$0xff]  }
 0x3ba   :  { %9298 = vmatprep.subr.bf16.mxu0 %v14245_v48 }
 0x3bb   :  { %5686 = vmatpush1.bf16.msra.mxu1 %v14234_v38  ;;  %v14287_v38 = vld [vmem:[#allocation8 + $0x11e4] ss:$16 sps:$4 sm:$0xff]  }
 0x3bc   :  { %5724 = vmatprep.subr.bf16.mxu1 %v14242_v6 }
 0x3bd   :  { %9299 = vmatpush1.bf16.msra.mxu0 %v14243_v9 }
 0x3be   :  { %5688 = vmatmul.mubr.bf16.vlgmr.msra.gmra.mrb[88].mxu1 %v16303_v49  ;;  %9300 = vmatprep.subr.bf16.mxu0 %v14251_v14  ;;  %v14269_v49 = vld [vmem:[#allocation8 + $0x1184] ss:$16 sps:$4 sm:$0xff]   ;;  %v14284_v14 = vld [vmem:[#allocation8 + $0xeec] ss:$16 sps:$4 sm:$0xff]  }
 0x3bf   :  { %5697 = vmatprep.mubr.bf16.mxu1 %v16947_v60  ;;  %5725 = vmatpush1.bf16.msra.mxu1 %v14240_v27  ;;  %v14293_v27 = vld [vmem:[#allocation8 + $0x1204] ss:$16 sps:$4 sm:$0xff]  }
 0x3c0   :  { %5726 = vmatprep.subr.bf16.mxu1 %v14248_v50  ;;  %v16948_v50 = vld [vmem:[#allocation28_spill] sm:$0xff] }
 0x3c1   :  { %9301 = vmatpush1.bf16.msra.mxu0 %v14249_v57  ;;  %v14282_v57 = vld [vmem:[#allocation8 + $0xee8] ss:$16 sps:$4 sm:$0xff]  }
 0x3c2   :  { %9302 = vmatprep.subr.bf16.mxu0 %v14257_v58  ;;  %v16949_v58 = vld [vmem:[#allocation24_spill] sm:$0xff] }
 0x3c3   :  { %5727 = vmatpush1.bf16.msra.mxu1 %v14246_v47  ;;  %v7915_v60 = vrot.slane %v16949_v58, 1  ;;  %v14290_v47 = vld [vmem:[#allocation8 + $0xf0c] ss:$16 sps:$4 sm:$0xff]  }
 0x3c4   :  { %5728 = vmatprep.subr.bf16.mxu1 %v14254_v28  ;;  %v16950_v28 = vld [vmem:[#allocation26_spill] sm:$0xff] }
 0x3c5   :  { %9303 = vmatpush1.bf16.msra.mxu0 %v14255_v31  ;;  %v7940_v31 = vrot.slane %v16950_v28, 1 }
 0x3c6   :  { %5698 = vmatmul.mubr.bf16.gmra.mrb[92].mxu1 %v16317_v26  ;;  %9304 = vmatprep.subr.bf16.mxu0 %v14263_v54  ;;  %v7137_v7 = vpop.f32.mrb[80].mxu0  ;;  %v14272_v26 = vld [vmem:[#allocation8 + $0xeac] ss:$16 sps:$4 sm:$0xff]  }
 0x3c7   :  { %5707 = vmatprep.mubr.bf16.mxu1 %v16322_v55  ;;  %5729 = vmatpush1.bf16.msra.mxu1 %v14252_v4  ;;  %v7138_v18 = vpop.f32.mrb[81].mxu0  ;;  %v14281_v55 = vld [vmem:[#allocation8 + $0x11c4] ss:$16 sps:$4 sm:$0xff]  }
 0x3c8   :  { %5730 = vmatprep.subr.bf16.mxu1 %v14260_v56  ;;  %v7139_v5 = vpop.f32.mrb[82].mxu0  ;;  %v16951_v4 = vld [vmem:[#allocation23_spill] sm:$0xff]  ;;  %v16420_v18 = vsel %vm1151_vm3, %v7918_v3, %v7940_v31 }
 0x3c9   :  { %9305 = vmatpush1.bf16.msra.mxu0 %v14261_v32  ;;  %v7140_v34 = vpop.f32.mrb[83].mxu0  ;;  %v7914_v56 = vrot.slane %v16951_v4, 1  ;;  %v14291_v32 = vld [vmem:[#allocation8 + $0x1200] ss:$16 sps:$4 sm:$0xff]  }
 0x3ca   :  { %9306 = vmatprep.subr.bf16.mxu0 %v14269_v49  ;;  %v14297_v5 = vld [vmem:[#allocation8 + $0x1220] ss:$16 sps:$4 sm:$0xff]   ;;  %v14294_v34 = vld [vmem:[#allocation8 + $0xf28] ss:$16 sps:$4 sm:$0xff]  }
 0x3cb   :  { %5731 = vmatpush1.bf16.msra.mxu1 %v14258_v25  ;;  %v16412_v7 = vsel %vm1151_vm3, %v7914_v56, %v7915_v60  ;;  %v14303_v3 = vld [vmem:[#allocation8 + $0x1240] ss:$16 sps:$4 sm:$0xff]  }
 0x3cc   :  { %5732 = vmatprep.subr.bf16.mxu1 %v14266_v13  ;;  %v14288_v13 = vld [vmem:[#allocation8 + $0xf08] ss:$16 sps:$4 sm:$0xff]   ;;  %v14309_v56 = vld [vmem:[#allocation8 + $0x1260] ss:$16 sps:$4 sm:$0xff]  }
 0x3cd   :  { %9307 = vmatpush1.bf16.msra.mxu0 %v14267_v1 }
 0x3ce   :  { %5708 = vmatmul.mubr.bf16.gmra.mrb[96].mxu1 %v16330_v43  ;;  %9308 = vmatprep.subr.bf16.mxu0 %v14275_v59  ;;  %v14276_v43 = vld [vmem:[#allocation8 + $0xec8] ss:$16 sps:$4 sm:$0xff]   ;;  %v14296_v59 = vld [vmem:[#allocation8 + $0xf2c] ss:$16 sps:$4 sm:$0xff]  }
 0x3cf   :  { %5733 = vmatpush1.bf16.msra.mxu1 %v14264_v24  ;;  %5717 = vmatprep.mubr.bf16.mxu1 %v16327_v39  ;;  %v14285_v39 = vld [vmem:[#allocation8 + $0x11e0] ss:$16 sps:$4 sm:$0xff]   ;;  %v14305_v24 = vld [vmem:[#allocation8 + $0x1244] ss:$16 sps:$4 sm:$0xff]  }
 0x3d0   :  { %5734 = vmatprep.subr.bf16.mxu1 %v14272_v26  ;;  %v16954_v26 = vld [vmem:[#allocation27_spill] sm:$0xff] }
 0x3d1   :  { %v16392_v17 = vpop.f32.mrb[64].mxu1  ;;  %9309 = vmatpush1.bf16.msra.mxu0 %v14273_v46  ;;  %v7938_v46 = vrot.slane %v16954_v26, 1 }
 0x3d2   :  { %v16394_v48 = vpop.f32.mrb[65].mxu1  ;;  %9310 = vmatprep.subr.bf16.mxu0 %v14281_v55  ;;  %v14302_v55 = vld [vmem:[#allocation8 + $0xf4c] ss:$16 sps:$4 sm:$0xff]  }
 0x3d3   :  { %v16396_v6 = vpop.f32.mrb[66].mxu1  ;;  %5735 = vmatpush1.bf16.msra.mxu1 %v14270_v0  ;;  %v16955_v0 = vld [vmem:[#allocation21_spill] sm:$0xff] }
 0x3d4   :  { %v16398_v9 = vpop.f32.mrb[67].mxu1  ;;  %5736 = vmatprep.subr.bf16.mxu1 %v14278_v53  ;;  %v16425_v53 = vrot.slane %v16955_v0, 1 }
 0x3d5   :  { %9311 = vmatpush1.bf16.msra.mxu0 %v14279_v51 }
 0x3d6   :  { %5718 = vmatmul.mubr.bf16.gmra.mrb[108].mxu1 %v16335_v37  ;;  %9312 = vmatprep.subr.bf16.mxu0 %v14287_v38  ;;  %v14299_v37 = vld [vmem:[#allocation8 + $0x1224] ss:$16 sps:$4 sm:$0xff]  }
 0x3d7   :  { %5737 = vmatpush1.bf16.msra.mxu1 %v14276_v43  ;;  %5756 = vmatprep.mubr.bf16.mxu1 %v16948_v50  ;;  %v14311_v43 = vld [vmem:[#allocation8 + $0x1264] ss:$16 sps:$4 sm:$0xff]  }
 0x3d8   :  { %5738 = vmatprep.subr.bf16.mxu1 %v14284_v14 }
 0x3d9   :  { %v16404_v54 = vpop.f32.mrb[68].mxu1  ;;  %9313 = vmatpush1.bf16.msra.mxu0 %v14285_v39  ;;  %v14300_v39 = vld [vmem:[#allocation8 + $0xf48] ss:$16 sps:$4 sm:$0xff]  }
 0x3da   :  { %v16407_v49 = vpop.f32.mrb[69].mxu1  ;;  %9351 = vmatprep.subr.bf16.mxu0 %v14293_v27  ;;  %v16434_v27 = vsel %vm1151_vm3, %v7915_v60, %v7938_v46  ;;  %v16960_v60 = vld [vmem:[#allocation22_spill] sm:$0xff] }
 0x3db   :  { %v16409_v25 = vpop.f32.mrb[70].mxu1  ;;  %5739 = vmatpush1.bf16.msra.mxu1 %v14282_v57  ;;  %v16441_v57 = vsel %vm1151_vm3, %v7940_v31, %v16425_v53  ;;  %v14323_v31 = vld [vmem:[#allocation8 + $0x12a4] ss:$16 sps:$4 sm:$0xff]  }
 0x3dc   :  { %16952 = vst [vmem:[#allocation36_spill] sm:$0xff] %v16409_v25  ;;  %v16414_v1 = vpop.f32.mrb[71].mxu1  ;;  %5740 = vmatprep.subr.bf16.mxu1 %v14290_v47  ;;  %9315 = vmatmul.mubr.bf16.vlgmr.msra.gmra.mrb[64].mxu0 %v16412_v7  ;;  %v14308_v47 = vld [vmem:[#allocation8 + $0xf6c] ss:$16 sps:$4 sm:$0xff]  }
 0x3dd   :  { %16953 = vst [vmem:[#allocation28_spill] sm:$0xff] %v16414_v1  ;;  %9324 = vmatprep.mubr.bf16.mxu0 %v16420_v18  ;;  %9352 = vmatpush1.bf16.msra.mxu0 %v14291_v32  ;;  %v14317_v32 = vld [vmem:[#allocation8 + $0x1284] ss:$16 sps:$4 sm:$0xff]  }
 0x3de   :  { %9353 = vmatprep.subr.bf16.mxu0 %v14299_v37  ;;  %v14306_v37 = vld [vmem:[#allocation8 + $0xf68] ss:$16 sps:$4 sm:$0xff]  }
 0x3df   :  { %5741 = vmatpush1.bf16.msra.mxu1 %v14288_v13  ;;  %v16445_v13 = vrot.slane %v16960_v60, 1  ;;  %v16966_v25 = vld [vmem:[#allocation34_spill] sm:$0xff] }
 0x3e0   :  { %5742 = vmatprep.subr.bf16.mxu1 %v14296_v59  ;;  %v14314_v59 = vld [vmem:[#allocation8 + $0xf8c] ss:$16 sps:$4 sm:$0xff]  }
 0x3e1   :  { %v16427_v51 = vpop.f32.mrb[72].mxu1  ;;  %9354 = vmatpush1.bf16.msra.mxu0 %v14297_v5  ;;  %v14315_v5 = vld [vmem:[#allocation8 + $0x1280] ss:$16 sps:$4 sm:$0xff]  }
 0x3e2   :  { %16956 = vst [vmem:[#allocation24_spill] sm:$0xff] %v16427_v51  ;;  %v16429_v38 = vpop.f32.mrb[73].mxu1  ;;  %9355 = vmatprep.subr.bf16.mxu0 %v14305_v24  ;;  %v16964_v51 = vld [vmem:[#allocation31_spill] sm:$0xff] }
 0x3e3   :  { %16957 = vst [vmem:[#allocation26_spill] sm:$0xff] %v16429_v38  ;;  %v16431_v14 = vpop.f32.mrb[74].mxu1  ;;  %5743 = vmatpush1.bf16.msra.mxu1 %v14294_v34  ;;  %v14353_v38 = vld [vmem:[#allocation8 + $0x1344] ss:$16 sps:$4 sm:$0xff]  }
 0x3e4   :  { %16958 = vst [vmem:[#allocation23_spill] sm:$0xff] %v16431_v14  ;;  %v16436_v50 = vpop.f32.mrb[75].mxu1  ;;  %5744 = vmatprep.subr.bf16.mxu1 %v14302_v55  ;;  %9325 = vmatmul.mubr.bf16.gmra.mrb[68].mxu0 %v16434_v27  ;;  %v14312_v55 = vld [vmem:[#allocation8 + $0xf88] ss:$16 sps:$4 sm:$0xff]  }
 0x3e5   :  { %16959 = vst [vmem:[#allocation27_spill] sm:$0xff] %v16436_v50  ;;  %9334 = vmatprep.mubr.bf16.mxu0 %v16441_v57  ;;  %9356 = vmatpush1.bf16.msra.mxu0 %v14303_v3  ;;  %v16449_v3 = vsel %vm1151_vm3, %v7938_v46, %v16445_v13  ;;  %v14327_v46 = vld [vmem:[#allocation8 + $0x12c0] ss:$16 sps:$4 sm:$0xff]   ;;  %v14336_v14 = vld [vmem:[#allocation8 + $0x8] ss:$16 sps:$4 sm:$0xff]  }
 0x3e6   :  { %9357 = vmatprep.subr.bf16.mxu0 %v14311_v43 }
 0x3e7   :  { %5745 = vmatpush1.bf16.msra.mxu1 %v14300_v39  ;;  %v14320_v39 = vld [vmem:[#allocation8 + $0xfac] ss:$16 sps:$4 sm:$0xff]  }
 0x3e8   :  { %5746 = vmatprep.subr.bf16.mxu1 %v14308_v47  ;;  %v14321_v47 = vld [vmem:[#allocation8 + $0x12a0] ss:$16 sps:$4 sm:$0xff]  }
 0x3e9   :  { %9358 = vmatpush1.bf16.msra.mxu0 %v14309_v56  ;;  %v5443_v24 = vpop.f32.mrb[84].mxu1  ;;  %v14329_v56 = vld [vmem:[#allocation8 + $0x12c4] ss:$16 sps:$4 sm:$0xff]  }
 0x3ea   :  { %9359 = vmatprep.subr.bf16.mxu0 %v14317_v32  ;;  %v5444_v34 = vpop.f32.mrb[85].mxu1  ;;  %v14318_v32 = vld [vmem:[#allocation8 + $0xfa8] ss:$16 sps:$4 sm:$0xff]   ;;  %v16922_v24 = vrot.slane %v16039_v52, 1 }
 0x3eb   :  { %5747 = vmatpush1.bf16.msra.mxu1 %v14306_v37  ;;  %v5445_v43 = vpop.f32.mrb[86].mxu1  ;;  %v14326_v37 = vld [vmem:[#allocation8 + $0xfcc] ss:$16 sps:$4 sm:$0xff]  }
 0x3ec   :  { %5748 = vmatprep.subr.bf16.mxu1 %v14314_v59  ;;  %9335 = vmatmul.mubr.bf16.gmra.mrb[72].mxu0 %v16449_v3  ;;  %v5446_v50 = vpop.f32.mrb[87].mxu1  ;;  %v16961_v59 = vld [vmem:[#allocation25_spill] sm:$0xff] }
 0x3ed   :  { %9360 = vmatpush1.bf16.msra.mxu0 %v14315_v5  ;;  %9344 = vmatprep.mubr.bf16.mxu0 %v16425_v53  ;;  %v7923_v34 = vrot.slane %v16961_v59, 1  ;;  %v14335_v43 = vld [vmem:[#allocation8 + $0x12e4] ss:$16 sps:$4 sm:$0xff]   ;;  %v14324_v50 = vld [vmem:[#allocation8 + $0xfc8] ss:$16 sps:$4 sm:$0xff]  }
 0x3ee   :  { %9361 = vmatprep.subr.bf16.mxu0 %v14323_v31  ;;  %v14332_v31 = vld [vmem:[#allocation8 + $0xfec] ss:$16 sps:$4 sm:$0xff]  }
 0x3ef   :  { %5749 = vmatpush1.bf16.msra.mxu1 %v14312_v55  ;;  %v16459_v5 = vsel %vm1151_vm3, %v7923_v34, %v16922_v24  ;;  %v14333_v55 = vld [vmem:[#allocation8 + $0x12e0] ss:$16 sps:$4 sm:$0xff]   ;;  %v14344_v34 = vld [vmem:[#allocation8 + $0x2c] ss:$16 sps:$4 sm:$0xff]  }
 0x3f0   :  { %5750 = vmatprep.subr.bf16.mxu1 %v14320_v39  ;;  %v14341_v39 = vld [vmem:[#allocation8 + $0x1304] ss:$16 sps:$4 sm:$0xff]   ;;  %v14345_v24 = vld [vmem:[#allocation8 + $0x1320] ss:$16 sps:$4 sm:$0xff]  }
 0x3f1   :  { %9362 = vmatpush1.bf16.msra.mxu0 %v14321_v47  ;;  %v14330_v47 = vld [vmem:[#allocation8 + $0xfe8] ss:$16 sps:$4 sm:$0xff]  }
 0x3f2   :  { %9363 = vmatprep.subr.bf16.mxu0 %v14329_v56  ;;  %v14338_v56 = vld [vmem:[#allocation8 + $0xc] ss:$16 sps:$4 sm:$0xff]  }
 0x3f3   :  { %5751 = vmatpush1.bf16.msra.mxu1 %v14318_v32  ;;  %v14339_v32 = vld [vmem:[#allocation8 + $0x1300] ss:$16 sps:$4 sm:$0xff]  }
 0x3f4   :  { %5752 = vmatprep.subr.bf16.mxu1 %v14326_v37  ;;  %9345 = vmatmul.mubr.bf16.gmra.mrb[96].mxu0 %v16445_v13  ;;  %v14347_v37 = vld [vmem:[#allocation8 + $0x1324] ss:$16 sps:$4 sm:$0xff]  }
 0x3f5   :  { %9364 = vmatpush1.bf16.msra.mxu0 %v14327_v46  ;;  %9383 = vmatprep.mubr.bf16.mxu0 %v16459_v5  ;;  %v16962_v46 = vld [vmem:[#allocation29_spill] sm:$0xff] }
 0x3f6   :  { %9365 = vmatprep.subr.bf16.mxu0 %v14335_v43  ;;  %v16963_v43 = vld [vmem:[#allocation30_spill] sm:$0xff] }
 0x3f7   :  { %5753 = vmatpush1.bf16.msra.mxu1 %v14324_v50  ;;  %v14342_v50 = vld [vmem:[#allocation8 + $0x28] ss:$16 sps:$4 sm:$0xff]  }
 0x3f8   :  { %5754 = vmatprep.subr.bf16.mxu1 %v14332_v31  ;;  %v14350_v31 = vld [vmem:[#allocation8 + $0x4c] ss:$16 sps:$4 sm:$0xff]  }
 0x3f9   :  { %9366 = vmatpush1.bf16.msra.mxu0 %v14333_v55  ;;  %v14351_v55 = vld [vmem:[#allocation8 + $0x1340] ss:$16 sps:$4 sm:$0xff]  }
 0x3fa   :  { %9367 = vmatprep.subr.bf16.mxu0 %v14341_v39  ;;  %v14359_v39 = vld [vmem:[#allocation8 + $0x1364] ss:$16 sps:$4 sm:$0xff]  }
 0x3fb   :  { %5755 = vmatpush1.bf16.msra.mxu1 %v14330_v47  ;;  %v14348_v47 = vld [vmem:[#allocation8 + $0x48] ss:$16 sps:$4 sm:$0xff]  }
 0x3fc   :  { %7349 = vmatprep.subr.bf16.mxu1 %v14338_v56  ;;  %v14356_v56 = vld [vmem:[#allocation8 + $0x6c] ss:$16 sps:$4 sm:$0xff]  }
 0x3fd   :  { %9368 = vmatpush1.bf16.msra.mxu0 %v14339_v32  ;;  %v14357_v32 = vld [vmem:[#allocation8 + $0x1360] ss:$16 sps:$4 sm:$0xff]  }
 0x3fe   :  { %5757 = vmatmul.mubr.bf16.vlgmr.msra.gmra.mrb[88].mxu1 %v16962_v46  ;;  %9369 = vmatprep.subr.bf16.mxu0 %v14347_v37  ;;  %v14365_v37 = vld [vmem:[#allocation8 + $0x1384] ss:$16 sps:$4 sm:$0xff]  }
 0x3ff   :  { %5766 = vmatprep.mubr.bf16.mxu1 %v16963_v43  ;;  %7350 = vmatpush1.bf16.msra.mxu1 %v14336_v14  ;;  %v16965_v46 = vld [vmem:[#allocation32_spill] sm:$0xff] }
 0x400   :  { %7351 = vmatprep.subr.bf16.mxu1 %v14344_v34  ;;  %v14354_v14 = vld [vmem:[#allocation8 + $0x68] ss:$16 sps:$4 sm:$0xff]   ;;  %v14362_v34 = vld [vmem:[#allocation8 + $0x8c] ss:$16 sps:$4 sm:$0xff]  }
 0x401   :  { %9370 = vmatpush1.bf16.msra.mxu0 %v14345_v24 }
 0x402   :  { %9371 = vmatprep.subr.bf16.mxu0 %v14353_v38  ;;  %v14363_v38 = vld [vmem:[#allocation8 + $0x1380] ss:$16 sps:$4 sm:$0xff]  }
 0x403   :  { %7352 = vmatpush1.bf16.msra.mxu1 %v14342_v50  ;;  %v14371_v50 = vld [vmem:[#allocation8 + $0x13a4] ss:$16 sps:$4 sm:$0xff]  }
 0x404   :  { %7353 = vmatprep.subr.bf16.mxu1 %v14350_v31 }
 0x405   :  { %9372 = vmatpush1.bf16.msra.mxu0 %v14351_v55  ;;  %v14360_v55 = vld [vmem:[#allocation8 + $0x88] ss:$16 sps:$4 sm:$0xff]  }
 0x406   :  { %5767 = vmatmul.mubr.bf16.gmra.mrb[92].mxu1 %v16964_v51  ;;  %9373 = vmatprep.subr.bf16.mxu0 %v14359_v39  ;;  %v14368_v51 = vld [vmem:[#allocation8 + $0xac] ss:$16 sps:$4 sm:$0xff]   ;;  %v14369_v39 = vld [vmem:[#allocation8 + $0x13a0] ss:$16 sps:$4 sm:$0xff]  }
 0x407   :  { %5776 = vmatprep.mubr.bf16.mxu1 %v16965_v46  ;;  %7354 = vmatpush1.bf16.msra.mxu1 %v14348_v47  ;;  %v7206_v24 = vpop.f32.mrb[84].mxu0  ;;  %v14377_v47 = vld [vmem:[#allocation8 + $0x13c4] ss:$16 sps:$4 sm:$0xff]  }
 0x408   :  { %7355 = vmatprep.subr.bf16.mxu1 %v14356_v56  ;;  %v7207_v43 = vpop.f32.mrb[85].mxu0  ;;  %v14366_v56 = vld [vmem:[#allocation8 + $0xa8] ss:$16 sps:$4 sm:$0xff]   ;;  %v16967_v46 = vld [vmem:[#allocation33_spill] sm:$0xff] }
 0x409   :  { %9374 = vmatpush1.bf16.msra.mxu0 %v14357_v32  ;;  %v7208_v31 = vpop.f32.mrb[86].mxu0  ;;  %v14374_v32 = vld [vmem:[#allocation8 + $0xcc] ss:$16 sps:$4 sm:$0xff]   ;;  %v14381_v24 = vld [vmem:[#allocation8 + $0x13e0] ss:$16 sps:$4 sm:$0xff]  }
 0x40a   :  { %9375 = vmatprep.subr.bf16.mxu0 %v14365_v37  ;;  %v7209_v1 = vpop.f32.mrb[87].mxu0  ;;  %v14375_v37 = vld [vmem:[#allocation8 + $0x13c0] ss:$16 sps:$4 sm:$0xff]   ;;  %v14378_v43 = vld [vmem:[#allocation8 + $0xe8] ss:$16 sps:$4 sm:$0xff]  }
 0x40b   :  { %7356 = vmatpush1.bf16.msra.mxu1 %v14354_v14  ;;  %v14383_v14 = vld [vmem:[#allocation8 + $0x13e4] ss:$16 sps:$4 sm:$0xff]   ;;  %v14372_v1 = vld [vmem:[#allocation8 + $0xc8] ss:$16 sps:$4 sm:$0xff]   ;;  %v14386_v31 = vld [vmem:[#allocation8 + $0x10c] ss:$16 sps:$4 sm:$0xff]  }
 0x40c   :  { %7357 = vmatprep.subr.bf16.mxu1 %v14362_v34  ;;  %v14380_v34 = vld [vmem:[#allocation8 + $0xec] ss:$16 sps:$4 sm:$0xff]  }
 0x40d   :  { %9376 = vmatpush1.bf16.msra.mxu0 %v14363_v38  ;;  %v16968_v38 = vld [vmem:[#allocation35_spill] sm:$0xff] }
 0x40e   :  { %5777 = vmatmul.mubr.bf16.gmra.mrb[96].mxu1 %v16966_v25  ;;  %9377 = vmatprep.subr.bf16.mxu0 %v14371_v50  ;;  %v14389_v25 = vld [vmem:[#allocation8 + $0x1404] ss:$16 sps:$4 sm:$0xff]   ;;  %v7921_v50 = vrot.slane %v16210_v61, 1 }
 0x40f   :  { %7358 = vmatpush1.bf16.msra.mxu1 %v14360_v55  ;;  %5786 = vmatprep.mubr.bf16.mxu1 %v16967_v46  ;;  %v7944_v55 = vrot.slane %v16214_v15, 1 }
 0x410   :  { %7359 = vmatprep.subr.bf16.mxu1 %v14368_v51  ;;  %v7920_v51 = vrot.slane %v16208_v16, 1 }
 0x411   :  { %9378 = vmatpush1.bf16.msra.mxu0 %v14369_v39  ;;  %v14387_v39 = vld [vmem:[#allocation8 + $0x1400] ss:$16 sps:$4 sm:$0xff]  }
 0x412   :  { %9379 = vmatprep.subr.bf16.mxu0 %v14377_v47  ;;  %v14395_v47 = vld [vmem:[#allocation8 + $0x1424] ss:$16 sps:$4 sm:$0xff]   ;;  %v16474_v46 = vsel %vm1151_vm3, %v7920_v51, %v7921_v50  ;;  %v14396_v51 = vld [vmem:[#allocation8 + $0x148] ss:$16 sps:$4 sm:$0xff]  }
 0x413   :  { %7360 = vmatpush1.bf16.msra.mxu1 %v14366_v56  ;;  %v14384_v56 = vld [vmem:[#allocation8 + $0x108] ss:$16 sps:$4 sm:$0xff]  }
 0x414   :  { %7361 = vmatprep.subr.bf16.mxu1 %v14374_v32 }
 0x415   :  { %9380 = vmatpush1.bf16.msra.mxu0 %v14375_v37  ;;  %v14392_v37 = vld [vmem:[#allocation8 + $0x12c] ss:$16 sps:$4 sm:$0xff]  }
 0x416   :  { %5787 = vmatmul.mubr.bf16.gmra.mrb[112].mxu1 %v16968_v38  ;;  %9381 = vmatprep.subr.bf16.mxu0 %v14383_v14  ;;  %v14393_v14 = vld [vmem:[#allocation8 + $0x1420] ss:$16 sps:$4 sm:$0xff]   ;;  %v14398_v38 = vld [vmem:[#allocation8 + $0x14c] ss:$16 sps:$4 sm:$0xff]  }
 0x417   :  { %7362 = vmatpush1.bf16.msra.mxu1 %v14372_v1  ;;  %7381 = vmatprep.mubr.bf16.mxu1 %v16016_v30  ;;  %v16969_v30 = vrot.slane %v16039_v52, 1  ;;  %v14401_v1 = vld [vmem:[#allocation8 + $0x1444] ss:$16 sps:$4 sm:$0xff]  }
 0x418   :  { %7363 = vmatprep.subr.bf16.mxu1 %v14380_v34  ;;  %v14390_v34 = vld [vmem:[#allocation8 + $0x128] ss:$16 sps:$4 sm:$0xff]  }
 0x419   :  { %9382 = vmatpush1.bf16.msra.mxu0 %v14381_v24  ;;  %v16480_v32 = vsel %vm1151_vm3, %v16969_v30, %v7944_v55  ;;  %v7942_v24 = vrot.slane %v16222_v10, 1  ;;  %v14405_v30 = vld [vmem:[#allocation8 + $0x1460] ss:$16 sps:$4 sm:$0xff]  }
 0x41a   :  { %9420 = vmatprep.subr.bf16.mxu0 %v14389_v25  ;;  %16970 = vst [vmem:[#allocation21_spill] sm:$0xff] %v16480_v32  ;;  %v16485_v25 = vrot.slane %v16226_v19, 1 }
 0x41b   :  { %7364 = vmatpush1.bf16.msra.mxu1 %v14378_v43  ;;  %v14399_v43 = vld [vmem:[#allocation8 + $0x1440] ss:$16 sps:$4 sm:$0xff]  }
 0x41c   :  { %7365 = vmatprep.subr.bf16.mxu1 %v14386_v31  ;;  %9384 = vmatmul.mubr.bf16.vlgmr.msra.gmra.mrb[64].mxu0 %v16474_v46  ;;  %v14407_v31 = vld [vmem:[#allocation8 + $0x1464] ss:$16 sps:$4 sm:$0xff]  }
 0x41d   :  { %9393 = vmatprep.mubr.bf16.mxu0 %v16480_v32  ;;  %9421 = vmatpush1.bf16.msra.mxu0 %v14387_v39  ;;  %v16488_v39 = vsel %vm1151_vm3, %v7921_v50, %v7942_v24  ;;  %v14410_v50 = vld [vmem:[#allocation8 + $0x18c] ss:$16 sps:$4 sm:$0xff]   ;;  %v14408_v32 = vld [vmem:[#allocation8 + $0x188] ss:$16 sps:$4 sm:$0xff]  }
 0x41e   :  { %9422 = vmatprep.subr.bf16.mxu0 %v14395_v47  ;;  %16971 = vst [vmem:[#allocation22_spill] sm:$0xff] %v16488_v39  ;;  %v16493_v47 = vsel %vm1151_vm3, %v7944_v55, %v16485_v25  ;;  %v14419_v55 = vld [vmem:[#allocation8 + $0x14a4] ss:$16 sps:$4 sm:$0xff]  }
 0x41f   :  { %7366 = vmatpush1.bf16.msra.mxu1 %v14384_v56  ;;  %16972 = vst [vmem:[#allocation25_spill] sm:$0xff] %v16493_v47  ;;  %v14404_v56 = vld [vmem:[#allocation8 + $0x16c] ss:$16 sps:$4 sm:$0xff]  }
 0x420   :  { %7367 = vmatprep.subr.bf16.mxu1 %v14392_v37  ;;  %v14413_v37 = vld [vmem:[#allocation8 + $0x1484] ss:$16 sps:$4 sm:$0xff]  }
 0x421   :  { %9423 = vmatpush1.bf16.msra.mxu0 %v14393_v14  ;;  %v14402_v14 = vld [vmem:[#allocation8 + $0x168] ss:$16 sps:$4 sm:$0xff]  }
 0x422   :  { %9424 = vmatprep.subr.bf16.mxu0 %v14401_v1  ;;  %v16497_v1 = vrot.slane %v16240_v35, 1 }
 0x423   :  { %7368 = vmatpush1.bf16.msra.mxu1 %v14390_v34  ;;  %v14411_v34 = vld [vmem:[#allocation8 + $0x1480] ss:$16 sps:$4 sm:$0xff]  }
 0x424   :  { %7369 = vmatprep.subr.bf16.mxu1 %v14398_v38  ;;  %9394 = vmatmul.mubr.bf16.gmra.mrb[68].mxu0 %v16488_v39 }
 0x425   :  { %9403 = vmatprep.mubr.bf16.mxu0 %v16493_v47  ;;  %9425 = vmatpush1.bf16.msra.mxu0 %v14399_v43  ;;  %v16501_v43 = vsel %vm1151_vm3, %v7942_v24, %v16497_v1  ;;  %v14423_v24 = vld [vmem:[#allocation8 + $0x14c0] ss:$16 sps:$4 sm:$0xff]  }
 0x426   :  { %9426 = vmatprep.subr.bf16.mxu0 %v14407_v31 }
 0x427   :  { %7370 = vmatpush1.bf16.msra.mxu1 %v14396_v51  ;;  %v14416_v51 = vld [vmem:[#allocation8 + $0x1ac] ss:$16 sps:$4 sm:$0xff]  }
 0x428   :  { %7371 = vmatprep.subr.bf16.mxu1 %v14404_v56  ;;  %v14417_v56 = vld [vmem:[#allocation8 + $0x14a0] ss:$16 sps:$4 sm:$0xff]  }
 0x429   :  { %9427 = vmatpush1.bf16.msra.mxu0 %v14405_v30  ;;  %v5581_v38 = vpop.f32.mrb[100].mxu1  ;;  %v14425_v30 = vld [vmem:[#allocation8 + $0x14c4] ss:$16 sps:$4 sm:$0xff]  }
 0x42a   :  { %9428 = vmatprep.subr.bf16.mxu0 %v14413_v37  ;;  %v5582_v39 = vpop.f32.mrb[101].mxu1  ;;  %v14422_v37 = vld [vmem:[#allocation8 + $0x1cc] ss:$16 sps:$4 sm:$0xff]   ;;  %v14431_v38 = vld [vmem:[#allocation8 + $0x14e4] ss:$16 sps:$4 sm:$0xff]  }
 0x42b   :  { %7372 = vmatpush1.bf16.msra.mxu1 %v14402_v14  ;;  %v5583_v31 = vpop.f32.mrb[102].mxu1  ;;  %v14414_v39 = vld [vmem:[#allocation8 + $0x1a8] ss:$16 sps:$4 sm:$0xff]   ;;  %v16926_v14 = vrot.slane %v16255_v45, 1 }
 0x42c   :  { %7373 = vmatprep.subr.bf16.mxu1 %v14410_v50  ;;  %9404 = vmatmul.mubr.bf16.gmra.mrb[72].mxu0 %v16501_v43  ;;  %v5584_v47 = vpop.f32.mrb[103].mxu1  ;;  %v7929_v50 = vrot.slane %v16253_v12, 1  ;;  %v14437_v31 = vld [vmem:[#allocation8 + $0x1504] ss:$16 sps:$4 sm:$0xff]  }
 0x42d   :  { %9429 = vmatpush1.bf16.msra.mxu0 %v14411_v34  ;;  %9413 = vmatprep.mubr.bf16.mxu0 %v16485_v25  ;;  %v14420_v47 = vld [vmem:[#allocation8 + $0x1c8] ss:$16 sps:$4 sm:$0xff]   ;;  %v14428_v34 = vld [vmem:[#allocation8 + $0x1ec] ss:$16 sps:$4 sm:$0xff]  }
 0x42e   :  { %9430 = vmatprep.subr.bf16.mxu0 %v14419_v55  ;;  %v14429_v55 = vld [vmem:[#allocation8 + $0x14e0] ss:$16 sps:$4 sm:$0xff]  }
 0x42f   :  { %7374 = vmatpush1.bf16.msra.mxu1 %v14408_v32  ;;  %v16511_v32 = vsel %vm1151_vm3, %v7929_v50, %v16926_v14  ;;  %v14440_v50 = vld [vmem:[#allocation8 + $0x22c] ss:$16 sps:$4 sm:$0xff]   ;;  %v14441_v14 = vld [vmem:[#allocation8 + $0x1520] ss:$16 sps:$4 sm:$0xff]  }
 0x430   :  { %7375 = vmatprep.subr.bf16.mxu1 %v14416_v51  ;;  %v14426_v51 = vld [vmem:[#allocation8 + $0x1e8] ss:$16 sps:$4 sm:$0xff]  }
 0x431   :  { %9431 = vmatpush1.bf16.msra.mxu0 %v14417_v56  ;;  %v14434_v56 = vld [vmem:[#allocation8 + $0x20c] ss:$16 sps:$4 sm:$0xff]  }
 0x432   :  { %9432 = vmatprep.subr.bf16.mxu0 %v14425_v30  ;;  %v14435_v30 = vld [vmem:[#allocation8 + $0x1500] ss:$16 sps:$4 sm:$0xff]  }
 0x433   :  { %7376 = vmatpush1.bf16.msra.mxu1 %v14414_v39  ;;  %v14443_v39 = vld [vmem:[#allocation8 + $0x1524] ss:$16 sps:$4 sm:$0xff]  }
 0x434   :  { %7377 = vmatprep.subr.bf16.mxu1 %v14422_v37  ;;  %9414 = vmatmul.mubr.bf16.gmra.mrb[100].mxu0 %v16497_v1  ;;  %v14432_v37 = vld [vmem:[#allocation8 + $0x208] ss:$16 sps:$4 sm:$0xff]  }
 0x435   :  { %9433 = vmatpush1.bf16.msra.mxu0 %v14423_v24  ;;  %9452 = vmatprep.mubr.bf16.mxu0 %v16511_v32  ;;  %v14449_v24 = vld [vmem:[#allocation8 + $0x1544] ss:$16 sps:$4 sm:$0xff]  }
 0x436   :  { %9434 = vmatprep.subr.bf16.mxu0 %v14431_v38  ;;  %v14438_v38 = vld [vmem:[#allocation8 + $0x228] ss:$16 sps:$4 sm:$0xff]  }
 0x437   :  { %7378 = vmatpush1.bf16.msra.mxu1 %v14420_v47  ;;  %v14446_v47 = vld [vmem:[#allocation8 + $0x24c] ss:$16 sps:$4 sm:$0xff]  }
 0x438   :  { %7379 = vmatprep.subr.bf16.mxu1 %v14428_v34  ;;  %v14447_v34 = vld [vmem:[#allocation8 + $0x1540] ss:$16 sps:$4 sm:$0xff]  }
 0x439   :  { %9435 = vmatpush1.bf16.msra.mxu0 %v14429_v55  ;;  %v14455_v55 = vld [vmem:[#allocation8 + $0x1564] ss:$16 sps:$4 sm:$0xff]  }
 0x43a   :  { %9436 = vmatprep.subr.bf16.mxu0 %v14437_v31  ;;  %v14444_v31 = vld [vmem:[#allocation8 + $0x248] ss:$16 sps:$4 sm:$0xff]  }
 0x43b   :  { %7380 = vmatpush1.bf16.msra.mxu1 %v14426_v51  ;;  %v14452_v51 = vld [vmem:[#allocation8 + $0x26c] ss:$16 sps:$4 sm:$0xff]  }
 0x43c   :  { %7418 = vmatprep.subr.bf16.mxu1 %v14434_v56  ;;  %v14453_v56 = vld [vmem:[#allocation8 + $0x1560] ss:$16 sps:$4 sm:$0xff]  }
 0x43d   :  { %9437 = vmatpush1.bf16.msra.mxu0 %v14435_v30 }
 0x43e   :  { %7382 = vmatmul.mubr.bf16.vlgmr.msra.gmra.mrb[88].mxu1 %v16951_v4  ;;  %9438 = vmatprep.subr.bf16.mxu0 %v14443_v39  ;;  %v14461_v4 = vld [vmem:[#allocation8 + $0x1584] ss:$16 sps:$4 sm:$0xff]  }
 0x43f   :  { %7391 = vmatprep.mubr.bf16.mxu1 %v16026_v2  ;;  %7419 = vmatpush1.bf16.msra.mxu1 %v14432_v37  ;;  %v14450_v2 = vld [vmem:[#allocation8 + $0x268] ss:$16 sps:$4 sm:$0xff]   ;;  %v14459_v37 = vld [vmem:[#allocation8 + $0x1580] ss:$16 sps:$4 sm:$0xff]  }
 0x440   :  { %7420 = vmatprep.subr.bf16.mxu1 %v14440_v50 }
 0x441   :  { %9439 = vmatpush1.bf16.msra.mxu0 %v14441_v14  ;;  %v14458_v14 = vld [vmem:[#allocation8 + $0x28c] ss:$16 sps:$4 sm:$0xff]  }
 0x442   :  { %9440 = vmatprep.subr.bf16.mxu0 %v14449_v24  ;;  %v14467_v24 = vld [vmem:[#allocation8 + $0x15a4] ss:$16 sps:$4 sm:$0xff]  }
 0x443   :  { %7421 = vmatpush1.bf16.msra.mxu1 %v14438_v38 }
 0x444   :  { %7422 = vmatprep.subr.bf16.mxu1 %v14446_v47  ;;  %v14456_v47 = vld [vmem:[#allocation8 + $0x288] ss:$16 sps:$4 sm:$0xff]  }
 0x445   :  { %9441 = vmatpush1.bf16.msra.mxu0 %v14447_v34  ;;  %v14465_v34 = vld [vmem:[#allocation8 + $0x15a0] ss:$16 sps:$4 sm:$0xff]  }
 0x446   :  { %7392 = vmatmul.mubr.bf16.gmra.mrb[92].mxu1 %v16949_v58  ;;  %9442 = vmatprep.subr.bf16.mxu0 %v14455_v55  ;;  %v14464_v58 = vld [vmem:[#allocation8 + $0x2ac] ss:$16 sps:$4 sm:$0xff]   ;;  %v14462_v55 = vld [vmem:[#allocation8 + $0x2a8] ss:$16 sps:$4 sm:$0xff]  }
 0x447   :  { %7401 = vmatprep.mubr.bf16.mxu1 %v16950_v28  ;;  %7423 = vmatpush1.bf16.msra.mxu1 %v14444_v31  ;;  %v7275_v30 = vpop.f32.mrb[88].mxu0  ;;  %v14473_v28 = vld [vmem:[#allocation8 + $0x15c4] ss:$16 sps:$4 sm:$0xff]   ;;  %v14470_v31 = vld [vmem:[#allocation8 + $0x2cc] ss:$16 sps:$4 sm:$0xff]  }
 0x448   :  { %7424 = vmatprep.subr.bf16.mxu1 %v14452_v51  ;;  %v7276_v39 = vpop.f32.mrb[89].mxu0  ;;  %v14471_v51 = vld [vmem:[#allocation8 + $0x15c0] ss:$16 sps:$4 sm:$0xff]  }
 0x449   :  { %9443 = vmatpush1.bf16.msra.mxu0 %v14453_v56  ;;  %v7277_v50 = vpop.f32.mrb[90].mxu0  ;;  %v14479_v56 = vld [vmem:[#allocation8 + $0x15e4] ss:$16 sps:$4 sm:$0xff]   ;;  %v14477_v30 = vld [vmem:[#allocation8 + $0x15e0] ss:$16 sps:$4 sm:$0xff]  }
 0x44a   :  { %9444 = vmatprep.subr.bf16.mxu0 %v14461_v4  ;;  %v7278_v38 = vpop.f32.mrb[91].mxu0  ;;  %v14468_v4 = vld [vmem:[#allocation8 + $0x2c8] ss:$16 sps:$4 sm:$0xff]   ;;  %v14482_v39 = vld [vmem:[#allocation8 + $0x30c] ss:$16 sps:$4 sm:$0xff]   ;;  %v7926_v50 = vrot.slane %v16284_v29, 1 }
 0x44b   :  { %7425 = vmatpush1.bf16.msra.mxu1 %v14450_v2  ;;  %v14476_v2 = vld [vmem:[#allocation8 + $0x2ec] ss:$16 sps:$4 sm:$0xff]   ;;  %v14491_v38 = vld [vmem:[#allocation8 + $0x1624] ss:$16 sps:$4 sm:$0xff]  }
 0x44c   :  { %7426 = vmatprep.subr.bf16.mxu1 %v14458_v14  ;;  %v7927_v14 = vrot.slane %v16286_v42, 1 }
 0x44d   :  { %9445 = vmatpush1.bf16.msra.mxu0 %v14459_v37  ;;  %v7948_v37 = vrot.slane %v16288_v20, 1 }
 0x44e   :  { %7402 = vmatmul.mubr.bf16.gmra.mrb[96].mxu1 %v16954_v26  ;;  %9446 = vmatprep.subr.bf16.mxu0 %v14467_v24  ;;  %v14485_v26 = vld [vmem:[#allocation8 + $0x1604] ss:$16 sps:$4 sm:$0xff]   ;;  %v14483_v24 = vld [vmem:[#allocation8 + $0x1600] ss:$16 sps:$4 sm:$0xff]  }
 0x44f   :  { %7427 = vmatpush1.bf16.msra.mxu1 %v14456_v47  ;;  %7411 = vmatprep.mubr.bf16.mxu1 %v16955_v0  ;;  %v14474_v0 = vld [vmem:[#allocation8 + $0x2e8] ss:$16 sps:$4 sm:$0xff]   ;;  %v16526_v47 = vsel %vm1151_vm3, %v7926_v50, %v7927_v14  ;;  %v14500_v50 = vld [vmem:[#allocation8 + $0x36c] ss:$16 sps:$4 sm:$0xff]  }
 0x450   :  { %7428 = vmatprep.subr.bf16.mxu1 %v14464_v58 }
 0x451   :  { %9447 = vmatpush1.bf16.msra.mxu0 %v14465_v34  ;;  %v14488_v34 = vld [vmem:[#allocation8 + $0x32c] ss:$16 sps:$4 sm:$0xff]  }
 0x452   :  { %9448 = vmatprep.subr.bf16.mxu0 %v14473_v28  ;;  %v14489_v28 = vld [vmem:[#allocation8 + $0x1620] ss:$16 sps:$4 sm:$0xff]  }
 0x453   :  { %7429 = vmatpush1.bf16.msra.mxu1 %v14462_v55  ;;  %v14497_v55 = vld [vmem:[#allocation8 + $0x1644] ss:$16 sps:$4 sm:$0xff]  }
 0x454   :  { %7430 = vmatprep.subr.bf16.mxu1 %v14470_v31  ;;  %v14486_v31 = vld [vmem:[#allocation8 + $0x328] ss:$16 sps:$4 sm:$0xff]  }
 0x455   :  { %9449 = vmatpush1.bf16.msra.mxu0 %v14471_v51  ;;  %v7946_v51 = vrot.slane %v16296_v44, 1 }
 0x456   :  { %7412 = vmatmul.mubr.bf16.gmra.mrb[116].mxu1 %v16960_v60  ;;  %9450 = vmatprep.subr.bf16.mxu0 %v14479_v56  ;;  %v14480_v60 = vld [vmem:[#allocation8 + $0x308] ss:$16 sps:$4 sm:$0xff]   ;;  %v14494_v56 = vld [vmem:[#allocation8 + $0x34c] ss:$16 sps:$4 sm:$0xff]  }
 0x457   :  { %7431 = vmatpush1.bf16.msra.mxu1 %v14468_v4  ;;  %7450 = vmatprep.mubr.bf16.mxu1 %v16961_v59  ;;  %v16973_v59 = vrot.slane %v16255_v45, 1  ;;  %v16537_v4 = vrot.slane %v16300_v63, 1 }
 0x458   :  { %7432 = vmatprep.subr.bf16.mxu1 %v14476_v2  ;;  %v14495_v2 = vld [vmem:[#allocation8 + $0x1640] ss:$16 sps:$4 sm:$0xff]  }
 0x459   :  { %9451 = vmatpush1.bf16.msra.mxu0 %v14477_v30  ;;  %v16532_v58 = vsel %vm1151_vm3, %v16973_v59, %v7948_v37  ;;  %v14503_v30 = vld [vmem:[#allocation8 + $0x1664] ss:$16 sps:$4 sm:$0xff]   ;;  %v16549_v59 = vrot.slane %v16314_v22, 1 }
 0x45a   :  { %9489 = vmatprep.subr.bf16.mxu0 %v14485_v26  ;;  %v14492_v26 = vld [vmem:[#allocation8 + $0x348] ss:$16 sps:$4 sm:$0xff]  }
 0x45b   :  { %7433 = vmatpush1.bf16.msra.mxu1 %v14474_v0  ;;  %v16540_v0 = vsel %vm1151_vm3, %v7927_v14, %v7946_v51  ;;  %v14506_v14 = vld [vmem:[#allocation8 + $0x38c] ss:$16 sps:$4 sm:$0xff]  }
 0x45c   :  { %7434 = vmatprep.subr.bf16.mxu1 %v14482_v39  ;;  %9453 = vmatmul.mubr.bf16.vlgmr.msra.gmra.mrb[64].mxu0 %v16526_v47  ;;  %v16545_v39 = vsel %vm1151_vm3, %v7948_v37, %v16537_v4  ;;  %v14515_v37 = vld [vmem:[#allocation8 + $0x16a4] ss:$16 sps:$4 sm:$0xff]  }
 0x45d   :  { %9462 = vmatprep.mubr.bf16.mxu0 %v16532_v58  ;;  %9490 = vmatpush1.bf16.msra.mxu0 %v14483_v24  ;;  %v14501_v24 = vld [vmem:[#allocation8 + $0x1660] ss:$16 sps:$4 sm:$0xff]  }
 0x45e   :  { %9491 = vmatprep.subr.bf16.mxu0 %v14491_v38  ;;  %v14509_v38 = vld [vmem:[#allocation8 + $0x1684] ss:$16 sps:$4 sm:$0xff]  }
 0x45f   :  { %7435 = vmatpush1.bf16.msra.mxu1 %v14480_v60  ;;  %v14498_v60 = vld [vmem:[#allocation8 + $0x368] ss:$16 sps:$4 sm:$0xff]  }
 0x460   :  { %7436 = vmatprep.subr.bf16.mxu1 %v14488_v34  ;;  %v14507_v34 = vld [vmem:[#allocation8 + $0x1680] ss:$16 sps:$4 sm:$0xff]  }
 0x461   :  { %9492 = vmatpush1.bf16.msra.mxu0 %v14489_v28 }
 0x462   :  { %9493 = vmatprep.subr.bf16.mxu0 %v14497_v55 }
 0x463   :  { %7437 = vmatpush1.bf16.msra.mxu1 %v14486_v31  ;;  %v14504_v31 = vld [vmem:[#allocation8 + $0x388] ss:$16 sps:$4 sm:$0xff]  }
 0x464   :  { %7438 = vmatprep.subr.bf16.mxu1 %v14494_v56  ;;  %9463 = vmatmul.mubr.bf16.gmra.mrb[68].mxu0 %v16540_v0  ;;  %v16553_v56 = vsel %vm1151_vm3, %v7946_v51, %v16549_v59  ;;  %v14519_v51 = vld [vmem:[#allocation8 + $0x16c0] ss:$16 sps:$4 sm:$0xff]  }
 0x465   :  { %9472 = vmatprep.mubr.bf16.mxu0 %v16545_v39  ;;  %9494 = vmatpush1.bf16.msra.mxu0 %v14495_v2 }
 0x466   :  { %9495 = vmatprep.subr.bf16.mxu0 %v14503_v30  ;;  %v14512_v30 = vld [vmem:[#allocation8 + $0x3ac] ss:$16 sps:$4 sm:$0xff]  }
 0x467   :  { %7439 = vmatpush1.bf16.msra.mxu1 %v14492_v26 }
 0x468   :  { %7440 = vmatprep.subr.bf16.mxu1 %v14500_v50  ;;  %v14513_v50 = vld [vmem:[#allocation8 + $0x16a0] ss:$16 sps:$4 sm:$0xff]  }
 0x469   :  { %9496 = vmatpush1.bf16.msra.mxu0 %v14501_v24  ;;  %v5650_v28 = vpop.f32.mrb[104].mxu1  ;;  %v14521_v24 = vld [vmem:[#allocation8 + $0x16c4] ss:$16 sps:$4 sm:$0xff]  }
 0x46a   :  { %9497 = vmatprep.subr.bf16.mxu0 %v14509_v38  ;;  %v5651_v55 = vpop.f32.mrb[105].mxu1  ;;  %v14510_v38 = vld [vmem:[#allocation8 + $0x3a8] ss:$16 sps:$4 sm:$0xff]   ;;  %v16927_v28 = vrot.slane %v16135_v40, 1 }
 0x46b   :  { %7441 = vmatpush1.bf16.msra.mxu1 %v14498_v60  ;;  %v5652_v2 = vpop.f32.mrb[106].mxu1  ;;  %v14518_v60 = vld [vmem:[#allocation8 + $0x3cc] ss:$16 sps:$4 sm:$0xff]   ;;  %v14527_v55 = vld [vmem:[#allocation8 + $0x16e4] ss:$16 sps:$4 sm:$0xff]  }
 0x46c   :  { %7442 = vmatprep.subr.bf16.mxu1 %v14506_v14  ;;  %9473 = vmatmul.mubr.bf16.gmra.mrb[72].mxu0 %v16553_v56  ;;  %v5653_v26 = vpop.f32.mrb[107].mxu1  ;;  %v7935_v14 = vrot.slane %v16131_v36, 1  ;;  %v14516_v2 = vld [vmem:[#allocation8 + $0x3c8] ss:$16 sps:$4 sm:$0xff]  }
 0x46d   :  { %9498 = vmatpush1.bf16.msra.mxu0 %v14507_v34  ;;  %9482 = vmatprep.mubr.bf16.mxu0 %v16537_v4  ;;  %v14522_v26 = vld [vmem:[#allocation8 + $0x3e8] ss:$16 sps:$4 sm:$0xff]  }
 0x46e   :  { %9499 = vmatprep.subr.bf16.mxu0 %v14515_v37  ;;  %v16563_v34 = vsel %vm1151_vm3, %v7935_v14, %v16927_v28  ;;  %v14524_v37 = vld [vmem:[#allocation8 + $0x3ec] ss:$16 sps:$4 sm:$0xff]   ;;  %v14537_v28 = vld [vmem:[#allocation8 + $0x1720] ss:$16 sps:$4 sm:$0xff]  }
 0x46f   :  { %7443 = vmatpush1.bf16.msra.mxu1 %v14504_v31  ;;  %v14525_v31 = vld [vmem:[#allocation8 + $0x16e0] ss:$16 sps:$4 sm:$0xff]   ;;  %v14536_v14 = vld [vmem:[#allocation8 + $0x42c] ss:$16 sps:$4 sm:$0xff]  }
 0x470   :  { %7444 = vmatprep.subr.bf16.mxu1 %v14512_v30  ;;  %v14533_v30 = vld [vmem:[#allocation8 + $0x1704] ss:$16 sps:$4 sm:$0xff]  }
 0x471   :  { %9500 = vmatpush1.bf16.msra.mxu0 %v14513_v50  ;;  %v14530_v50 = vld [vmem:[#allocation8 + $0x40c] ss:$16 sps:$4 sm:$0xff]  }
 0x472   :  { %9501 = vmatprep.subr.bf16.mxu0 %v14521_v24  ;;  %v14531_v24 = vld [vmem:[#allocation8 + $0x1700] ss:$16 sps:$4 sm:$0xff]  }
 0x473   :  { %7445 = vmatpush1.bf16.msra.mxu1 %v14510_v38  ;;  %v14539_v38 = vld [vmem:[#allocation8 + $0x1724] ss:$16 sps:$4 sm:$0xff]  }
 0x474   :  { %7446 = vmatprep.subr.bf16.mxu1 %v14518_v60  ;;  %9483 = vmatmul.mubr.bf16.gmra.mrb[104].mxu0 %v16549_v59  ;;  %v14528_v60 = vld [vmem:[#allocation8 + $0x408] ss:$16 sps:$4 sm:$0xff]  }
 0x475   :  { %9502 = vmatpush1.bf16.msra.mxu0 %v14519_v51  ;;  %9521 = vmatprep.mubr.bf16.mxu0 %v16563_v34  ;;  %v14545_v51 = vld [vmem:[#allocation8 + $0x1744] ss:$16 sps:$4 sm:$0xff]  }
 0x476   :  { %9503 = vmatprep.subr.bf16.mxu0 %v14527_v55  ;;  %v14534_v55 = vld [vmem:[#allocation8 + $0x428] ss:$16 sps:$4 sm:$0xff]  }
 0x477   :  { %7447 = vmatpush1.bf16.msra.mxu1 %v14516_v2  ;;  %v14542_v2 = vld [vmem:[#allocation8 + $0x44c] ss:$16 sps:$4 sm:$0xff]  }
 0x478   :  { %7448 = vmatprep.subr.bf16.mxu1 %v14524_v37  ;;  %v14543_v37 = vld [vmem:[#allocation8 + $0x1740] ss:$16 sps:$4 sm:$0xff]  }
 0x479   :  { %9504 = vmatpush1.bf16.msra.mxu0 %v14525_v31  ;;  %v14551_v31 = vld [vmem:[#allocation8 + $0x1764] ss:$16 sps:$4 sm:$0xff]  }
 0x47a   :  { %9505 = vmatprep.subr.bf16.mxu0 %v14533_v30  ;;  %v14540_v30 = vld [vmem:[#allocation8 + $0x448] ss:$16 sps:$4 sm:$0xff]  }
 0x47b   :  { %7449 = vmatpush1.bf16.msra.mxu1 %v14522_v26  ;;  %v14548_v26 = vld [vmem:[#allocation8 + $0x46c] ss:$16 sps:$4 sm:$0xff]  }
 0x47c   :  { %7487 = vmatprep.subr.bf16.mxu1 %v14530_v50  ;;  %v14549_v50 = vld [vmem:[#allocation8 + $0x1760] ss:$16 sps:$4 sm:$0xff]  }
 0x47d   :  { %9506 = vmatpush1.bf16.msra.mxu0 %v14531_v24 }
 0x47e   :  { %7451 = vmatmul.mubr.bf16.vlgmr.msra.gmra.mrb[88].mxu1 %v16208_v16  ;;  %9507 = vmatprep.subr.bf16.mxu0 %v14539_v38  ;;  %v14557_v16 = vld [vmem:[#allocation8 + $0x1784] ss:$16 sps:$4 sm:$0xff]  }
 0x47f   :  { %7460 = vmatprep.mubr.bf16.mxu1 %v16039_v52  ;;  %7488 = vmatpush1.bf16.msra.mxu1 %v14528_v60  ;;  %v14546_v52 = vld [vmem:[#allocation8 + $0x468] ss:$16 sps:$4 sm:$0xff]   ;;  %v14555_v60 = vld [vmem:[#allocation8 + $0x1780] ss:$16 sps:$4 sm:$0xff]  }
 0x480   :  { %7489 = vmatprep.subr.bf16.mxu1 %v14536_v14 }
 0x481   :  { %9508 = vmatpush1.bf16.msra.mxu0 %v14537_v28  ;;  %v14554_v28 = vld [vmem:[#allocation8 + $0x48c] ss:$16 sps:$4 sm:$0xff]  }
 0x482   :  { %9509 = vmatprep.subr.bf16.mxu0 %v14545_v51  ;;  %v14563_v51 = vld [vmem:[#allocation8 + $0x17a4] ss:$16 sps:$4 sm:$0xff]  }
 0x483   :  { %7490 = vmatpush1.bf16.msra.mxu1 %v14534_v55 }
 0x484   :  { %7491 = vmatprep.subr.bf16.mxu1 %v14542_v2  ;;  %v14552_v2 = vld [vmem:[#allocation8 + $0x488] ss:$16 sps:$4 sm:$0xff]  }
 0x485   :  { %9510 = vmatpush1.bf16.msra.mxu0 %v14543_v37  ;;  %v14561_v37 = vld [vmem:[#allocation8 + $0x17a0] ss:$16 sps:$4 sm:$0xff]  }
 0x486   :  { %7461 = vmatmul.mubr.bf16.gmra.mrb[92].mxu1 %v16210_v61  ;;  %9511 = vmatprep.subr.bf16.mxu0 %v14551_v31  ;;  %v14560_v61 = vld [vmem:[#allocation8 + $0x4ac] ss:$16 sps:$4 sm:$0xff]   ;;  %v14558_v31 = vld [vmem:[#allocation8 + $0x4a8] ss:$16 sps:$4 sm:$0xff]  }
 0x487   :  { %7470 = vmatprep.mubr.bf16.mxu1 %v16214_v15  ;;  %7492 = vmatpush1.bf16.msra.mxu1 %v14540_v30  ;;  %v7344_v24 = vpop.f32.mrb[92].mxu0  ;;  %v14569_v15 = vld [vmem:[#allocation8 + $0x17c4] ss:$16 sps:$4 sm:$0xff]   ;;  %v14566_v30 = vld [vmem:[#allocation8 + $0x4cc] ss:$16 sps:$4 sm:$0xff]  }
 0x488   :  { %7493 = vmatprep.subr.bf16.mxu1 %v14548_v26  ;;  %v7345_v38 = vpop.f32.mrb[93].mxu0  ;;  %v14567_v26 = vld [vmem:[#allocation8 + $0x17c0] ss:$16 sps:$4 sm:$0xff]  }
 0x489   :  { %9512 = vmatpush1.bf16.msra.mxu0 %v14549_v50  ;;  %v7346_v14 = vpop.f32.mrb[94].mxu0  ;;  %v14575_v50 = vld [vmem:[#allocation8 + $0x17e4] ss:$16 sps:$4 sm:$0xff]   ;;  %v14573_v24 = vld [vmem:[#allocation8 + $0x17e0] ss:$16 sps:$4 sm:$0xff]   ;;  %v7952_v38 = vrot.slane %v16174_v62, 1 }
 0x48a   :  { %9513 = vmatprep.subr.bf16.mxu0 %v14557_v16  ;;  %v7347_v55 = vpop.f32.mrb[95].mxu0  ;;  %v14564_v16 = vld [vmem:[#allocation8 + $0x4c8] ss:$16 sps:$4 sm:$0xff]  }
 0x48b   :  { %7494 = vmatpush1.bf16.msra.mxu1 %v14546_v52  ;;  %v14572_v52 = vld [vmem:[#allocation8 + $0x4ec] ss:$16 sps:$4 sm:$0xff]   ;;  %v14576_v14 = vld [vmem:[#allocation8 + $0x508] ss:$16 sps:$4 sm:$0xff]  }
 0x48c   :  { %7495 = vmatprep.subr.bf16.mxu1 %v14554_v28  ;;  %v14578_v28 = vld [vmem:[#allocation8 + $0x50c] ss:$16 sps:$4 sm:$0xff]  }
 0x48d   :  { %9514 = vmatpush1.bf16.msra.mxu0 %v14555_v60  ;;  %v7932_v60 = vrot.slane %v16133_v41, 1  ;;  %v14581_v55 = vld [vmem:[#allocation8 + $0x52c] ss:$16 sps:$4 sm:$0xff]  }
 0x48e   :  { %7471 = vmatmul.mubr.bf16.gmra.mrb[96].mxu1 %v16222_v10  ;;  %9515 = vmatprep.subr.bf16.mxu0 %v14563_v51  ;;  %v14570_v10 = vld [vmem:[#allocation8 + $0x4e8] ss:$16 sps:$4 sm:$0xff]  }
 0x48f   :  { %7496 = vmatpush1.bf16.msra.mxu1 %v14552_v2  ;;  %7480 = vmatprep.mubr.bf16.mxu1 %v16226_v19  ;;  %v7933_v19 = vrot.slane %v16137_v23, 1  ;;  %v14579_v2 = vld [vmem:[#allocation8 + $0x528] ss:$16 sps:$4 sm:$0xff]  }
 0x490   :  { %7497 = vmatprep.subr.bf16.mxu1 %v14560_v61  ;;  %v7950_v61 = vrot.slane %v16169_v8, 1 }
 0x491   :  { %9516 = vmatpush1.bf16.msra.mxu0 %v14561_v37  ;;  %v16578_v51 = vsel %vm1151_vm3, %v7932_v60, %v7933_v19  ;;  %v14584_v37 = vld [vmem:[#allocation8 + $0x54c] ss:$16 sps:$4 sm:$0xff]  }
 0x492   :  { %9517 = vmatprep.subr.bf16.mxu0 %v14569_v15  ;;  %v16589_v15 = vrot.slane %v16171_v11, 1 }
 0x493   :  { %7498 = vmatpush1.bf16.msra.mxu1 %v14558_v31  ;;  %v14582_v31 = vld [vmem:[#allocation8 + $0x548] ss:$16 sps:$4 sm:$0xff]  }
 0x494   :  { %7499 = vmatprep.subr.bf16.mxu1 %v14566_v30  ;;  %v16592_v30 = vsel %vm1151_vm3, %v7933_v19, %v7950_v61 }
 0x495   :  { %9518 = vmatpush1.bf16.msra.mxu0 %v14567_v26  ;;  %v16597_v26 = vsel %vm1151_vm3, %v7952_v38, %v16589_v15 }
 0x496   :  { %7481 = vmatmul.mubr.bf16.gmra.mrb[120].mxu1 %v16240_v35  ;;  %9519 = vmatprep.subr.bf16.mxu0 %v14575_v50  ;;  %v16974_v35 = vrot.slane %v16135_v40, 1  ;;  %v14587_v50 = vld [vmem:[#allocation8 + $0x56c] ss:$16 sps:$4 sm:$0xff]  }
 0x497   :  { %7500 = vmatpush1.bf16.msra.mxu1 %v14564_v16  ;;  %7519 = vmatprep.mubr.bf16.mxu1 %v16253_v12  ;;  %v14585_v16 = vld [vmem:[#allocation8 + $0x568] ss:$16 sps:$4 sm:$0xff]  }
 0x498   :  { %7501 = vmatprep.subr.bf16.mxu1 %v14572_v52  ;;  %v16584_v12 = vsel %vm1151_vm3, %v16974_v35, %v7952_v38  ;;  %v16601_v52 = vrot.slane %v16183_v21, 1 }
 0x499   :  { %9520 = vmatpush1.bf16.msra.mxu0 %v14573_v24  ;;  %v14590_v24 = vld [vmem:[#allocation8 + $0x58c] ss:$16 sps:$4 sm:$0xff]  }
 0x49a   :  { %v16605_v60 = vsel %vm1151_vm3, %v7950_v61, %v16601_v52  ;;  %v14597_v61 = vld [vmem:[#allocation8 + $0x5e8] ss:$16 sps:$4 sm:$0xff]  }
 0x49b   :  { %7502 = vmatpush1.bf16.msra.mxu1 %v14570_v10 }
 0x49c   :  { %7503 = vmatprep.subr.bf16.mxu1 %v14578_v28  ;;  %9522 = vmatmul.mubr.bf16.vlgmr.msra.gmra.mrb[64].mxu0 %v16578_v51  ;;  %v14588_v28 = vld [vmem:[#allocation8 + $0x588] ss:$16 sps:$4 sm:$0xff]  }
 0x49d   :  { %9531 = vmatprep.mubr.bf16.mxu0 %v16584_v12 }
 0x49f   :  { %7504 = vmatpush1.bf16.msra.mxu1 %v14576_v14  ;;  %v14593_v14 = vld [vmem:[#allocation8 + $0x5ac] ss:$16 sps:$4 sm:$0xff]  }
 0x4a0   :  { %7505 = vmatprep.subr.bf16.mxu1 %v14581_v55  ;;  %v14591_v55 = vld [vmem:[#allocation8 + $0x5a8] ss:$16 sps:$4 sm:$0xff]  }
 0x4a3   :  { %7506 = vmatpush1.bf16.msra.mxu1 %v14579_v2  ;;  %v14596_v2 = vld [vmem:[#allocation8 + $0x5cc] ss:$16 sps:$4 sm:$0xff]  }
 0x4a4   :  { %7507 = vmatprep.subr.bf16.mxu1 %v14584_v37  ;;  %9532 = vmatmul.mubr.bf16.gmra.mrb[68].mxu0 %v16592_v30  ;;  %v14594_v37 = vld [vmem:[#allocation8 + $0x5c8] ss:$16 sps:$4 sm:$0xff]  }
 0x4a5   :  { %9541 = vmatprep.mubr.bf16.mxu0 %v16597_v26 }
 0x4a7   :  { %7508 = vmatpush1.bf16.msra.mxu1 %v14582_v31  ;;  %v14599_v31 = vld [vmem:[#allocation8 + $0x5ec] ss:$16 sps:$4 sm:$0xff]  }
 0x4a8   :  { %7509 = vmatprep.subr.bf16.mxu1 %v14587_v50  ;;  %v14602_v50 = vld [vmem:[#allocation8 + $0x60c] ss:$16 sps:$4 sm:$0xff]  }
 0x4a9   :  { %v5719_v10 = vpop.f32.mrb[108].mxu1 }
 0x4aa   :  { %v5720_v19 = vpop.f32.mrb[109].mxu1  ;;  %v14603_v10 = vld [vmem:[#allocation8 + $0x628] ss:$16 sps:$4 sm:$0xff]  }
 0x4ab   :  { %7510 = vmatpush1.bf16.msra.mxu1 %v14585_v16  ;;  %v5721_v38 = vpop.f32.mrb[110].mxu1  ;;  %v14600_v16 = vld [vmem:[#allocation8 + $0x608] ss:$16 sps:$4 sm:$0xff]   ;;  %v14608_v19 = vld [vmem:[#allocation8 + $0x64c] ss:$16 sps:$4 sm:$0xff]  }
 0x4ac   :  { %7511 = vmatprep.subr.bf16.mxu1 %v14590_v24  ;;  %9542 = vmatmul.mubr.bf16.gmra.mrb[72].mxu0 %v16605_v60  ;;  %v5722_v35 = vpop.f32.mrb[111].mxu1  ;;  %v14605_v24 = vld [vmem:[#allocation8 + $0x62c] ss:$16 sps:$4 sm:$0xff]  }
 0x4ad   :  { %9551 = vmatprep.mubr.bf16.mxu0 %v16589_v15  ;;  %v14611_v38 = vld [vmem:[#allocation8 + $0x66c] ss:$16 sps:$4 sm:$0xff]  }
 0x4af   :  { %7512 = vmatpush1.bf16.msra.mxu1 %v14588_v28  ;;  %v14606_v28 = vld [vmem:[#allocation8 + $0x648] ss:$16 sps:$4 sm:$0xff]  }
 0x4b0   :  { %7513 = vmatprep.subr.bf16.mxu1 %v14593_v14  ;;  %v14609_v14 = vld [vmem:[#allocation8 + $0x668] ss:$16 sps:$4 sm:$0xff]  }
 0x4b3   :  { %7514 = vmatpush1.bf16.msra.mxu1 %v14591_v55  ;;  %v14614_v55 = vld [vmem:[#allocation8 + $0x68c] ss:$16 sps:$4 sm:$0xff]  }
 0x4b4   :  { %7515 = vmatprep.subr.bf16.mxu1 %v14596_v2  ;;  %9552 = vmatmul.mubr.bf16.gmra.mrb[108].mxu0 %v16601_v52 }
 0x4b7   :  { %7516 = vmatpush1.bf16.msra.mxu1 %v14594_v37  ;;  %v14612_v37 = vld [vmem:[#allocation8 + $0x688] ss:$16 sps:$4 sm:$0xff]  }
 0x4b8   :  { %7517 = vmatprep.subr.bf16.mxu1 %v14599_v31  ;;  %v14617_v31 = vld [vmem:[#allocation8 + $0x6ac] ss:$16 sps:$4 sm:$0xff]  }
 0x4bb   :  { %7518 = vmatpush1.bf16.msra.mxu1 %v14597_v61  ;;  %v14615_v61 = vld [vmem:[#allocation8 + $0x6a8] ss:$16 sps:$4 sm:$0xff]  }
 0x4bc   :  { %7556 = vmatprep.subr.bf16.mxu1 %v14602_v50  ;;  %v14623_v50 = vld [vmem:[#allocation8 + $0x6ec] ss:$16 sps:$4 sm:$0xff]  }
 0x4be   :  { %7520 = vmatmul.mubr.bf16.vlgmr.msra.gmra.mrb[88].mxu1 %v16284_v29 }
 0x4bf   :  { %7529 = vmatprep.mubr.bf16.mxu1 %v16255_v45  ;;  %7557 = vmatpush1.bf16.msra.mxu1 %v14600_v16  ;;  %v14621_v16 = vld [vmem:[#allocation8 + $0x6e8] ss:$16 sps:$4 sm:$0xff]  }
 0x4c0   :  { %7558 = vmatprep.subr.bf16.mxu1 %v14605_v24  ;;  %v14626_v24 = vld [vmem:[#allocation8 + $0x70c] ss:$16 sps:$4 sm:$0xff]  }
 0x4c3   :  { %7559 = vmatpush1.bf16.msra.mxu1 %v14603_v10  ;;  %v14720_v10 = vld [vmem:[#allocation11 + $0x200] ss:$8 sps:$4 sm:$0xff]  }
 0x4c4   :  { %7560 = vmatprep.subr.bf16.mxu1 %v14608_v19  ;;  %v14722_v19 = vld [vmem:[#allocation11 + $0x204] ss:$8 sps:$4 sm:$0xff]  }
 0x4c5   :  { %10674 = vmatprep.subr.bf16.mxu0 %v14722_v19  ;;  %v14639_v19 = vld [vmem:[#allocation8 + $0x7a8] ss:$16 sps:$4 sm:$0xff]  }
 0x4c6   :  { %7530 = vmatmul.mubr.bf16.gmra.mrb[92].mxu1 %v16286_v42  ;;  %v14620_v42 = vld [vmem:[#allocation8 + $0x6cc] ss:$16 sps:$4 sm:$0xff]   ;;  %10675 = vmatpush1.bf16.msra.mxu0 %v14720_v10 }
 0x4c7   :  { %7539 = vmatprep.mubr.bf16.mxu1 %v16288_v20  ;;  %7561 = vmatpush1.bf16.msra.mxu1 %v14606_v28  ;;  %v9346_v35 = vpop.f32.mrb[96].mxu0  ;;  %v14618_v20 = vld [vmem:[#allocation8 + $0x6c8] ss:$16 sps:$4 sm:$0xff]  }
 0x4c8   :  { %7562 = vmatprep.subr.bf16.mxu1 %v14611_v38  ;;  %v9347_v29 = vpop.f32.mrb[97].mxu0  ;;  %v14627_v28 = vld [vmem:[#allocation8 + $0x728] ss:$16 sps:$4 sm:$0xff]   ;;  %v14726_v38 = vld [vmem:[#allocation11 + $0x210] ss:$8 sps:$4 sm:$0xff]  }
 0x4c9   :  { %v9348_v2 = vpop.f32.mrb[98].mxu0  ;;  %v14732_v35 = vld [vmem:[#allocation11 + $0x220] ss:$8 sps:$4 sm:$0xff]  }
 0x4ca   :  { %v9349_v45 = vpop.f32.mrb[99].mxu0  ;;  %v14635_v29 = vld [vmem:[#allocation8 + $0x76c] ss:$16 sps:$4 sm:$0xff]   ;;  %v14633_v2 = vld [vmem:[#allocation8 + $0x768] ss:$16 sps:$4 sm:$0xff]  }
 0x4cb   :  { %7563 = vmatpush1.bf16.msra.mxu1 %v14609_v14  ;;  %v14728_v14 = vld [vmem:[#allocation11 + $0x214] ss:$8 sps:$4 sm:$0xff]   ;;  %v14738_v45 = vld [vmem:[#allocation11 + $0x230] ss:$8 sps:$4 sm:$0xff]  }
 0x4cc   :  { %7564 = vmatprep.subr.bf16.mxu1 %v14614_v55  ;;  %10676 = vmatprep.subr.bf16.mxu0 %v14728_v14  ;;  %v14734_v55 = vld [vmem:[#allocation11 + $0x224] ss:$8 sps:$4 sm:$0xff]  }
 0x4cd   :  { %10677 = vmatpush1.bf16.msra.mxu0 %v14726_v38  ;;  %v14647_v38 = vld [vmem:[#allocation8 + $0x7ec] ss:$16 sps:$4 sm:$0xff]   ;;  %v14645_v14 = vld [vmem:[#allocation8 + $0x7e8] ss:$16 sps:$4 sm:$0xff]  }
 0x4ce   :  { %7540 = vmatmul.mubr.bf16.gmra.mrb[96].mxu1 %v16296_v44  ;;  %v14624_v44 = vld [vmem:[#allocation8 + $0x708] ss:$16 sps:$4 sm:$0xff]   ;;  %10678 = vmatprep.subr.bf16.mxu0 %v14734_v55 }
 0x4cf   :  { %7565 = vmatpush1.bf16.msra.mxu1 %v14612_v37  ;;  %7549 = vmatprep.mubr.bf16.mxu1 %v16300_v63  ;;  %v14629_v63 = vld [vmem:[#allocation8 + $0x72c] ss:$16 sps:$4 sm:$0xff]   ;;  %v14740_v37 = vld [vmem:[#allocation11 + $0x234] ss:$8 sps:$4 sm:$0xff]  }
 0x4d0   :  { %7566 = vmatprep.subr.bf16.mxu1 %v14617_v31  ;;  %v14638_v31 = vld [vmem:[#allocation8 + $0x78c] ss:$16 sps:$4 sm:$0xff]   ;;  %v14651_v55 = vld [vmem:[#allocation8 + $0x1028] ss:$16 sps:$4 sm:$0xff]  }
 0x4d1   :  { %10679 = vmatpush1.bf16.msra.mxu0 %v14732_v35  ;;  %v14653_v35 = vld [vmem:[#allocation8 + $0x102c] ss:$16 sps:$4 sm:$0xff]  }
 0x4d2   :  { %10680 = vmatprep.subr.bf16.mxu0 %v14740_v37  ;;  %v14654_v37 = vld [vmem:[#allocation8 + $0x1048] ss:$16 sps:$4 sm:$0xff]  }
 0x4d3   :  { %7567 = vmatpush1.bf16.msra.mxu1 %v14615_v61 }
 0x4d4   :  { %7568 = vmatprep.subr.bf16.mxu1 %v14620_v42  ;;  %v14636_v42 = vld [vmem:[#allocation8 + $0x788] ss:$16 sps:$4 sm:$0xff]  }
 0x4d5   :  { %10681 = vmatpush1.bf16.msra.mxu0 %v14738_v45  ;;  %v14656_v45 = vld [vmem:[#allocation8 + $0x104c] ss:$16 sps:$4 sm:$0xff]  }
 0x4d6   :  { %7550 = vmatmul.mubr.bf16.gmra.mrb[124].mxu1 %v16314_v22  ;;  %v14632_v22 = vld [vmem:[#allocation8 + $0x74c] ss:$16 sps:$4 sm:$0xff]  }
 0x4d7   :  { %7569 = vmatpush1.bf16.msra.mxu1 %v14618_v20  ;;  %7588 = vmatprep.mubr.bf16.mxu1 %v16131_v36  ;;  %v14630_v36 = vld [vmem:[#allocation8 + $0x748] ss:$16 sps:$4 sm:$0xff]  }
 0x4d8   :  { %7570 = vmatprep.subr.bf16.mxu1 %v14623_v50 }
 0x4db   :  { %7571 = vmatpush1.bf16.msra.mxu1 %v14621_v16  ;;  %v14744_v16 = vld [vmem:[#allocation11 + $0x240] ss:$8 sps:$4 sm:$0xff]  }
 0x4dc   :  { %7572 = vmatprep.subr.bf16.mxu1 %v14626_v24  ;;  %v14746_v24 = vld [vmem:[#allocation11 + $0x244] ss:$8 sps:$4 sm:$0xff]  }
 0x4dd   :  { %10682 = vmatprep.subr.bf16.mxu0 %v14746_v24 }
 0x4de   :  { %10683 = vmatpush1.bf16.msra.mxu0 %v14744_v16 }
 0x4df   :  { %7573 = vmatpush1.bf16.msra.mxu1 %v14624_v44  ;;  %v14641_v44 = vld [vmem:[#allocation8 + $0x7ac] ss:$16 sps:$4 sm:$0xff]  }
 0x4e0   :  { %7574 = vmatprep.subr.bf16.mxu1 %v14629_v63  ;;  %v14644_v63 = vld [vmem:[#allocation8 + $0x7cc] ss:$16 sps:$4 sm:$0xff]  }
 0x4e3   :  { %7575 = vmatpush1.bf16.msra.mxu1 %v14627_v28  ;;  %v14642_v28 = vld [vmem:[#allocation8 + $0x7c8] ss:$16 sps:$4 sm:$0xff]  }
 0x4e4   :  { %7576 = vmatprep.subr.bf16.mxu1 %v14632_v22  ;;  %v14650_v22 = vld [vmem:[#allocation8 + $0x100c] ss:$16 sps:$4 sm:$0xff]  }
 0x4e7   :  { %7577 = vmatpush1.bf16.msra.mxu1 %v14630_v36  ;;  %v14648_v36 = vld [vmem:[#allocation8 + $0x1008] ss:$16 sps:$4 sm:$0xff]  }
 0x4e8   :  { %7578 = vmatprep.subr.bf16.mxu1 %v14635_v29  ;;  %v14750_v29 = vld [vmem:[#allocation11 + $0x250] ss:$8 sps:$4 sm:$0xff]  }
 0x4e9   :  { %v5788_v61 = vpop.f32.mrb[112].mxu1 }
 0x4ea   :  { %v5789_v20 = vpop.f32.mrb[113].mxu1  ;;  %v14756_v61 = vld [vmem:[#allocation11 + $0x260] ss:$8 sps:$4 sm:$0xff]  }
 0x4eb   :  { %7579 = vmatpush1.bf16.msra.mxu1 %v14633_v2  ;;  %v5790_v50 = vpop.f32.mrb[114].mxu1  ;;  %v14752_v2 = vld [vmem:[#allocation11 + $0x254] ss:$8 sps:$4 sm:$0xff]   ;;  %v14662_v20 = vld [vmem:[#allocation8 + $0x108c] ss:$16 sps:$4 sm:$0xff]  }
 0x4ec   :  { %7580 = vmatprep.subr.bf16.mxu1 %v14638_v31  ;;  %v5791_v10 = vpop.f32.mrb[115].mxu1  ;;  %10684 = vmatprep.subr.bf16.mxu0 %v14752_v2  ;;  %v14659_v31 = vld [vmem:[#allocation8 + $0x106c] ss:$16 sps:$4 sm:$0xff]  }
 0x4ed   :  { %10685 = vmatpush1.bf16.msra.mxu0 %v14750_v29  ;;  %v14764_v10 = vld [vmem:[#allocation11 + $0x274] ss:$8 sps:$4 sm:$0xff]   ;;  %v14782_v29 = vld [vmem:[#allocation11 + $0x2a4] ss:$8 sps:$4 sm:$0xff]   ;;  %v14674_v2 = vld [vmem:[#allocation8 + $0x110c] ss:$16 sps:$4 sm:$0xff]  }
 0x4ef   :  { %7581 = vmatpush1.bf16.msra.mxu1 %v14636_v42  ;;  %v14758_v42 = vld [vmem:[#allocation11 + $0x264] ss:$8 sps:$4 sm:$0xff]  }
 0x4f0   :  { %7582 = vmatprep.subr.bf16.mxu1 %v14641_v44  ;;  %10686 = vmatprep.subr.bf16.mxu0 %v14758_v42  ;;  %v14762_v44 = vld [vmem:[#allocation11 + $0x270] ss:$8 sps:$4 sm:$0xff]   ;;  %v14792_v42 = vld [vmem:[#allocation11 + $0x2c0] ss:$8 sps:$4 sm:$0xff]  }
 0x4f1   :  { %10687 = vmatpush1.bf16.msra.mxu0 %v14756_v61  ;;  %v14677_v61 = vld [vmem:[#allocation8 + $0x112c] ss:$16 sps:$4 sm:$0xff]  }
 0x4f2   :  { %10688 = vmatprep.subr.bf16.mxu0 %v14764_v10  ;;  %v14804_v10 = vld [vmem:[#allocation11 + $0x2e0] ss:$8 sps:$4 sm:$0xff]  }
 0x4f3   :  { %7583 = vmatpush1.bf16.msra.mxu1 %v14639_v19  ;;  %v14660_v19 = vld [vmem:[#allocation8 + $0x1088] ss:$16 sps:$4 sm:$0xff]  }
 0x4f4   :  { %7584 = vmatprep.subr.bf16.mxu1 %v14644_v63  ;;  %v14665_v63 = vld [vmem:[#allocation8 + $0x10ac] ss:$16 sps:$4 sm:$0xff]  }
 0x4f5   :  { %10689 = vmatpush1.bf16.msra.mxu0 %v14762_v44  ;;  %v14683_v44 = vld [vmem:[#allocation8 + $0x116c] ss:$16 sps:$4 sm:$0xff]  }
 0x4f7   :  { %7585 = vmatpush1.bf16.msra.mxu1 %v14642_v28  ;;  %v14663_v28 = vld [vmem:[#allocation8 + $0x10a8] ss:$16 sps:$4 sm:$0xff]  }
 0x4f8   :  { %7586 = vmatprep.subr.bf16.mxu1 %v14647_v38  ;;  %v14668_v38 = vld [vmem:[#allocation8 + $0x10cc] ss:$16 sps:$4 sm:$0xff]  }
 0x4fb   :  { %7587 = vmatpush1.bf16.msra.mxu1 %v14645_v14  ;;  %v14774_v14 = vld [vmem:[#allocation11 + $0x290] ss:$8 sps:$4 sm:$0xff]  }
 0x4fc   :  { %9558 = vmatprep.subr.bf16.mxu1 %v14650_v22  ;;  %v14776_v22 = vld [vmem:[#allocation11 + $0x294] ss:$8 sps:$4 sm:$0xff]  }
 0x4fe   :  { %7589 = vmatmul.mubr.bf16.vlgmr.msra.gmra.mrb[88].mxu1 %v16133_v41  ;;  %v14657_v41 = vld [vmem:[#allocation8 + $0x1068] ss:$16 sps:$4 sm:$0xff]  }
 0x4ff   :  { %7598 = vmatprep.mubr.bf16.mxu1 %v16135_v40  ;;  %9559 = vmatpush1.bf16.msra.mxu1 %v14648_v36  ;;  %v14666_v36 = vld [vmem:[#allocation8 + $0x10c8] ss:$16 sps:$4 sm:$0xff]  }
 0x500   :  { %9560 = vmatprep.subr.bf16.mxu1 %v14653_v35  ;;  %v14671_v35 = vld [vmem:[#allocation8 + $0x10ec] ss:$16 sps:$4 sm:$0xff]  }
 0x503   :  { %9561 = vmatpush1.bf16.msra.mxu1 %v14651_v55  ;;  %v14780_v55 = vld [vmem:[#allocation11 + $0x2a0] ss:$8 sps:$4 sm:$0xff]  }
 0x504   :  { %9562 = vmatprep.subr.bf16.mxu1 %v14656_v45  ;;  %v14786_v45 = vld [vmem:[#allocation11 + $0x2b0] ss:$8 sps:$4 sm:$0xff]  }
 0x506   :  { %7599 = vmatmul.mubr.bf16.gmra.mrb[92].mxu1 %v16137_v23  ;;  %v14770_v23 = vld [vmem:[#allocation11 + $0x284] ss:$8 sps:$4 sm:$0xff]  }
 0x507   :  { %7608 = vmatprep.mubr.bf16.mxu1 %v16174_v62  ;;  %9563 = vmatpush1.bf16.msra.mxu1 %v14654_v37  ;;  %v9415_v40 = vpop.f32.mrb[100].mxu0  ;;  %v14768_v62 = vld [vmem:[#allocation11 + $0x280] ss:$8 sps:$4 sm:$0xff]   ;;  %v14794_v37 = vld [vmem:[#allocation11 + $0x2c4] ss:$8 sps:$4 sm:$0xff]  }
 0x508   :  { %9564 = vmatprep.subr.bf16.mxu1 %v14659_v31  ;;  %v9416_v50 = vpop.f32.mrb[101].mxu0  ;;  %10690 = vmatprep.subr.bf16.mxu0 %v14770_v23  ;;  %v14672_v31 = vld [vmem:[#allocation8 + $0x1108] ss:$16 sps:$4 sm:$0xff]   ;;  %v16976_v40 = vmov 0.0   ;;  %v14686_v23 = vld [vmem:[#allocation8 + $0x118c] ss:$16 sps:$4 sm:$0xff]  }
 0x509   :  { %v9417_v16 = vpop.f32.mrb[102].mxu0  ;;  %10691 = vmatpush1.bf16.msra.mxu0 %v14768_v62  ;;  %v14798_v50 = vld [vmem:[#allocation11 + $0x2d0] ss:$8 sps:$4 sm:$0xff]  }
 0x50a   :  { %v9418_v24 = vpop.f32.mrb[103].mxu0  ;;  %10692 = vmatprep.subr.bf16.mxu0 %v14776_v22  ;;  %v14806_v16 = vld [vmem:[#allocation11 + $0x2e4] ss:$8 sps:$4 sm:$0xff]  }
 0x50b   :  { %9565 = vmatpush1.bf16.msra.mxu1 %v14657_v41  ;;  %v16975_v41 = vlaneseq  ;;  %v14678_v24 = vld [vmem:[#allocation8 + $0x1148] ss:$16 sps:$4 sm:$0xff]  }
 0x50c   :  { %9566 = vmatprep.subr.bf16.mxu1 %v14662_v20  ;;  %v14680_v20 = vld [vmem:[#allocation8 + $0x114c] ss:$16 sps:$4 sm:$0xff]  }
 0x50d   :  { %10693 = vmatpush1.bf16.msra.mxu0 %v14774_v14  ;;  %vm9930_vm6 = vcmp.lt.s32.totalorder %v16975_v41, 512  ;;  %v14684_v14 = vld [vmem:[#allocation8 + $0x1188] ss:$16 sps:$4 sm:$0xff]  }
 0x50e   :  { %7609 = vmatmul.mubr.bf16.gmra.mrb[96].mxu1 %v16169_v8  ;;  %v14788_v8 = vld [vmem:[#allocation11 + $0x2b4] ss:$8 sps:$4 sm:$0xff]   ;;  %10694 = vmatprep.subr.bf16.mxu0 %v14782_v29  ;;  %9933 = vst.msk [vmem:[#allocation3 + $0x7] ss:$8 sm:$0xf] %vm9930_vm6, %v16976_v40 }
 0x50f   :  { %9567 = vmatpush1.bf16.msra.mxu1 %v14660_v19  ;;  %7618 = vmatprep.mubr.bf16.mxu1 %v16171_v11  ;;  %v14669_v11 = vld [vmem:[#allocation8 + $0x10e8] ss:$16 sps:$4 sm:$0xff]   ;;  %9936 = vst.msk [vmem:[#allocation3 + $0x60] ss:$8 sm:$0xf] %vm9930_vm6, %v16976_v40 }
 0x510   :  { %9568 = vmatprep.subr.bf16.mxu1 %v14665_v63  ;;  %9988 = vst.msk [vmem:[#allocation3 + $0x67] ss:$8 sm:$0xf] %vm9930_vm6, %v16976_v40  ;;  %9991 = vst.msk [vmem:[#allocation3 + $0xc0] ss:$8 sm:$0xf] %vm9930_vm6, %v16976_v40 }
 0x511   :  { %10695 = vmatpush1.bf16.msra.mxu0 %v14780_v55  ;;  %v14812_v19 = vld [vmem:[#allocation11 + $0x2f4] ss:$8 sps:$4 sm:$0xff]   ;;  %v14692_v29 = vld [vmem:[#allocation8 + $0x11cc] ss:$16 sps:$4 sm:$0xff]  }
 0x512   :  { %10696 = vmatprep.subr.bf16.mxu0 %v14788_v8  ;;  %v14681_v63 = vld [vmem:[#allocation8 + $0x1168] ss:$16 sps:$4 sm:$0xff]  }
 0x513   :  { %9569 = vmatpush1.bf16.msra.mxu1 %v14663_v28  ;;  %v14810_v28 = vld [vmem:[#allocation11 + $0x2f0] ss:$8 sps:$4 sm:$0xff]   ;;  %v14687_v55 = vld [vmem:[#allocation8 + $0x11a8] ss:$16 sps:$4 sm:$0xff]  }
 0x514   :  { %9570 = vmatprep.subr.bf16.mxu1 %v14668_v38  ;;  %v14690_v8 = vld [vmem:[#allocation8 + $0x11c8] ss:$16 sps:$4 sm:$0xff]  }
 0x515   :  { %10697 = vmatpush1.bf16.msra.mxu0 %v14786_v45  ;;  %v14698_v45 = vld [vmem:[#allocation8 + $0x120c] ss:$16 sps:$4 sm:$0xff]   ;;  %v14702_v41 = vld [vmem:[#allocation8 + $0x1248] ss:$16 sps:$4 sm:$0xff]  }
 0x516   :  { %7619 = vmatmul.mubr.bf16.gmra.mrb[128].mxu1 %v16183_v21  ;;  %10698 = vmatprep.subr.bf16.mxu0 %v14794_v37  ;;  %v14800_v21 = vld [vmem:[#allocation11 + $0x2d4] ss:$8 sps:$4 sm:$0xff]  }
 0x517   :  { %9571 = vmatpush1.bf16.msra.mxu1 %v14666_v36  ;;  %9590 = vmatprep.mubr.bf16.mxu1 %v16383_v33  ;;  %v14675_v33 = vld [vmem:[#allocation8 + $0x1128] ss:$16 sps:$4 sm:$0xff]   ;;  %v14689_v36 = vld [vmem:[#allocation8 + $0x11ac] ss:$16 sps:$4 sm:$0xff]  }
 0x518   :  { %9572 = vmatprep.subr.bf16.mxu1 %v14671_v35  ;;  %v14696_v37 = vld [vmem:[#allocation8 + $0x1208] ss:$16 sps:$4 sm:$0xff]  }
 0x519   :  { %10699 = vmatpush1.bf16.msra.mxu0 %v14792_v42  ;;  %v14704_v42 = vld [vmem:[#allocation8 + $0x124c] ss:$16 sps:$4 sm:$0xff]   ;;  %v14705_v40 = vld [vmem:[#allocation8 + $0x1268] ss:$16 sps:$4 sm:$0xff]  }
 0x51a   :  { %10700 = vmatprep.subr.bf16.mxu0 %v14800_v21  ;;  %v14707_v21 = vld [vmem:[#allocation8 + $0x126c] ss:$16 sps:$4 sm:$0xff]  }
 0x51b   :  { %9573 = vmatpush1.bf16.msra.mxu1 %v14669_v11  ;;  %v14695_v11 = vld [vmem:[#allocation8 + $0x11ec] ss:$16 sps:$4 sm:$0xff]  }
 0x51c   :  { %9574 = vmatprep.subr.bf16.mxu1 %v14674_v2  ;;  %v14693_v2 = vld [vmem:[#allocation8 + $0x11e8] ss:$16 sps:$4 sm:$0xff]  }
 0x51d   :  { %10701 = vmatpush1.bf16.msra.mxu0 %v14798_v50 }
 0x51e   :  { %10702 = vmatprep.subr.bf16.mxu0 %v14806_v16  ;;  %v14708_v16 = vld [vmem:[#allocation8 + $0x1288] ss:$16 sps:$4 sm:$0xff]  }
 0x51f   :  { %9575 = vmatpush1.bf16.msra.mxu1 %v14672_v31  ;;  %v14701_v31 = vld [vmem:[#allocation8 + $0x122c] ss:$16 sps:$4 sm:$0xff]  }
 0x520   :  { %9576 = vmatprep.subr.bf16.mxu1 %v14677_v61  ;;  %v14699_v61 = vld [vmem:[#allocation8 + $0x1228] ss:$16 sps:$4 sm:$0xff]  }
 0x521   :  { %10703 = vmatpush1.bf16.msra.mxu0 %v14804_v10  ;;  %v14719_v10 = vld [vmem:[#allocation8 + $0x12ec] ss:$16 sps:$4 sm:$0xff]  }
 0x522   :  { %10704 = vmatprep.subr.bf16.mxu0 %v14812_v19  ;;  %v14717_v19 = vld [vmem:[#allocation8 + $0x12e8] ss:$16 sps:$4 sm:$0xff]  }
 0x523   :  { %9577 = vmatpush1.bf16.msra.mxu1 %v14675_v33 }
 0x524   :  { %9578 = vmatprep.subr.bf16.mxu1 %v14680_v20  ;;  %v14710_v20 = vld [vmem:[#allocation8 + $0x128c] ss:$16 sps:$4 sm:$0xff]  }
 0x525   :  { %10705 = vmatpush1.bf16.msra.mxu0 %v14810_v28  ;;  %v14735_v28 = vld [vmem:[#allocation8 + $0x1348] ss:$16 sps:$4 sm:$0xff]  }
 0x527   :  { %9579 = vmatpush1.bf16.msra.mxu1 %v14678_v24  ;;  %v14713_v24 = vld [vmem:[#allocation8 + $0x12ac] ss:$16 sps:$4 sm:$0xff]  }
 0x528   :  { %9580 = vmatprep.subr.bf16.mxu1 %v14683_v44  ;;  %v14711_v44 = vld [vmem:[#allocation8 + $0x12a8] ss:$16 sps:$4 sm:$0xff]  }
 0x529   :  { %v7413_v62 = vpop.f32.mrb[116].mxu1 }
 0x52a   :  { %v7414_v38 = vpop.f32.mrb[117].mxu1  ;;  %v14737_v62 = vld [vmem:[#allocation8 + $0x134c] ss:$16 sps:$4 sm:$0xff]  }
 0x52b   :  { %9581 = vmatpush1.bf16.msra.mxu1 %v14681_v63  ;;  %v7415_v22 = vpop.f32.mrb[118].mxu1  ;;  %v14725_v63 = vld [vmem:[#allocation8 + $0x130c] ss:$16 sps:$4 sm:$0xff]  }
 0x52c   :  { %9582 = vmatprep.subr.bf16.mxu1 %v14686_v23  ;;  %v7416_v35 = vpop.f32.mrb[119].mxu1  ;;  %v14731_v23 = vld [vmem:[#allocation8 + $0x132c] ss:$16 sps:$4 sm:$0xff]  }
 0x52d   :  { %v14743_v38 = vld [vmem:[#allocation8 + $0x136c] ss:$16 sps:$4 sm:$0xff]   ;;  %v16639_v35 = vld [vmem:[#allocation9] sm:$0xf] }
 0x52f   :  { %9583 = vmatpush1.bf16.msra.mxu1 %v14684_v14  ;;  %v14749_v14 = vld [vmem:[#allocation8 + $0x138c] ss:$16 sps:$4 sm:$0xff]  }
 0x530   :  { %9584 = vmatprep.subr.bf16.mxu1 %v14689_v36  ;;  %v14747_v36 = vld [vmem:[#allocation8 + $0x1388] ss:$16 sps:$4 sm:$0xff]  }
 0x533   :  { %9585 = vmatpush1.bf16.msra.mxu1 %v14687_v55 }
 0x534   :  { %9586 = vmatprep.subr.bf16.mxu1 %v14692_v29  ;;  %v14755_v29 = vld [vmem:[#allocation8 + $0x13ac] ss:$16 sps:$4 sm:$0xff]  }
 0x537   :  { %9587 = vmatpush1.bf16.msra.mxu1 %v14690_v8 }
 0x538   :  { %9588 = vmatprep.subr.bf16.mxu1 %v14695_v11  ;;  %v16977_v11 = vld [vmem:[#allocation19_spill] sm:$0xff] }
 0x53b   :  { %9589 = vmatpush1.bf16.msra.mxu1 %v14693_v2  ;;  %v16643_v2 = vrot.slane %v16639_v35, %v16977_v11 }
 0x53c   :  { %9627 = vmatprep.subr.bf16.mxu1 %v14698_v45 }
 0x53e   :  { %9591 = vmatmul.mubr.bf16.vlgmr.msra.gmra.mrb[88].mxu1 %v16412_v7 }
 0x53f   :  { %9600 = vmatprep.mubr.bf16.mxu1 %v16420_v18  ;;  %9628 = vmatpush1.bf16.msra.mxu1 %v14696_v37  ;;  %v16978_v37 = vld [vmem:[#allocation20_spill] sm:$0xff] }
 0x540   :  { %9629 = vmatprep.subr.bf16.mxu1 %v14701_v31  ;;  %v16647_v31 = vrot.slane %v16639_v35, %v16978_v37 }
 0x543   :  { %9630 = vmatpush1.bf16.msra.mxu1 %v14699_v61  ;;  %v14753_v61 = vld [vmem:[#allocation8 + $0x13a8] ss:$16 sps:$4 sm:$0xff]  }
 0x544   :  { %9631 = vmatprep.subr.bf16.mxu1 %v14704_v42 }
 0x546   :  { %9601 = vmatmul.mubr.bf16.gmra.mrb[92].mxu1 %v16434_v27  ;;  %v14716_v27 = vld [vmem:[#allocation8 + $0x12cc] ss:$16 sps:$4 sm:$0xff]  }
 0x547   :  { %9610 = vmatprep.mubr.bf16.mxu1 %v16441_v57  ;;  %9632 = vmatpush1.bf16.msra.mxu1 %v14702_v41  ;;  %v9484_v33 = vpop.f32.mrb[104].mxu0  ;;  %v14714_v57 = vld [vmem:[#allocation8 + $0x12c8] ss:$16 sps:$4 sm:$0xff]  }
 0x548   :  { %9633 = vmatprep.subr.bf16.mxu1 %v14707_v21  ;;  %v9485_v7 = vpop.f32.mrb[105].mxu0  ;;  %v14761_v21 = vld [vmem:[#allocation8 + $0x13cc] ss:$16 sps:$4 sm:$0xff]  }
 0x549   :  { %v9486_v50 = vpop.f32.mrb[106].mxu0 }
 0x54a   :  { %v9487_v18 = vpop.f32.mrb[107].mxu0 }
 0x54b   :  { %9634 = vmatpush1.bf16.msra.mxu1 %v14705_v40 }
 0x54c   :  { %9635 = vmatprep.subr.bf16.mxu1 %v14710_v20 }
 0x54e   :  { %9611 = vmatmul.mubr.bf16.gmra.mrb[96].mxu1 %v16449_v3  ;;  %v14723_v3 = vld [vmem:[#allocation8 + $0x1308] ss:$16 sps:$4 sm:$0xff]  }
 0x54f   :  { %9636 = vmatpush1.bf16.msra.mxu1 %v14708_v16  ;;  %9620 = vmatprep.mubr.bf16.mxu1 %v16425_v53  ;;  %v14729_v53 = vld [vmem:[#allocation8 + $0x1328] ss:$16 sps:$4 sm:$0xff]  }
 0x550   :  { %9637 = vmatprep.subr.bf16.mxu1 %v14713_v24  ;;  %v14759_v24 = vld [vmem:[#allocation8 + $0x13c8] ss:$16 sps:$4 sm:$0xff]  }
 0x553   :  { %9638 = vmatpush1.bf16.msra.mxu1 %v14711_v44  ;;  %v14767_v44 = vld [vmem:[#allocation8 + $0x13ec] ss:$16 sps:$4 sm:$0xff]  }
 0x554   :  { %9639 = vmatprep.subr.bf16.mxu1 %v14716_v27 }
 0x556   :  { %9621 = vmatmul.mubr.bf16.gmra.mrb[132].mxu1 %v16445_v13  ;;  %v14741_v13 = vld [vmem:[#allocation8 + $0x1368] ss:$16 sps:$4 sm:$0xff]  }
 0x557   :  { %9640 = vmatpush1.bf16.msra.mxu1 %v14714_v57  ;;  %9659 = vmatprep.mubr.bf16.mxu1 %v16459_v5 }
 0x558   :  { %9641 = vmatprep.subr.bf16.mxu1 %v14719_v10 }
 0x55b   :  { %9642 = vmatpush1.bf16.msra.mxu1 %v14717_v19  ;;  %v14773_v19 = vld [vmem:[#allocation8 + $0x140c] ss:$16 sps:$4 sm:$0xff]  }
 0x55c   :  { %9643 = vmatprep.subr.bf16.mxu1 %v14725_v63 }
 0x55f   :  { %9644 = vmatpush1.bf16.msra.mxu1 %v14723_v3 }
 0x560   :  { %9645 = vmatprep.subr.bf16.mxu1 %v14731_v23  ;;  %v16979_v23 = vld [vmem:[#allocation36_spill] sm:$0xff] }
 0x563   :  { %9646 = vmatpush1.bf16.msra.mxu1 %v14729_v53 }
 0x564   :  { %9647 = vmatprep.subr.bf16.mxu1 %v14737_v62 }
 0x567   :  { %9648 = vmatpush1.bf16.msra.mxu1 %v14735_v28 }
 0x568   :  { %9649 = vmatprep.subr.bf16.mxu1 %v14743_v38  ;;  %v16980_v38 = vld [vmem:[#allocation28_spill] sm:$0xff] }
 0x569   :  { %v7482_v5 = vpop.f32.mrb[120].mxu1 }
 0x56a   :  { %v7483_v22 = vpop.f32.mrb[121].mxu1 }
 0x56b   :  { %9650 = vmatpush1.bf16.msra.mxu1 %v14741_v13  ;;  %v7484_v55 = vpop.f32.mrb[122].mxu1 }
 0x56c   :  { %9651 = vmatprep.subr.bf16.mxu1 %v14749_v14  ;;  %v7485_v8 = vpop.f32.mrb[123].mxu1  ;;  %v14771_v14 = vld [vmem:[#allocation8 + $0x1408] ss:$16 sps:$4 sm:$0xff]   ;;  %v16981_v55 = vld [vmem:[#allocation21_spill] sm:$0xff] }
 0x56d   :  { %v14777_v8 = vld [vmem:[#allocation8 + $0x1428] ss:$16 sps:$4 sm:$0xff]  }
 0x56f   :  { %9652 = vmatpush1.bf16.msra.mxu1 %v14747_v36  ;;  %v9523_v45 = vpop.f32.mrb[64].mxu0 }
 0x570   :  { %v13154_v42 = vadd.f32 %v9523_v45, %v16392_v17  ;;  %v9525_v41 = vpop.f32.mrb[65].mxu0  ;;  %9653 = vmatprep.subr.bf16.mxu1 %v14755_v29 }
 0x571   :  { %v13155_v40 = vadd.f32 %v9525_v41, %v16394_v48  ;;  %v9527_v33 = vpop.f32.mrb[66].mxu0 }
 0x572   :  { %v9880_v20 = vadd.f32 %v13154_v42, %v16643_v2  ;;  %v13156_v7 = vadd.f32 %v9527_v33, %v16396_v6  ;;  %v9529_v50 = vpop.f32.mrb[67].mxu0  ;;  %v14765_v6 = vld [vmem:[#allocation8 + $0x13e8] ss:$16 sps:$4 sm:$0xff]  }
 0x573   :  { %v9881_v18 = vadd.f32 %v13155_v40, %v16647_v31  ;;  %9654 = vmatpush1.bf16.msra.mxu1 %v14753_v61  ;;  %v13157_v16 = vadd.f32 %v9529_v50, %v16398_v9  ;;  %v16982_v61 = vld [vmem:[#allocation24_spill] sm:$0xff] }
 0x574   :  { %15224 = vtanh.f32 %v9880_v20  ;;  %v9884_v17 = vadd.f32 %v13156_v7, %v16643_v2  ;;  %9655 = vmatprep.subr.bf16.mxu1 %v14761_v21  ;;  %v14785_v21 = vld [vmem:[#allocation8 + $0x144c] ss:$16 sps:$4 sm:$0xff]  }
 0x575   :  { %15226 = vtanh.f32 %v9881_v18  ;;  %v9885_v48 = vadd.f32 %v13157_v16, %v16647_v31  ;;  %v10041_v18 = vld [vmem:[#allocation3] sm:$0xff] }
 0x576   :  { %15228 = vtanh.f32 %v9884_v17 }
 0x577   :  { %15230 = vtanh.f32 %v9885_v48  ;;  %9656 = vmatpush1.bf16.msra.mxu1 %v14759_v24  ;;  %v9533_v27 = vpop.f32.mrb[68].mxu0 }
 0x578   :  { %v13158_v57 = vadd.f32 %v9533_v27, %v16404_v54  ;;  %v9535_v10 = vpop.f32.mrb[69].mxu0  ;;  %9657 = vmatprep.subr.bf16.mxu1 %v14767_v44  ;;  %v14779_v54 = vld [vmem:[#allocation8 + $0x142c] ss:$16 sps:$4 sm:$0xff]  }
 0x579   :  { %v13159_v9 = vadd.f32 %v9535_v10, %v16407_v49  ;;  %v9537_v63 = vpop.f32.mrb[70].mxu0  ;;  %v16984_v44 = vld [vmem:[#allocation23_spill] sm:$0xff] }
 0x57a   :  { %v9888_v3 = vadd.f32 %v13158_v57, %v16643_v2  ;;  %v13160_v53 = vadd.f32 %v9537_v63, %v16979_v23  ;;  %v9539_v62 = vpop.f32.mrb[71].mxu0  ;;  %v14783_v63 = vld [vmem:[#allocation8 + $0x1448] ss:$16 sps:$4 sm:$0xff]  }
 0x57b   :  { %v9889_v28 = vadd.f32 %v13159_v9, %v16647_v31  ;;  %9658 = vmatpush1.bf16.msra.mxu1 %v14765_v6  ;;  %v13161_v13 = vadd.f32 %v9539_v62, %v16980_v38  ;;  %v10042_v6 = vld [vmem:[#allocation3 + $0x8] sm:$0xff] }
 0x57c   :  { %15232 = vtanh.f32 %v9888_v3  ;;  %9696 = vmatprep.subr.bf16.mxu1 %v14773_v19  ;;  %v9892_v5 = vadd.f32 %v13160_v53, %v16643_v2  ;;  %v16985_v19 = vld [vmem:[#allocation27_spill] sm:$0xff] }
 0x57d   :  { %15234 = vtanh.f32 %v9889_v28  ;;  %v9893_v36 = vadd.f32 %v13161_v13, %v16647_v31  ;;  %v14791_v53 = vld [vmem:[#allocation8 + $0x146c] ss:$16 sps:$4 sm:$0xff]  }
 0x57e   :  { %v15225_v22 = vpop.eup %15224  ;;  %9660 = vmatmul.mubr.bf16.vlgmr.msra.gmra.mrb[88].mxu1 %v16474_v46  ;;  %15236 = vtanh.f32 %v9892_v5  ;;  %v16983_v46 = vld [vmem:[#allocation26_spill] sm:$0xff] }
 0x57f   :  { %v15227_v49 = vpop.eup %15226  ;;  %9669 = vmatprep.mubr.bf16.mxu1 %v16981_v55  ;;  %9697 = vmatpush1.bf16.msra.mxu1 %v14771_v14  ;;  %v9543_v29 = vpop.f32.mrb[72].mxu0  ;;  %v9951_v33 = vrot.slane %v15225_v22, 7  ;;  %15238 = vtanh.f32 %v9893_v36  ;;  %v16986_v14 = vld [vmem:[#allocation22_spill] sm:$0xff]  ;;  %v16987_v22 = vld [vmem:[#allocation25_spill] sm:$0xff] }
 0x580   :  { %v15229_v45 = vpop.eup %15228  ;;  %v13162_v42 = vadd.f32 %v9543_v29, %v16982_v61  ;;  %v9545_v41 = vpop.f32.mrb[73].mxu0  ;;  %9698 = vmatprep.subr.bf16.mxu1 %v14779_v54  ;;  %v9954_v16 = vrot.slane %v15227_v49, 7  ;;  %v10053_v36 = vld [vmem:[#allocation3 + $0x60] sm:$0xff] }
 0x581   :  { %v15231_v40 = vpop.eup %15230  ;;  %v9952_v20 = vrot.slane %v15229_v45, 7  ;;  %v13163_v7 = vadd.f32 %v9545_v41, %v16983_v46  ;;  %v9547_v50 = vpop.f32.mrb[74].mxu0 }
 0x582   :  { %v9955_v24 = vrot.slane %v15231_v40, 7  ;;  %v9896_v17 = vadd.f32 %v13162_v42, %v16643_v2  ;;  %v13164_v48 = vadd.f32 %v9547_v50, %v16984_v44  ;;  %v9549_v27 = vpop.f32.mrb[75].mxu0 }
 0x583   :  { %v9953_v57 = vsel %vm9950_vm7, %v9951_v33, %v9952_v20  ;;  %v9897_v10 = vadd.f32 %v13163_v7, %v16647_v31  ;;  %9699 = vmatpush1.bf16.msra.mxu1 %v14777_v8  ;;  %v13165_v9 = vadd.f32 %v9549_v27, %v16985_v19  ;;  %v10054_v8 = vld [vmem:[#allocation3 + $0x68] sm:$0xff]  ;;  %v14795_v7 = vld [vmem:[#allocation8 + $0x1488] ss:$16 sps:$4 sm:$0xff]  }
 0x584   :  { %v9956_v3 = vsel %vm9950_vm7, %v9954_v16, %v9955_v24  ;;  %15240 = vtanh.f32 %v9896_v17  ;;  %v9900_v23 = vadd.f32 %v13164_v48, %v16643_v2  ;;  %9700 = vmatprep.subr.bf16.mxu1 %v14785_v21  ;;  %v16676_v62 = vpack.c.bf16 %v9953_v57, %v10041_v18  ;;  %v14789_v2 = vld [vmem:[#allocation8 + $0x1468] ss:$16 sps:$4 sm:$0xff]   ;;  %v14803_v16 = vld [vmem:[#allocation8 + $0x14ac] ss:$16 sps:$4 sm:$0xff]  }
 0x585   :  { %15242 = vtanh.f32 %v9897_v10  ;;  %v9901_v28 = vadd.f32 %v13165_v9, %v16647_v31  ;;  %v16679_v38 = vpack.c.bf16 %v9956_v3, %v10042_v6  ;;  %v14797_v31 = vld [vmem:[#allocation8 + $0x148c] ss:$16 sps:$4 sm:$0xff]  }
 0x586   :  { %v15233_v13 = vpop.eup %15232  ;;  %15244 = vtanh.f32 %v9900_v23  ;;  %9670 = vmatmul.mubr.bf16.gmra.mrb[92].mxu1 %v16986_v14  ;;  %v10217_v45 = vshll.u32 %v16676_v62, 16  ;;  %v10215_v6 = vshrl.u32 %v16676_v62, 16  ;;  %v14809_v14 = vld [vmem:[#allocation8 + $0x14cc] ss:$16 sps:$4 sm:$0xff]  }
 0x587   :  { %v15235_v54 = vpop.eup %15234  ;;  %v9963_v5 = vrot.slane %v15233_v13, 7  ;;  %15246 = vtanh.f32 %v9901_v28  ;;  %9679 = vmatprep.mubr.bf16.mxu1 %v16987_v22  ;;  %9701 = vmatpush1.bf16.msra.mxu1 %v14783_v63  ;;  %v10229_v49 = vshll.u32 %v16679_v38, 16  ;;  %v9553_v55 = vpop.f32.mrb[108].mxu0  ;;  %v14801_v63 = vld [vmem:[#allocation8 + $0x14a8] ss:$16 sps:$4 sm:$0xff]  }
 0x588   :  { %v9965_v29 = vrot.slane %v15235_v54, 7  ;;  %9702 = vmatprep.subr.bf16.mxu1 %v14791_v53  ;;  %v9554_v61 = vpop.f32.mrb[109].mxu0  ;;  %v15237_v46 = vpop.eup %15236  ;;  %v10219_v17 = vrot.slane %v10217_v45, 1 }
 0x589   :  { %v9964_v42 = vsel %vm9950_vm7, %v9952_v20, %v9963_v5  ;;  %v9555_v41 = vpop.f32.mrb[110].mxu0  ;;  %v10231_v18 = vrot.slane %v10229_v49, 1  ;;  %v15239_v48 = vpop.eup %15238  ;;  %v10227_v20 = vshrl.u32 %v16679_v38, 16  ;;  %v10005_v19 = vrot.slane %v15237_v46, 7  ;;  %v10066_v5 = vld [vmem:[#allocation3 + $0xc8] sm:$0xff] }
 0x58a   :  { %v9966_v21 = vsel %vm9950_vm7, %v9955_v24, %v9965_v29  ;;  %v16687_v40 = vpack.c.bf16 %v10053_v36, %v9964_v42  ;;  %v9556_v33 = vpop.f32.mrb[111].mxu0  ;;  %v10008_v28 = vrot.slane %v15239_v48, 7  ;;  %v10220_v54 = vor.u32 %v10219_v17, %v10215_v6  ;;  %v14815_v61 = vld [vmem:[#allocation8 + $0x14ec] ss:$16 sps:$4 sm:$0xff]   ;;  %v14813_v46 = vld [vmem:[#allocation8 + $0x14e8] ss:$16 sps:$4 sm:$0xff]  }
 0x58b   :  { %9703 = vmatpush1.bf16.msra.mxu1 %v14789_v2  ;;  %v16689_v50 = vpack.c.bf16 %v10054_v8, %v9966_v21  ;;  %v10232_v3 = vor.u32 %v10231_v18, %v10227_v20  ;;  %v16702_v8 = vpack.c.bf16 %v10066_v5, %v10066_v5  ;;  %v14818_v17 = vld [vmem:[#allocation8 + $0x150c] ss:$16 sps:$4 sm:$0xff]   ;;  %v14822_v5 = vld [vmem:[#allocation8 + $0x1548] ss:$16 sps:$4 sm:$0xff]  }
 0x58c   :  { %9704 = vmatprep.subr.bf16.mxu1 %v14797_v31  ;;  %v10222_v44 = vshll.u32 %v16687_v40, 16  ;;  %v14807_v31 = vld [vmem:[#allocation8 + $0x14c8] ss:$16 sps:$4 sm:$0xff]  }
 0x58d   :  { %v10234_v27 = vshll.u32 %v16689_v50, 16  ;;  %v10306_v21 = vshll.u32 %v16702_v8, 16 }
 0x58e   :  { %v15241_v24 = vpop.eup %15240  ;;  %9680 = vmatmul.mubr.bf16.gmra.mrb[96].mxu1 %v16501_v43  ;;  %v10224_v57 = vrot.slane %v10222_v44, 1  ;;  %v10262_v44 = vshrl.u32 %v16687_v40, 16 }
 0x58f   :  { %v15243_v10 = vpop.eup %15242  ;;  %v10006_v9 = vrot.slane %v15241_v24, 7  ;;  %9705 = vmatpush1.bf16.msra.mxu1 %v14795_v7  ;;  %9689 = vmatprep.mubr.bf16.mxu1 %v16485_v25  ;;  %v10236_v23 = vrot.slane %v10234_v27, 1  ;;  %v10270_v7 = vshrl.u32 %v16689_v50, 16  ;;  %v16717_v24 = vrot.slane %v10306_v21, 1  ;;  %v14836_v21 = vld [vmem:[#allocation8 + $0x15cc] ss:$16 sps:$4 sm:$0xff]  }
 0x590   :  { %v15245_v53 = vpop.eup %15244  ;;  %v10009_v13 = vrot.slane %v15243_v10, 7  ;;  %9706 = vmatprep.subr.bf16.mxu1 %v14803_v16  ;;  %v10225_v25 = vsel %vm193_vm0, %v10220_v54, %v10224_v57  ;;  %v10065_v16 = vld [vmem:[#allocation3 + $0xc0] sm:$0xff]  ;;  %v10264_v6 = vor.u32 %v10262_v44, %v10224_v57 }
 0x591   :  { %v15247_v43 = vpop.eup %15246  ;;  %v10007_v22 = vsel %vm9950_vm7, %v10005_v19, %v10006_v9  ;;  %v10017_v2 = vrot.slane %v15245_v53, 7  ;;  %v10237_v49 = vsel %vm193_vm0, %v10232_v3, %v10236_v23  ;;  %v10272_v20 = vor.u32 %v10270_v7, %v10236_v23  ;;  %v14837_v7 = vld [vmem:[#allocation8 + $0x15e8] ss:$16 sps:$4 sm:$0xff]  }
 0x592   :  { %v10010_v36 = vsel %vm9950_vm7, %v10008_v28, %v10009_v13  ;;  %v10019_v55 = vrot.slane %v15247_v43, 7  ;;  %10706 = vmatprep.mubr.bf16.mxu0 %v10237_v49  ;;  %v16719_v10 = vpack.c.bf16 %v10065_v16, %v10065_v16  ;;  %v14819_v28 = vld [vmem:[#allocation8 + $0x1528] ss:$16 sps:$4 sm:$0xff]   ;;  %v14827_v43 = vld [vmem:[#allocation8 + $0x156c] ss:$16 sps:$4 sm:$0xff]  }
 0x593   :  { %v10018_v29 = vsel %vm9950_vm7, %v10006_v9, %v10017_v2  ;;  %9707 = vmatpush1.bf16.msra.mxu1 %v14801_v63  ;;  %10707 = vmatmul.mubr.bf16.vlgmr.msra.gmra.mrb[112].mxu0 %v10225_v25  ;;  %v14821_v63 = vld [vmem:[#allocation8 + $0x152c] ss:$16 sps:$4 sm:$0xff]   ;;  %v14825_v2 = vld [vmem:[#allocation8 + $0x1568] ss:$16 sps:$4 sm:$0xff]  }
 0x594   :  { %v10020_v45 = vsel %vm9950_vm7, %v10009_v13, %v10019_v55  ;;  %9708 = vmatprep.subr.bf16.mxu1 %v14809_v14  ;;  %v16705_v42 = vpack.c.bf16 %v10018_v29, %v10007_v22  ;;  %v10298_v23 = vshll.u32 %v16719_v10, 16  ;;  %v14824_v13 = vld [vmem:[#allocation8 + $0x154c] ss:$16 sps:$4 sm:$0xff]   ;;  %v14828_v25 = vld [vmem:[#allocation8 + $0x1588] ss:$16 sps:$4 sm:$0xff]  }
 0x595   :  { %v16707_v41 = vpack.c.bf16 %v10020_v45, %v10010_v36  ;;  %v14830_v49 = vld [vmem:[#allocation8 + $0x158c] ss:$16 sps:$4 sm:$0xff]   ;;  %v14840_v16 = vld [vmem:[#allocation8 + $0x1608] ss:$16 sps:$4 sm:$0xff]  }
 0x596   :  { %9690 = vmatmul.mubr.bf16.gmra.mrb[136].mxu1 %v16497_v1  ;;  %v10266_v33 = vshll.u32 %v16705_v42, 16  ;;  %v10294_v57 = vshrl.u32 %v16705_v42, 16  ;;  %v16727_v54 = vrot.slane %v10298_v23, 1  ;;  %v14843_v44 = vld [vmem:[#allocation8 + $0x1628] ss:$16 sps:$4 sm:$0xff]  }
 0x597   :  { %9709 = vmatpush1.bf16.msra.mxu1 %v14807_v31  ;;  %9728 = vmatprep.mubr.bf16.mxu1 %v16511_v32  ;;  %v10274_v18 = vshll.u32 %v16707_v41, 16  ;;  %v10302_v1 = vshrl.u32 %v16707_v41, 16  ;;  %v14816_v32 = vld [vmem:[#allocation8 + $0x1508] ss:$16 sps:$4 sm:$0xff]   ;;  %v14833_v31 = vld [vmem:[#allocation8 + $0x15ac] ss:$16 sps:$4 sm:$0xff]  }
 0x598   :  { %9710 = vmatprep.subr.bf16.mxu1 %v14815_v61  ;;  %v10268_v48 = vrot.slane %v10266_v33, 1  ;;  %v14831_v61 = vld [vmem:[#allocation8 + $0x15a8] ss:$16 sps:$4 sm:$0xff]   ;;  %v14872_v23 = vld [vmem:[#allocation8 + $0x174c] ss:$16 sps:$4 sm:$0xff]  }
 0x599   :  { %v10276_v27 = vrot.slane %v10274_v18, 1  ;;  %v14834_v33 = vld [vmem:[#allocation8 + $0x15c8] ss:$16 sps:$4 sm:$0xff]   ;;  %v14842_v18 = vld [vmem:[#allocation8 + $0x160c] ss:$16 sps:$4 sm:$0xff]  }
 0x59a   :  { %v10269_v3 = vsel %vm193_vm0, %v10264_v6, %v10268_v48  ;;  %v10296_v14 = vor.u32 %v10294_v57, %v10268_v48  ;;  %v14848_v48 = vld [vmem:[#allocation8 + $0x164c] ss:$16 sps:$4 sm:$0xff]  }
 0x59b   :  { %9711 = vmatpush1.bf16.msra.mxu1 %v14813_v46  ;;  %v10277_v19 = vsel %vm193_vm0, %v10272_v20, %v10276_v27  ;;  %v10304_v9 = vor.u32 %v10302_v1, %v10276_v27  ;;  %v14839_v46 = vld [vmem:[#allocation8 + $0x15ec] ss:$16 sps:$4 sm:$0xff]   ;;  %v14846_v20 = vld [vmem:[#allocation8 + $0x1648] ss:$16 sps:$4 sm:$0xff]  }
 0x59c   :  { %9712 = vmatprep.subr.bf16.mxu1 %v14818_v17  ;;  %10716 = vmatprep.mubr.bf16.mxu0 %v10277_v19  ;;  %v10301_v22 = vsel %vm193_vm0, %v10296_v14, %v16727_v54  ;;  %v14845_v17 = vld [vmem:[#allocation8 + $0x162c] ss:$16 sps:$4 sm:$0xff]   ;;  %v14849_v1 = vld [vmem:[#allocation8 + $0x1668] ss:$16 sps:$4 sm:$0xff]  }
 0x59d   :  { %10717 = vmatmul.mubr.bf16.gmra.mrb[116].mxu0 %v10269_v3  ;;  %v10309_v53 = vsel %vm193_vm0, %v10304_v9, %v16717_v24  ;;  %v14851_v27 = vld [vmem:[#allocation8 + $0x166c] ss:$16 sps:$4 sm:$0xff]   ;;  %v14861_v9 = vld [vmem:[#allocation8 + $0x16e8] ss:$16 sps:$4 sm:$0xff]  }
 0x59e   :  { %10726 = vmatprep.mubr.bf16.mxu0 %v10309_v53  ;;  %v14854_v6 = vld [vmem:[#allocation8 + $0x168c] ss:$16 sps:$4 sm:$0xff]   ;;  %v14870_v53 = vld [vmem:[#allocation8 + $0x1748] ss:$16 sps:$4 sm:$0xff]  }
 0x59f   :  { %9713 = vmatpush1.bf16.msra.mxu1 %v14816_v32  ;;  %v14855_v32 = vld [vmem:[#allocation8 + $0x16a8] ss:$16 sps:$4 sm:$0xff]   ;;  %v14860_v19 = vld [vmem:[#allocation8 + $0x16cc] ss:$16 sps:$4 sm:$0xff]  }
 0x5a0   :  { %9714 = vmatprep.subr.bf16.mxu1 %v14821_v63  ;;  %v14866_v63 = vld [vmem:[#allocation8 + $0x170c] ss:$16 sps:$4 sm:$0xff]   ;;  %v14876_v14 = vld [vmem:[#allocation8 + $0x1788] ss:$16 sps:$4 sm:$0xff]  }
 0x5a1   :  { %v14869_v3 = vld [vmem:[#allocation8 + $0x172c] ss:$16 sps:$4 sm:$0xff]  }
 0x5a2   :  { %v14875_v57 = vld [vmem:[#allocation8 + $0x176c] ss:$16 sps:$4 sm:$0xff]  }
 0x5a3   :  { %9715 = vmatpush1.bf16.msra.mxu1 %v14819_v28  ;;  %v14878_v28 = vld [vmem:[#allocation8 + $0x178c] ss:$16 sps:$4 sm:$0xff]  }
 0x5a4   :  { %9716 = vmatprep.subr.bf16.mxu1 %v14824_v13 }
 0x5a5   :  { %10727 = vmatmul.mubr.bf16.gmra.mrb[120].mxu0 %v10301_v22 }
 0x5a7   :  { %9717 = vmatpush1.bf16.msra.mxu1 %v14822_v5  ;;  %v14881_v5 = vld [vmem:[#allocation8 + $0x17ac] ss:$16 sps:$4 sm:$0xff]  }
 0x5a8   :  { %9718 = vmatprep.subr.bf16.mxu1 %v14827_v43 }
 0x5a9   :  { %v7551_v36 = vpop.f32.mrb[124].mxu1 }
 0x5aa   :  { %v7552_v55 = vpop.f32.mrb[125].mxu1  ;;  %v14893_v36 = vld [vmem:[#allocation11 + $0x314] ss:$8 sps:$4 sm:$0xff]  }
 0x5ab   :  { %9719 = vmatpush1.bf16.msra.mxu1 %v14825_v2  ;;  %v7553_v29 = vpop.f32.mrb[126].mxu1  ;;  %v14888_v2 = vld [vmem:[#allocation11 + $0x300] ss:$8 sps:$4 sm:$0xff]   ;;  %v14879_v55 = vld [vmem:[#allocation8 + $0x17a8] ss:$16 sps:$4 sm:$0xff]  }
 0x5ac   :  { %9720 = vmatprep.subr.bf16.mxu1 %v14830_v49  ;;  %v7554_v45 = vpop.f32.mrb[127].mxu1  ;;  %v14890_v49 = vld [vmem:[#allocation11 + $0x304] ss:$8 sps:$4 sm:$0xff]   ;;  %v14884_v29 = vld [vmem:[#allocation8 + $0x17cc] ss:$16 sps:$4 sm:$0xff]  }
 0x5ad   :  { %10743 = vmatprep.subr.bf16.mxu0 %v14890_v49  ;;  %v14882_v45 = vld [vmem:[#allocation8 + $0x17c8] ss:$16 sps:$4 sm:$0xff]  }
 0x5ae   :  { %10744 = vmatpush1.bf16.msra.mxu0 %v14888_v2  ;;  %v16988_v49 = vld [vmem:[#allocation18_spill] sm:$0xff] }
 0x5af   :  { %9721 = vmatpush1.bf16.msra.mxu1 %v14828_v25  ;;  %v14891_v25 = vld [vmem:[#allocation11 + $0x310] ss:$8 sps:$4 sm:$0xff]   ;;  %10745 = vmatprep.subr.bf16.mxu0 %v14893_v36  ;;  %v16989_v36 = vsub.s32 2, %v16988_v49 }
 0x5b0   :  { %9722 = vmatprep.subr.bf16.mxu1 %v14833_v31  ;;  %v14896_v31 = vld [vmem:[#allocation11 + $0x324] ss:$8 sps:$4 sm:$0xff]  }
 0x5b2   :  { %10746 = vmatpush1.bf16.msra.mxu0 %v14891_v25  ;;  %v16990_v25 = vsub.s32 3, %v16988_v49 }
 0x5b3   :  { %9723 = vmatpush1.bf16.msra.mxu1 %v14831_v61  ;;  %v14894_v61 = vld [vmem:[#allocation11 + $0x320] ss:$8 sps:$4 sm:$0xff]   ;;  %10747 = vmatprep.subr.bf16.mxu0 %v14896_v31 }
 0x5b4   :  { %9724 = vmatprep.subr.bf16.mxu1 %v14836_v21  ;;  %v14887_v21 = vld [vmem:[#allocation8 + $0x17ec] ss:$16 sps:$4 sm:$0xff]  }
 0x5b6   :  { %10748 = vmatpush1.bf16.msra.mxu0 %v14894_v61 }
 0x5b7   :  { %9725 = vmatpush1.bf16.msra.mxu1 %v14834_v33  ;;  %v14899_v33 = vld [vmem:[#allocation11 + $0x334] ss:$8 sps:$4 sm:$0xff]  }
 0x5b8   :  { %9726 = vmatprep.subr.bf16.mxu1 %v14839_v46  ;;  %v14885_v46 = vld [vmem:[#allocation8 + $0x17e8] ss:$16 sps:$4 sm:$0xff]   ;;  %10749 = vmatprep.subr.bf16.mxu0 %v14899_v33 }
 0x5bb   :  { %9727 = vmatpush1.bf16.msra.mxu1 %v14837_v7  ;;  %v14897_v7 = vld [vmem:[#allocation11 + $0x330] ss:$8 sps:$4 sm:$0xff]  }
 0x5bc   :  { %9765 = vmatprep.subr.bf16.mxu1 %v14842_v18  ;;  %10750 = vmatpush1.bf16.msra.mxu0 %v14897_v7 }
 0x5be   :  { %9729 = vmatmul.mubr.bf16.vlgmr.msra.gmra.mrb[88].mxu1 %v16526_v47  ;;  %v14852_v47 = vld [vmem:[#allocation8 + $0x1688] ss:$16 sps:$4 sm:$0xff]  }
 0x5bf   :  { %9738 = vmatprep.mubr.bf16.mxu1 %v16532_v58  ;;  %9766 = vmatpush1.bf16.msra.mxu1 %v14840_v16  ;;  %v14857_v58 = vld [vmem:[#allocation8 + $0x16ac] ss:$16 sps:$4 sm:$0xff]  }
 0x5c0   :  { %9767 = vmatprep.subr.bf16.mxu1 %v14845_v17 }
 0x5c3   :  { %9768 = vmatpush1.bf16.msra.mxu1 %v14843_v44 }
 0x5c4   :  { %9769 = vmatprep.subr.bf16.mxu1 %v14848_v48  ;;  %v14900_v48 = vld [vmem:[#allocation11 + $0x340] ss:$8 sps:$4 sm:$0xff]  }
 0x5c6   :  { %9739 = vmatmul.mubr.bf16.gmra.mrb[92].mxu1 %v16540_v0  ;;  %v14858_v0 = vld [vmem:[#allocation8 + $0x16c8] ss:$16 sps:$4 sm:$0xff]  }
 0x5c7   :  { %9748 = vmatprep.mubr.bf16.mxu1 %v16545_v39  ;;  %9770 = vmatpush1.bf16.msra.mxu1 %v14846_v20  ;;  %v14863_v39 = vld [vmem:[#allocation8 + $0x16ec] ss:$16 sps:$4 sm:$0xff]   ;;  %v14902_v20 = vld [vmem:[#allocation11 + $0x344] ss:$8 sps:$4 sm:$0xff]  }
 0x5c8   :  { %9771 = vmatprep.subr.bf16.mxu1 %v14851_v27  ;;  %v14905_v27 = vld [vmem:[#allocation11 + $0x354] ss:$8 sps:$4 sm:$0xff]   ;;  %10751 = vmatprep.subr.bf16.mxu0 %v14902_v20 }
 0x5c9   :  { %10752 = vmatpush1.bf16.msra.mxu0 %v14900_v48 }
 0x5ca   :  { %10753 = vmatprep.subr.bf16.mxu0 %v14905_v27 }
 0x5cb   :  { %9772 = vmatpush1.bf16.msra.mxu1 %v14849_v1 }
 0x5cc   :  { %9773 = vmatprep.subr.bf16.mxu1 %v14854_v6  ;;  %v14912_v6 = vld [vmem:[#allocation11 + $0x380] ss:$8 sps:$4 sm:$0xff]  }
 0x5ce   :  { %9749 = vmatmul.mubr.bf16.gmra.mrb[96].mxu1 %v16553_v56  ;;  %v14864_v56 = vld [vmem:[#allocation8 + $0x1708] ss:$16 sps:$4 sm:$0xff]  }
 0x5cf   :  { %9774 = vmatpush1.bf16.msra.mxu1 %v14852_v47  ;;  %9758 = vmatprep.mubr.bf16.mxu1 %v16537_v4  ;;  %v14867_v4 = vld [vmem:[#allocation8 + $0x1728] ss:$16 sps:$4 sm:$0xff]  }
 0x5d0   :  { %9775 = vmatprep.subr.bf16.mxu1 %v14857_v58  ;;  %v14914_v47 = vld [vmem:[#allocation11 + $0x384] ss:$8 sps:$4 sm:$0xff]  }
 0x5d3   :  { %9776 = vmatpush1.bf16.msra.mxu1 %v14855_v32  ;;  %v14917_v32 = vld [vmem:[#allocation11 + $0x394] ss:$8 sps:$4 sm:$0xff]  }
 0x5d4   :  { %9777 = vmatprep.subr.bf16.mxu1 %v14860_v19  ;;  %v14915_v19 = vld [vmem:[#allocation11 + $0x390] ss:$8 sps:$4 sm:$0xff]  }
 0x5d6   :  { %9759 = vmatmul.mubr.bf16.gmra.mrb[140].mxu1 %v16549_v59  ;;  %v14873_v59 = vld [vmem:[#allocation8 + $0x1768] ss:$16 sps:$4 sm:$0xff]  }
 0x5d7   :  { %9778 = vmatpush1.bf16.msra.mxu1 %v14858_v0  ;;  %9797 = vmatprep.mubr.bf16.mxu1 %v16563_v34  ;;  %v14918_v0 = vld [vmem:[#allocation11 + $0x3a0] ss:$8 sps:$4 sm:$0xff]  }
 0x5d8   :  { %9779 = vmatprep.subr.bf16.mxu1 %v14863_v39  ;;  %v14920_v39 = vld [vmem:[#allocation11 + $0x3a4] ss:$8 sps:$4 sm:$0xff]  }
 0x5db   :  { %9780 = vmatpush1.bf16.msra.mxu1 %v14861_v9  ;;  %v14923_v9 = vld [vmem:[#allocation11 + $0x3b4] ss:$8 sps:$4 sm:$0xff]  }
 0x5dc   :  { %9781 = vmatprep.subr.bf16.mxu1 %v14866_v63  ;;  %v14921_v63 = vld [vmem:[#allocation11 + $0x3b0] ss:$8 sps:$4 sm:$0xff]  }
 0x5df   :  { %9782 = vmatpush1.bf16.msra.mxu1 %v14864_v56  ;;  %v14926_v56 = vld [vmem:[#allocation11 + $0x3c4] ss:$8 sps:$4 sm:$0xff]  }
 0x5e0   :  { %9783 = vmatprep.subr.bf16.mxu1 %v14869_v3  ;;  %v10329_v3 = vshrl.u32 %v16702_v8, 16 }
 0x5e3   :  { %9784 = vmatpush1.bf16.msra.mxu1 %v14867_v4  ;;  %v10326_v4 = vshrl.u32 %v16719_v10, 16 }
 0x5e4   :  { %9785 = vmatprep.subr.bf16.mxu1 %v14872_v23  ;;  %v10331_v23 = vor.u32 %v10329_v3, %v16717_v24  ;;  %v14938_v24 = vld [vmem:[#allocation11 + $0x4] ss:$8 sps:$4 sm:$0xff]  }
 0x5e6   :  { %10736 = vmatprep.mubr.bf16.mxu0 %v10331_v23 }
 0x5e7   :  { %9786 = vmatpush1.bf16.msra.mxu1 %v14870_v53  ;;  %v10328_v53 = vor.u32 %v10326_v4, %v16727_v54 }
 0x5e8   :  { %9787 = vmatprep.subr.bf16.mxu1 %v14875_v57  ;;  %v14924_v57 = vld [vmem:[#allocation11 + $0x3c0] ss:$8 sps:$4 sm:$0xff]  }
 0x5e9   :  { %v7620_v34 = vpop.f32.mrb[128].mxu1  ;;  %10737 = vmatmul.mubr.bf16.gmra.mrb[124].mxu0 %v10328_v53 }
 0x5ea   :  { %v7621_v13 = vpop.f32.mrb[129].mxu1  ;;  %v14932_v34 = vld [vmem:[#allocation11 + $0x3e4] ss:$8 sps:$4 sm:$0xff]  }
 0x5eb   :  { %9788 = vmatpush1.bf16.msra.mxu1 %v14873_v59  ;;  %v7622_v43 = vpop.f32.mrb[130].mxu1  ;;  %v14929_v59 = vld [vmem:[#allocation11 + $0x3d4] ss:$8 sps:$4 sm:$0xff]   ;;  %v14930_v13 = vld [vmem:[#allocation11 + $0x3e0] ss:$8 sps:$4 sm:$0xff]  }
 0x5ec   :  { %9789 = vmatprep.subr.bf16.mxu1 %v14878_v28  ;;  %v7623_v22 = vpop.f32.mrb[131].mxu1  ;;  %v14927_v28 = vld [vmem:[#allocation11 + $0x3d0] ss:$8 sps:$4 sm:$0xff]  }
 0x5ef   :  { %9790 = vmatpush1.bf16.msra.mxu1 %v14876_v14  ;;  %v14935_v14 = vld [vmem:[#allocation11 + $0x3f4] ss:$8 sps:$4 sm:$0xff]  }
 0x5f0   :  { %9791 = vmatprep.subr.bf16.mxu1 %v14881_v5  ;;  %v14933_v5 = vld [vmem:[#allocation11 + $0x3f0] ss:$8 sps:$4 sm:$0xff]  }
 0x5f3   :  { %9792 = vmatpush1.bf16.msra.mxu1 %v14879_v55  ;;  %v9871_v55 = vrot.slane %v16639_v35, %v16989_v36 }
 0x5f4   :  { %9793 = vmatprep.subr.bf16.mxu1 %v14884_v29  ;;  %v9875_v29 = vrot.slane %v16639_v35, %v16990_v25 }
 0x5f7   :  { %9794 = vmatpush1.bf16.msra.mxu1 %v14882_v45 }
 0x5f8   :  { %9795 = vmatprep.subr.bf16.mxu1 %v14887_v21 }
 0x5fb   :  { %9796 = vmatpush1.bf16.msra.mxu1 %v14885_v46 }
 0x5fe   :  { %9798 = vmatmul.mubr.bf16.vlgmr.msra.gmra.mrb[88].mxu1 %v16578_v51  ;;  %v14903_v51 = vld [vmem:[#allocation11 + $0x350] ss:$8 sps:$4 sm:$0xff]  }
 0x5ff   :  { %9807 = vmatprep.mubr.bf16.mxu1 %v16584_v12  ;;  %10754 = vmatpush1.bf16.msra.mxu0 %v14903_v51  ;;  %v14906_v12 = vld [vmem:[#allocation11 + $0x360] ss:$8 sps:$4 sm:$0xff]  }
 0x606   :  { %9808 = vmatmul.mubr.bf16.gmra.mrb[92].mxu1 %v16592_v30  ;;  %v14908_v30 = vld [vmem:[#allocation11 + $0x364] ss:$8 sps:$4 sm:$0xff]  }
 0x607   :  { %9817 = vmatprep.mubr.bf16.mxu1 %v16597_v26  ;;  %10755 = vmatprep.subr.bf16.mxu0 %v14908_v30  ;;  %v14909_v26 = vld [vmem:[#allocation11 + $0x370] ss:$8 sps:$4 sm:$0xff]  }
 0x608   :  { %10756 = vmatpush1.bf16.msra.mxu0 %v14906_v12 }
 0x60e   :  { %9818 = vmatmul.mubr.bf16.gmra.mrb[96].mxu1 %v16605_v60 }
 0x60f   :  { %9827 = vmatprep.mubr.bf16.mxu1 %v16589_v15  ;;  %v14911_v15 = vld [vmem:[#allocation11 + $0x374] ss:$8 sps:$4 sm:$0xff]  }
 0x610   :  { %10757 = vmatprep.subr.bf16.mxu0 %v14911_v15 }
 0x611   :  { %10758 = vmatpush1.bf16.msra.mxu0 %v14909_v26 }
 0x612   :  { %10759 = vmatprep.subr.bf16.mxu0 %v14914_v47 }
 0x615   :  { %10760 = vmatpush1.bf16.msra.mxu0 %v14912_v6  ;;  %v10043_v6 = vld [vmem:[#allocation3 + $0x10] sm:$0xff] }
 0x616   :  { %9828 = vmatmul.mubr.bf16.gmra.mrb[144].mxu1 %v16601_v52  ;;  %10761 = vmatprep.subr.bf16.mxu0 %v14917_v32 }
 0x619   :  { %10762 = vmatpush1.bf16.msra.mxu0 %v14915_v19 }
 0x61a   :  { %10763 = vmatprep.subr.bf16.mxu0 %v14920_v39 }
 0x61d   :  { %10764 = vmatpush1.bf16.msra.mxu0 %v14918_v0  ;;  %v10044_v0 = vld [vmem:[#allocation3 + $0x18] sm:$0xff] }
 0x61e   :  { %10765 = vmatprep.subr.bf16.mxu0 %v14923_v9 }
 0x621   :  { %10766 = vmatpush1.bf16.msra.mxu0 %v14921_v63 }
 0x622   :  { %10767 = vmatprep.subr.bf16.mxu0 %v14926_v56 }
 0x625   :  { %10768 = vmatpush1.bf16.msra.mxu0 %v14924_v57 }
 0x626   :  { %10769 = vmatprep.subr.bf16.mxu0 %v14929_v59 }
 0x629   :  { %v9622_v18 = vpop.f32.mrb[132].mxu1  ;;  %10770 = vmatpush1.bf16.msra.mxu0 %v14927_v28 }
 0x62a   :  { %v9623_v16 = vpop.f32.mrb[133].mxu1  ;;  %10771 = vmatprep.subr.bf16.mxu0 %v14932_v34 }
 0x62b   :  { %v9624_v17 = vpop.f32.mrb[134].mxu1 }
 0x62c   :  { %v9625_v44 = vpop.f32.mrb[135].mxu1 }
 0x62d   :  { %10772 = vmatpush1.bf16.msra.mxu0 %v14930_v13 }
 0x62e   :  { %10773 = vmatprep.subr.bf16.mxu0 %v14935_v14  ;;  %v10055_v14 = vld [vmem:[#allocation3 + $0x70] sm:$0xff] }
 0x631   :  { %10774 = vmatpush1.bf16.msra.mxu0 %v14933_v5 }
 0x632   :  { %11132 = vmatprep.subr.bf16.mxu0 %v14938_v24  ;;  %v10056_v24 = vld [vmem:[#allocation3 + $0x78] sm:$0xff] }
 0x669   :  { %v9691_v52 = vpop.f32.mrb[136].mxu1 }
 0x66a   :  { %v9692_v60 = vpop.f32.mrb[137].mxu1 }
 0x66b   :  { %v9693_v1 = vpop.f32.mrb[138].mxu1 }
 0x66c   :  { %v9694_v58 = vpop.f32.mrb[139].mxu1 }
 0x6a9   :  { %v9760_v54 = vpop.f32.mrb[140].mxu1 }
 0x6aa   :  { %v9761_v43 = vpop.f32.mrb[141].mxu1 }
 0x6ab   :  { %v9762_v22 = vpop.f32.mrb[142].mxu1 }
 0x6ac   :  { %v9763_v2 = vpop.f32.mrb[143].mxu1 }
 0x6d1   :  { %v9799_v31 = vpop.f32.mrb[88].mxu1 }
 0x6d2   :  { %v9882_v45 = vadd.f32 %v9871_v55, %v9799_v31  ;;  %v9801_v61 = vpop.f32.mrb[89].mxu1 }
 0x6d3   :  { %v9883_v21 = vadd.f32 %v9875_v29, %v9801_v61  ;;  %v9803_v33 = vpop.f32.mrb[90].mxu1 }
 0x6d4   :  { %15248 = vtanh.f32 %v9882_v45  ;;  %v9886_v46 = vadd.f32 %v9871_v55, %v9803_v33  ;;  %v9805_v7 = vpop.f32.mrb[91].mxu1 }
 0x6d5   :  { %15250 = vtanh.f32 %v9883_v21  ;;  %v9887_v18 = vadd.f32 %v9875_v29, %v9805_v7 }
 0x6d6   :  { %15252 = vtanh.f32 %v9886_v46 }
 0x6d7   :  { %15254 = vtanh.f32 %v9887_v18 }
 0x6d9   :  { %v9809_v16 = vpop.f32.mrb[92].mxu1 }
 0x6da   :  { %v9890_v17 = vadd.f32 %v9871_v55, %v9809_v16  ;;  %v9811_v44 = vpop.f32.mrb[93].mxu1 }
 0x6db   :  { %v9891_v48 = vadd.f32 %v9875_v29, %v9811_v44  ;;  %v9813_v20 = vpop.f32.mrb[94].mxu1 }
 0x6dc   :  { %15256 = vtanh.f32 %v9890_v17  ;;  %v9815_v27 = vpop.f32.mrb[95].mxu1  ;;  %v9894_v51 = vadd.f32 %v9871_v55, %v9813_v20 }
 0x6dd   :  { %15258 = vtanh.f32 %v9891_v48  ;;  %v9895_v30 = vadd.f32 %v9875_v29, %v9815_v27 }
 0x6de   :  { %v15249_v35 = vpop.eup %15248  ;;  %15260 = vtanh.f32 %v9894_v51 }
 0x6df   :  { %v15251_v12 = vpop.eup %15250  ;;  %v9957_v52 = vrot.slane %v15249_v35, 7  ;;  %15262 = vtanh.f32 %v9895_v30 }
 0x6e0   :  { %v15253_v26 = vpop.eup %15252  ;;  %v9960_v47 = vrot.slane %v15251_v12, 7 }
 0x6e1   :  { %v15255_v15 = vpop.eup %15254  ;;  %v9958_v60 = vrot.slane %v15253_v26, 7  ;;  %v9819_v1 = vpop.f32.mrb[96].mxu1  ;;  %v14936_v26 = vld [vmem:[#allocation11] ss:$8 sps:$4 sm:$0xff]  }
 0x6e2   :  { %v9961_v58 = vrot.slane %v15255_v15, 7  ;;  %v9898_v32 = vadd.f32 %v9871_v55, %v9819_v1  ;;  %v9821_v19 = vpop.f32.mrb[97].mxu1 }
 0x6e3   :  { %v9959_v39 = vsel %vm9950_vm7, %v9957_v52, %v9958_v60  ;;  %v9899_v9 = vadd.f32 %v9875_v29, %v9821_v19  ;;  %v9823_v63 = vpop.f32.mrb[98].mxu1  ;;  %v10068_v52 = vld [vmem:[#allocation3 + $0xd8] sm:$0xff] }
 0x6e4   :  { %v9962_v56 = vsel %vm9950_vm7, %v9960_v47, %v9961_v58  ;;  %15264 = vtanh.f32 %v9898_v32  ;;  %v9902_v3 = vadd.f32 %v9871_v55, %v9823_v63  ;;  %v9825_v4 = vpop.f32.mrb[99].mxu1  ;;  %v16758_v23 = vpack.c.bf16 %v9959_v39, %v10043_v6 }
 0x6e5   :  { %15266 = vtanh.f32 %v9899_v9  ;;  %v9903_v53 = vadd.f32 %v9875_v29, %v9825_v4  ;;  %v16760_v57 = vpack.c.bf16 %v9962_v56, %v10044_v0  ;;  %v16779_v9 = vpack.c.bf16 %v10068_v52, %v10068_v52  ;;  %v14939_v56 = vld [vmem:[#allocation11 + $0x10] ss:$8 sps:$4 sm:$0xff]   ;;  %v14944_v4 = vld [vmem:[#allocation11 + $0x24] ss:$8 sps:$4 sm:$0xff]  }
 0x6e6   :  { %v15257_v59 = vpop.eup %15256  ;;  %15268 = vtanh.f32 %v9902_v3  ;;  %v10241_v54 = vshll.u32 %v16758_v23, 16  ;;  %v10239_v16 = vshrl.u32 %v16758_v23, 16 }
 0x6e7   :  { %v15259_v28 = vpop.eup %15258  ;;  %v9967_v34 = vrot.slane %v15257_v59, 7  ;;  %15270 = vtanh.f32 %v9903_v53  ;;  %v10253_v13 = vshll.u32 %v16760_v57, 16  ;;  %v10251_v33 = vshrl.u32 %v16760_v57, 16 }
 0x6e8   :  { %v9969_v5 = vrot.slane %v15259_v28, 7  ;;  %v15261_v31 = vpop.eup %15260  ;;  %v10243_v45 = vrot.slane %v10241_v54, 1  ;;  %v10322_v59 = vshll.u32 %v16779_v9, 16 }
 0x6e9   :  { %v9968_v43 = vsel %vm9950_vm7, %v9958_v60, %v9967_v34  ;;  %v9829_v22 = vpop.f32.mrb[144].mxu1  ;;  %v10255_v25 = vrot.slane %v10253_v13, 1  ;;  %v15263_v21 = vpop.eup %15262  ;;  %v10011_v48 = vrot.slane %v15261_v31, 7 }
 0x6ea   :  { %v9970_v2 = vsel %vm9950_vm7, %v9961_v58, %v9969_v5  ;;  %v16766_v49 = vpack.c.bf16 %v10055_v14, %v9968_v43  ;;  %v9830_v36 = vpop.f32.mrb[145].mxu1  ;;  %v10014_v12 = vrot.slane %v15263_v21, 7  ;;  %v10244_v15 = vor.u32 %v10243_v45, %v10239_v16  ;;  %v14941_v58 = vld [vmem:[#allocation11 + $0x14] ss:$8 sps:$4 sm:$0xff]   ;;  %v10067_v14 = vld [vmem:[#allocation3 + $0xd0] sm:$0xff] }
 0x6eb   :  { %v16768_v55 = vpack.c.bf16 %v10056_v24, %v9970_v2  ;;  %v9831_v29 = vpop.f32.mrb[146].mxu1  ;;  %v10256_v27 = vor.u32 %v10255_v25, %v10251_v33  ;;  %v14942_v5 = vld [vmem:[#allocation11 + $0x20] ss:$8 sps:$4 sm:$0xff]   ;;  %v10324_v36 = vrot.slane %v10322_v59, 1  ;;  %v14947_v25 = vld [vmem:[#allocation11 + $0x34] ss:$8 sps:$4 sm:$0xff]   ;;  %v16792_v31 = vpack.c.bf16 %v10067_v14, %v10067_v14 }
 0x6ec   :  { %v10246_v61 = vshll.u32 %v16766_v49, 16  ;;  %v9832_v7 = vpop.f32.mrb[147].mxu1  ;;  %v10278_v24 = vshrl.u32 %v16766_v49, 16  ;;  %v14945_v33 = vld [vmem:[#allocation11 + $0x30] ss:$8 sps:$4 sm:$0xff]  }
 0x6ed   :  { %v10258_v46 = vshll.u32 %v16768_v55, 16  ;;  %v10286_v34 = vshrl.u32 %v16768_v55, 16  ;;  %v14977_v59 = vld [vmem:[#allocation11 + $0xd4] ss:$8 sps:$4 sm:$0xff]  }
 0x6ee   :  { %v15265_v18 = vpop.eup %15264  ;;  %v10248_v17 = vrot.slane %v10246_v61, 1  ;;  %v14983_v14 = vld [vmem:[#allocation11 + $0xf4] ss:$8 sps:$4 sm:$0xff]  }
 0x6ef   :  { %v15267_v44 = vpop.eup %15266  ;;  %v10012_v20 = vrot.slane %v15265_v18, 7  ;;  %v10260_v35 = vrot.slane %v10258_v46, 1  ;;  %v10314_v46 = vshll.u32 %v16792_v31, 16  ;;  %v14950_v18 = vld [vmem:[#allocation11 + $0x44] ss:$8 sps:$4 sm:$0xff]  }
 0x6f0   :  { %v15269_v51 = vpop.eup %15268  ;;  %v10015_v30 = vrot.slane %v15267_v44, 7  ;;  %v10249_v0 = vsel %vm193_vm0, %v10244_v15, %v10248_v17  ;;  %v10280_v29 = vor.u32 %v10278_v24, %v10248_v17  ;;  %v10335_v17 = vshrl.u32 %v16779_v9, 16  ;;  %v14948_v44 = vld [vmem:[#allocation11 + $0x40] ss:$8 sps:$4 sm:$0xff]   ;;  %v14986_v24 = vld [vmem:[#allocation11 + $0x104] ss:$8 sps:$4 sm:$0xff]  }
 0x6f1   :  { %v15271_v60 = vpop.eup %15270  ;;  %v10013_v1 = vsel %vm9950_vm7, %v10011_v48, %v10012_v20  ;;  %v10021_v6 = vrot.slane %v15269_v51, 7  ;;  %v10261_v47 = vsel %vm193_vm0, %v10256_v27, %v10260_v35  ;;  %v10288_v43 = vor.u32 %v10286_v34, %v10260_v35  ;;  %v14953_v27 = vld [vmem:[#allocation11 + $0x54] ss:$8 sps:$4 sm:$0xff]   ;;  %v14954_v15 = vld [vmem:[#allocation11 + $0x60] ss:$8 sps:$4 sm:$0xff]  }
 0x6f2   :  { %v10016_v32 = vsel %vm9950_vm7, %v10014_v12, %v10015_v30  ;;  %v10023_v19 = vrot.slane %v15271_v60, 7  ;;  %10775 = vmatprep.mubr.bf16.mxu0 %v10261_v47  ;;  %v10337_v35 = vor.u32 %v10335_v17, %v10324_v36  ;;  %v14951_v12 = vld [vmem:[#allocation11 + $0x50] ss:$8 sps:$4 sm:$0xff]   ;;  %v14959_v60 = vld [vmem:[#allocation11 + $0x74] ss:$8 sps:$4 sm:$0xff]  }
 0x6f3   :  { %v10022_v39 = vsel %vm9950_vm7, %v10012_v20, %v10021_v6  ;;  %10776 = vmatmul.mubr.bf16.vlgmr.msra.gmra.mrb[112].mxu0 %v10249_v0  ;;  %v10316_v20 = vrot.slane %v10314_v46, 1  ;;  %v14962_v6 = vld [vmem:[#allocation11 + $0x84] ss:$8 sps:$4 sm:$0xff]   ;;  %v14960_v47 = vld [vmem:[#allocation11 + $0x80] ss:$8 sps:$4 sm:$0xff]  }
 0x6f4   :  { %v10024_v63 = vsel %vm9950_vm7, %v10015_v30, %v10023_v19  ;;  %11133 = vmatpush1.bf16.msra.mxu0 %v14936_v26  ;;  %v16782_v3 = vpack.c.bf16 %v10022_v39, %v10013_v1  ;;  %v14956_v30 = vld [vmem:[#allocation11 + $0x64] ss:$8 sps:$4 sm:$0xff]   ;;  %v10332_v26 = vshrl.u32 %v16792_v31, 16  ;;  %v14957_v1 = vld [vmem:[#allocation11 + $0x70] ss:$8 sps:$4 sm:$0xff]  }
 0x6f5   :  { %11134 = vmatprep.subr.bf16.mxu0 %v14941_v58  ;;  %v16784_v53 = vpack.c.bf16 %v10024_v63, %v10016_v32  ;;  %v14965_v58 = vld [vmem:[#allocation11 + $0x94] ss:$8 sps:$4 sm:$0xff]   ;;  %v14963_v32 = vld [vmem:[#allocation11 + $0x90] ss:$8 sps:$4 sm:$0xff]   ;;  %v14968_v19 = vld [vmem:[#allocation11 + $0xa4] ss:$8 sps:$4 sm:$0xff]  }
 0x6f6   :  { %v10282_v28 = vshll.u32 %v16782_v3, 16  ;;  %v10310_v16 = vshrl.u32 %v16782_v3, 16  ;;  %v10334_v52 = vor.u32 %v10332_v26, %v10316_v20  ;;  %v14966_v0 = vld [vmem:[#allocation11 + $0xa0] ss:$8 sps:$4 sm:$0xff]   ;;  %v14971_v39 = vld [vmem:[#allocation11 + $0xb4] ss:$8 sps:$4 sm:$0xff]  }
 0x6f7   :  { %v10290_v13 = vshll.u32 %v16784_v53, 16  ;;  %v10318_v2 = vshrl.u32 %v16784_v53, 16  ;;  %v14969_v63 = vld [vmem:[#allocation11 + $0xb0] ss:$8 sps:$4 sm:$0xff]   ;;  %v14980_v34 = vld [vmem:[#allocation11 + $0xe4] ss:$8 sps:$4 sm:$0xff]  }
 0x6f8   :  { %11135 = vmatpush1.bf16.msra.mxu0 %v14939_v56  ;;  %v10284_v54 = vrot.slane %v10282_v28, 1  ;;  %v14974_v56 = vld [vmem:[#allocation11 + $0xc4] ss:$8 sps:$4 sm:$0xff]   ;;  %v14975_v28 = vld [vmem:[#allocation11 + $0xd0] ss:$8 sps:$4 sm:$0xff]  }
 0x6f9   :  { %11136 = vmatprep.subr.bf16.mxu0 %v14944_v4  ;;  %v10292_v22 = vrot.slane %v10290_v13, 1  ;;  %v14972_v4 = vld [vmem:[#allocation11 + $0xc0] ss:$8 sps:$4 sm:$0xff]   ;;  %v15004_v46 = vld [vmem:[#allocation11 + $0x164] ss:$8 sps:$4 sm:$0xff]  }
 0x6fa   :  { %v10285_v21 = vsel %vm193_vm0, %v10280_v29, %v10284_v54  ;;  %v10312_v48 = vor.u32 %v10310_v16, %v10284_v54  ;;  %v14978_v13 = vld [vmem:[#allocation11 + $0xe0] ss:$8 sps:$4 sm:$0xff]   ;;  %v14993_v29 = vld [vmem:[#allocation11 + $0x130] ss:$8 sps:$4 sm:$0xff]   ;;  %v15010_v17 = vld [vmem:[#allocation11 + $0x184] ss:$8 sps:$4 sm:$0xff]  }
 0x6fb   :  { %v10293_v45 = vsel %vm193_vm0, %v10288_v43, %v10292_v22  ;;  %v10320_v61 = vor.u32 %v10318_v2, %v10292_v22  ;;  %v14984_v54 = vld [vmem:[#allocation11 + $0x100] ss:$8 sps:$4 sm:$0xff]   ;;  %v14989_v43 = vld [vmem:[#allocation11 + $0x114] ss:$8 sps:$4 sm:$0xff]   ;;  %v14987_v22 = vld [vmem:[#allocation11 + $0x110] ss:$8 sps:$4 sm:$0xff]  }
 0x6fc   :  { %11137 = vmatpush1.bf16.msra.mxu0 %v14942_v5  ;;  %10785 = vmatprep.mubr.bf16.mxu0 %v10293_v45  ;;  %v10317_v51 = vsel %vm193_vm0, %v10312_v48, %v10316_v20  ;;  %v14981_v5 = vld [vmem:[#allocation11 + $0xf0] ss:$8 sps:$4 sm:$0xff]   ;;  %v14992_v2 = vld [vmem:[#allocation11 + $0x124] ss:$8 sps:$4 sm:$0xff]   ;;  %v15008_v48 = vld [vmem:[#allocation11 + $0x180] ss:$8 sps:$4 sm:$0xff]  }
 0x6fd   :  { %10786 = vmatmul.mubr.bf16.gmra.mrb[116].mxu0 %v10285_v21  ;;  %v10325_v7 = vsel %vm193_vm0, %v10320_v61, %v10324_v36  ;;  %11138 = vmatprep.subr.bf16.mxu0 %v14947_v25  ;;  %v14990_v36 = vld [vmem:[#allocation11 + $0x120] ss:$8 sps:$4 sm:$0xff]   ;;  %v14995_v25 = vld [vmem:[#allocation11 + $0x134] ss:$8 sps:$4 sm:$0xff]   ;;  %v14998_v45 = vld [vmem:[#allocation11 + $0x144] ss:$8 sps:$4 sm:$0xff]  }
 0x6fe   :  { %10795 = vmatprep.mubr.bf16.mxu0 %v10325_v7  ;;  %v14996_v61 = vld [vmem:[#allocation11 + $0x140] ss:$8 sps:$4 sm:$0xff]   ;;  %v15001_v21 = vld [vmem:[#allocation11 + $0x154] ss:$8 sps:$4 sm:$0xff]   ;;  %v15005_v16 = vld [vmem:[#allocation11 + $0x170] ss:$8 sps:$4 sm:$0xff]  }
 0x6ff   :  { %v15002_v7 = vld [vmem:[#allocation11 + $0x160] ss:$8 sps:$4 sm:$0xff]  }
 0x700   :  { %11139 = vmatpush1.bf16.msra.mxu0 %v14945_v33  ;;  %v14999_v33 = vld [vmem:[#allocation11 + $0x150] ss:$8 sps:$4 sm:$0xff]   ;;  %v15014_v26 = vld [vmem:[#allocation11 + $0x1a0] ss:$8 sps:$4 sm:$0xff]  }
 0x701   :  { %11140 = vmatprep.subr.bf16.mxu0 %v14950_v18  ;;  %v15007_v18 = vld [vmem:[#allocation11 + $0x174] ss:$8 sps:$4 sm:$0xff]  }
 0x704   :  { %11141 = vmatpush1.bf16.msra.mxu0 %v14948_v44  ;;  %v10738_v44 = vpop.f32.mrb[124].mxu0 }
 0x705   :  { %10796 = vmatmul.mubr.bf16.gmra.mrb[120].mxu0 %v10317_v51  ;;  %11142 = vmatprep.subr.bf16.mxu0 %v14953_v27  ;;  %v10739_v20 = vpop.f32.mrb[125].mxu0  ;;  %v15013_v27 = vld [vmem:[#allocation11 + $0x194] ss:$8 sps:$4 sm:$0xff]  }
 0x706   :  { %10805 = vmatprep.mubr.bf16.mxu0 %v10337_v35  ;;  %v10740_v35 = vpop.f32.mrb[126].mxu0  ;;  %v15073_v44 = vld [vmem:[#allocation11 + $0x4d4] ss:$8 sps:$4 sm:$0xff]   ;;  %v15076_v20 = vld [vmem:[#allocation11 + $0x4e4] ss:$8 sps:$4 sm:$0xff]  }
 0x707   :  { %v10741_v51 = vpop.f32.mrb[127].mxu0  ;;  %v15079_v35 = vld [vmem:[#allocation11 + $0x4f4] ss:$8 sps:$4 sm:$0xff]  }
 0x708   :  { %11143 = vmatpush1.bf16.msra.mxu0 %v14951_v12  ;;  %v15011_v12 = vld [vmem:[#allocation11 + $0x190] ss:$8 sps:$4 sm:$0xff]  }
 0x709   :  { %11144 = vmatprep.subr.bf16.mxu0 %v14956_v30  ;;  %v15016_v30 = vld [vmem:[#allocation11 + $0x1a4] ss:$8 sps:$4 sm:$0xff]   ;;  %v15077_v51 = vld [vmem:[#allocation11 + $0x4f0] ss:$8 sps:$4 sm:$0xff]  }
 0x70c   :  { %11145 = vmatpush1.bf16.msra.mxu0 %v14954_v15  ;;  %v15019_v15 = vld [vmem:[#allocation11 + $0x1b4] ss:$8 sps:$4 sm:$0xff]  }
 0x70d   :  { %10806 = vmatmul.mubr.bf16.gmra.mrb[128].mxu0 %v10334_v52  ;;  %11146 = vmatprep.subr.bf16.mxu0 %v14959_v60  ;;  %v15017_v52 = vld [vmem:[#allocation11 + $0x1b0] ss:$8 sps:$4 sm:$0xff]   ;;  %v15022_v60 = vld [vmem:[#allocation11 + $0x1c4] ss:$8 sps:$4 sm:$0xff]  }
 0x70e   :  { %11164 = vmatprep.mubr.bf16.mxu0 %v16679_v38 }
 0x710   :  { %11147 = vmatpush1.bf16.msra.mxu0 %v14957_v1  ;;  %v15020_v1 = vld [vmem:[#allocation11 + $0x1c0] ss:$8 sps:$4 sm:$0xff]  }
 0x711   :  { %11148 = vmatprep.subr.bf16.mxu0 %v14962_v6  ;;  %v15025_v6 = vld [vmem:[#allocation11 + $0x1d4] ss:$8 sps:$4 sm:$0xff]  }
 0x714   :  { %11149 = vmatpush1.bf16.msra.mxu0 %v14960_v47  ;;  %v15023_v47 = vld [vmem:[#allocation11 + $0x1d0] ss:$8 sps:$4 sm:$0xff]  }
 0x715   :  { %11150 = vmatprep.subr.bf16.mxu0 %v14965_v58  ;;  %v15028_v58 = vld [vmem:[#allocation11 + $0x1e4] ss:$8 sps:$4 sm:$0xff]  }
 0x718   :  { %11151 = vmatpush1.bf16.msra.mxu0 %v14963_v32  ;;  %v15026_v32 = vld [vmem:[#allocation11 + $0x1e0] ss:$8 sps:$4 sm:$0xff]  }
 0x719   :  { %11152 = vmatprep.subr.bf16.mxu0 %v14968_v19  ;;  %v15031_v19 = vld [vmem:[#allocation11 + $0x1f4] ss:$8 sps:$4 sm:$0xff]  }
 0x71c   :  { %11153 = vmatpush1.bf16.msra.mxu0 %v14966_v0  ;;  %v15029_v0 = vld [vmem:[#allocation11 + $0x1f0] ss:$8 sps:$4 sm:$0xff]  }
 0x71d   :  { %11154 = vmatprep.subr.bf16.mxu0 %v14971_v39  ;;  %v15034_v39 = vld [vmem:[#allocation11 + $0x404] ss:$8 sps:$4 sm:$0xff]  }
 0x720   :  { %11155 = vmatpush1.bf16.msra.mxu0 %v14969_v63  ;;  %v15032_v63 = vld [vmem:[#allocation11 + $0x400] ss:$8 sps:$4 sm:$0xff]  }
 0x721   :  { %11156 = vmatprep.subr.bf16.mxu0 %v14974_v56  ;;  %v15037_v56 = vld [vmem:[#allocation11 + $0x414] ss:$8 sps:$4 sm:$0xff]  }
 0x724   :  { %11157 = vmatpush1.bf16.msra.mxu0 %v14972_v4  ;;  %v15035_v4 = vld [vmem:[#allocation11 + $0x410] ss:$8 sps:$4 sm:$0xff]  }
 0x725   :  { %11158 = vmatprep.subr.bf16.mxu0 %v14977_v59  ;;  %v15040_v59 = vld [vmem:[#allocation11 + $0x424] ss:$8 sps:$4 sm:$0xff]  }
 0x728   :  { %11159 = vmatpush1.bf16.msra.mxu0 %v14975_v28  ;;  %v15038_v28 = vld [vmem:[#allocation11 + $0x420] ss:$8 sps:$4 sm:$0xff]  }
 0x729   :  { %11160 = vmatprep.subr.bf16.mxu0 %v14980_v34  ;;  %v15043_v34 = vld [vmem:[#allocation11 + $0x434] ss:$8 sps:$4 sm:$0xff]  }
 0x72c   :  { %11161 = vmatpush1.bf16.msra.mxu0 %v14978_v13  ;;  %v15041_v13 = vld [vmem:[#allocation11 + $0x430] ss:$8 sps:$4 sm:$0xff]  }
 0x72d   :  { %11162 = vmatprep.subr.bf16.mxu0 %v14983_v14  ;;  %v15046_v14 = vld [vmem:[#allocation11 + $0x444] ss:$8 sps:$4 sm:$0xff]  }
 0x730   :  { %11163 = vmatpush1.bf16.msra.mxu0 %v14981_v5  ;;  %v15044_v5 = vld [vmem:[#allocation11 + $0x440] ss:$8 sps:$4 sm:$0xff]  }
 0x731   :  { %11201 = vmatprep.subr.bf16.mxu0 %v14986_v24  ;;  %v15049_v24 = vld [vmem:[#allocation11 + $0x454] ss:$8 sps:$4 sm:$0xff]  }
 0x733   :  { %11165 = vmatmul.mubr.bf16.vlgmr.msra.gmra.mrb[112].mxu0 %v16676_v62 }
 0x734   :  { %11174 = vmatprep.mubr.bf16.mxu0 %v16689_v50  ;;  %11202 = vmatpush1.bf16.msra.mxu0 %v14984_v54  ;;  %v15047_v54 = vld [vmem:[#allocation11 + $0x450] ss:$8 sps:$4 sm:$0xff]  }
 0x735   :  { %11203 = vmatprep.subr.bf16.mxu0 %v14989_v43  ;;  %v15052_v43 = vld [vmem:[#allocation11 + $0x464] ss:$8 sps:$4 sm:$0xff]  }
 0x738   :  { %11204 = vmatpush1.bf16.msra.mxu0 %v14987_v22  ;;  %v11355_v22 = vrot.slane %v16689_v50, 1  ;;  %v15059_v50 = vld [vmem:[#allocation11 + $0x490] ss:$8 sps:$4 sm:$0xff]  }
 0x739   :  { %11205 = vmatprep.subr.bf16.mxu0 %v14992_v2  ;;  %v15050_v2 = vld [vmem:[#allocation11 + $0x460] ss:$8 sps:$4 sm:$0xff]  }
 0x73b   :  { %11175 = vmatmul.mubr.bf16.gmra.mrb[116].mxu0 %v16687_v40 }
 0x73c   :  { %11184 = vmatprep.mubr.bf16.mxu0 %v16707_v41  ;;  %11206 = vmatpush1.bf16.msra.mxu0 %v14990_v36  ;;  %v11354_v36 = vrot.slane %v16679_v38, 1  ;;  %v15062_v38 = vld [vmem:[#allocation11 + $0x4a0] ss:$8 sps:$4 sm:$0xff]  }
 0x73d   :  { %11207 = vmatprep.subr.bf16.mxu0 %v14995_v25  ;;  %v15055_v25 = vld [vmem:[#allocation11 + $0x474] ss:$8 sps:$4 sm:$0xff]  }
 0x740   :  { %11208 = vmatpush1.bf16.msra.mxu0 %v14993_v29  ;;  %v11356_v29 = vsel %vm1151_vm3, %v11354_v36, %v11355_v22  ;;  %v15110_v36 = vld [vmem:[#allocation11 + $0x5a0] ss:$8 sps:$4 sm:$0xff]  }
 0x741   :  { %11209 = vmatprep.subr.bf16.mxu0 %v14998_v45  ;;  %v15053_v45 = vld [vmem:[#allocation11 + $0x470] ss:$8 sps:$4 sm:$0xff]  }
 0x743   :  { %11185 = vmatmul.mubr.bf16.gmra.mrb[120].mxu0 %v16705_v42 }
 0x744   :  { %11210 = vmatpush1.bf16.msra.mxu0 %v14996_v61  ;;  %11194 = vmatprep.mubr.bf16.mxu0 %v16702_v8  ;;  %v15058_v61 = vld [vmem:[#allocation11 + $0x484] ss:$8 sps:$4 sm:$0xff]  }
 0x745   :  { %11211 = vmatprep.subr.bf16.mxu0 %v15001_v21  ;;  %v15056_v21 = vld [vmem:[#allocation11 + $0x480] ss:$8 sps:$4 sm:$0xff]  }
 0x748   :  { %11212 = vmatpush1.bf16.msra.mxu0 %v14999_v33  ;;  %v15061_v33 = vld [vmem:[#allocation11 + $0x494] ss:$8 sps:$4 sm:$0xff]  }
 0x749   :  { %11213 = vmatprep.subr.bf16.mxu0 %v15004_v46  ;;  %v15064_v46 = vld [vmem:[#allocation11 + $0x4a4] ss:$8 sps:$4 sm:$0xff]  }
 0x74b   :  { %11195 = vmatmul.mubr.bf16.gmra.mrb[132].mxu0 %v16719_v10 }
 0x74c   :  { %11214 = vmatpush1.bf16.msra.mxu0 %v15002_v7  ;;  %11233 = vmatprep.mubr.bf16.mxu0 %v16760_v57  ;;  %v15067_v7 = vld [vmem:[#allocation11 + $0x4b4] ss:$8 sps:$4 sm:$0xff]  }
 0x74d   :  { %11215 = vmatprep.subr.bf16.mxu0 %v15007_v18  ;;  %v15065_v18 = vld [vmem:[#allocation11 + $0x4b0] ss:$8 sps:$4 sm:$0xff]  }
 0x750   :  { %11216 = vmatpush1.bf16.msra.mxu0 %v15005_v16  ;;  %v15070_v16 = vld [vmem:[#allocation11 + $0x4c4] ss:$8 sps:$4 sm:$0xff]  }
 0x751   :  { %11217 = vmatprep.subr.bf16.mxu0 %v15010_v17  ;;  %v15068_v17 = vld [vmem:[#allocation11 + $0x4c0] ss:$8 sps:$4 sm:$0xff]  }
 0x754   :  { %11218 = vmatpush1.bf16.msra.mxu0 %v15008_v48  ;;  %v15071_v48 = vld [vmem:[#allocation11 + $0x4d0] ss:$8 sps:$4 sm:$0xff]  }
 0x755   :  { %11219 = vmatprep.subr.bf16.mxu0 %v15013_v27  ;;  %v15074_v27 = vld [vmem:[#allocation11 + $0x4e0] ss:$8 sps:$4 sm:$0xff]  }
 0x758   :  { %11220 = vmatpush1.bf16.msra.mxu0 %v15011_v12  ;;  %v15082_v12 = vld [vmem:[#allocation11 + $0x504] ss:$8 sps:$4 sm:$0xff]  }
 0x759   :  { %11221 = vmatprep.subr.bf16.mxu0 %v15016_v30  ;;  %v11352_v30 = vrot.slane %v16687_v40, 1  ;;  %v11363_v40 = vrot.slane %v16705_v42, 1  ;;  %v15092_v42 = vld [vmem:[#allocation11 + $0x540] ss:$8 sps:$4 sm:$0xff]  }
 0x75c   :  { %11222 = vmatpush1.bf16.msra.mxu0 %v15014_v26  ;;  %v11365_v26 = vrot.slane %v16707_v41, 1  ;;  %v11373_v41 = vrot.slane %v16702_v8, 1  ;;  %v15097_v8 = vld [vmem:[#allocation11 + $0x554] ss:$8 sps:$4 sm:$0xff]  }
 0x75d   :  { %11223 = vmatprep.subr.bf16.mxu0 %v15019_v15  ;;  %v11351_v15 = vrot.slane %v16676_v62, 1  ;;  %v15091_v62 = vld [vmem:[#allocation11 + $0x534] ss:$8 sps:$4 sm:$0xff]  }
 0x760   :  { %11224 = vmatpush1.bf16.msra.mxu0 %v15017_v52  ;;  %v15080_v52 = vld [vmem:[#allocation11 + $0x500] ss:$8 sps:$4 sm:$0xff]  }
 0x761   :  { %11225 = vmatprep.subr.bf16.mxu0 %v15022_v60  ;;  %v15085_v60 = vld [vmem:[#allocation11 + $0x514] ss:$8 sps:$4 sm:$0xff]  }
 0x764   :  { %11226 = vmatpush1.bf16.msra.mxu0 %v15020_v1  ;;  %v11353_v1 = vsel %vm1151_vm3, %v11351_v15, %v11352_v30 }
 0x765   :  { %11227 = vmatprep.subr.bf16.mxu0 %v15025_v6  ;;  %v11366_v6 = vsel %vm1151_vm3, %v11355_v22, %v11365_v26  ;;  %v15109_v22 = vld [vmem:[#allocation11 + $0x594] ss:$8 sps:$4 sm:$0xff]  }
 0x768   :  { %11228 = vmatpush1.bf16.msra.mxu0 %v15023_v47  ;;  %v15083_v47 = vld [vmem:[#allocation11 + $0x510] ss:$8 sps:$4 sm:$0xff]  }
 0x769   :  { %11229 = vmatprep.subr.bf16.mxu0 %v15028_v58  ;;  %v15088_v58 = vld [vmem:[#allocation11 + $0x524] ss:$8 sps:$4 sm:$0xff]  }
 0x76c   :  { %11230 = vmatpush1.bf16.msra.mxu0 %v15026_v32  ;;  %v15086_v32 = vld [vmem:[#allocation11 + $0x520] ss:$8 sps:$4 sm:$0xff]  }
 0x76d   :  { %11231 = vmatprep.subr.bf16.mxu0 %v15031_v19  ;;  %v11364_v19 = vsel %vm1151_vm3, %v11352_v30, %v11363_v40 }
 0x770   :  { %11232 = vmatpush1.bf16.msra.mxu0 %v15029_v0  ;;  %v11374_v0 = vsel %vm1151_vm3, %v11365_v26, %v11373_v41 }
 0x771   :  { %11715 = vmatprep.subr.bf16.mxu0 %v15034_v39  ;;  %v15089_v39 = vld [vmem:[#allocation11 + $0x530] ss:$8 sps:$4 sm:$0xff]  }
 0x773   :  { %11234 = vmatmul.mubr.bf16.vlgmr.msra.gmra.mrb[112].mxu0 %v16758_v23 }
 0x774   :  { %11243 = vmatprep.mubr.bf16.mxu0 %v16768_v55  ;;  %11716 = vmatpush1.bf16.msra.mxu0 %v15032_v63  ;;  %v15094_v63 = vld [vmem:[#allocation11 + $0x544] ss:$8 sps:$4 sm:$0xff]  }
 0x775   :  { %11717 = vmatprep.subr.bf16.mxu0 %v15037_v56  ;;  %v11371_v56 = vrot.slane %v16719_v10, 1  ;;  %v15103_v10 = vld [vmem:[#allocation11 + $0x574] ss:$8 sps:$4 sm:$0xff]  }
 0x778   :  { %11718 = vmatpush1.bf16.msra.mxu0 %v15035_v4  ;;  %v11372_v4 = vsel %vm1151_vm3, %v11363_v40, %v11371_v56 }
 0x779   :  { %11719 = vmatprep.subr.bf16.mxu0 %v15040_v59  ;;  %v15095_v59 = vld [vmem:[#allocation11 + $0x550] ss:$8 sps:$4 sm:$0xff]  }
 0x77b   :  { %11244 = vmatmul.mubr.bf16.gmra.mrb[116].mxu0 %v16766_v49 }
 0x77c   :  { %11253 = vmatprep.mubr.bf16.mxu0 %v16784_v53  ;;  %11720 = vmatpush1.bf16.msra.mxu0 %v15038_v28  ;;  %v15100_v28 = vld [vmem:[#allocation11 + $0x564] ss:$8 sps:$4 sm:$0xff]  }
 0x77d   :  { %11721 = vmatprep.subr.bf16.mxu0 %v15043_v34  ;;  %v11361_v34 = vrot.slane %v16768_v55, 1  ;;  %v15107_v55 = vld [vmem:[#allocation11 + $0x590] ss:$8 sps:$4 sm:$0xff]  }
 0x780   :  { %11722 = vmatpush1.bf16.msra.mxu0 %v15041_v13  ;;  %v15098_v13 = vld [vmem:[#allocation11 + $0x560] ss:$8 sps:$4 sm:$0xff]  }
 0x781   :  { %11723 = vmatprep.subr.bf16.mxu0 %v15046_v14  ;;  %v11360_v14 = vrot.slane %v16760_v57, 1  ;;  %v15115_v57 = vld [vmem:[#allocation11 + $0x5b4] ss:$8 sps:$4 sm:$0xff]  }
 0x783   :  { %11254 = vmatmul.mubr.bf16.gmra.mrb[120].mxu0 %v16782_v3 }
 0x784   :  { %11724 = vmatpush1.bf16.msra.mxu0 %v15044_v5  ;;  %11263 = vmatprep.mubr.bf16.mxu0 %v16779_v9  ;;  %v11362_v5 = vsel %vm1151_vm3, %v11360_v14, %v11361_v34 }
 0x785   :  { %11725 = vmatprep.subr.bf16.mxu0 %v15049_v24  ;;  %v15101_v24 = vld [vmem:[#allocation11 + $0x570] ss:$8 sps:$4 sm:$0xff]  }
 0x788   :  { %11726 = vmatpush1.bf16.msra.mxu0 %v15047_v54  ;;  %v15106_v54 = vld [vmem:[#allocation11 + $0x584] ss:$8 sps:$4 sm:$0xff]  }
 0x789   :  { %11727 = vmatprep.subr.bf16.mxu0 %v15052_v43  ;;  %v15104_v43 = vld [vmem:[#allocation11 + $0x580] ss:$8 sps:$4 sm:$0xff]  }
 0x78b   :  { %11264 = vmatmul.mubr.bf16.gmra.mrb[136].mxu0 %v16792_v31 }
 0x78c   :  { %11728 = vmatpush1.bf16.msra.mxu0 %v15050_v2  ;;  %11747 = vmatprep.mubr.bf16.mxu0 %v11356_v29  ;;  %v15112_v2 = vld [vmem:[#allocation11 + $0x5a4] ss:$8 sps:$4 sm:$0xff]  }
 0x78d   :  { %11729 = vmatprep.subr.bf16.mxu0 %v15055_v25  ;;  %v15113_v25 = vld [vmem:[#allocation11 + $0x5b0] ss:$8 sps:$4 sm:$0xff]   ;;  %v15118_v29 = vld [vmem:[#allocation11 + $0x5c4] ss:$8 sps:$4 sm:$0xff]  }
 0x790   :  { %11730 = vmatpush1.bf16.msra.mxu0 %v15053_v45  ;;  %v15116_v45 = vld [vmem:[#allocation11 + $0x5c0] ss:$8 sps:$4 sm:$0xff]  }
 0x791   :  { %11731 = vmatprep.subr.bf16.mxu0 %v15058_v61 }
 0x794   :  { %11732 = vmatpush1.bf16.msra.mxu0 %v15056_v21  ;;  %v15121_v21 = vld [vmem:[#allocation11 + $0x5d4] ss:$8 sps:$4 sm:$0xff]  }
 0x795   :  { %11733 = vmatprep.subr.bf16.mxu0 %v15061_v33 }
 0x798   :  { %11734 = vmatpush1.bf16.msra.mxu0 %v15059_v50 }
 0x799   :  { %11735 = vmatprep.subr.bf16.mxu0 %v15064_v46 }
 0x79c   :  { %11736 = vmatpush1.bf16.msra.mxu0 %v15062_v38  ;;  %v15119_v38 = vld [vmem:[#allocation11 + $0x5d0] ss:$8 sps:$4 sm:$0xff]  }
 0x79d   :  { %11737 = vmatprep.subr.bf16.mxu0 %v15067_v7  ;;  %v15124_v7 = vld [vmem:[#allocation11 + $0x5e4] ss:$8 sps:$4 sm:$0xff]  }
 0x7a0   :  { %11738 = vmatpush1.bf16.msra.mxu0 %v15065_v18  ;;  %v15122_v18 = vld [vmem:[#allocation11 + $0x5e0] ss:$8 sps:$4 sm:$0xff]  }
 0x7a1   :  { %11739 = vmatprep.subr.bf16.mxu0 %v15070_v16  ;;  %v15127_v16 = vld [vmem:[#allocation11 + $0x5f4] ss:$8 sps:$4 sm:$0xff]  }
 0x7a4   :  { %11740 = vmatpush1.bf16.msra.mxu0 %v15068_v17  ;;  %v15125_v17 = vld [vmem:[#allocation11 + $0x5f0] ss:$8 sps:$4 sm:$0xff]  }
 0x7a5   :  { %11741 = vmatprep.subr.bf16.mxu0 %v15073_v44  ;;  %v11358_v44 = vrot.slane %v16766_v49, 1 }
 0x7a8   :  { %11742 = vmatpush1.bf16.msra.mxu0 %v15071_v48  ;;  %v11369_v48 = vrot.slane %v16784_v53, 1  ;;  %v11375_v53 = vrot.slane %v16792_v31, 1 }
 0x7a9   :  { %11743 = vmatprep.subr.bf16.mxu0 %v15076_v20  ;;  %v11357_v20 = vrot.slane %v16758_v23, 1 }
 0x7ac   :  { %11744 = vmatpush1.bf16.msra.mxu0 %v15074_v27  ;;  %v11359_v27 = vsel %vm1151_vm3, %v11357_v20, %v11358_v44 }
 0x7ad   :  { %11745 = vmatprep.subr.bf16.mxu0 %v15079_v35  ;;  %v11370_v35 = vsel %vm1151_vm3, %v11361_v34, %v11369_v48 }
 0x7b0   :  { %11746 = vmatpush1.bf16.msra.mxu0 %v15077_v51  ;;  %v11367_v51 = vrot.slane %v16782_v3, 1 }
 0x7b1   :  { %11784 = vmatprep.subr.bf16.mxu0 %v15082_v12  ;;  %v11377_v12 = vrot.slane %v16779_v9, 1 }
 0x7b2   :  { %v11368_v30 = vsel %vm1151_vm3, %v11358_v44, %v11367_v51  ;;  %v11376_v23 = vsel %vm1151_vm3, %v11367_v51, %v11375_v53 }
 0x7b3   :  { %11748 = vmatmul.mubr.bf16.vlgmr.msra.gmra.mrb[112].mxu0 %v11353_v1  ;;  %v11378_v49 = vsel %vm1151_vm3, %v11369_v48, %v11377_v12 }
 0x7b4   :  { %11757 = vmatprep.mubr.bf16.mxu0 %v11366_v6  ;;  %11785 = vmatpush1.bf16.msra.mxu0 %v15080_v52 }
 0x7b5   :  { %11786 = vmatprep.subr.bf16.mxu0 %v15085_v60 }
 0x7b8   :  { %11787 = vmatpush1.bf16.msra.mxu0 %v15083_v47 }
 0x7b9   :  { %11788 = vmatprep.subr.bf16.mxu0 %v15088_v58 }
 0x7bb   :  { %11758 = vmatmul.mubr.bf16.gmra.mrb[116].mxu0 %v11364_v19 }
 0x7bc   :  { %11767 = vmatprep.mubr.bf16.mxu0 %v11374_v0  ;;  %11789 = vmatpush1.bf16.msra.mxu0 %v15086_v32  ;;  %v11865_v32 = vld [vmem:[#allocation12] sm:$0x3] }
 0x7bd   :  { %11790 = vmatprep.subr.bf16.mxu0 %v15091_v62  ;;  %v11870_v31 = vrot.slane %v11865_v32, %v16977_v11  ;;  %v11874_v62 = vrot.slane %v11865_v32, %v16978_v37 }
 0x7c0   :  { %11791 = vmatpush1.bf16.msra.mxu0 %v15089_v39 }
 0x7c1   :  { %11792 = vmatprep.subr.bf16.mxu0 %v15094_v63 }
 0x7c3   :  { %11768 = vmatmul.mubr.bf16.gmra.mrb[120].mxu0 %v11372_v4 }
 0x7c4   :  { %11793 = vmatpush1.bf16.msra.mxu0 %v15092_v42  ;;  %11777 = vmatprep.mubr.bf16.mxu0 %v11373_v41 }
 0x7c5   :  { %11794 = vmatprep.subr.bf16.mxu0 %v15097_v8 }
 0x7c8   :  { %11795 = vmatpush1.bf16.msra.mxu0 %v15095_v59 }
 0x7c9   :  { %11796 = vmatprep.subr.bf16.mxu0 %v15100_v28 }
 0x7cb   :  { %11778 = vmatmul.mubr.bf16.gmra.mrb[140].mxu0 %v11371_v56 }
 0x7cc   :  { %11797 = vmatpush1.bf16.msra.mxu0 %v15098_v13  ;;  %11816 = vmatprep.mubr.bf16.mxu0 %v11362_v5 }
 0x7cd   :  { %11798 = vmatprep.subr.bf16.mxu0 %v15103_v10 }
 0x7d0   :  { %11799 = vmatpush1.bf16.msra.mxu0 %v15101_v24 }
 0x7d1   :  { %11800 = vmatprep.subr.bf16.mxu0 %v15106_v54 }
 0x7d4   :  { %11801 = vmatpush1.bf16.msra.mxu0 %v15104_v43 }
 0x7d5   :  { %11802 = vmatprep.subr.bf16.mxu0 %v15109_v22 }
 0x7d8   :  { %11803 = vmatpush1.bf16.msra.mxu0 %v15107_v55 }
 0x7d9   :  { %11804 = vmatprep.subr.bf16.mxu0 %v15112_v2 }
 0x7dc   :  { %11805 = vmatpush1.bf16.msra.mxu0 %v15110_v36 }
 0x7dd   :  { %11806 = vmatprep.subr.bf16.mxu0 %v15115_v57 }
 0x7e0   :  { %11807 = vmatpush1.bf16.msra.mxu0 %v15113_v25  ;;  %v10807_v61 = vpop.f32.mrb[128].mxu0 }
 0x7e1   :  { %11808 = vmatprep.subr.bf16.mxu0 %v15118_v29  ;;  %v10808_v33 = vpop.f32.mrb[129].mxu0 }
 0x7e2   :  { %v10809_v50 = vpop.f32.mrb[130].mxu0 }
 0x7e3   :  { %v10810_v46 = vpop.f32.mrb[131].mxu0 }
 0x7e4   :  { %11809 = vmatpush1.bf16.msra.mxu0 %v15116_v45 }
 0x7e5   :  { %11810 = vmatprep.subr.bf16.mxu0 %v15121_v21 }
 0x7e8   :  { %11811 = vmatpush1.bf16.msra.mxu0 %v15119_v38 }
 0x7e9   :  { %11812 = vmatprep.subr.bf16.mxu0 %v15124_v7 }
 0x7ec   :  { %11813 = vmatpush1.bf16.msra.mxu0 %v15122_v18 }
 0x7ed   :  { %11814 = vmatprep.subr.bf16.mxu0 %v15127_v16 }
 0x7f0   :  { %11815 = vmatpush1.bf16.msra.mxu0 %v15125_v17 }
 0x7f3   :  { %11817 = vmatmul.mubr.bf16.vlgmr.msra.gmra.mrb[112].mxu0 %v11359_v27 }
 0x7f4   :  { %11826 = vmatprep.mubr.bf16.mxu0 %v11370_v35 }
 0x7fb   :  { %11827 = vmatmul.mubr.bf16.gmra.mrb[116].mxu0 %v11368_v30 }
 0x7fc   :  { %11836 = vmatprep.mubr.bf16.mxu0 %v11378_v49 }
 0x803   :  { %11837 = vmatmul.mubr.bf16.gmra.mrb[120].mxu0 %v11376_v23 }
 0x804   :  { %11846 = vmatprep.mubr.bf16.mxu0 %v11377_v12 }
 0x80b   :  { %11847 = vmatmul.mubr.bf16.gmra.mrb[144].mxu0 %v11375_v53 }
 0x81e   :  { %v11196_v26 = vpop.f32.mrb[132].mxu0 }
 0x81f   :  { %v11197_v15 = vpop.f32.mrb[133].mxu0 }
 0x820   :  { %v11198_v52 = vpop.f32.mrb[134].mxu0 }
 0x821   :  { %v11199_v60 = vpop.f32.mrb[135].mxu0 }
 0x85e   :  { %v11265_v3 = vpop.f32.mrb[136].mxu0 }
 0x85f   :  { %v11266_v1 = vpop.f32.mrb[137].mxu0 }
 0x860   :  { %v11267_v9 = vpop.f32.mrb[138].mxu0 }
 0x861   :  { %v11268_v6 = vpop.f32.mrb[139].mxu0 }
 0x89e   :  { %v11779_v47 = vpop.f32.mrb[140].mxu0 }
 0x89f   :  { %v11780_v58 = vpop.f32.mrb[141].mxu0 }
 0x8a0   :  { %v11781_v40 = vpop.f32.mrb[142].mxu0 }
 0x8a1   :  { %v11782_v41 = vpop.f32.mrb[143].mxu0 }
 0x8c6   :  { %v11818_v19 = vpop.f32.mrb[112].mxu0 }
 0x8c7   :  { %v11877_v0 = vadd.f32 %v11870_v31, %v11818_v19  ;;  %v11820_v39 = vpop.f32.mrb[113].mxu0 }
 0x8c8   :  { %v11878_v63 = vadd.f32 %v11874_v62, %v11820_v39  ;;  %v11822_v56 = vpop.f32.mrb[114].mxu0 }
 0x8c9   :  { %v11879_v42 = vadd.f32 %v11870_v31, %v11822_v56  ;;  %v11824_v8 = vpop.f32.mrb[115].mxu0  ;;  %v11895_v59 = vrot.slane %v11877_v0, 7 }
 0x8ca   :  { %v11880_v4 = vadd.f32 %v11874_v62, %v11824_v8  ;;  %v11898_v34 = vrot.slane %v11878_v63, 7 }
 0x8cb   :  { %v11896_v28 = vrot.slane %v11879_v42, 7 }
 0x8cc   :  { %v11899_v13 = vrot.slane %v11880_v4, 7 }
 0x8cd   :  { %v11897_v14 = vsel %vm9950_vm7, %v11895_v59, %v11896_v28 }
 0x8ce   :  { %11909 = vst [vmem:[%s16887_s7] sm:$0xff] %v11897_v14  ;;  %v11900_v11 = vsel %vm9950_vm7, %v11898_v34, %v11899_v13  ;;  %v11828_v37 = vpop.f32.mrb[116].mxu0 }
 0x8cf   :  { %11910 = vst [vmem:[%s16887_s7 + $0x8] sm:$0xff] %v11900_v11  ;;  %v11881_v10 = vadd.f32 %v11870_v31, %v11828_v37  ;;  %v11830_v5 = vpop.f32.mrb[117].mxu0 }
 0x8d0   :  { %v11882_v24 = vadd.f32 %v11874_v62, %v11830_v5  ;;  %v11832_v54 = vpop.f32.mrb[118].mxu0 }
 0x8d1   :  { %v11901_v43 = vrot.slane %v11881_v10, 7  ;;  %v11834_v22 = vpop.f32.mrb[119].mxu0  ;;  %v11883_v57 = vadd.f32 %v11870_v31, %v11832_v54 }
 0x8d2   :  { %v11903_v55 = vrot.slane %v11882_v24, 7  ;;  %v11884_v25 = vadd.f32 %v11874_v62, %v11834_v22 }
 0x8d3   :  { %v11902_v2 = vsel %vm9950_vm7, %v11896_v28, %v11901_v43  ;;  %v11919_v50 = vrot.slane %v11883_v57, 7 }
 0x8d4   :  { %11911 = vst [vmem:[%s16887_s7 + $0x10] sm:$0xff] %v11902_v2  ;;  %v11904_v36 = vsel %vm9950_vm7, %v11899_v13, %v11903_v55  ;;  %v11922_v18 = vrot.slane %v11884_v25, 7 }
 0x8d5   :  { %11912 = vst [vmem:[%s16887_s7 + $0x18] sm:$0xff] %v11904_v36 }
 0x8d6   :  { %v11838_v29 = vpop.f32.mrb[120].mxu0 }
 0x8d7   :  { %v11885_v45 = vadd.f32 %v11870_v31, %v11838_v29  ;;  %v11840_v61 = vpop.f32.mrb[121].mxu0 }
 0x8d8   :  { %v11886_v21 = vadd.f32 %v11874_v62, %v11840_v61  ;;  %v11842_v33 = vpop.f32.mrb[122].mxu0 }
 0x8d9   :  { %v11920_v46 = vrot.slane %v11885_v45, 7  ;;  %v11887_v38 = vadd.f32 %v11870_v31, %v11842_v33  ;;  %v11844_v7 = vpop.f32.mrb[123].mxu0 }
 0x8da   :  { %v11923_v16 = vrot.slane %v11886_v21, 7  ;;  %v11888_v17 = vadd.f32 %v11874_v62, %v11844_v7 }
 0x8db   :  { %v11921_v44 = vsel %vm9950_vm7, %v11919_v50, %v11920_v46  ;;  %v11925_v48 = vrot.slane %v11887_v38, 7 }
 0x8dc   :  { %13150 = vst [vmem:[%s16887_s7 + $0x20] sm:$0xff] %v11921_v44  ;;  %v11924_v20 = vsel %vm9950_vm7, %v11922_v18, %v11923_v16  ;;  %v11927_v27 = vrot.slane %v11888_v17, 7 }
 0x8dd   :  { %13151 = vst [vmem:[%s16887_s7 + $0x28] sm:$0xff] %v11924_v20  ;;  %v11926_v35 = vsel %vm9950_vm7, %v11920_v46, %v11925_v48 }
 0x8de   :  { %13152 = vst [vmem:[%s16887_s7 + $0x30] sm:$0xff] %v11926_v35  ;;  %v11928_v51 = vsel %vm9950_vm7, %v11923_v16, %v11927_v27  ;;  %v11848_v12 = vpop.f32.mrb[144].mxu0 }
 0x8df   :  { %13153 = vst [vmem:[%s16887_s7 + $0x38] sm:$0xff] %v11928_v51  ;;  %v11849_v30 = vpop.f32.mrb[145].mxu0 }
 0x8e0   :  { %v11850_v49 = vpop.f32.mrb[146].mxu0 }
 0x8e1   :  { %v11851_v53 = vpop.f32.mrb[147].mxu0 }
 0x8e2   :  { %11942 = vsyncpa [#allocation5], 1 }
 0x8e3   :  { %11943 = vsyncpa [#allocation7], 1 }
 0x8e4   :  { %11944 = vsyncpa [#allocation10], 1 }
 0x8e5   :  { %11945 = vsyncpa [#allocation13], 1 }

</bundles_post_ra>
